<compile_context>
chip_gen: v6e
topology: v6e:2x2x1
jax: 0.10.0
libtpu: 0.0.40
codegen_flags: <defaults>
</compile_context>

<pallas_src>
import functools
import math

import jax
import jax.numpy as jnp
from jax import lax
from jax.experimental import pallas as pl
from jax.experimental.pallas import tpu as pltpu

BF = jnp.bfloat16  # MXU operand dtype (v5e/v6e/v7x all run bf16 matmuls)


# ---------------------------------------------------------------------------
# in-kernel helpers
# ---------------------------------------------------------------------------
def _mish(v):
    # mish(x) = x * tanh(softplus(x)) = x * (s - 1) / (s + 1),  s = (1 + e^x)^2
    # single EUP exp + approx reciprocal; clamp keeps s finite (ratio -> 1).
    t = jnp.exp(jnp.minimum(v, 20.0))
    s = (1.0 + t) * (1.0 + t)
    return v * (s - 1.0) * pl.reciprocal(s + 1.0, approx=True)


def _make_shift_masks(L, ds):
    """Bool [L,1] validity masks for time shifts d (zero-padding at edges)."""
    t = lax.broadcasted_iota(jnp.int32, (L, 1), 0)
    masks = {}
    for d in ds:
        if d == 0:
            continue
        masks[d] = (t < (L - d)) if d > 0 else (t >= (-d))
    return masks


def _shift(h, d, L, masks):
    """Row t of result = h[t + d] (zero outside [0, L)).  XLU roll + mask."""
    if d == 0:
        return h
    r = pltpu.roll(h, shift=(-d) % L, axis=0)
    return jnp.where(masks[d], r, jnp.zeros_like(r))


def _conv_taps(xs, w_ref, b, L, masks):
    """'same' Conv1d over the (virtual) channel-concat of xs ([L, Ci] f32).
    w_ref: [K, sum(Ci), Cout] bf16; per-tap/per-input matmuls accumulate in
    f32 — no im2col slab, no channel concat materialized."""
    K = w_ref.shape[0]
    pad = K // 2
    acc = None
    for j in range(K):
        wj = w_ref[j]                                    # [Cin_total, Cout]
        off = 0
        for xin in xs:
            ci = xin.shape[1]
            hj = _shift(xin, j - pad, L, masks).astype(BF)
            wpart = wj if (off == 0 and ci == wj.shape[0]) else wj[off:off + ci, :]
            t = jnp.dot(hj, wpart, preferred_element_type=jnp.float32)
            acc = t if acc is None else acc + t
            off += ci
    return acc + b


def _group_norm(h, gamma, beta, sg, inv_n, eps=1e-5):
    """GroupNorm on h [L, C] (one batch element).  sg: [C, C] 0/1 same-group
    matrix (hoisted constant operand); inv_n = 1 / (Cg * L)."""
    s1 = jnp.sum(h, axis=0, keepdims=True)               # [1, C]
    s2 = jnp.sum(h * h, axis=0, keepdims=True)           # [1, C]
    mean = jnp.dot(s1, sg, preferred_element_type=jnp.float32) * inv_n
    ex2 = jnp.dot(s2, sg, preferred_element_type=jnp.float32) * inv_n
    var = jnp.maximum(ex2 - mean * mean, 0.0)             # clamp: no NaN rsqrt
    istd = lax.rsqrt(var + eps)
    return (h - mean) * istd * gamma + beta


def _rtb(xs, c, p, L, masks, sg, n_groups):
    """ResidualTemporalBlock (adagn=True) on one batch element.
    xs: list of [L, Ci] f32 (channel-concat order matches torch.cat);
    c: [1, time_dim] cond embedding; p: dict of Refs."""
    cout = p['b1'].shape[-1]
    inv_n = 1.0 / float(max(cout // n_groups, 1) * L)

    # time_mlp: Mish -> Linear(time_dim, 2*cout); chunk -> (scale, shift)
    cond = jnp.dot(_mish(c).astype(BF), p['tm_w'][...],
                   preferred_element_type=jnp.float32) + p['tm_b'][...]
    scale = cond[:, :cout]
    shift = cond[:, cout:]

    # block 0: Conv1d -> GroupNorm -> AdaGN -> Mish
    h = _conv_taps(xs, p['w1'], p['b1'][...], L, masks)
    h = _group_norm(h, p['g1'][...], p['be1'][...], sg, inv_n)
    h = _mish(h * (1.0 + scale) + shift)

    # block 1: Conv1d -> GroupNorm -> Mish
    h = _conv_taps([h], p['w2'], p['b2'][...], L, masks)
    h = _group_norm(h, p['g2'][...], p['be2'][...], sg, inv_n)
    h = _mish(h)

    # residual 1x1 conv (identity when channel counts match)
    if 'rw' in p:
        rw = p['rw'][...]
        res = p['rb'][...]
        off = 0
        for xin in xs:
            ci = xin.shape[1]
            piece = rw if (off == 0 and ci == rw.shape[0]) else rw[off:off + ci, :]
            res = res + jnp.dot(xin.astype(BF), piece,
                                preferred_element_type=jnp.float32)
            off += ci
    else:
        res = xs[0]
    return h + res


# ---------------------------------------------------------------------------
# fused level kernels (one pallas_call per resolution level)
# ---------------------------------------------------------------------------
def _two_rtb_level_kernel(*refs, treedef, n_params, L, has_down, n_groups):
    x_ref, c_ref, sg_ref = refs[0], refs[1], refs[2]
    prm = jax.tree_util.tree_unflatten(treedef, list(refs[3:3 + n_params]))
    outs = refs[3 + n_params:]

    sg = sg_ref[...]
    masks = _make_shift_masks(L, (-1, 1))
    x = x_ref[...]
    c = c_ref[...]

    x1 = _rtb([x], c, prm['rtb1'], L, masks, sg, n_groups)
    x2 = _rtb([x1], c, prm['rtb2'], L, masks, sg, n_groups)
    outs[0][...] = x1
    outs[1][...] = x2
    if has_down:
        # full-length stride-1 conv; the stride-2 column pick happens wrapper-side
        yf = _conv_taps([x2], prm['down']['w'], prm['down']['b'][...], L, masks)
        outs[2][...] = yf


def _up_level_kernel(*refs, treedef, n_params, L, has_up, n_groups):
    x_ref, skip_ref, c_ref, sg_ref = refs[:4]
    prm = jax.tree_util.tree_unflatten(treedef, list(refs[4:4 + n_params]))
    outs = refs[4 + n_params:]

    sg = sg_ref[...]
    masks = _make_shift_masks(L, (-1, 1))
    x = x_ref[...]
    skip = skip_ref[...]
    c = c_ref[...]

    x6 = _rtb([x, skip], c, prm['rtb1'], L, masks, sg, n_groups)   # cat never built
    x7 = _rtb([x6], c, prm['rtb2'], L, masks, sg, n_groups)
    outs[0][...] = x6
    outs[1][...] = x7
    if has_up:
        # ConvTranspose1d(k=4, s=2, p=1): even/odd output phases computed here,
        # interleaved wrapper-side.
        uw = prm['up']['w']                                 # [4, Cin, Cout]
        ub = prm['up']['b'][...]
        x7c = x7.astype(BF)
        xm1 = _shift(x7, -1, L, masks).astype(BF)           # x7[m-1]
        xp1 = _shift(x7, 1, L, masks).astype(BF)            # x7[m+1]
        even = (jnp.dot(x7c, uw[1], preferred_element_type=jnp.float32)
                + jnp.dot(xm1, uw[3], preferred_element_type=jnp.float32) + ub)
        odd = (jnp.dot(xp1, uw[0], preferred_element_type=jnp.float32)
               + jnp.dot(x7c, uw[2], preferred_element_type=jnp.float32) + ub)
        outs[2][...] = even
        outs[3][...] = odd


def _final_kernel(*refs, treedef, n_params, L, n_groups):
    x_ref, sg_ref = refs[:2]
    prm = jax.tree_util.tree_unflatten(treedef, list(refs[2:2 + n_params]))
    o_ref = refs[2 + n_params]

    sg = sg_ref[...]
    x = x_ref[...]
    C = x.shape[1]
    inv_n = 1.0 / float(max(C // n_groups, 1) * L)
    masks = _make_shift_masks(L, (-2, -1, 1, 2))

    h = _conv_taps([x], prm['w1'], prm['b1'][...], L, masks)
    h = _group_norm(h, prm['g1'][...], prm['be1'][...], sg, inv_n)
    h = _mish(h)
    o_ref[...] = (jnp.dot(h.astype(BF), prm['w2'][...],
                          preferred_element_type=jnp.float32) + prm['b2'][...])


def _cond_mlp_kernel(c_ref, w1_ref, b1_ref, w2_ref, b2_ref, o_ref):
    h = _mish(jnp.dot(c_ref[...].astype(BF), w1_ref[...],
                      preferred_element_type=jnp.float32) + b1_ref[...])
    o_ref[...] = jnp.dot(h.astype(BF), w2_ref[...],
                         preferred_element_type=jnp.float32) + b2_ref[...]


# ---------------------------------------------------------------------------
# pallas_call wrappers
# ---------------------------------------------------------------------------
_CPARAMS = pltpu.CompilerParams(dimension_semantics=("parallel",),
                                vmem_limit_bytes=32 * 1024 * 1024)


def _full_spec(a):
    nd = a.ndim
    return pl.BlockSpec(a.shape, lambda b, _nd=nd: (0,) * _nd)


def _call_cond_mlp(cond, params):
    B = cond.shape[0]
    dim = params['cond_w2'].shape[1]
    return pl.pallas_call(
        _cond_mlp_kernel,
        out_shape=jax.ShapeDtypeStruct((B, dim), jnp.float32),
    )(cond, params['cond_w1'], params['cond_b1'],
      params['cond_w2'], params['cond_b2'])


def _call_two_rtb_level(xc, c3, blk, L, *, n_groups=8):
    B, _, cin = xc.shape
    dim = c3.shape[-1]
    cout = blk['rtb1']['b1'].shape[-1]
    has_down = 'down' in blk
    kp = {k: blk[k] for k in ('rtb1', 'rtb2', 'down') if k in blk}
    flat, treedef = jax.tree_util.tree_flatten(kp)
    kern = functools.partial(_two_rtb_level_kernel, treedef=treedef,
                             n_params=len(flat), L=L, has_down=has_down,
                             n_groups=n_groups)
    in_specs = ([pl.BlockSpec((None, L, cin), lambda b: (b, 0, 0)),
                 pl.BlockSpec((None, 1, dim), lambda b: (b, 0, 0)),
                 _full_spec(blk['sg'])]
                + [_full_spec(a) for a in flat])
    n_out = 3 if has_down else 2
    out_shape = [jax.ShapeDtypeStruct((B, L, cout), jnp.float32)] * n_out
    out_specs = [pl.BlockSpec((None, L, cout), lambda b: (b, 0, 0))] * n_out
    return pl.pallas_call(
        kern, grid=(B,), in_specs=in_specs, out_specs=out_specs,
        out_shape=out_shape, compiler_params=_CPARAMS,
    )(xc, c3, blk['sg'], *flat)


def _call_up_level(xc, skip, c3, blk, L, *, n_groups=8):
    B, _, cx = xc.shape
    cs = skip.shape[-1]
    dim = c3.shape[-1]
    cout = blk['rtb1']['b1'].shape[-1]
    has_up = 'up' in blk
    kp = {k: blk[k] for k in ('rtb1', 'rtb2', 'up') if k in blk}
    flat, treedef = jax.tree_util.tree_flatten(kp)
    kern = functools.partial(_up_level_kernel, treedef=treedef,
                             n_params=len(flat), L=L, has_up=has_up,
                             n_groups=n_groups)
    in_specs = ([pl.BlockSpec((None, L, cx), lambda b: (b, 0, 0)),
                 pl.BlockSpec((None, L, cs), lambda b: (b, 0, 0)),
                 pl.BlockSpec((None, 1, dim), lambda b: (b, 0, 0)),
                 _full_spec(blk['sg'])]
                + [_full_spec(a) for a in flat])
    n_out = 4 if has_up else 2
    out_shape = [jax.ShapeDtypeStruct((B, L, cout), jnp.float32)] * n_out
    out_specs = [pl.BlockSpec((None, L, cout), lambda b: (b, 0, 0))] * n_out
    return pl.pallas_call(
        kern, grid=(B,), in_specs=in_specs, out_specs=out_specs,
        out_shape=out_shape, compiler_params=_CPARAMS,
    )(xc, skip, c3, blk['sg'], *flat)


def _call_final(xc, params, L, *, n_groups=8):
    B, _, C = xc.shape
    dout = params['final']['w2'].shape[-1]
    flat, treedef = jax.tree_util.tree_flatten(params['final'])
    kern = functools.partial(_final_kernel, treedef=treedef,
                             n_params=len(flat), L=L, n_groups=n_groups)
    in_specs = ([pl.BlockSpec((None, L, C), lambda b: (b, 0, 0)),
                 _full_spec(params['final_sg'])]
                + [_full_spec(a) for a in flat])
    return pl.pallas_call(
        kern, grid=(B,), in_specs=in_specs,
        out_specs=pl.BlockSpec((None, L, dout), lambda b: (b, 0, 0)),
        out_shape=jax.ShapeDtypeStruct((B, L, dout), jnp.float32),
        compiler_params=_CPARAMS,
    )(xc, params['final_sg'], *flat)


# ---------------------------------------------------------------------------
# full forward (TemporalControlUnet, env_emb_dim == 0 path, control all zero)
# ---------------------------------------------------------------------------
def temporal_control_unet_forward(x, cond, env_emb, params, control=None):
    """x: [B, T, input_dim]; cond: [B, cond_dim].  Returns (out, intermediate)
    like the reference (intermediate tensors in torch's [B, C, L] layout)."""
    # TODO(synk): non-zero external `control` tensors and the env_emb /
    # input_projector / `past` path (env_emb_dim > 0) are not plumbed through
    # the fused kernels; control defaults to all-zero (identical to control=[]).
    del env_emb, control
    B, T, _ = x.shape

    def to_ncl(a):
        return jnp.swapaxes(a, 1, 2)

    c = _call_cond_mlp(cond, params)          # [B, dim]
    c3 = c[:, None, :]                        # [B, 1, dim]

    intermediate = []
    hs = []
    xc, L = x, T
    for blk in params['downs']:
        outs = _call_two_rtb_level(xc, c3, blk, L)
        x1, x2 = outs[0], outs[1]
        hs.append(x2)
        if 'down' in blk:
            x3, Ln = outs[2][:, ::2, :], L // 2     # stride-2 column pick
        else:
            x3, Ln = x2, L
        intermediate.append([to_ncl(x1), to_ncl(x2), to_ncl(x3)])
        xc, L = x3, Ln

    mid = _call_two_rtb_level(xc, c3, params['mid'], L)
    x4, x5 = mid[0], mid[1]
    intermediate.append([to_ncl(x4), to_ncl(x5)])
    xc = x5

    for blk in params['ups']:
        skip = hs.pop()
        outs = _call_up_level(xc, skip, c3, blk, L)
        x6, x7 = outs[0], outs[1]
        if 'up' in blk:
            ue, uo = outs[2], outs[3]
            x8 = jnp.stack([ue, uo], axis=2).reshape(B, 2 * L, ue.shape[-1])
            Ln = 2 * L
        else:
            x8, Ln = x7, L
        intermediate.append([to_ncl(x6), to_ncl(x7), to_ncl(x8)])
        xc, L = x8, Ln

    y = _call_final(xc, params, L)            # [B, T, input_dim] directly
    return y, intermediate


# ---------------------------------------------------------------------------
# deterministic parameter construction (shapes follow TemporalUnet.__init__);
# all weight reshapes / transposes / bf16 casts are done ONCE here.
# ---------------------------------------------------------------------------
def _uniform(key, shape, bound):
    return jax.random.uniform(key, shape, jnp.float32, -bound, bound)


def _init_conv(key, cin, cout, k):
    k1, k2 = jax.random.split(key)
    bnd = 1.0 / math.sqrt(cin * k)
    w = _uniform(k1, (cout, cin, k), bnd)                 # torch layout
    b = _uniform(k2, (cout,), bnd)
    return jnp.transpose(w, (2, 1, 0)).astype(BF), b.reshape(1, cout)


def _init_conv1x1(key, cin, cout):
    w, b = _init_conv(key, cin, cout, 1)
    return w[0], b                                        # [cin, cout]


def _init_linear(key, din, dout):
    k1, k2 = jax.random.split(key)
    bnd = 1.0 / math.sqrt(din)
    w = _uniform(k1, (dout, din), bnd)
    b = _uniform(k2, (dout,), bnd)
    return jnp.transpose(w).astype(BF), b.reshape(1, dout)


def _init_rtb(key, cin, cout, embed_dim, k=3):
    ks = jax.random.split(key, 4)
    w1, b1 = _init_conv(ks[0], cin, cout, k)
    w2, b2 = _init_conv(ks[1], cout, cout, k)
    tm_w, tm_b = _init_linear(ks[2], embed_dim, 2 * cout)  # adagn -> 2*Cout
    prm = dict(w1=w1, b1=b1,
               g1=jnp.ones((1, cout), jnp.float32),
               be1=jnp.zeros((1, cout), jnp.float32),
               w2=w2, b2=b2,
               g2=jnp.ones((1, cout), jnp.float32),
               be2=jnp.zeros((1, cout), jnp.float32),
               tm_w=tm_w, tm_b=tm_b)
    if cin != cout:
        prm['rw'], prm['rb'] = _init_conv1x1(ks[3], cin, cout)
    return prm


def _same_group(c, n_groups):
    cg = max(c // n_groups, 1)
    i = jnp.arange(c)
    return (i[:, None] // cg == i[None, :] // cg).astype(jnp.float32)


def make_params(key, input_dim, cond_dim, dim, dim_mults=(2, 2), n_groups=8):
    dims = [input_dim] + [int(dim * m) for m in dim_mults]   # env_emb_dim = 0
    in_out = list(zip(dims[:-1], dims[1:]))
    num_res = len(in_out)
    ks = iter(jax.random.split(key, 64))
    p = {}
    p['cond_w1'], p['cond_b1'] = _init_linear(next(ks), cond_dim, dim * 4)
    p['cond_w2'], p['cond_b2'] = _init_linear(next(ks), dim * 4, dim)

    downs = []
    for ind, (din, dout) in enumerate(in_out):
        is_last = ind >= num_res - 1
        blk = dict(rtb1=_init_rtb(next(ks), din, dout, dim),
                   rtb2=_init_rtb(next(ks), dout, dout, dim),
                   sg=_same_group(dout, n_groups))
        if not is_last:
            dw, db = _init_conv(next(ks), dout, dout, 3)
            blk['down'] = dict(w=dw, b=db)
        downs.append(blk)
    p['downs'] = downs

    mid_dim = dims[-1]
    p['mid'] = dict(rtb1=_init_rtb(next(ks), mid_dim, mid_dim, dim),
                    rtb2=_init_rtb(next(ks), mid_dim, mid_dim, dim),
                    sg=_same_group(mid_dim, n_groups))

    ups = []
    dim_in_final = dims[1]
    for ind, (din, dout) in enumerate(reversed(in_out[1:])):
        is_last = ind >= num_res - 1
        blk = dict(rtb1=_init_rtb(next(ks), dout * 2, din, dim),
                   rtb2=_init_rtb(next(ks), din, din, dim),
                   sg=_same_group(din, n_groups))
        if not is_last:
            k1, k2 = jax.random.split(next(ks))
            bnd = 1.0 / math.sqrt(din * 4)
            w = _uniform(k1, (din, din, 4), bnd)              # torch [Cin,Cout,K]
            blk['up'] = dict(w=jnp.transpose(w, (2, 0, 1)).astype(BF),  # [K,Cin,Cout]
                             b=_uniform(k2, (din,), bnd).reshape(1, din))
        ups.append(blk)
        dim_in_final = din
    p['ups'] = ups

    f1w, f1b = _init_conv(next(ks), dim_in_final, dim_in_final, 5)
    f2w, f2b = _init_conv1x1(next(ks), dim_in_final, input_dim)
    p['final'] = dict(w1=f1w, b1=f1b,
                      g1=jnp.ones((1, dim_in_final), jnp.float32),
                      be1=jnp.zeros((1, dim_in_final), jnp.float32),
                      w2=f2w, b2=f2b)
    p['final_sg'] = _same_group(dim_in_final, n_groups)
    return p


# ---------------------------------------------------------------------------
if __name__ == "__main__":
    key = jax.random.PRNGKey(0)
    B, T, input_dim, cond_dim, dim = 2, 16, 8, 16, 32
    kp, kx, kc = jax.random.split(key, 3)
    params = make_params(kp, input_dim, cond_dim, dim, dim_mults=(2, 2))

    x = jax.random.normal(kx, (B, T, input_dim), jnp.float32)
    cond = jax.random.normal(kc, (B, cond_dim), jnp.float32)

    fwd = jax.jit(functools.partial(temporal_control_unet_forward, params=params))
    out, intermediate = fwd(x, cond, None)
    out = jax.block_until_ready(out)

    assert out.shape == (B, T, input_dim), out.shape
    assert bool(jnp.all(jnp.isfinite(out)))
    assert len(intermediate) == len(params['downs']) + 1 + len(params['ups'])
    # spot-check intermediate layouts ([B, C, L] like the reference)
    assert intermediate[0][0].shape == (B, 2 * dim, T)
    assert intermediate[-1][-1].shape == (B, 2 * dim, T)
    print("KERNEL_OK")
</pallas_src>

<mosaic_0001>
module attributes {stable_mosaic.version = 11 : i64} {
  func.func @_cond_mlp_kernel(%arg0: memref<2x16xf32, #tpu.memory_space<vmem>>, %arg1: memref<16x128xbf16, #tpu.memory_space<vmem>>, %arg2: memref<1x128xf32, #tpu.memory_space<vmem>>, %arg3: memref<128x32xbf16, #tpu.memory_space<vmem>>, %arg4: memref<1x32xf32, #tpu.memory_space<vmem>>, %arg5: memref<2x32xf32, #tpu.memory_space<vmem>>) attributes {dimension_semantics = [], scalar_prefetch = 0 : i64, scratch_operands = 0 : i64, tpu.core_type = #tpu.core_type<tc>} {
    %c0 = arith.constant 0 : index
    %c0_0 = arith.constant 0 : index
    %0 = vector.load %arg0[%c0, %c0_0] : memref<2x16xf32, #tpu.memory_space<vmem>>, vector<2x16xf32>
    %1 = arith.truncf %0 : vector<2x16xf32> to vector<2x16xbf16>
    %c0_1 = arith.constant 0 : index
    %c0_2 = arith.constant 0 : index
    %2 = vector.load %arg1[%c0_1, %c0_2] : memref<16x128xbf16, #tpu.memory_space<vmem>>, vector<16x128xbf16>
    %cst = arith.constant dense<0.000000e+00> : vector<2x128xf32>
    %3 = tpu.matmul %1, %2, %cst {dimension_numbers = #tpu.dot_dimension_numbers<[1], [0], [0], [1], [0, 0, 1, 1], [], []>} : vector<2x16xbf16>, vector<16x128xbf16>, vector<2x128xf32> -> vector<2x128xf32>
    %c0_3 = arith.constant 0 : index
    %c0_4 = arith.constant 0 : index
    %4 = vector.load %arg2[%c0_3, %c0_4] : memref<1x128xf32, #tpu.memory_space<vmem>>, vector<1x128xf32>
    %5 = vector.broadcast %4 : vector<1x128xf32> to vector<2x128xf32>
    %6 = arith.addf %3, %5 : vector<2x128xf32>
    %cst_5 = arith.constant 2.000000e+01 : f32
    %7 = vector.broadcast %cst_5 : f32 to vector<2x128xf32>
    %8 = arith.minimumf %6, %7 : vector<2x128xf32>
    %9 = math.exp %8 : vector<2x128xf32>
    %cst_6 = arith.constant 1.000000e+00 : f32
    %10 = vector.broadcast %cst_6 : f32 to vector<2x128xf32>
    %11 = arith.addf %10, %9 : vector<2x128xf32>
    %cst_7 = arith.constant 1.000000e+00 : f32
    %12 = vector.broadcast %cst_7 : f32 to vector<2x128xf32>
    %13 = arith.addf %12, %9 : vector<2x128xf32>
    %14 = arith.mulf %11, %13 : vector<2x128xf32>
    %cst_8 = arith.constant 1.000000e+00 : f32
    %15 = vector.broadcast %cst_8 : f32 to vector<2x128xf32>
    %16 = arith.subf %14, %15 : vector<2x128xf32>
    %17 = arith.mulf %6, %16 : vector<2x128xf32>
    %cst_9 = arith.constant 1.000000e+00 : f32
    %18 = vector.broadcast %cst_9 : f32 to vector<2x128xf32>
    %19 = arith.addf %14, %18 : vector<2x128xf32>
    %20 = tpu.reciprocal %19 {approx = true} : vector<2x128xf32> -> vector<2x128xf32>
    %21 = arith.mulf %17, %20 : vector<2x128xf32>
    %22 = arith.truncf %21 : vector<2x128xf32> to vector<2x128xbf16>
    %c0_10 = arith.constant 0 : index
    %c0_11 = arith.constant 0 : index
    %23 = vector.load %arg3[%c0_10, %c0_11] : memref<128x32xbf16, #tpu.memory_space<vmem>>, vector<128x32xbf16>
    %cst_12 = arith.constant dense<0.000000e+00> : vector<2x32xf32>
    %24 = tpu.matmul %22, %23, %cst_12 {dimension_numbers = #tpu.dot_dimension_numbers<[1], [0], [0], [1], [0, 0, 1, 1], [], []>} : vector<2x128xbf16>, vector<128x32xbf16>, vector<2x32xf32> -> vector<2x32xf32>
    %c0_13 = arith.constant 0 : index
    %c0_14 = arith.constant 0 : index
    %25 = vector.load %arg4[%c0_13, %c0_14] : memref<1x32xf32, #tpu.memory_space<vmem>>, vector<1x32xf32>
    %26 = vector.broadcast %25 : vector<1x32xf32> to vector<2x32xf32>
    %27 = arith.addf %24, %26 : vector<2x32xf32>
    %c0_15 = arith.constant 0 : index
    %c0_16 = arith.constant 0 : index
    %28 = vector.load %arg5[%c0_15, %c0_16] : memref<2x32xf32, #tpu.memory_space<vmem>>, vector<2x32xf32>
    tpu.vector_store %arg5[%c0_15, %c0_16], %27 {strides = array<i32>} : memref<2x32xf32, #tpu.memory_space<vmem>>, vector<2x32xf32>,
    return
  }
}

module attributes {stable_mosaic.version = 11 : i64} {
  func.func @_two_rtb_level_kernel(%arg0: i32, %arg1: memref<1x16x8xf32, #tpu.memory_space<vmem>>, %arg2: memref<1x1x32xf32, #tpu.memory_space<vmem>>, %arg3: memref<64x64xf32, #tpu.memory_space<vmem>>, %arg4: memref<1x64xf32, #tpu.memory_space<vmem>>, %arg5: memref<3x64x64xbf16, #tpu.memory_space<vmem>>, %arg6: memref<1x64xf32, #tpu.memory_space<vmem>>, %arg7: memref<1x64xf32, #tpu.memory_space<vmem>>, %arg8: memref<1x64xf32, #tpu.memory_space<vmem>>, %arg9: memref<1x64xf32, #tpu.memory_space<vmem>>, %arg10: memref<1x64xf32, #tpu.memory_space<vmem>>, %arg11: memref<1x64xf32, #tpu.memory_space<vmem>>, %arg12: memref<1x64xf32, #tpu.memory_space<vmem>>, %arg13: memref<8x64xbf16, #tpu.memory_space<vmem>>, %arg14: memref<1x128xf32, #tpu.memory_space<vmem>>, %arg15: memref<32x128xbf16, #tpu.memory_space<vmem>>, %arg16: memref<3x8x64xbf16, #tpu.memory_space<vmem>>, %arg17: memref<3x64x64xbf16, #tpu.memory_space<vmem>>, %arg18: memref<1x64xf32, #tpu.memory_space<vmem>>, %arg19: memref<1x64xf32, #tpu.memory_space<vmem>>, %arg20: memref<1x64xf32, #tpu.memory_space<vmem>>, %arg21: memref<1x64xf32, #tpu.memory_space<vmem>>, %arg22: memref<1x64xf32, #tpu.memory_space<vmem>>, %arg23: memref<1x64xf32, #tpu.memory_space<vmem>>, %arg24: memref<1x128xf32, #tpu.memory_space<vmem>>, %arg25: memref<32x128xbf16, #tpu.memory_space<vmem>>, %arg26: memref<3x64x64xbf16, #tpu.memory_space<vmem>>, %arg27: memref<3x64x64xbf16, #tpu.memory_space<vmem>>, %arg28: memref<1x16x64xf32, #tpu.memory_space<vmem>>, %arg29: memref<1x16x64xf32, #tpu.memory_space<vmem>>, %arg30: memref<1x16x64xf32, #tpu.memory_space<vmem>>) attributes {dimension_semantics = [#tpu.dimension_semantics<parallel>], iteration_bounds = array<i64: 2>, scalar_prefetch = 0 : i64, scratch_operands = 0 : i64, tpu.core_type = #tpu.core_type<tc>, window_params = [{transform_indices = @transform_0, window_bounds = array<i64: 1, 16, 8>}, {transform_indices = @transform_1, window_bounds = array<i64: 1, 1, 32>}, {pipeline_mode = #tpu.pipeline_mode<synchronous>, transform_indices = @transform_2, window_bounds = array<i64: 64, 64>}, {pipeline_mode = #tpu.pipeline_mode<synchronous>, transform_indices = @transform_3, window_bounds = array<i64: 1, 64>}, {pipeline_mode = #tpu.pipeline_mode<synchronous>, transform_indices = @transform_4, window_bounds = array<i64: 3, 64, 64>}, {pipeline_mode = #tpu.pipeline_mode<synchronous>, transform_indices = @transform_5, window_bounds = array<i64: 1, 64>}, {pipeline_mode = #tpu.pipeline_mode<synchronous>, transform_indices = @transform_6, window_bounds = array<i64: 1, 64>}, {pipeline_mode = #tpu.pipeline_mode<synchronous>, transform_indices = @transform_7, window_bounds = array<i64: 1, 64>}, {pipeline_mode = #tpu.pipeline_mode<synchronous>, transform_indices = @transform_8, window_bounds = array<i64: 1, 64>}, {pipeline_mode = #tpu.pipeline_mode<synchronous>, transform_indices = @transform_9, window_bounds = array<i64: 1, 64>}, {pipeline_mode = #tpu.pipeline_mode<synchronous>, transform_indices = @transform_10, window_bounds = array<i64: 1, 64>}, {pipeline_mode = #tpu.pipeline_mode<synchronous>, transform_indices = @transform_11, window_bounds = array<i64: 1, 64>}, {pipeline_mode = #tpu.pipeline_mode<synchronous>, transform_indices = @transform_12, window_bounds = array<i64: 8, 64>}, {pipeline_mode = #tpu.pipeline_mode<synchronous>, transform_indices = @transform_13, window_bounds = array<i64: 1, 128>}, {pipeline_mode = #tpu.pipeline_mode<synchronous>, transform_indices = @transform_14, window_bounds = array<i64: 32, 128>}, {pipeline_mode = #tpu.pipeline_mode<synchronous>, transform_indices = @transform_15, window_bounds = array<i64: 3, 8, 64>}, {pipeline_mode = #tpu.pipeline_mode<synchronous>, transform_indices = @transform_16, window_bounds = array<i64: 3, 64, 64>}, {pipeline_mode = #tpu.pipeline_mode<synchronous>, transform_indices = @transform_17, window_bounds = array<i64: 1, 64>}, {pipeline_mode = #tpu.pipeline_mode<synchronous>, transform_indices = @transform_18, window_bounds = array<i64: 1, 64>}, {pipeline_mode = #tpu.pipeline_mode<synchronous>, transform_indices = @transform_19, window_bounds = array<i64: 1, 64>}, {pipeline_mode = #tpu.pipeline_mode<synchronous>, transform_indices = @transform_20, window_bounds = array<i64: 1, 64>}, {pipeline_mode = #tpu.pipeline_mode<synchronous>, transform_indices = @transform_21, window_bounds = array<i64: 1, 64>}, {pipeline_mode = #tpu.pipeline_mode<synchronous>, transform_indices = @transform_22, window_bounds = array<i64: 1, 64>}, {pipeline_mode = #tpu.pipeline_mode<synchronous>, transform_indices = @transform_23, window_bounds = array<i64: 1, 128>}, {pipeline_mode = #tpu.pipeline_mode<synchronous>, transform_indices = @transform_24, window_bounds = array<i64: 32, 128>}, {pipeline_mode = #tpu.pipeline_mode<synchronous>, transform_indices = @transform_25, window_bounds = array<i64: 3, 64, 64>}, {pipeline_mode = #tpu.pipeline_mode<synchronous>, transform_indices = @transform_26, window_bounds = array<i64: 3, 64, 64>}, {transform_indices = @transform_27, window_bounds = array<i64: 1, 16, 64>}, {transform_indices = @transform_28, window_bounds = array<i64: 1, 16, 64>}, {transform_indices = @transform_29, window_bounds = array<i64: 1, 16, 64>}]} {
    %c0 = arith.constant 0 : index
    %c0_0 = arith.constant 0 : index
    %0 = vector.load %arg3[%c0, %c0_0] : memref<64x64xf32, #tpu.memory_space<vmem>>, vector<64x64xf32>
    %1 = tpu.iota {dimensions = array<i32: 0>} : vector<16x1xi32>
    %c1_i32 = arith.constant 1 : i32
    %2 = vector.broadcast %c1_i32 : i32 to vector<16x1xi32>
    %3 = arith.cmpi sge, %1, %2 : vector<16x1xi32>
    %c15_i32 = arith.constant 15 : i32
    %4 = vector.broadcast %c15_i32 : i32 to vector<16x1xi32>
    %5 = arith.cmpi slt, %1, %4 : vector<16x1xi32>
    %c0_1 = arith.constant 0 : index
    %c0_2 = arith.constant 0 : index
    %c0_3 = arith.constant 0 : index
    %6 = vector.load %arg1[%c0_1, %c0_2, %c0_3] : memref<1x16x8xf32, #tpu.memory_space<vmem>>, vector<1x16x8xf32>
    %7 = vector.shape_cast %6 : vector<1x16x8xf32> to vector<16x8xf32>
    %c0_4 = arith.constant 0 : index
    %c0_5 = arith.constant 0 : index
    %c0_6 = arith.constant 0 : index
    %8 = vector.load %arg2[%c0_4, %c0_5, %c0_6] : memref<1x1x32xf32, #tpu.memory_space<vmem>>, vector<1x1x32xf32>
    %9 = vector.shape_cast %8 : vector<1x1x32xf32> to vector<1x32xf32>
    %cst = arith.constant 2.000000e+01 : f32
    %10 = vector.broadcast %cst : f32 to vector<1x32xf32>
    %11 = arith.minimumf %9, %10 : vector<1x32xf32>
    %12 = math.exp %11 : vector<1x32xf32>
    %cst_7 = arith.constant 1.000000e+00 : f32
    %13 = vector.broadcast %cst_7 : f32 to vector<1x32xf32>
    %14 = arith.addf %13, %12 : vector<1x32xf32>
    %cst_8 = arith.constant 1.000000e+00 : f32
    %15 = vector.broadcast %cst_8 : f32 to vector<1x32xf32>
    %16 = arith.addf %15, %12 : vector<1x32xf32>
    %17 = arith.mulf %14, %16 : vector<1x32xf32>
    %cst_9 = arith.constant 1.000000e+00 : f32
    %18 = vector.broadcast %cst_9 : f32 to vector<1x32xf32>
    %19 = arith.subf %17, %18 : vector<1x32xf32>
    %20 = arith.mulf %9, %19 : vector<1x32xf32>
    %cst_10 = arith.constant 1.000000e+00 : f32
    %21 = vector.broadcast %cst_10 : f32 to vector<1x32xf32>
    %22 = arith.addf %17, %21 : vector<1x32xf32>
    %23 = tpu.reciprocal %22 {approx = true} : vector<1x32xf32> -> vector<1x32xf32>
    %24 = arith.mulf %20, %23 : vector<1x32xf32>
    %25 = arith.truncf %24 : vector<1x32xf32> to vector<1x32xbf16>
    %c0_11 = arith.constant 0 : index
    %c0_12 = arith.constant 0 : index
    %26 = vector.load %arg15[%c0_11, %c0_12] : memref<32x128xbf16, #tpu.memory_space<vmem>>, vector<32x128xbf16>
    %cst_13 = arith.constant dense<0.000000e+00> : vector<1x128xf32>
    %27 = tpu.matmul %25, %26, %cst_13 {dimension_numbers = #tpu.dot_dimension_numbers<[1], [0], [0], [1], [0, 0, 1, 1], [], []>} : vector<1x32xbf16>, vector<32x128xbf16>, vector<1x128xf32> -> vector<1x128xf32>
    %c0_14 = arith.constant 0 : index
    %c0_15 = arith.constant 0 : index
    %28 = vector.load %arg14[%c0_14, %c0_15] : memref<1x128xf32, #tpu.memory_space<vmem>>, vector<1x128xf32>
    %29 = arith.addf %27, %28 : vector<1x128xf32>
    %30 = vector.extract_strided_slice %29 {offsets = [0, 0], sizes = [1, 64], strides = [1, 1]} : vector<1x128xf32> to vector<1x64xf32>
    %31 = vector.extract_strided_slice %29 {offsets = [0, 64], sizes = [1, 64], strides = [1, 1]} : vector<1x128xf32> to vector<1x64xf32>
    %c0_16 = arith.constant 0 : index
    %c0_17 = arith.constant 0 : index
    %32 = vector.load %arg6[%c0_16, %c0_17] : memref<1x64xf32, #tpu.memory_space<vmem>>, vector<1x64xf32>
    %c0_18 = arith.constant 0 : index
    %c0_19 = arith.constant 0 : index
    %c0_20 = arith.constant 0 : index
    %33 = vector.load %arg16[%c0_18, %c0_19, %c0_20] : memref<3x8x64xbf16, #tpu.memory_space<vmem>>, vector<1x8x64xbf16>
    %34 = vector.shape_cast %33 : vector<1x8x64xbf16> to vector<8x64xbf16>
    %c1_i32_21 = arith.constant 1 : i32
    %35 = tpu.dynamic_rotate %7 by %c1_i32_21 dim 0 : vector<16x8xf32>, i32 -> vector<16x8xf32>
    %cst_22 = arith.constant 0.000000e+00 : f32
    %36 = vector.broadcast %cst_22 : f32 to vector<16x8xf32>
    %37 = vector.shape_cast %3 : vector<16x1xi1> to vector<16x1xi1>
    %38 = vector.broadcast %37 : vector<16x1xi1> to vector<16x8xi1>
    %39 = arith.select %38, %35, %36 : vector<16x8xi1>, vector<16x8xf32>
    %40 = arith.truncf %39 : vector<16x8xf32> to vector<16x8xbf16>
    %cst_23 = arith.constant dense<0.000000e+00> : vector<16x64xf32>
    %41 = tpu.matmul %40, %34, %cst_23 {dimension_numbers = #tpu.dot_dimension_numbers<[1], [0], [0], [1], [0, 0, 1, 1], [], []>} : vector<16x8xbf16>, vector<8x64xbf16>, vector<16x64xf32> -> vector<16x64xf32>
    %c1 = arith.constant 1 : index
    %c0_24 = arith.constant 0 : index
    %c0_25 = arith.constant 0 : index
    %42 = vector.load %arg16[%c1, %c0_24, %c0_25] : memref<3x8x64xbf16, #tpu.memory_space<vmem>>, vector<1x8x64xbf16>
    %43 = vector.shape_cast %42 : vector<1x8x64xbf16> to vector<8x64xbf16>
    %44 = arith.truncf %7 : vector<16x8xf32> to vector<16x8xbf16>
    %cst_26 = arith.constant dense<0.000000e+00> : vector<16x64xf32>
    %45 = tpu.matmul %44, %43, %cst_26 {dimension_numbers = #tpu.dot_dimension_numbers<[1], [0], [0], [1], [0, 0, 1, 1], [], []>} : vector<16x8xbf16>, vector<8x64xbf16>, vector<16x64xf32> -> vector<16x64xf32>
    %46 = arith.addf %41, %45 : vector<16x64xf32>
    %c2 = arith.constant 2 : index
    %c0_27 = arith.constant 0 : index
    %c0_28 = arith.constant 0 : index
    %47 = vector.load %arg16[%c2, %c0_27, %c0_28] : memref<3x8x64xbf16, #tpu.memory_space<vmem>>, vector<1x8x64xbf16>
    %48 = vector.shape_cast %47 : vector<1x8x64xbf16> to vector<8x64xbf16>
    %c15_i32_29 = arith.constant 15 : i32
    %49 = tpu.dynamic_rotate %7 by %c15_i32_29 dim 0 : vector<16x8xf32>, i32 -> vector<16x8xf32>
    %cst_30 = arith.constant 0.000000e+00 : f32
    %50 = vector.broadcast %cst_30 : f32 to vector<16x8xf32>
    %51 = vector.shape_cast %5 : vector<16x1xi1> to vector<16x1xi1>
    %52 = vector.broadcast %51 : vector<16x1xi1> to vector<16x8xi1>
    %53 = arith.select %52, %49, %50 : vector<16x8xi1>, vector<16x8xf32>
    %54 = arith.truncf %53 : vector<16x8xf32> to vector<16x8xbf16>
    %cst_31 = arith.constant dense<0.000000e+00> : vector<16x64xf32>
    %55 = tpu.matmul %54, %48, %cst_31 {dimension_numbers = #tpu.dot_dimension_numbers<[1], [0], [0], [1], [0, 0, 1, 1], [], []>} : vector<16x8xbf16>, vector<8x64xbf16>, vector<16x64xf32> -> vector<16x64xf32>
    %56 = arith.addf %46, %55 : vector<16x64xf32>
    %57 = vector.broadcast %32 : vector<1x64xf32> to vector<16x64xf32>
    %58 = arith.addf %56, %57 : vector<16x64xf32>
    %c0_32 = arith.constant 0 : index
    %c0_33 = arith.constant 0 : index
    %59 = vector.load %arg10[%c0_32, %c0_33] : memref<1x64xf32, #tpu.memory_space<vmem>>, vector<1x64xf32>
    %c0_34 = arith.constant 0 : index
    %c0_35 = arith.constant 0 : index
    %60 = vector.load %arg8[%c0_34, %c0_35] : memref<1x64xf32, #tpu.memory_space<vmem>>, vector<1x64xf32>
    %cst_36 = arith.constant dense<0.000000e+00> : vector<64xf32>
    %61 = vector.multi_reduction <add>, %58, %cst_36 [0] : vector<16x64xf32> to vector<64xf32>
    %62 = vector.shape_cast %61 : vector<64xf32> to vector<1x64xf32>
    %63 = arith.mulf %58, %58 : vector<16x64xf32>
    %cst_37 = arith.constant dense<0.000000e+00> : vector<64xf32>
    %64 = vector.multi_reduction <add>, %63, %cst_37 [0] : vector<16x64xf32> to vector<64xf32>
    %65 = vector.shape_cast %64 : vector<64xf32> to vector<1x64xf32>
    %cst_38 = arith.constant dense<0.000000e+00> : vector<1x64xf32>
    %66 = tpu.matmul %62, %0, %cst_38 {dimension_numbers = #tpu.dot_dimension_numbers<[1], [0], [0], [1], [0, 0, 1, 1], [], []>} : vector<1x64xf32>, vector<64x64xf32>, vector<1x64xf32> -> vector<1x64xf32>
    %cst_39 = arith.constant 7.812500e-03 : f32
    %67 = vector.broadcast %cst_39 : f32 to vector<1x64xf32>
    %68 = arith.mulf %66, %67 : vector<1x64xf32>
    %cst_40 = arith.constant dense<0.000000e+00> : vector<1x64xf32>
    %69 = tpu.matmul %65, %0, %cst_40 {dimension_numbers = #tpu.dot_dimension_numbers<[1], [0], [0], [1], [0, 0, 1, 1], [], []>} : vector<1x64xf32>, vector<64x64xf32>, vector<1x64xf32> -> vector<1x64xf32>
    %cst_41 = arith.constant 7.812500e-03 : f32
    %70 = vector.broadcast %cst_41 : f32 to vector<1x64xf32>
    %71 = arith.mulf %69, %70 : vector<1x64xf32>
    %72 = arith.mulf %68, %68 : vector<1x64xf32>
    %73 = arith.subf %71, %72 : vector<1x64xf32>
    %cst_42 = arith.constant 0.000000e+00 : f32
    %74 = vector.broadcast %cst_42 : f32 to vector<1x64xf32>
    %75 = arith.maximumf %73, %74 : vector<1x64xf32>
    %cst_43 = arith.constant 9.99999974E-6 : f32
    %76 = vector.broadcast %cst_43 : f32 to vector<1x64xf32>
    %77 = arith.addf %75, %76 : vector<1x64xf32>
    %78 = math.rsqrt %77 : vector<1x64xf32>
    %79 = vector.broadcast %68 : vector<1x64xf32> to vector<16x64xf32>
    %80 = arith.subf %58, %79 : vector<16x64xf32>
    %81 = vector.broadcast %78 : vector<1x64xf32> to vector<16x64xf32>
    %82 = arith.mulf %80, %81 : vector<16x64xf32>
    %83 = vector.broadcast %59 : vector<1x64xf32> to vector<16x64xf32>
    %84 = arith.mulf %82, %83 : vector<16x64xf32>
    %85 = vector.broadcast %60 : vector<1x64xf32> to vector<16x64xf32>
    %86 = arith.addf %84, %85 : vector<16x64xf32>
    %cst_44 = arith.constant 1.000000e+00 : f32
    %87 = vector.broadcast %cst_44 : f32 to vector<1x64xf32>
    %88 = arith.addf %87, %30 : vector<1x64xf32>
    %89 = vector.broadcast %88 : vector<1x64xf32> to vector<16x64xf32>
    %90 = arith.mulf %86, %89 : vector<16x64xf32>
    %91 = vector.broadcast %31 : vector<1x64xf32> to vector<16x64xf32>
    %92 = arith.addf %90, %91 : vector<16x64xf32>
    %cst_45 = arith.constant 2.000000e+01 : f32
    %93 = vector.broadcast %cst_45 : f32 to vector<16x64xf32>
    %94 = arith.minimumf %92, %93 : vector<16x64xf32>
    %95 = math.exp %94 : vector<16x64xf32>
    %cst_46 = arith.constant 1.000000e+00 : f32
    %96 = vector.broadcast %cst_46 : f32 to vector<16x64xf32>
    %97 = arith.addf %96, %95 : vector<16x64xf32>
    %cst_47 = arith.constant 1.000000e+00 : f32
    %98 = vector.broadcast %cst_47 : f32 to vector<16x64xf32>
    %99 = arith.addf %98, %95 : vector<16x64xf32>
    %100 = arith.mulf %97, %99 : vector<16x64xf32>
    %cst_48 = arith.constant 1.000000e+00 : f32
    %101 = vector.broadcast %cst_48 : f32 to vector<16x64xf32>
    %102 = arith.subf %100, %101 : vector<16x64xf32>
    %103 = arith.mulf %92, %102 : vector<16x64xf32>
    %cst_49 = arith.constant 1.000000e+00 : f32
    %104 = vector.broadcast %cst_49 : f32 to vector<16x64xf32>
    %105 = arith.addf %100, %104 : vector<16x64xf32>
    %106 = tpu.reciprocal %105 {approx = true} : vector<16x64xf32> -> vector<16x64xf32>
    %107 = arith.mulf %103, %106 : vector<16x64xf32>
    %c0_50 = arith.constant 0 : index
    %c0_51 = arith.constant 0 : index
    %108 = vector.load %arg7[%c0_50, %c0_51] : memref<1x64xf32, #tpu.memory_space<vmem>>, vector<1x64xf32>
    %c0_52 = arith.constant 0 : index
    %c0_53 = arith.constant 0 : index
    %c0_54 = arith.constant 0 : index
    %109 = vector.load %arg17[%c0_52, %c0_53, %c0_54] : memref<3x64x64xbf16, #tpu.memory_space<vmem>>, vector<1x64x64xbf16>
    %110 = vector.shape_cast %109 : vector<1x64x64xbf16> to vector<64x64xbf16>
    %c1_i32_55 = arith.constant 1 : i32
    %111 = tpu.dynamic_rotate %107 by %c1_i32_55 dim 0 : vector<16x64xf32>, i32 -> vector<16x64xf32>
    %cst_56 = arith.constant 0.000000e+00 : f32
    %112 = vector.broadcast %cst_56 : f32 to vector<16x64xf32>
    %113 = vector.shape_cast %3 : vector<16x1xi1> to vector<16x1xi1>
    %114 = vector.broadcast %113 : vector<16x1xi1> to vector<16x64xi1>
    %115 = arith.select %114, %111, %112 : vector<16x64xi1>, vector<16x64xf32>
    %116 = arith.truncf %115 : vector<16x64xf32> to vector<16x64xbf16>
    %cst_57 = arith.constant dense<0.000000e+00> : vector<16x64xf32>
    %117 = tpu.matmul %116, %110, %cst_57 {dimension_numbers = #tpu.dot_dimension_numbers<[1], [0], [0], [1], [0, 0, 1, 1], [], []>} : vector<16x64xbf16>, vector<64x64xbf16>, vector<16x64xf32> -> vector<16x64xf32>
    %c1_58 = arith.constant 1 : index
    %c0_59 = arith.constant 0 : index
    %c0_60 = arith.constant 0 : index
    %118 = vector.load %arg17[%c1_58, %c0_59, %c0_60] : memref<3x64x64xbf16, #tpu.memory_space<vmem>>, vector<1x64x64xbf16>
    %119 = vector.shape_cast %118 : vector<1x64x64xbf16> to vector<64x64xbf16>
    %120 = arith.truncf %107 : vector<16x64xf32> to vector<16x64xbf16>
    %cst_61 = arith.constant dense<0.000000e+00> : vector<16x64xf32>
    %121 = tpu.matmul %120, %119, %cst_61 {dimension_numbers = #tpu.dot_dimension_numbers<[1], [0], [0], [1], [0, 0, 1, 1], [], []>} : vector<16x64xbf16>, vector<64x64xbf16>, vector<16x64xf32> -> vector<16x64xf32>
    %122 = arith.addf %117, %121 : vector<16x64xf32>
    %c2_62 = arith.constant 2 : index
    %c0_63 = arith.constant 0 : index
    %c0_64 = arith.constant 0 : index
    %123 = vector.load %arg17[%c2_62, %c0_63, %c0_64] : memref<3x64x64xbf16, #tpu.memory_space<vmem>>, vector<1x64x64xbf16>
    %124 = vector.shape_cast %123 : vector<1x64x64xbf16> to vector<64x64xbf16>
    %c15_i32_65 = arith.constant 15 : i32
    %125 = tpu.dynamic_rotate %107 by %c15_i32_65 dim 0 : vector<16x64xf32>, i32 -> vector<16x64xf32>
    %cst_66 = arith.constant 0.000000e+00 : f32
    %126 = vector.broadcast %cst_66 : f32 to vector<16x64xf32>
    %127 = vector.shape_cast %5 : vector<16x1xi1> to vector<16x1xi1>
    %128 = vector.broadcast %127 : vector<16x1xi1> to vector<16x64xi1>
    %129 = arith.select %128, %125, %126 : vector<16x64xi1>, vector<16x64xf32>
    %130 = arith.truncf %129 : vector<16x64xf32> to vector<16x64xbf16>
    %cst_67 = arith.constant dense<0.000000e+00> : vector<16x64xf32>
    %131 = tpu.matmul %130, %124, %cst_67 {dimension_numbers = #tpu.dot_dimension_numbers<[1], [0], [0], [1], [0, 0, 1, 1], [], []>} : vector<16x64xbf16>, vector<64x64xbf16>, vector<16x64xf32> -> vector<16x64xf32>
    %132 = arith.addf %122, %131 : vector<16x64xf32>
    %133 = vector.broadcast %108 : vector<1x64xf32> to vector<16x64xf32>
    %134 = arith.addf %132, %133 : vector<16x64xf32>
    %c0_68 = arith.constant 0 : index
    %c0_69 = arith.constant 0 : index
    %135 = vector.load %arg11[%c0_68, %c0_69] : memref<1x64xf32, #tpu.memory_space<vmem>>, vector<1x64xf32>
    %c0_70 = arith.constant 0 : index
    %c0_71 = arith.constant 0 : index
    %136 = vector.load %arg9[%c0_70, %c0_71] : memref<1x64xf32, #tpu.memory_space<vmem>>, vector<1x64xf32>
    %cst_72 = arith.constant dense<0.000000e+00> : vector<64xf32>
    %137 = vector.multi_reduction <add>, %134, %cst_72 [0] : vector<16x64xf32> to vector<64xf32>
    %138 = vector.shape_cast %137 : vector<64xf32> to vector<1x64xf32>
    %139 = arith.mulf %134, %134 : vector<16x64xf32>
    %cst_73 = arith.constant dense<0.000000e+00> : vector<64xf32>
    %140 = vector.multi_reduction <add>, %139, %cst_73 [0] : vector<16x64xf32> to vector<64xf32>
    %141 = vector.shape_cast %140 : vector<64xf32> to vector<1x64xf32>
    %cst_74 = arith.constant dense<0.000000e+00> : vector<1x64xf32>
    %142 = tpu.matmul %138, %0, %cst_74 {dimension_numbers = #tpu.dot_dimension_numbers<[1], [0], [0], [1], [0, 0, 1, 1], [], []>} : vector<1x64xf32>, vector<64x64xf32>, vector<1x64xf32> -> vector<1x64xf32>
    %cst_75 = arith.constant 7.812500e-03 : f32
    %143 = vector.broadcast %cst_75 : f32 to vector<1x64xf32>
    %144 = arith.mulf %142, %143 : vector<1x64xf32>
    %cst_76 = arith.constant dense<0.000000e+00> : vector<1x64xf32>
    %145 = tpu.matmul %141, %0, %cst_76 {dimension_numbers = #tpu.dot_dimension_numbers<[1], [0], [0], [1], [0, 0, 1, 1], [], []>} : vector<1x64xf32>, vector<64x64xf32>, vector<1x64xf32> -> vector<1x64xf32>
    %cst_77 = arith.constant 7.812500e-03 : f32
    %146 = vector.broadcast %cst_77 : f32 to vector<1x64xf32>
    %147 = arith.mulf %145, %146 : vector<1x64xf32>
    %148 = arith.mulf %144, %144 : vector<1x64xf32>
    %149 = arith.subf %147, %148 : vector<1x64xf32>
    %cst_78 = arith.constant 0.000000e+00 : f32
    %150 = vector.broadcast %cst_78 : f32 to vector<1x64xf32>
    %151 = arith.maximumf %149, %150 : vector<1x64xf32>
    %cst_79 = arith.constant 9.99999974E-6 : f32
    %152 = vector.broadcast %cst_79 : f32 to vector<1x64xf32>
    %153 = arith.addf %151, %152 : vector<1x64xf32>
    %154 = math.rsqrt %153 : vector<1x64xf32>
    %155 = vector.broadcast %144 : vector<1x64xf32> to vector<16x64xf32>
    %156 = arith.subf %134, %155 : vector<16x64xf32>
    %157 = vector.broadcast %154 : vector<1x64xf32> to vector<16x64xf32>
    %158 = arith.mulf %156, %157 : vector<16x64xf32>
    %159 = vector.broadcast %135 : vector<1x64xf32> to vector<16x64xf32>
    %160 = arith.mulf %158, %159 : vector<16x64xf32>
    %161 = vector.broadcast %136 : vector<1x64xf32> to vector<16x64xf32>
    %162 = arith.addf %160, %161 : vector<16x64xf32>
    %cst_80 = arith.constant 2.000000e+01 : f32
    %163 = vector.broadcast %cst_80 : f32 to vector<16x64xf32>
    %164 = arith.minimumf %162, %163 : vector<16x64xf32>
    %165 = math.exp %164 : vector<16x64xf32>
    %cst_81 = arith.constant 1.000000e+00 : f32
    %166 = vector.broadcast %cst_81 : f32 to vector<16x64xf32>
    %167 = arith.addf %166, %165 : vector<16x64xf32>
    %cst_82 = arith.constant 1.000000e+00 : f32
    %168 = vector.broadcast %cst_82 : f32 to vector<16x64xf32>
    %169 = arith.addf %168, %165 : vector<16x64xf32>
    %170 = arith.mulf %167, %169 : vector<16x64xf32>
    %cst_83 = arith.constant 1.000000e+00 : f32
    %171 = vector.broadcast %cst_83 : f32 to vector<16x64xf32>
    %172 = arith.subf %170, %171 : vector<16x64xf32>
    %173 = arith.mulf %162, %172 : vector<16x64xf32>
    %cst_84 = arith.constant 1.000000e+00 : f32
    %174 = vector.broadcast %cst_84 : f32 to vector<16x64xf32>
    %175 = arith.addf %170, %174 : vector<16x64xf32>
    %176 = tpu.reciprocal %175 {approx = true} : vector<16x64xf32> -> vector<16x64xf32>
    %177 = arith.mulf %173, %176 : vector<16x64xf32>
    %c0_85 = arith.constant 0 : index
    %c0_86 = arith.constant 0 : index
    %178 = vector.load %arg13[%c0_85, %c0_86] : memref<8x64xbf16, #tpu.memory_space<vmem>>, vector<8x64xbf16>
    %c0_87 = arith.constant 0 : index
    %c0_88 = arith.constant 0 : index
    %179 = vector.load %arg12[%c0_87, %c0_88] : memref<1x64xf32, #tpu.memory_space<vmem>>, vector<1x64xf32>
    %180 = arith.truncf %7 : vector<16x8xf32> to vector<16x8xbf16>
    %cst_89 = arith.constant dense<0.000000e+00> : vector<16x64xf32>
    %181 = tpu.matmul %180, %178, %cst_89 {dimension_numbers = #tpu.dot_dimension_numbers<[1], [0], [0], [1], [0, 0, 1, 1], [], []>} : vector<16x8xbf16>, vector<8x64xbf16>, vector<16x64xf32> -> vector<16x64xf32>
    %182 = vector.broadcast %179 : vector<1x64xf32> to vector<16x64xf32>
    %183 = arith.addf %182, %181 : vector<16x64xf32>
    %184 = arith.addf %177, %183 : vector<16x64xf32>
    %cst_90 = arith.constant 2.000000e+01 : f32
    %185 = vector.broadcast %cst_90 : f32 to vector<1x32xf32>
    %186 = arith.minimumf %9, %185 : vector<1x32xf32>
    %187 = math.exp %186 : vector<1x32xf32>
    %cst_91 = arith.constant 1.000000e+00 : f32
    %188 = vector.broadcast %cst_91 : f32 to vector<1x32xf32>
    %189 = arith.addf %188, %187 : vector<1x32xf32>
    %cst_92 = arith.constant 1.000000e+00 : f32
    %190 = vector.broadcast %cst_92 : f32 to vector<1x32xf32>
    %191 = arith.addf %190, %187 : vector<1x32xf32>
    %192 = arith.mulf %189, %191 : vector<1x32xf32>
    %cst_93 = arith.constant 1.000000e+00 : f32
    %193 = vector.broadcast %cst_93 : f32 to vector<1x32xf32>
    %194 = arith.subf %192, %193 : vector<1x32xf32>
    %195 = arith.mulf %9, %194 : vector<1x32xf32>
    %cst_94 = arith.constant 1.000000e+00 : f32
    %196 = vector.broadcast %cst_94 : f32 to vector<1x32xf32>
    %197 = arith.addf %192, %196 : vector<1x32xf32>
    %198 = tpu.reciprocal %197 {approx = true} : vector<1x32xf32> -> vector<1x32xf32>
    %199 = arith.mulf %195, %198 : vector<1x32xf32>
    %200 = arith.truncf %199 : vector<1x32xf32> to vector<1x32xbf16>
    %c0_95 = arith.constant 0 : index
    %c0_96 = arith.constant 0 : index
    %201 = vector.load %arg25[%c0_95, %c0_96] : memref<32x128xbf16, #tpu.memory_space<vmem>>, vector<32x128xbf16>
    %cst_97 = arith.constant dense<0.000000e+00> : vector<1x128xf32>
    %202 = tpu.matmul %200, %201, %cst_97 {dimension_numbers = #tpu.dot_dimension_numbers<[1], [0], [0], [1], [0, 0, 1, 1], [], []>} : vector<1x32xbf16>, vector<32x128xbf16>, vector<1x128xf32> -> vector<1x128xf32>
    %c0_98 = arith.constant 0 : index
    %c0_99 = arith.constant 0 : index
    %203 = vector.load %arg24[%c0_98, %c0_99] : memref<1x128xf32, #tpu.memory_space<vmem>>, vector<1x128xf32>
    %204 = arith.addf %202, %203 : vector<1x128xf32>
    %205 = vector.extract_strided_slice %204 {offsets = [0, 0], sizes = [1, 64], strides = [1, 1]} : vector<1x128xf32> to vector<1x64xf32>
    %206 = vector.extract_strided_slice %204 {offsets = [0, 64], sizes = [1, 64], strides = [1, 1]} : vector<1x128xf32> to vector<1x64xf32>
    %c0_100 = arith.constant 0 : index
    %c0_101 = arith.constant 0 : index
    %207 = vector.load %arg18[%c0_100, %c0_101] : memref<1x64xf32, #tpu.memory_space<vmem>>, vector<1x64xf32>
    %c0_102 = arith.constant 0 : index
    %c0_103 = arith.constant 0 : index
    %c0_104 = arith.constant 0 : index
    %208 = vector.load %arg26[%c0_102, %c0_103, %c0_104] : memref<3x64x64xbf16, #tpu.memory_space<vmem>>, vector<1x64x64xbf16>
    %209 = vector.shape_cast %208 : vector<1x64x64xbf16> to vector<64x64xbf16>
    %c1_i32_105 = arith.constant 1 : i32
    %210 = tpu.dynamic_rotate %184 by %c1_i32_105 dim 0 : vector<16x64xf32>, i32 -> vector<16x64xf32>
    %cst_106 = arith.constant 0.000000e+00 : f32
    %211 = vector.broadcast %cst_106 : f32 to vector<16x64xf32>
    %212 = vector.shape_cast %3 : vector<16x1xi1> to vector<16x1xi1>
    %213 = vector.broadcast %212 : vector<16x1xi1> to vector<16x64xi1>
    %214 = arith.select %213, %210, %211 : vector<16x64xi1>, vector<16x64xf32>
    %215 = arith.truncf %214 : vector<16x64xf32> to vector<16x64xbf16>
    %cst_107 = arith.constant dense<0.000000e+00> : vector<16x64xf32>
    %216 = tpu.matmul %215, %209, %cst_107 {dimension_numbers = #tpu.dot_dimension_numbers<[1], [0], [0], [1], [0, 0, 1, 1], [], []>} : vector<16x64xbf16>, vector<64x64xbf16>, vector<16x64xf32> -> vector<16x64xf32>
    %c1_108 = arith.constant 1 : index
    %c0_109 = arith.constant 0 : index
    %c0_110 = arith.constant 0 : index
    %217 = vector.load %arg26[%c1_108, %c0_109, %c0_110] : memref<3x64x64xbf16, #tpu.memory_space<vmem>>, vector<1x64x64xbf16>
    %218 = vector.shape_cast %217 : vector<1x64x64xbf16> to vector<64x64xbf16>
    %219 = arith.truncf %184 : vector<16x64xf32> to vector<16x64xbf16>
    %cst_111 = arith.constant dense<0.000000e+00> : vector<16x64xf32>
    %220 = tpu.matmul %219, %218, %cst_111 {dimension_numbers = #tpu.dot_dimension_numbers<[1], [0], [0], [1], [0, 0, 1, 1], [], []>} : vector<16x64xbf16>, vector<64x64xbf16>, vector<16x64xf32> -> vector<16x64xf32>
    %221 = arith.addf %216, %220 : vector<16x64xf32>
    %c2_112 = arith.constant 2 : index
    %c0_113 = arith.constant 0 : index
    %c0_114 = arith.constant 0 : index
    %222 = vector.load %arg26[%c2_112, %c0_113, %c0_114] : memref<3x64x64xbf16, #tpu.memory_space<vmem>>, vector<1x64x64xbf16>
    %223 = vector.shape_cast %222 : vector<1x64x64xbf16> to vector<64x64xbf16>
    %c15_i32_115 = arith.constant 15 : i32
    %224 = tpu.dynamic_rotate %184 by %c15_i32_115 dim 0 : vector<16x64xf32>, i32 -> vector<16x64xf32>
    %cst_116 = arith.constant 0.000000e+00 : f32
    %225 = vector.broadcast %cst_116 : f32 to vector<16x64xf32>
    %226 = vector.shape_cast %5 : vector<16x1xi1> to vector<16x1xi1>
    %227 = vector.broadcast %226 : vector<16x1xi1> to vector<16x64xi1>
    %228 = arith.select %227, %224, %225 : vector<16x64xi1>, vector<16x64xf32>
    %229 = arith.truncf %228 : vector<16x64xf32> to vector<16x64xbf16>
    %cst_117 = arith.constant dense<0.000000e+00> : vector<16x64xf32>
    %230 = tpu.matmul %229, %223, %cst_117 {dimension_numbers = #tpu.dot_dimension_numbers<[1], [0], [0], [1], [0, 0, 1, 1], [], []>} : vector<16x64xbf16>, vector<64x64xbf16>, vector<16x64xf32> -> vector<16x64xf32>
    %231 = arith.addf %221, %230 : vector<16x64xf32>
    %232 = vector.broadcast %207 : vector<1x64xf32> to vector<16x64xf32>
    %233 = arith.addf %231, %232 : vector<16x64xf32>
    %c0_118 = arith.constant 0 : index
    %c0_119 = arith.constant 0 : index
    %234 = vector.load %arg22[%c0_118, %c0_119] : memref<1x64xf32, #tpu.memory_space<vmem>>, vector<1x64xf32>
    %c0_120 = arith.constant 0 : index
    %c0_121 = arith.constant 0 : index
    %235 = vector.load %arg20[%c0_120, %c0_121] : memref<1x64xf32, #tpu.memory_space<vmem>>, vector<1x64xf32>
    %cst_122 = arith.constant dense<0.000000e+00> : vector<64xf32>
    %236 = vector.multi_reduction <add>, %233, %cst_122 [0] : vector<16x64xf32> to vector<64xf32>
    %237 = vector.shape_cast %236 : vector<64xf32> to vector<1x64xf32>
    %238 = arith.mulf %233, %233 : vector<16x64xf32>
    %cst_123 = arith.constant dense<0.000000e+00> : vector<64xf32>
    %239 = vector.multi_reduction <add>, %238, %cst_123 [0] : vector<16x64xf32> to vector<64xf32>
    %240 = vector.shape_cast %239 : vector<64xf32> to vector<1x64xf32>
    %cst_124 = arith.constant dense<0.000000e+00> : vector<1x64xf32>
    %241 = tpu.matmul %237, %0, %cst_124 {dimension_numbers = #tpu.dot_dimension_numbers<[1], [0], [0], [1], [0, 0, 1, 1], [], []>} : vector<1x64xf32>, vector<64x64xf32>, vector<1x64xf32> -> vector<1x64xf32>
    %cst_125 = arith.constant 7.812500e-03 : f32
    %242 = vector.broadcast %cst_125 : f32 to vector<1x64xf32>
    %243 = arith.mulf %241, %242 : vector<1x64xf32>
    %cst_126 = arith.constant dense<0.000000e+00> : vector<1x64xf32>
    %244 = tpu.matmul %240, %0, %cst_126 {dimension_numbers = #tpu.dot_dimension_numbers<[1], [0], [0], [1], [0, 0, 1, 1], [], []>} : vector<1x64xf32>, vector<64x64xf32>, vector<1x64xf32> -> vector<1x64xf32>
    %cst_127 = arith.constant 7.812500e-03 : f32
    %245 = vector.broadcast %cst_127 : f32 to vector<1x64xf32>
    %246 = arith.mulf %244, %245 : vector<1x64xf32>
    %247 = arith.mulf %243, %243 : vector<1x64xf32>
    %248 = arith.subf %246, %247 : vector<1x64xf32>
    %cst_128 = arith.constant 0.000000e+00 : f32
    %249 = vector.broadcast %cst_128 : f32 to vector<1x64xf32>
    %250 = arith.maximumf %248, %249 : vector<1x64xf32>
    %cst_129 = arith.constant 9.99999974E-6 : f32
    %251 = vector.broadcast %cst_129 : f32 to vector<1x64xf32>
    %252 = arith.addf %250, %251 : vector<1x64xf32>
    %253 = math.rsqrt %252 : vector<1x64xf32>
    %254 = vector.broadcast %243 : vector<1x64xf32> to vector<16x64xf32>
    %255 = arith.subf %233, %254 : vector<16x64xf32>
    %256 = vector.broadcast %253 : vector<1x64xf32> to vector<16x64xf32>
    %257 = arith.mulf %255, %256 : vector<16x64xf32>
    %258 = vector.broadcast %234 : vector<1x64xf32> to vector<16x64xf32>
    %259 = arith.mulf %257, %258 : vector<16x64xf32>
    %260 = vector.broadcast %235 : vector<1x64xf32> to vector<16x64xf32>
    %261 = arith.addf %259, %260 : vector<16x64xf32>
    %cst_130 = arith.constant 1.000000e+00 : f32
    %262 = vector.broadcast %cst_130 : f32 to vector<1x64xf32>
    %263 = arith.addf %262, %205 : vector<1x64xf32>
    %264 = vector.broadcast %263 : vector<1x64xf32> to vector<16x64xf32>
    %265 = arith.mulf %261, %264 : vector<16x64xf32>
    %266 = vector.broadcast %206 : vector<1x64xf32> to vector<16x64xf32>
    %267 = arith.addf %265, %266 : vector<16x64xf32>
    %cst_131 = arith.constant 2.000000e+01 : f32
    %268 = vector.broadcast %cst_131 : f32 to vector<16x64xf32>
    %269 = arith.minimumf %267, %268 : vector<16x64xf32>
    %270 = math.exp %269 : vector<16x64xf32>
    %cst_132 = arith.constant 1.000000e+00 : f32
    %271 = vector.broadcast %cst_132 : f32 to vector<16x64xf32>
    %272 = arith.addf %271, %270 : vector<16x64xf32>
    %cst_133 = arith.constant 1.000000e+00 : f32
    %273 = vector.broadcast %cst_133 : f32 to vector<16x64xf32>
    %274 = arith.addf %273, %270 : vector<16x64xf32>
    %275 = arith.mulf %272, %274 : vector<16x64xf32>
    %cst_134 = arith.constant 1.000000e+00 : f32
    %276 = vector.broadcast %cst_134 : f32 to vector<16x64xf32>
    %277 = arith.subf %275, %276 : vector<16x64xf32>
    %278 = arith.mulf %267, %277 : vector<16x64xf32>
    %cst_135 = arith.constant 1.000000e+00 : f32
    %279 = vector.broadcast %cst_135 : f32 to vector<16x64xf32>
    %280 = arith.addf %275, %279 : vector<16x64xf32>
    %281 = tpu.reciprocal %280 {approx = true} : vector<16x64xf32> -> vector<16x64xf32>
    %282 = arith.mulf %278, %281 : vector<16x64xf32>
    %c0_136 = arith.constant 0 : index
    %c0_137 = arith.constant 0 : index
    %283 = vector.load %arg19[%c0_136, %c0_137] : memref<1x64xf32, #tpu.memory_space<vmem>>, vector<1x64xf32>
    %c0_138 = arith.constant 0 : index
    %c0_139 = arith.constant 0 : index
    %c0_140 = arith.constant 0 : index
    %284 = vector.load %arg27[%c0_138, %c0_139, %c0_140] : memref<3x64x64xbf16, #tpu.memory_space<vmem>>, vector<1x64x64xbf16>
    %285 = vector.shape_cast %284 : vector<1x64x64xbf16> to vector<64x64xbf16>
    %c1_i32_141 = arith.constant 1 : i32
    %286 = tpu.dynamic_rotate %282 by %c1_i32_141 dim 0 : vector<16x64xf32>, i32 -> vector<16x64xf32>
    %cst_142 = arith.constant 0.000000e+00 : f32
    %287 = vector.broadcast %cst_142 : f32 to vector<16x64xf32>
    %288 = vector.shape_cast %3 : vector<16x1xi1> to vector<16x1xi1>
    %289 = vector.broadcast %288 : vector<16x1xi1> to vector<16x64xi1>
    %290 = arith.select %289, %286, %287 : vector<16x64xi1>, vector<16x64xf32>
    %291 = arith.truncf %290 : vector<16x64xf32> to vector<16x64xbf16>
    %cst_143 = arith.constant dense<0.000000e+00> : vector<16x64xf32>
    %292 = tpu.matmul %291, %285, %cst_143 {dimension_numbers = #tpu.dot_dimension_numbers<[1], [0], [0], [1], [0, 0, 1, 1], [], []>} : vector<16x64xbf16>, vector<64x64xbf16>, vector<16x64xf32> -> vector<16x64xf32>
    %c1_144 = arith.constant 1 : index
    %c0_145 = arith.constant 0 : index
    %c0_146 = arith.constant 0 : index
    %293 = vector.load %arg27[%c1_144, %c0_145, %c0_146] : memref<3x64x64xbf16, #tpu.memory_space<vmem>>, vector<1x64x64xbf16>
    %294 = vector.shape_cast %293 : vector<1x64x64xbf16> to vector<64x64xbf16>
    %295 = arith.truncf %282 : vector<16x64xf32> to vector<16x64xbf16>
    %cst_147 = arith.constant dense<0.000000e+00> : vector<16x64xf32>
    %296 = tpu.matmul %295, %294, %cst_147 {dimension_numbers = #tpu.dot_dimension_numbers<[1], [0], [0], [1], [0, 0, 1, 1], [], []>} : vector<16x64xbf16>, vector<64x64xbf16>, vector<16x64xf32> -> vector<16x64xf32>
    %297 = arith.addf %292, %296 : vector<16x64xf32>
    %c2_148 = arith.constant 2 : index
    %c0_149 = arith.constant 0 : index
    %c0_150 = arith.constant 0 : index
    %298 = vector.load %arg27[%c2_148, %c0_149, %c0_150] : memref<3x64x64xbf16, #tpu.memory_space<vmem>>, vector<1x64x64xbf16>
    %299 = vector.shape_cast %298 : vector<1x64x64xbf16> to vector<64x64xbf16>
    %c15_i32_151 = arith.constant 15 : i32
    %300 = tpu.dynamic_rotate %282 by %c15_i32_151 dim 0 : vector<16x64xf32>, i32 -> vector<16x64xf32>
    %cst_152 = arith.constant 0.000000e+00 : f32
    %301 = vector.broadcast %cst_152 : f32 to vector<16x64xf32>
    %302 = vector.shape_cast %5 : vector<16x1xi1> to vector<16x1xi1>
    %303 = vector.broadcast %302 : vector<16x1xi1> to vector<16x64xi1>
    %304 = arith.select %303, %300, %301 : vector<16x64xi1>, vector<16x64xf32>
    %305 = arith.truncf %304 : vector<16x64xf32> to vector<16x64xbf16>
    %cst_153 = arith.constant dense<0.000000e+00> : vector<16x64xf32>
    %306 = tpu.matmul %305, %299, %cst_153 {dimension_numbers = #tpu.dot_dimension_numbers<[1], [0], [0], [1], [0, 0, 1, 1], [], []>} : vector<16x64xbf16>, vector<64x64xbf16>, vector<16x64xf32> -> vector<16x64xf32>
    %307 = arith.addf %297, %306 : vector<16x64xf32>
    %308 = vector.broadcast %283 : vector<1x64xf32> to vector<16x64xf32>
    %309 = arith.addf %307, %308 : vector<16x64xf32>
    %c0_154 = arith.constant 0 : index
    %c0_155 = arith.constant 0 : index
    %310 = vector.load %arg23[%c0_154, %c0_155] : memref<1x64xf32, #tpu.memory_space<vmem>>, vector<1x64xf32>
    %c0_156 = arith.constant 0 : index
    %c0_157 = arith.constant 0 : index
    %311 = vector.load %arg21[%c0_156, %c0_157] : memref<1x64xf32, #tpu.memory_space<vmem>>, vector<1x64xf32>
    %cst_158 = arith.constant dense<0.000000e+00> : vector<64xf32>
    %312 = vector.multi_reduction <add>, %309, %cst_158 [0] : vector<16x64xf32> to vector<64xf32>
    %313 = vector.shape_cast %312 : vector<64xf32> to vector<1x64xf32>
    %314 = arith.mulf %309, %309 : vector<16x64xf32>
    %cst_159 = arith.constant dense<0.000000e+00> : vector<64xf32>
    %315 = vector.multi_reduction <add>, %314, %cst_159 [0] : vector<16x64xf32> to vector<64xf32>
    %316 = vector.shape_cast %315 : vector<64xf32> to vector<1x64xf32>
    %cst_160 = arith.constant dense<0.000000e+00> : vector<1x64xf32>
    %317 = tpu.matmul %313, %0, %cst_160 {dimension_numbers = #tpu.dot_dimension_numbers<[1], [0], [0], [1], [0, 0, 1, 1], [], []>} : vector<1x64xf32>, vector<64x64xf32>, vector<1x64xf32> -> vector<1x64xf32>
    %cst_161 = arith.constant 7.812500e-03 : f32
    %318 = vector.broadcast %cst_161 : f32 to vector<1x64xf32>
    %319 = arith.mulf %317, %318 : vector<1x64xf32>
    %cst_162 = arith.constant dense<0.000000e+00> : vector<1x64xf32>
    %320 = tpu.matmul %316, %0, %cst_162 {dimension_numbers = #tpu.dot_dimension_numbers<[1], [0], [0], [1], [0, 0, 1, 1], [], []>} : vector<1x64xf32>, vector<64x64xf32>, vector<1x64xf32> -> vector<1x64xf32>
    %cst_163 = arith.constant 7.812500e-03 : f32
    %321 = vector.broadcast %cst_163 : f32 to vector<1x64xf32>
    %322 = arith.mulf %320, %321 : vector<1x64xf32>
    %323 = arith.mulf %319, %319 : vector<1x64xf32>
    %324 = arith.subf %322, %323 : vector<1x64xf32>
    %cst_164 = arith.constant 0.000000e+00 : f32
    %325 = vector.broadcast %cst_164 : f32 to vector<1x64xf32>
    %326 = arith.maximumf %324, %325 : vector<1x64xf32>
    %cst_165 = arith.constant 9.99999974E-6 : f32
    %327 = vector.broadcast %cst_165 : f32 to vector<1x64xf32>
    %328 = arith.addf %326, %327 : vector<1x64xf32>
    %329 = math.rsqrt %328 : vector<1x64xf32>
    %330 = vector.broadcast %319 : vector<1x64xf32> to vector<16x64xf32>
    %331 = arith.subf %309, %330 : vector<16x64xf32>
    %332 = vector.broadcast %329 : vector<1x64xf32> to vector<16x64xf32>
    %333 = arith.mulf %331, %332 : vector<16x64xf32>
    %334 = vector.broadcast %310 : vector<1x64xf32> to vector<16x64xf32>
    %335 = arith.mulf %333, %334 : vector<16x64xf32>
    %336 = vector.broadcast %311 : vector<1x64xf32> to vector<16x64xf32>
    %337 = arith.addf %335, %336 : vector<16x64xf32>
    %cst_166 = arith.constant 2.000000e+01 : f32
    %338 = vector.broadcast %cst_166 : f32 to vector<16x64xf32>
    %339 = arith.minimumf %337, %338 : vector<16x64xf32>
    %340 = math.exp %339 : vector<16x64xf32>
    %cst_167 = arith.constant 1.000000e+00 : f32
    %341 = vector.broadcast %cst_167 : f32 to vector<16x64xf32>
    %342 = arith.addf %341, %340 : vector<16x64xf32>
    %cst_168 = arith.constant 1.000000e+00 : f32
    %343 = vector.broadcast %cst_168 : f32 to vector<16x64xf32>
    %344 = arith.addf %343, %340 : vector<16x64xf32>
    %345 = arith.mulf %342, %344 : vector<16x64xf32>
    %cst_169 = arith.constant 1.000000e+00 : f32
    %346 = vector.broadcast %cst_169 : f32 to vector<16x64xf32>
    %347 = arith.subf %345, %346 : vector<16x64xf32>
    %348 = arith.mulf %337, %347 : vector<16x64xf32>
    %cst_170 = arith.constant 1.000000e+00 : f32
    %349 = vector.broadcast %cst_170 : f32 to vector<16x64xf32>
    %350 = arith.addf %345, %349 : vector<16x64xf32>
    %351 = tpu.reciprocal %350 {approx = true} : vector<16x64xf32> -> vector<16x64xf32>
    %352 = arith.mulf %348, %351 : vector<16x64xf32>
    %353 = arith.addf %352, %184 : vector<16x64xf32>
    %c0_171 = arith.constant 0 : index
    %c0_172 = arith.constant 0 : index
    %c0_173 = arith.constant 0 : index
    %354 = vector.load %arg28[%c0_171, %c0_172, %c0_173] : memref<1x16x64xf32, #tpu.memory_space<vmem>>, vector<1x16x64xf32>
    %355 = vector.shape_cast %354 : vector<1x16x64xf32> to vector<16x64xf32>
    %356 = vector.shape_cast %184 : vector<16x64xf32> to vector<1x16x64xf32>
    tpu.vector_store %arg28[%c0_171, %c0_172, %c0_173], %356 {strides = array<i32>} : memref<1x16x64xf32, #tpu.memory_space<vmem>>, vector<1x16x64xf32>,
    %c0_174 = arith.constant 0 : index
    %c0_175 = arith.constant 0 : index
    %c0_176 = arith.constant 0 : index
    %357 = vector.load %arg29[%c0_174, %c0_175, %c0_176] : memref<1x16x64xf32, #tpu.memory_space<vmem>>, vector<1x16x64xf32>
    %358 = vector.shape_cast %357 : vector<1x16x64xf32> to vector<16x64xf32>
    %359 = vector.shape_cast %353 : vector<16x64xf32> to vector<1x16x64xf32>
    tpu.vector_store %arg29[%c0_174, %c0_175, %c0_176], %359 {strides = array<i32>} : memref<1x16x64xf32, #tpu.memory_space<vmem>>, vector<1x16x64xf32>,
    %c0_177 = arith.constant 0 : index
    %c0_178 = arith.constant 0 : index
    %360 = vector.load %arg4[%c0_177, %c0_178] : memref<1x64xf32, #tpu.memory_space<vmem>>, vector<1x64xf32>
    %c0_179 = arith.constant 0 : index
    %c0_180 = arith.constant 0 : index
    %c0_181 = arith.constant 0 : index
    %361 = vector.load %arg5[%c0_179, %c0_180, %c0_181] : memref<3x64x64xbf16, #tpu.memory_space<vmem>>, vector<1x64x64xbf16>
    %362 = vector.shape_cast %361 : vector<1x64x64xbf16> to vector<64x64xbf16>
    %c1_i32_182 = arith.constant 1 : i32
    %363 = tpu.dynamic_rotate %353 by %c1_i32_182 dim 0 : vector<16x64xf32>, i32 -> vector<16x64xf32>
    %cst_183 = arith.constant 0.000000e+00 : f32
    %364 = vector.broadcast %cst_183 : f32 to vector<16x64xf32>
    %365 = vector.shape_cast %3 : vector<16x1xi1> to vector<16x1xi1>
    %366 = vector.broadcast %365 : vector<16x1xi1> to vector<16x64xi1>
    %367 = arith.select %366, %363, %364 : vector<16x64xi1>, vector<16x64xf32>
    %368 = arith.truncf %367 : vector<16x64xf32> to vector<16x64xbf16>
    %cst_184 = arith.constant dense<0.000000e+00> : vector<16x64xf32>
    %369 = tpu.matmul %368, %362, %cst_184 {dimension_numbers = #tpu.dot_dimension_numbers<[1], [0], [0], [1], [0, 0, 1, 1], [], []>} : vector<16x64xbf16>, vector<64x64xbf16>, vector<16x64xf32> -> vector<16x64xf32>
    %c1_185 = arith.constant 1 : index
    %c0_186 = arith.constant 0 : index
    %c0_187 = arith.constant 0 : index
    %370 = vector.load %arg5[%c1_185, %c0_186, %c0_187] : memref<3x64x64xbf16, #tpu.memory_space<vmem>>, vector<1x64x64xbf16>
    %371 = vector.shape_cast %370 : vector<1x64x64xbf16> to vector<64x64xbf16>
    %372 = arith.truncf %353 : vector<16x64xf32> to vector<16x64xbf16>
    %cst_188 = arith.constant dense<0.000000e+00> : vector<16x64xf32>
    %373 = tpu.matmul %372, %371, %cst_188 {dimension_numbers = #tpu.dot_dimension_numbers<[1], [0], [0], [1], [0, 0, 1, 1], [], []>} : vector<16x64xbf16>, vector<64x64xbf16>, vector<16x64xf32> -> vector<16x64xf32>
    %374 = arith.addf %369, %373 : vector<16x64xf32>
    %c2_189 = arith.constant 2 : index
    %c0_190 = arith.constant 0 : index
    %c0_191 = arith.constant 0 : index
    %375 = vector.load %arg5[%c2_189, %c0_190, %c0_191] : memref<3x64x64xbf16, #tpu.memory_space<vmem>>, vector<1x64x64xbf16>
    %376 = vector.shape_cast %375 : vector<1x64x64xbf16> to vector<64x64xbf16>
    %c15_i32_192 = arith.constant 15 : i32
    %377 = tpu.dynamic_rotate %353 by %c15_i32_192 dim 0 : vector<16x64xf32>, i32 -> vector<16x64xf32>
    %cst_193 = arith.constant 0.000000e+00 : f32
    %378 = vector.broadcast %cst_193 : f32 to vector<16x64xf32>
    %379 = vector.shape_cast %5 : vector<16x1xi1> to vector<16x1xi1>
    %380 = vector.broadcast %379 : vector<16x1xi1> to vector<16x64xi1>
    %381 = arith.select %380, %377, %378 : vector<16x64xi1>, vector<16x64xf32>
    %382 = arith.truncf %381 : vector<16x64xf32> to vector<16x64xbf16>
    %cst_194 = arith.constant dense<0.000000e+00> : vector<16x64xf32>
    %383 = tpu.matmul %382, %376, %cst_194 {dimension_numbers = #tpu.dot_dimension_numbers<[1], [0], [0], [1], [0, 0, 1, 1], [], []>} : vector<16x64xbf16>, vector<64x64xbf16>, vector<16x64xf32> -> vector<16x64xf32>
    %384 = arith.addf %374, %383 : vector<16x64xf32>
    %385 = vector.broadcast %360 : vector<1x64xf32> to vector<16x64xf32>
    %386 = arith.addf %384, %385 : vector<16x64xf32>
    %c0_195 = arith.constant 0 : index
    %c0_196 = arith.constant 0 : index
    %c0_197 = arith.constant 0 : index
    %387 = vector.load %arg30[%c0_195, %c0_196, %c0_197] : memref<1x16x64xf32, #tpu.memory_space<vmem>>, vector<1x16x64xf32>
    %388 = vector.shape_cast %387 : vector<1x16x64xf32> to vector<16x64xf32>
    %389 = vector.shape_cast %386 : vector<16x64xf32> to vector<1x16x64xf32>
    tpu.vector_store %arg30[%c0_195, %c0_196, %c0_197], %389 {strides = array<i32>} : memref<1x16x64xf32, #tpu.memory_space<vmem>>, vector<1x16x64xf32>,
    return
  }
  func.func @transform_0(%arg0: i32) -> (i32, i32, i32) {
    %c0_i32 = arith.constant 0 : i32
    %c0_i32_0 = arith.constant 0 : i32
    %c0_i32_1 = arith.constant 0 : i32
    return %arg0, %c0_i32, %c0_i32_0 : i32, i32, i32
  }
  func.func @transform_1(%arg0: i32) -> (i32, i32, i32) {
    %c0_i32 = arith.constant 0 : i32
    %c0_i32_0 = arith.constant 0 : i32
    %c0_i32_1 = arith.constant 0 : i32
    return %arg0, %c0_i32, %c0_i32_0 : i32, i32, i32
  }
  func.func @transform_2(%arg0: i32) -> (i32, i32) {
    %c0_i32 = arith.constant 0 : i32
    %c0_i32_0 = arith.constant 0 : i32
    %c0_i32_1 = arith.constant 0 : i32
    return %c0_i32, %c0_i32_0 : i32, i32
  }
  func.func @transform_3(%arg0: i32) -> (i32, i32) {
    %c0_i32 = arith.constant 0 : i32
    %c0_i32_0 = arith.constant 0 : i32
    %c0_i32_1 = arith.constant 0 : i32
    return %c0_i32, %c0_i32_0 : i32, i32
  }
  func.func @transform_4(%arg0: i32) -> (i32, i32, i32) {
    %c0_i32 = arith.constant 0 : i32
    %c0_i32_0 = arith.constant 0 : i32
    %c0_i32_1 = arith.constant 0 : i32
    %c0_i32_2 = arith.constant 0 : i32
    return %c0_i32, %c0_i32_0, %c0_i32_1 : i32, i32, i32
  }
  func.func @transform_5(%arg0: i32) -> (i32, i32) {
    %c0_i32 = arith.constant 0 : i32
    %c0_i32_0 = arith.constant 0 : i32
    %c0_i32_1 = arith.constant 0 : i32
    return %c0_i32, %c0_i32_0 : i32, i32
  }
  func.func @transform_6(%arg0: i32) -> (i32, i32) {
    %c0_i32 = arith.constant 0 : i32
    %c0_i32_0 = arith.constant 0 : i32
    %c0_i32_1 = arith.constant 0 : i32
    return %c0_i32, %c0_i32_0 : i32, i32
  }
  func.func @transform_7(%arg0: i32) -> (i32, i32) {
    %c0_i32 = arith.constant 0 : i32
    %c0_i32_0 = arith.constant 0 : i32
    %c0_i32_1 = arith.constant 0 : i32
    return %c0_i32, %c0_i32_0 : i32, i32
  }
  func.func @transform_8(%arg0: i32) -> (i32, i32) {
    %c0_i32 = arith.constant 0 : i32
    %c0_i32_0 = arith.constant 0 : i32
    %c0_i32_1 = arith.constant 0 : i32
    return %c0_i32, %c0_i32_0 : i32, i32
  }
  func.func @transform_9(%arg0: i32) -> (i32, i32) {
    %c0_i32 = arith.constant 0 : i32
    %c0_i32_0 = arith.constant 0 : i32
    %c0_i32_1 = arith.constant 0 : i32
    return %c0_i32, %c0_i32_0 : i32, i32
  }
  func.func @transform_10(%arg0: i32) -> (i32, i32) {
    %c0_i32 = arith.constant 0 : i32
    %c0_i32_0 = arith.constant 0 : i32
    %c0_i32_1 = arith.constant 0 : i32
    return %c0_i32, %c0_i32_0 : i32, i32
  }
  func.func @transform_11(%arg0: i32) -> (i32, i32) {
    %c0_i32 = arith.constant 0 : i32
    %c0_i32_0 = arith.constant 0 : i32
    %c0_i32_1 = arith.constant 0 : i32
    return %c0_i32, %c0_i32_0 : i32, i32
  }
  func.func @transform_12(%arg0: i32) -> (i32, i32) {
    %c0_i32 = arith.constant 0 : i32
    %c0_i32_0 = arith.constant 0 : i32
    %c0_i32_1 = arith.constant 0 : i32
    return %c0_i32, %c0_i32_0 : i32, i32
  }
  func.func @transform_13(%arg0: i32) -> (i32, i32) {
    %c0_i32 = arith.constant 0 : i32
    %c0_i32_0 = arith.constant 0 : i32
    %c0_i32_1 = arith.constant 0 : i32
    return %c0_i32, %c0_i32_0 : i32, i32
  }
  func.func @transform_14(%arg0: i32) -> (i32, i32) {
    %c0_i32 = arith.constant 0 : i32
    %c0_i32_0 = arith.constant 0 : i32
    %c0_i32_1 = arith.constant 0 : i32
    return %c0_i32, %c0_i32_0 : i32, i32
  }
  func.func @transform_15(%arg0: i32) -> (i32, i32, i32) {
    %c0_i32 = arith.constant 0 : i32
    %c0_i32_0 = arith.constant 0 : i32
    %c0_i32_1 = arith.constant 0 : i32
    %c0_i32_2 = arith.constant 0 : i32
    return %c0_i32, %c0_i32_0, %c0_i32_1 : i32, i32, i32
  }
  func.func @transform_16(%arg0: i32) -> (i32, i32, i32) {
    %c0_i32 = arith.constant 0 : i32
    %c0_i32_0 = arith.constant 0 : i32
    %c0_i32_1 = arith.constant 0 : i32
    %c0_i32_2 = arith.constant 0 : i32
    return %c0_i32, %c0_i32_0, %c0_i32_1 : i32, i32, i32
  }
  func.func @transform_17(%arg0: i32) -> (i32, i32) {
    %c0_i32 = arith.constant 0 : i32
    %c0_i32_0 = arith.constant 0 : i32
    %c0_i32_1 = arith.constant 0 : i32
    return %c0_i32, %c0_i32_0 : i32, i32
  }
  func.func @transform_18(%arg0: i32) -> (i32, i32) {
    %c0_i32 = arith.constant 0 : i32
    %c0_i32_0 = arith.constant 0 : i32
    %c0_i32_1 = arith.constant 0 : i32
    return %c0_i32, %c0_i32_0 : i32, i32
  }
  func.func @transform_19(%arg0: i32) -> (i32, i32) {
    %c0_i32 = arith.constant 0 : i32
    %c0_i32_0 = arith.constant 0 : i32
    %c0_i32_1 = arith.constant 0 : i32
    return %c0_i32, %c0_i32_0 : i32, i32
  }
  func.func @transform_20(%arg0: i32) -> (i32, i32) {
    %c0_i32 = arith.constant 0 : i32
    %c0_i32_0 = arith.constant 0 : i32
    %c0_i32_1 = arith.constant 0 : i32
    return %c0_i32, %c0_i32_0 : i32, i32
  }
  func.func @transform_21(%arg0: i32) -> (i32, i32) {
    %c0_i32 = arith.constant 0 : i32
    %c0_i32_0 = arith.constant 0 : i32
    %c0_i32_1 = arith.constant 0 : i32
    return %c0_i32, %c0_i32_0 : i32, i32
  }
  func.func @transform_22(%arg0: i32) -> (i32, i32) {
    %c0_i32 = arith.constant 0 : i32
    %c0_i32_0 = arith.constant 0 : i32
    %c0_i32_1 = arith.constant 0 : i32
    return %c0_i32, %c0_i32_0 : i32, i32
  }
  func.func @transform_23(%arg0: i32) -> (i32, i32) {
    %c0_i32 = arith.constant 0 : i32
    %c0_i32_0 = arith.constant 0 : i32
    %c0_i32_1 = arith.constant 0 : i32
    return %c0_i32, %c0_i32_0 : i32, i32
  }
  func.func @transform_24(%arg0: i32) -> (i32, i32) {
    %c0_i32 = arith.constant 0 : i32
    %c0_i32_0 = arith.constant 0 : i32
    %c0_i32_1 = arith.constant 0 : i32
    return %c0_i32, %c0_i32_0 : i32, i32
  }
  func.func @transform_25(%arg0: i32) -> (i32, i32, i32) {
    %c0_i32 = arith.constant 0 : i32
    %c0_i32_0 = arith.constant 0 : i32
    %c0_i32_1 = arith.constant 0 : i32
    %c0_i32_2 = arith.constant 0 : i32
    return %c0_i32, %c0_i32_0, %c0_i32_1 : i32, i32, i32
  }
  func.func @transform_26(%arg0: i32) -> (i32, i32, i32) {
    %c0_i32 = arith.constant 0 : i32
    %c0_i32_0 = arith.constant 0 : i32
    %c0_i32_1 = arith.constant 0 : i32
    %c0_i32_2 = arith.constant 0 : i32
    return %c0_i32, %c0_i32_0, %c0_i32_1 : i32, i32, i32
  }
  func.func @transform_27(%arg0: i32) -> (i32, i32, i32) {
    %c0_i32 = arith.constant 0 : i32
    %c0_i32_0 = arith.constant 0 : i32
    %c0_i32_1 = arith.constant 0 : i32
    return %arg0, %c0_i32, %c0_i32_0 : i32, i32, i32
  }
  func.func @transform_28(%arg0: i32) -> (i32, i32, i32) {
    %c0_i32 = arith.constant 0 : i32
    %c0_i32_0 = arith.constant 0 : i32
    %c0_i32_1 = arith.constant 0 : i32
    return %arg0, %c0_i32, %c0_i32_0 : i32, i32, i32
  }
  func.func @transform_29(%arg0: i32) -> (i32, i32, i32) {
    %c0_i32 = arith.constant 0 : i32
    %c0_i32_0 = arith.constant 0 : i32
    %c0_i32_1 = arith.constant 0 : i32
    return %arg0, %c0_i32, %c0_i32_0 : i32, i32, i32
  }
}

module attributes {stable_mosaic.version = 11 : i64} {
  func.func @_up_level_kernel(%arg0: i32, %arg1: memref<1x8x64xf32, #tpu.memory_space<vmem>>, %arg2: memref<1x8x64xf32, #tpu.memory_space<vmem>>, %arg3: memref<1x1x32xf32, #tpu.memory_space<vmem>>, %arg4: memref<64x64xf32, #tpu.memory_space<vmem>>, %arg5: memref<1x64xf32, #tpu.memory_space<vmem>>, %arg6: memref<1x64xf32, #tpu.memory_space<vmem>>, %arg7: memref<1x64xf32, #tpu.memory_space<vmem>>, %arg8: memref<1x64xf32, #tpu.memory_space<vmem>>, %arg9: memref<1x64xf32, #tpu.memory_space<vmem>>, %arg10: memref<1x64xf32, #tpu.memory_space<vmem>>, %arg11: memref<1x64xf32, #tpu.memory_space<vmem>>, %arg12: memref<128x64xbf16, #tpu.memory_space<vmem>>, %arg13: memref<1x128xf32, #tpu.memory_space<vmem>>, %arg14: memref<32x128xbf16, #tpu.memory_space<vmem>>, %arg15: memref<3x128x64xbf16, #tpu.memory_space<vmem>>, %arg16: memref<3x64x64xbf16, #tpu.memory_space<vmem>>, %arg17: memref<1x64xf32, #tpu.memory_space<vmem>>, %arg18: memref<1x64xf32, #tpu.memory_space<vmem>>, %arg19: memref<1x64xf32, #tpu.memory_space<vmem>>, %arg20: memref<1x64xf32, #tpu.memory_space<vmem>>, %arg21: memref<1x64xf32, #tpu.memory_space<vmem>>, %arg22: memref<1x64xf32, #tpu.memory_space<vmem>>, %arg23: memref<1x128xf32, #tpu.memory_space<vmem>>, %arg24: memref<32x128xbf16, #tpu.memory_space<vmem>>, %arg25: memref<3x64x64xbf16, #tpu.memory_space<vmem>>, %arg26: memref<3x64x64xbf16, #tpu.memory_space<vmem>>, %arg27: memref<1x64xf32, #tpu.memory_space<vmem>>, %arg28: memref<4x64x64xbf16, #tpu.memory_space<vmem>>, %arg29: memref<1x8x64xf32, #tpu.memory_space<vmem>>, %arg30: memref<1x8x64xf32, #tpu.memory_space<vmem>>, %arg31: memref<1x8x64xf32, #tpu.memory_space<vmem>>, %arg32: memref<1x8x64xf32, #tpu.memory_space<vmem>>) attributes {dimension_semantics = [#tpu.dimension_semantics<parallel>], iteration_bounds = array<i64: 2>, scalar_prefetch = 0 : i64, scratch_operands = 0 : i64, tpu.core_type = #tpu.core_type<tc>, window_params = [{transform_indices = @transform_0, window_bounds = array<i64: 1, 8, 64>}, {transform_indices = @transform_1, window_bounds = array<i64: 1, 8, 64>}, {transform_indices = @transform_2, window_bounds = array<i64: 1, 1, 32>}, {pipeline_mode = #tpu.pipeline_mode<synchronous>, transform_indices = @transform_3, window_bounds = array<i64: 64, 64>}, {pipeline_mode = #tpu.pipeline_mode<synchronous>, transform_indices = @transform_4, window_bounds = array<i64: 1, 64>}, {pipeline_mode = #tpu.pipeline_mode<synchronous>, transform_indices = @transform_5, window_bounds = array<i64: 1, 64>}, {pipeline_mode = #tpu.pipeline_mode<synchronous>, transform_indices = @transform_6, window_bounds = array<i64: 1, 64>}, {pipeline_mode = #tpu.pipeline_mode<synchronous>, transform_indices = @transform_7, window_bounds = array<i64: 1, 64>}, {pipeline_mode = #tpu.pipeline_mode<synchronous>, transform_indices = @transform_8, window_bounds = array<i64: 1, 64>}, {pipeline_mode = #tpu.pipeline_mode<synchronous>, transform_indices = @transform_9, window_bounds = array<i64: 1, 64>}, {pipeline_mode = #tpu.pipeline_mode<synchronous>, transform_indices = @transform_10, window_bounds = array<i64: 1, 64>}, {pipeline_mode = #tpu.pipeline_mode<synchronous>, transform_indices = @transform_11, window_bounds = array<i64: 128, 64>}, {pipeline_mode = #tpu.pipeline_mode<synchronous>, transform_indices = @transform_12, window_bounds = array<i64: 1, 128>}, {pipeline_mode = #tpu.pipeline_mode<synchronous>, transform_indices = @transform_13, window_bounds = array<i64: 32, 128>}, {pipeline_mode = #tpu.pipeline_mode<synchronous>, transform_indices = @transform_14, window_bounds = array<i64: 3, 128, 64>}, {pipeline_mode = #tpu.pipeline_mode<synchronous>, transform_indices = @transform_15, window_bounds = array<i64: 3, 64, 64>}, {pipeline_mode = #tpu.pipeline_mode<synchronous>, transform_indices = @transform_16, window_bounds = array<i64: 1, 64>}, {pipeline_mode = #tpu.pipeline_mode<synchronous>, transform_indices = @transform_17, window_bounds = array<i64: 1, 64>}, {pipeline_mode = #tpu.pipeline_mode<synchronous>, transform_indices = @transform_18, window_bounds = array<i64: 1, 64>}, {pipeline_mode = #tpu.pipeline_mode<synchronous>, transform_indices = @transform_19, window_bounds = array<i64: 1, 64>}, {pipeline_mode = #tpu.pipeline_mode<synchronous>, transform_indices = @transform_20, window_bounds = array<i64: 1, 64>}, {pipeline_mode = #tpu.pipeline_mode<synchronous>, transform_indices = @transform_21, window_bounds = array<i64: 1, 64>}, {pipeline_mode = #tpu.pipeline_mode<synchronous>, transform_indices = @transform_22, window_bounds = array<i64: 1, 128>}, {pipeline_mode = #tpu.pipeline_mode<synchronous>, transform_indices = @transform_23, window_bounds = array<i64: 32, 128>}, {pipeline_mode = #tpu.pipeline_mode<synchronous>, transform_indices = @transform_24, window_bounds = array<i64: 3, 64, 64>}, {pipeline_mode = #tpu.pipeline_mode<synchronous>, transform_indices = @transform_25, window_bounds = array<i64: 3, 64, 64>}, {pipeline_mode = #tpu.pipeline_mode<synchronous>, transform_indices = @transform_26, window_bounds = array<i64: 1, 64>}, {pipeline_mode = #tpu.pipeline_mode<synchronous>, transform_indices = @transform_27, window_bounds = array<i64: 4, 64, 64>}, {transform_indices = @transform_28, window_bounds = array<i64: 1, 8, 64>}, {transform_indices = @transform_29, window_bounds = array<i64: 1, 8, 64>}, {transform_indices = @transform_30, window_bounds = array<i64: 1, 8, 64>}, {transform_indices = @transform_31, window_bounds = array<i64: 1, 8, 64>}]} {
    %c0 = arith.constant 0 : index
    %c0_0 = arith.constant 0 : index
    %0 = vector.load %arg4[%c0, %c0_0] : memref<64x64xf32, #tpu.memory_space<vmem>>, vector<64x64xf32>
    %1 = tpu.iota {dimensions = array<i32: 0>} : vector<8x1xi32>
    %c1_i32 = arith.constant 1 : i32
    %2 = vector.broadcast %c1_i32 : i32 to vector<8x1xi32>
    %3 = arith.cmpi sge, %1, %2 : vector<8x1xi32>
    %c7_i32 = arith.constant 7 : i32
    %4 = vector.broadcast %c7_i32 : i32 to vector<8x1xi32>
    %5 = arith.cmpi slt, %1, %4 : vector<8x1xi32>
    %c0_1 = arith.constant 0 : index
    %c0_2 = arith.constant 0 : index
    %c0_3 = arith.constant 0 : index
    %6 = vector.load %arg1[%c0_1, %c0_2, %c0_3] : memref<1x8x64xf32, #tpu.memory_space<vmem>>, vector<1x8x64xf32>
    %7 = vector.shape_cast %6 : vector<1x8x64xf32> to vector<8x64xf32>
    %c0_4 = arith.constant 0 : index
    %c0_5 = arith.constant 0 : index
    %c0_6 = arith.constant 0 : index
    %8 = vector.load %arg2[%c0_4, %c0_5, %c0_6] : memref<1x8x64xf32, #tpu.memory_space<vmem>>, vector<1x8x64xf32>
    %9 = vector.shape_cast %8 : vector<1x8x64xf32> to vector<8x64xf32>
    %c0_7 = arith.constant 0 : index
    %c0_8 = arith.constant 0 : index
    %c0_9 = arith.constant 0 : index
    %10 = vector.load %arg3[%c0_7, %c0_8, %c0_9] : memref<1x1x32xf32, #tpu.memory_space<vmem>>, vector<1x1x32xf32>
    %11 = vector.shape_cast %10 : vector<1x1x32xf32> to vector<1x32xf32>
    %cst = arith.constant 2.000000e+01 : f32
    %12 = vector.broadcast %cst : f32 to vector<1x32xf32>
    %13 = arith.minimumf %11, %12 : vector<1x32xf32>
    %14 = math.exp %13 : vector<1x32xf32>
    %cst_10 = arith.constant 1.000000e+00 : f32
    %15 = vector.broadcast %cst_10 : f32 to vector<1x32xf32>
    %16 = arith.addf %15, %14 : vector<1x32xf32>
    %cst_11 = arith.constant 1.000000e+00 : f32
    %17 = vector.broadcast %cst_11 : f32 to vector<1x32xf32>
    %18 = arith.addf %17, %14 : vector<1x32xf32>
    %19 = arith.mulf %16, %18 : vector<1x32xf32>
    %cst_12 = arith.constant 1.000000e+00 : f32
    %20 = vector.broadcast %cst_12 : f32 to vector<1x32xf32>
    %21 = arith.subf %19, %20 : vector<1x32xf32>
    %22 = arith.mulf %11, %21 : vector<1x32xf32>
    %cst_13 = arith.constant 1.000000e+00 : f32
    %23 = vector.broadcast %cst_13 : f32 to vector<1x32xf32>
    %24 = arith.addf %19, %23 : vector<1x32xf32>
    %25 = tpu.reciprocal %24 {approx = true} : vector<1x32xf32> -> vector<1x32xf32>
    %26 = arith.mulf %22, %25 : vector<1x32xf32>
    %27 = arith.truncf %26 : vector<1x32xf32> to vector<1x32xbf16>
    %c0_14 = arith.constant 0 : index
    %c0_15 = arith.constant 0 : index
    %28 = vector.load %arg14[%c0_14, %c0_15] : memref<32x128xbf16, #tpu.memory_space<vmem>>, vector<32x128xbf16>
    %cst_16 = arith.constant dense<0.000000e+00> : vector<1x128xf32>
    %29 = tpu.matmul %27, %28, %cst_16 {dimension_numbers = #tpu.dot_dimension_numbers<[1], [0], [0], [1], [0, 0, 1, 1], [], []>} : vector<1x32xbf16>, vector<32x128xbf16>, vector<1x128xf32> -> vector<1x128xf32>
    %c0_17 = arith.constant 0 : index
    %c0_18 = arith.constant 0 : index
    %30 = vector.load %arg13[%c0_17, %c0_18] : memref<1x128xf32, #tpu.memory_space<vmem>>, vector<1x128xf32>
    %31 = arith.addf %29, %30 : vector<1x128xf32>
    %32 = vector.extract_strided_slice %31 {offsets = [0, 0], sizes = [1, 64], strides = [1, 1]} : vector<1x128xf32> to vector<1x64xf32>
    %33 = vector.extract_strided_slice %31 {offsets = [0, 64], sizes = [1, 64], strides = [1, 1]} : vector<1x128xf32> to vector<1x64xf32>
    %c0_19 = arith.constant 0 : index
    %c0_20 = arith.constant 0 : index
    %34 = vector.load %arg5[%c0_19, %c0_20] : memref<1x64xf32, #tpu.memory_space<vmem>>, vector<1x64xf32>
    %c0_21 = arith.constant 0 : index
    %c0_22 = arith.constant 0 : index
    %c0_23 = arith.constant 0 : index
    %35 = vector.load %arg15[%c0_21, %c0_22, %c0_23] : memref<3x128x64xbf16, #tpu.memory_space<vmem>>, vector<1x128x64xbf16>
    %36 = vector.shape_cast %35 : vector<1x128x64xbf16> to vector<128x64xbf16>
    %c1_i32_24 = arith.constant 1 : i32
    %37 = tpu.dynamic_rotate %7 by %c1_i32_24 dim 0 : vector<8x64xf32>, i32 -> vector<8x64xf32>
    %cst_25 = arith.constant 0.000000e+00 : f32
    %38 = vector.broadcast %cst_25 : f32 to vector<8x64xf32>
    %39 = vector.shape_cast %3 : vector<8x1xi1> to vector<8x1xi1>
    %40 = vector.broadcast %39 : vector<8x1xi1> to vector<8x64xi1>
    %41 = arith.select %40, %37, %38 : vector<8x64xi1>, vector<8x64xf32>
    %42 = arith.truncf %41 : vector<8x64xf32> to vector<8x64xbf16>
    %43 = vector.extract_strided_slice %36 {offsets = [0, 0], sizes = [64, 64], strides = [1, 1]} : vector<128x64xbf16> to vector<64x64xbf16>
    %cst_26 = arith.constant dense<0.000000e+00> : vector<8x64xf32>
    %44 = tpu.matmul %42, %43, %cst_26 {dimension_numbers = #tpu.dot_dimension_numbers<[1], [0], [0], [1], [0, 0, 1, 1], [], []>} : vector<8x64xbf16>, vector<64x64xbf16>, vector<8x64xf32> -> vector<8x64xf32>
    %c1_i32_27 = arith.constant 1 : i32
    %45 = tpu.dynamic_rotate %9 by %c1_i32_27 dim 0 : vector<8x64xf32>, i32 -> vector<8x64xf32>
    %cst_28 = arith.constant 0.000000e+00 : f32
    %46 = vector.broadcast %cst_28 : f32 to vector<8x64xf32>
    %47 = vector.shape_cast %3 : vector<8x1xi1> to vector<8x1xi1>
    %48 = vector.broadcast %47 : vector<8x1xi1> to vector<8x64xi1>
    %49 = arith.select %48, %45, %46 : vector<8x64xi1>, vector<8x64xf32>
    %50 = arith.truncf %49 : vector<8x64xf32> to vector<8x64xbf16>
    %51 = vector.extract_strided_slice %36 {offsets = [64, 0], sizes = [64, 64], strides = [1, 1]} : vector<128x64xbf16> to vector<64x64xbf16>
    %cst_29 = arith.constant dense<0.000000e+00> : vector<8x64xf32>
    %52 = tpu.matmul %50, %51, %cst_29 {dimension_numbers = #tpu.dot_dimension_numbers<[1], [0], [0], [1], [0, 0, 1, 1], [], []>} : vector<8x64xbf16>, vector<64x64xbf16>, vector<8x64xf32> -> vector<8x64xf32>
    %53 = arith.addf %44, %52 : vector<8x64xf32>
    %c1 = arith.constant 1 : index
    %c0_30 = arith.constant 0 : index
    %c0_31 = arith.constant 0 : index
    %54 = vector.load %arg15[%c1, %c0_30, %c0_31] : memref<3x128x64xbf16, #tpu.memory_space<vmem>>, vector<1x128x64xbf16>
    %55 = vector.shape_cast %54 : vector<1x128x64xbf16> to vector<128x64xbf16>
    %56 = arith.truncf %7 : vector<8x64xf32> to vector<8x64xbf16>
    %57 = vector.extract_strided_slice %55 {offsets = [0, 0], sizes = [64, 64], strides = [1, 1]} : vector<128x64xbf16> to vector<64x64xbf16>
    %cst_32 = arith.constant dense<0.000000e+00> : vector<8x64xf32>
    %58 = tpu.matmul %56, %57, %cst_32 {dimension_numbers = #tpu.dot_dimension_numbers<[1], [0], [0], [1], [0, 0, 1, 1], [], []>} : vector<8x64xbf16>, vector<64x64xbf16>, vector<8x64xf32> -> vector<8x64xf32>
    %59 = arith.addf %53, %58 : vector<8x64xf32>
    %60 = arith.truncf %9 : vector<8x64xf32> to vector<8x64xbf16>
    %61 = vector.extract_strided_slice %55 {offsets = [64, 0], sizes = [64, 64], strides = [1, 1]} : vector<128x64xbf16> to vector<64x64xbf16>
    %cst_33 = arith.constant dense<0.000000e+00> : vector<8x64xf32>
    %62 = tpu.matmul %60, %61, %cst_33 {dimension_numbers = #tpu.dot_dimension_numbers<[1], [0], [0], [1], [0, 0, 1, 1], [], []>} : vector<8x64xbf16>, vector<64x64xbf16>, vector<8x64xf32> -> vector<8x64xf32>
    %63 = arith.addf %59, %62 : vector<8x64xf32>
    %c2 = arith.constant 2 : index
    %c0_34 = arith.constant 0 : index
    %c0_35 = arith.constant 0 : index
    %64 = vector.load %arg15[%c2, %c0_34, %c0_35] : memref<3x128x64xbf16, #tpu.memory_space<vmem>>, vector<1x128x64xbf16>
    %65 = vector.shape_cast %64 : vector<1x128x64xbf16> to vector<128x64xbf16>
    %c7_i32_36 = arith.constant 7 : i32
    %66 = tpu.dynamic_rotate %7 by %c7_i32_36 dim 0 : vector<8x64xf32>, i32 -> vector<8x64xf32>
    %cst_37 = arith.constant 0.000000e+00 : f32
    %67 = vector.broadcast %cst_37 : f32 to vector<8x64xf32>
    %68 = vector.shape_cast %5 : vector<8x1xi1> to vector<8x1xi1>
    %69 = vector.broadcast %68 : vector<8x1xi1> to vector<8x64xi1>
    %70 = arith.select %69, %66, %67 : vector<8x64xi1>, vector<8x64xf32>
    %71 = arith.truncf %70 : vector<8x64xf32> to vector<8x64xbf16>
    %72 = vector.extract_strided_slice %65 {offsets = [0, 0], sizes = [64, 64], strides = [1, 1]} : vector<128x64xbf16> to vector<64x64xbf16>
    %cst_38 = arith.constant dense<0.000000e+00> : vector<8x64xf32>
    %73 = tpu.matmul %71, %72, %cst_38 {dimension_numbers = #tpu.dot_dimension_numbers<[1], [0], [0], [1], [0, 0, 1, 1], [], []>} : vector<8x64xbf16>, vector<64x64xbf16>, vector<8x64xf32> -> vector<8x64xf32>
    %74 = arith.addf %63, %73 : vector<8x64xf32>
    %c7_i32_39 = arith.constant 7 : i32
    %75 = tpu.dynamic_rotate %9 by %c7_i32_39 dim 0 : vector<8x64xf32>, i32 -> vector<8x64xf32>
    %cst_40 = arith.constant 0.000000e+00 : f32
    %76 = vector.broadcast %cst_40 : f32 to vector<8x64xf32>
    %77 = vector.shape_cast %5 : vector<8x1xi1> to vector<8x1xi1>
    %78 = vector.broadcast %77 : vector<8x1xi1> to vector<8x64xi1>
    %79 = arith.select %78, %75, %76 : vector<8x64xi1>, vector<8x64xf32>
    %80 = arith.truncf %79 : vector<8x64xf32> to vector<8x64xbf16>
    %81 = vector.extract_strided_slice %65 {offsets = [64, 0], sizes = [64, 64], strides = [1, 1]} : vector<128x64xbf16> to vector<64x64xbf16>
    %cst_41 = arith.constant dense<0.000000e+00> : vector<8x64xf32>
    %82 = tpu.matmul %80, %81, %cst_41 {dimension_numbers = #tpu.dot_dimension_numbers<[1], [0], [0], [1], [0, 0, 1, 1], [], []>} : vector<8x64xbf16>, vector<64x64xbf16>, vector<8x64xf32> -> vector<8x64xf32>
    %83 = arith.addf %74, %82 : vector<8x64xf32>
    %84 = vector.broadcast %34 : vector<1x64xf32> to vector<8x64xf32>
    %85 = arith.addf %83, %84 : vector<8x64xf32>
    %c0_42 = arith.constant 0 : index
    %c0_43 = arith.constant 0 : index
    %86 = vector.load %arg9[%c0_42, %c0_43] : memref<1x64xf32, #tpu.memory_space<vmem>>, vector<1x64xf32>
    %c0_44 = arith.constant 0 : index
    %c0_45 = arith.constant 0 : index
    %87 = vector.load %arg7[%c0_44, %c0_45] : memref<1x64xf32, #tpu.memory_space<vmem>>, vector<1x64xf32>
    %cst_46 = arith.constant dense<0.000000e+00> : vector<64xf32>
    %88 = vector.multi_reduction <add>, %85, %cst_46 [0] : vector<8x64xf32> to vector<64xf32>
    %89 = vector.shape_cast %88 : vector<64xf32> to vector<1x64xf32>
    %90 = arith.mulf %85, %85 : vector<8x64xf32>
    %cst_47 = arith.constant dense<0.000000e+00> : vector<64xf32>
    %91 = vector.multi_reduction <add>, %90, %cst_47 [0] : vector<8x64xf32> to vector<64xf32>
    %92 = vector.shape_cast %91 : vector<64xf32> to vector<1x64xf32>
    %cst_48 = arith.constant dense<0.000000e+00> : vector<1x64xf32>
    %93 = tpu.matmul %89, %0, %cst_48 {dimension_numbers = #tpu.dot_dimension_numbers<[1], [0], [0], [1], [0, 0, 1, 1], [], []>} : vector<1x64xf32>, vector<64x64xf32>, vector<1x64xf32> -> vector<1x64xf32>
    %cst_49 = arith.constant 1.562500e-02 : f32
    %94 = vector.broadcast %cst_49 : f32 to vector<1x64xf32>
    %95 = arith.mulf %93, %94 : vector<1x64xf32>
    %cst_50 = arith.constant dense<0.000000e+00> : vector<1x64xf32>
    %96 = tpu.matmul %92, %0, %cst_50 {dimension_numbers = #tpu.dot_dimension_numbers<[1], [0], [0], [1], [0, 0, 1, 1], [], []>} : vector<1x64xf32>, vector<64x64xf32>, vector<1x64xf32> -> vector<1x64xf32>
    %cst_51 = arith.constant 1.562500e-02 : f32
    %97 = vector.broadcast %cst_51 : f32 to vector<1x64xf32>
    %98 = arith.mulf %96, %97 : vector<1x64xf32>
    %99 = arith.mulf %95, %95 : vector<1x64xf32>
    %100 = arith.subf %98, %99 : vector<1x64xf32>
    %cst_52 = arith.constant 0.000000e+00 : f32
    %101 = vector.broadcast %cst_52 : f32 to vector<1x64xf32>
    %102 = arith.maximumf %100, %101 : vector<1x64xf32>
    %cst_53 = arith.constant 9.99999974E-6 : f32
    %103 = vector.broadcast %cst_53 : f32 to vector<1x64xf32>
    %104 = arith.addf %102, %103 : vector<1x64xf32>
    %105 = math.rsqrt %104 : vector<1x64xf32>
    %106 = vector.broadcast %95 : vector<1x64xf32> to vector<8x64xf32>
    %107 = arith.subf %85, %106 : vector<8x64xf32>
    %108 = vector.broadcast %105 : vector<1x64xf32> to vector<8x64xf32>
    %109 = arith.mulf %107, %108 : vector<8x64xf32>
    %110 = vector.broadcast %86 : vector<1x64xf32> to vector<8x64xf32>
    %111 = arith.mulf %109, %110 : vector<8x64xf32>
    %112 = vector.broadcast %87 : vector<1x64xf32> to vector<8x64xf32>
    %113 = arith.addf %111, %112 : vector<8x64xf32>
    %cst_54 = arith.constant 1.000000e+00 : f32
    %114 = vector.broadcast %cst_54 : f32 to vector<1x64xf32>
    %115 = arith.addf %114, %32 : vector<1x64xf32>
    %116 = vector.broadcast %115 : vector<1x64xf32> to vector<8x64xf32>
    %117 = arith.mulf %113, %116 : vector<8x64xf32>
    %118 = vector.broadcast %33 : vector<1x64xf32> to vector<8x64xf32>
    %119 = arith.addf %117, %118 : vector<8x64xf32>
    %cst_55 = arith.constant 2.000000e+01 : f32
    %120 = vector.broadcast %cst_55 : f32 to vector<8x64xf32>
    %121 = arith.minimumf %119, %120 : vector<8x64xf32>
    %122 = math.exp %121 : vector<8x64xf32>
    %cst_56 = arith.constant 1.000000e+00 : f32
    %123 = vector.broadcast %cst_56 : f32 to vector<8x64xf32>
    %124 = arith.addf %123, %122 : vector<8x64xf32>
    %cst_57 = arith.constant 1.000000e+00 : f32
    %125 = vector.broadcast %cst_57 : f32 to vector<8x64xf32>
    %126 = arith.addf %125, %122 : vector<8x64xf32>
    %127 = arith.mulf %124, %126 : vector<8x64xf32>
    %cst_58 = arith.constant 1.000000e+00 : f32
    %128 = vector.broadcast %cst_58 : f32 to vector<8x64xf32>
    %129 = arith.subf %127, %128 : vector<8x64xf32>
    %130 = arith.mulf %119, %129 : vector<8x64xf32>
    %cst_59 = arith.constant 1.000000e+00 : f32
    %131 = vector.broadcast %cst_59 : f32 to vector<8x64xf32>
    %132 = arith.addf %127, %131 : vector<8x64xf32>
    %133 = tpu.reciprocal %132 {approx = true} : vector<8x64xf32> -> vector<8x64xf32>
    %134 = arith.mulf %130, %133 : vector<8x64xf32>
    %c0_60 = arith.constant 0 : index
    %c0_61 = arith.constant 0 : index
    %135 = vector.load %arg6[%c0_60, %c0_61] : memref<1x64xf32, #tpu.memory_space<vmem>>, vector<1x64xf32>
    %c0_62 = arith.constant 0 : index
    %c0_63 = arith.constant 0 : index
    %c0_64 = arith.constant 0 : index
    %136 = vector.load %arg16[%c0_62, %c0_63, %c0_64] : memref<3x64x64xbf16, #tpu.memory_space<vmem>>, vector<1x64x64xbf16>
    %137 = vector.shape_cast %136 : vector<1x64x64xbf16> to vector<64x64xbf16>
    %c1_i32_65 = arith.constant 1 : i32
    %138 = tpu.dynamic_rotate %134 by %c1_i32_65 dim 0 : vector<8x64xf32>, i32 -> vector<8x64xf32>
    %cst_66 = arith.constant 0.000000e+00 : f32
    %139 = vector.broadcast %cst_66 : f32 to vector<8x64xf32>
    %140 = vector.shape_cast %3 : vector<8x1xi1> to vector<8x1xi1>
    %141 = vector.broadcast %140 : vector<8x1xi1> to vector<8x64xi1>
    %142 = arith.select %141, %138, %139 : vector<8x64xi1>, vector<8x64xf32>
    %143 = arith.truncf %142 : vector<8x64xf32> to vector<8x64xbf16>
    %cst_67 = arith.constant dense<0.000000e+00> : vector<8x64xf32>
    %144 = tpu.matmul %143, %137, %cst_67 {dimension_numbers = #tpu.dot_dimension_numbers<[1], [0], [0], [1], [0, 0, 1, 1], [], []>} : vector<8x64xbf16>, vector<64x64xbf16>, vector<8x64xf32> -> vector<8x64xf32>
    %c1_68 = arith.constant 1 : index
    %c0_69 = arith.constant 0 : index
    %c0_70 = arith.constant 0 : index
    %145 = vector.load %arg16[%c1_68, %c0_69, %c0_70] : memref<3x64x64xbf16, #tpu.memory_space<vmem>>, vector<1x64x64xbf16>
    %146 = vector.shape_cast %145 : vector<1x64x64xbf16> to vector<64x64xbf16>
    %147 = arith.truncf %134 : vector<8x64xf32> to vector<8x64xbf16>
    %cst_71 = arith.constant dense<0.000000e+00> : vector<8x64xf32>
    %148 = tpu.matmul %147, %146, %cst_71 {dimension_numbers = #tpu.dot_dimension_numbers<[1], [0], [0], [1], [0, 0, 1, 1], [], []>} : vector<8x64xbf16>, vector<64x64xbf16>, vector<8x64xf32> -> vector<8x64xf32>
    %149 = arith.addf %144, %148 : vector<8x64xf32>
    %c2_72 = arith.constant 2 : index
    %c0_73 = arith.constant 0 : index
    %c0_74 = arith.constant 0 : index
    %150 = vector.load %arg16[%c2_72, %c0_73, %c0_74] : memref<3x64x64xbf16, #tpu.memory_space<vmem>>, vector<1x64x64xbf16>
    %151 = vector.shape_cast %150 : vector<1x64x64xbf16> to vector<64x64xbf16>
    %c7_i32_75 = arith.constant 7 : i32
    %152 = tpu.dynamic_rotate %134 by %c7_i32_75 dim 0 : vector<8x64xf32>, i32 -> vector<8x64xf32>
    %cst_76 = arith.constant 0.000000e+00 : f32
    %153 = vector.broadcast %cst_76 : f32 to vector<8x64xf32>
    %154 = vector.shape_cast %5 : vector<8x1xi1> to vector<8x1xi1>
    %155 = vector.broadcast %154 : vector<8x1xi1> to vector<8x64xi1>
    %156 = arith.select %155, %152, %153 : vector<8x64xi1>, vector<8x64xf32>
    %157 = arith.truncf %156 : vector<8x64xf32> to vector<8x64xbf16>
    %cst_77 = arith.constant dense<0.000000e+00> : vector<8x64xf32>
    %158 = tpu.matmul %157, %151, %cst_77 {dimension_numbers = #tpu.dot_dimension_numbers<[1], [0], [0], [1], [0, 0, 1, 1], [], []>} : vector<8x64xbf16>, vector<64x64xbf16>, vector<8x64xf32> -> vector<8x64xf32>
    %159 = arith.addf %149, %158 : vector<8x64xf32>
    %160 = vector.broadcast %135 : vector<1x64xf32> to vector<8x64xf32>
    %161 = arith.addf %159, %160 : vector<8x64xf32>
    %c0_78 = arith.constant 0 : index
    %c0_79 = arith.constant 0 : index
    %162 = vector.load %arg10[%c0_78, %c0_79] : memref<1x64xf32, #tpu.memory_space<vmem>>, vector<1x64xf32>
    %c0_80 = arith.constant 0 : index
    %c0_81 = arith.constant 0 : index
    %163 = vector.load %arg8[%c0_80, %c0_81] : memref<1x64xf32, #tpu.memory_space<vmem>>, vector<1x64xf32>
    %cst_82 = arith.constant dense<0.000000e+00> : vector<64xf32>
    %164 = vector.multi_reduction <add>, %161, %cst_82 [0] : vector<8x64xf32> to vector<64xf32>
    %165 = vector.shape_cast %164 : vector<64xf32> to vector<1x64xf32>
    %166 = arith.mulf %161, %161 : vector<8x64xf32>
    %cst_83 = arith.constant dense<0.000000e+00> : vector<64xf32>
    %167 = vector.multi_reduction <add>, %166, %cst_83 [0] : vector<8x64xf32> to vector<64xf32>
    %168 = vector.shape_cast %167 : vector<64xf32> to vector<1x64xf32>
    %cst_84 = arith.constant dense<0.000000e+00> : vector<1x64xf32>
    %169 = tpu.matmul %165, %0, %cst_84 {dimension_numbers = #tpu.dot_dimension_numbers<[1], [0], [0], [1], [0, 0, 1, 1], [], []>} : vector<1x64xf32>, vector<64x64xf32>, vector<1x64xf32> -> vector<1x64xf32>
    %cst_85 = arith.constant 1.562500e-02 : f32
    %170 = vector.broadcast %cst_85 : f32 to vector<1x64xf32>
    %171 = arith.mulf %169, %170 : vector<1x64xf32>
    %cst_86 = arith.constant dense<0.000000e+00> : vector<1x64xf32>
    %172 = tpu.matmul %168, %0, %cst_86 {dimension_numbers = #tpu.dot_dimension_numbers<[1], [0], [0], [1], [0, 0, 1, 1], [], []>} : vector<1x64xf32>, vector<64x64xf32>, vector<1x64xf32> -> vector<1x64xf32>
    %cst_87 = arith.constant 1.562500e-02 : f32
    %173 = vector.broadcast %cst_87 : f32 to vector<1x64xf32>
    %174 = arith.mulf %172, %173 : vector<1x64xf32>
    %175 = arith.mulf %171, %171 : vector<1x64xf32>
    %176 = arith.subf %174, %175 : vector<1x64xf32>
    %cst_88 = arith.constant 0.000000e+00 : f32
    %177 = vector.broadcast %cst_88 : f32 to vector<1x64xf32>
    %178 = arith.maximumf %176, %177 : vector<1x64xf32>
    %cst_89 = arith.constant 9.99999974E-6 : f32
    %179 = vector.broadcast %cst_89 : f32 to vector<1x64xf32>
    %180 = arith.addf %178, %179 : vector<1x64xf32>
    %181 = math.rsqrt %180 : vector<1x64xf32>
    %182 = vector.broadcast %171 : vector<1x64xf32> to vector<8x64xf32>
    %183 = arith.subf %161, %182 : vector<8x64xf32>
    %184 = vector.broadcast %181 : vector<1x64xf32> to vector<8x64xf32>
    %185 = arith.mulf %183, %184 : vector<8x64xf32>
    %186 = vector.broadcast %162 : vector<1x64xf32> to vector<8x64xf32>
    %187 = arith.mulf %185, %186 : vector<8x64xf32>
    %188 = vector.broadcast %163 : vector<1x64xf32> to vector<8x64xf32>
    %189 = arith.addf %187, %188 : vector<8x64xf32>
    %cst_90 = arith.constant 2.000000e+01 : f32
    %190 = vector.broadcast %cst_90 : f32 to vector<8x64xf32>
    %191 = arith.minimumf %189, %190 : vector<8x64xf32>
    %192 = math.exp %191 : vector<8x64xf32>
    %cst_91 = arith.constant 1.000000e+00 : f32
    %193 = vector.broadcast %cst_91 : f32 to vector<8x64xf32>
    %194 = arith.addf %193, %192 : vector<8x64xf32>
    %cst_92 = arith.constant 1.000000e+00 : f32
    %195 = vector.broadcast %cst_92 : f32 to vector<8x64xf32>
    %196 = arith.addf %195, %192 : vector<8x64xf32>
    %197 = arith.mulf %194, %196 : vector<8x64xf32>
    %cst_93 = arith.constant 1.000000e+00 : f32
    %198 = vector.broadcast %cst_93 : f32 to vector<8x64xf32>
    %199 = arith.subf %197, %198 : vector<8x64xf32>
    %200 = arith.mulf %189, %199 : vector<8x64xf32>
    %cst_94 = arith.constant 1.000000e+00 : f32
    %201 = vector.broadcast %cst_94 : f32 to vector<8x64xf32>
    %202 = arith.addf %197, %201 : vector<8x64xf32>
    %203 = tpu.reciprocal %202 {approx = true} : vector<8x64xf32> -> vector<8x64xf32>
    %204 = arith.mulf %200, %203 : vector<8x64xf32>
    %c0_95 = arith.constant 0 : index
    %c0_96 = arith.constant 0 : index
    %205 = vector.load %arg12[%c0_95, %c0_96] : memref<128x64xbf16, #tpu.memory_space<vmem>>, vector<128x64xbf16>
    %c0_97 = arith.constant 0 : index
    %c0_98 = arith.constant 0 : index
    %206 = vector.load %arg11[%c0_97, %c0_98] : memref<1x64xf32, #tpu.memory_space<vmem>>, vector<1x64xf32>
    %207 = vector.extract_strided_slice %205 {offsets = [0, 0], sizes = [64, 64], strides = [1, 1]} : vector<128x64xbf16> to vector<64x64xbf16>
    %208 = arith.truncf %7 : vector<8x64xf32> to vector<8x64xbf16>
    %cst_99 = arith.constant dense<0.000000e+00> : vector<8x64xf32>
    %209 = tpu.matmul %208, %207, %cst_99 {dimension_numbers = #tpu.dot_dimension_numbers<[1], [0], [0], [1], [0, 0, 1, 1], [], []>} : vector<8x64xbf16>, vector<64x64xbf16>, vector<8x64xf32> -> vector<8x64xf32>
    %210 = vector.broadcast %206 : vector<1x64xf32> to vector<8x64xf32>
    %211 = arith.addf %210, %209 : vector<8x64xf32>
    %212 = vector.extract_strided_slice %205 {offsets = [64, 0], sizes = [64, 64], strides = [1, 1]} : vector<128x64xbf16> to vector<64x64xbf16>
    %213 = arith.truncf %9 : vector<8x64xf32> to vector<8x64xbf16>
    %cst_100 = arith.constant dense<0.000000e+00> : vector<8x64xf32>
    %214 = tpu.matmul %213, %212, %cst_100 {dimension_numbers = #tpu.dot_dimension_numbers<[1], [0], [0], [1], [0, 0, 1, 1], [], []>} : vector<8x64xbf16>, vector<64x64xbf16>, vector<8x64xf32> -> vector<8x64xf32>
    %215 = arith.addf %211, %214 : vector<8x64xf32>
    %216 = arith.addf %204, %215 : vector<8x64xf32>
    %cst_101 = arith.constant 2.000000e+01 : f32
    %217 = vector.broadcast %cst_101 : f32 to vector<1x32xf32>
    %218 = arith.minimumf %11, %217 : vector<1x32xf32>
    %219 = math.exp %218 : vector<1x32xf32>
    %cst_102 = arith.constant 1.000000e+00 : f32
    %220 = vector.broadcast %cst_102 : f32 to vector<1x32xf32>
    %221 = arith.addf %220, %219 : vector<1x32xf32>
    %cst_103 = arith.constant 1.000000e+00 : f32
    %222 = vector.broadcast %cst_103 : f32 to vector<1x32xf32>
    %223 = arith.addf %222, %219 : vector<1x32xf32>
    %224 = arith.mulf %221, %223 : vector<1x32xf32>
    %cst_104 = arith.constant 1.000000e+00 : f32
    %225 = vector.broadcast %cst_104 : f32 to vector<1x32xf32>
    %226 = arith.subf %224, %225 : vector<1x32xf32>
    %227 = arith.mulf %11, %226 : vector<1x32xf32>
    %cst_105 = arith.constant 1.000000e+00 : f32
    %228 = vector.broadcast %cst_105 : f32 to vector<1x32xf32>
    %229 = arith.addf %224, %228 : vector<1x32xf32>
    %230 = tpu.reciprocal %229 {approx = true} : vector<1x32xf32> -> vector<1x32xf32>
    %231 = arith.mulf %227, %230 : vector<1x32xf32>
    %232 = arith.truncf %231 : vector<1x32xf32> to vector<1x32xbf16>
    %c0_106 = arith.constant 0 : index
    %c0_107 = arith.constant 0 : index
    %233 = vector.load %arg24[%c0_106, %c0_107] : memref<32x128xbf16, #tpu.memory_space<vmem>>, vector<32x128xbf16>
    %cst_108 = arith.constant dense<0.000000e+00> : vector<1x128xf32>
    %234 = tpu.matmul %232, %233, %cst_108 {dimension_numbers = #tpu.dot_dimension_numbers<[1], [0], [0], [1], [0, 0, 1, 1], [], []>} : vector<1x32xbf16>, vector<32x128xbf16>, vector<1x128xf32> -> vector<1x128xf32>
    %c0_109 = arith.constant 0 : index
    %c0_110 = arith.constant 0 : index
    %235 = vector.load %arg23[%c0_109, %c0_110] : memref<1x128xf32, #tpu.memory_space<vmem>>, vector<1x128xf32>
    %236 = arith.addf %234, %235 : vector<1x128xf32>
    %237 = vector.extract_strided_slice %236 {offsets = [0, 0], sizes = [1, 64], strides = [1, 1]} : vector<1x128xf32> to vector<1x64xf32>
    %238 = vector.extract_strided_slice %236 {offsets = [0, 64], sizes = [1, 64], strides = [1, 1]} : vector<1x128xf32> to vector<1x64xf32>
    %c0_111 = arith.constant 0 : index
    %c0_112 = arith.constant 0 : index
    %239 = vector.load %arg17[%c0_111, %c0_112] : memref<1x64xf32, #tpu.memory_space<vmem>>, vector<1x64xf32>
    %c0_113 = arith.constant 0 : index
    %c0_114 = arith.constant 0 : index
    %c0_115 = arith.constant 0 : index
    %240 = vector.load %arg25[%c0_113, %c0_114, %c0_115] : memref<3x64x64xbf16, #tpu.memory_space<vmem>>, vector<1x64x64xbf16>
    %241 = vector.shape_cast %240 : vector<1x64x64xbf16> to vector<64x64xbf16>
    %c1_i32_116 = arith.constant 1 : i32
    %242 = tpu.dynamic_rotate %216 by %c1_i32_116 dim 0 : vector<8x64xf32>, i32 -> vector<8x64xf32>
    %cst_117 = arith.constant 0.000000e+00 : f32
    %243 = vector.broadcast %cst_117 : f32 to vector<8x64xf32>
    %244 = vector.shape_cast %3 : vector<8x1xi1> to vector<8x1xi1>
    %245 = vector.broadcast %244 : vector<8x1xi1> to vector<8x64xi1>
    %246 = arith.select %245, %242, %243 : vector<8x64xi1>, vector<8x64xf32>
    %247 = arith.truncf %246 : vector<8x64xf32> to vector<8x64xbf16>
    %cst_118 = arith.constant dense<0.000000e+00> : vector<8x64xf32>
    %248 = tpu.matmul %247, %241, %cst_118 {dimension_numbers = #tpu.dot_dimension_numbers<[1], [0], [0], [1], [0, 0, 1, 1], [], []>} : vector<8x64xbf16>, vector<64x64xbf16>, vector<8x64xf32> -> vector<8x64xf32>
    %c1_119 = arith.constant 1 : index
    %c0_120 = arith.constant 0 : index
    %c0_121 = arith.constant 0 : index
    %249 = vector.load %arg25[%c1_119, %c0_120, %c0_121] : memref<3x64x64xbf16, #tpu.memory_space<vmem>>, vector<1x64x64xbf16>
    %250 = vector.shape_cast %249 : vector<1x64x64xbf16> to vector<64x64xbf16>
    %251 = arith.truncf %216 : vector<8x64xf32> to vector<8x64xbf16>
    %cst_122 = arith.constant dense<0.000000e+00> : vector<8x64xf32>
    %252 = tpu.matmul %251, %250, %cst_122 {dimension_numbers = #tpu.dot_dimension_numbers<[1], [0], [0], [1], [0, 0, 1, 1], [], []>} : vector<8x64xbf16>, vector<64x64xbf16>, vector<8x64xf32> -> vector<8x64xf32>
    %253 = arith.addf %248, %252 : vector<8x64xf32>
    %c2_123 = arith.constant 2 : index
    %c0_124 = arith.constant 0 : index
    %c0_125 = arith.constant 0 : index
    %254 = vector.load %arg25[%c2_123, %c0_124, %c0_125] : memref<3x64x64xbf16, #tpu.memory_space<vmem>>, vector<1x64x64xbf16>
    %255 = vector.shape_cast %254 : vector<1x64x64xbf16> to vector<64x64xbf16>
    %c7_i32_126 = arith.constant 7 : i32
    %256 = tpu.dynamic_rotate %216 by %c7_i32_126 dim 0 : vector<8x64xf32>, i32 -> vector<8x64xf32>
    %cst_127 = arith.constant 0.000000e+00 : f32
    %257 = vector.broadcast %cst_127 : f32 to vector<8x64xf32>
    %258 = vector.shape_cast %5 : vector<8x1xi1> to vector<8x1xi1>
    %259 = vector.broadcast %258 : vector<8x1xi1> to vector<8x64xi1>
    %260 = arith.select %259, %256, %257 : vector<8x64xi1>, vector<8x64xf32>
    %261 = arith.truncf %260 : vector<8x64xf32> to vector<8x64xbf16>
    %cst_128 = arith.constant dense<0.000000e+00> : vector<8x64xf32>
    %262 = tpu.matmul %261, %255, %cst_128 {dimension_numbers = #tpu.dot_dimension_numbers<[1], [0], [0], [1], [0, 0, 1, 1], [], []>} : vector<8x64xbf16>, vector<64x64xbf16>, vector<8x64xf32> -> vector<8x64xf32>
    %263 = arith.addf %253, %262 : vector<8x64xf32>
    %264 = vector.broadcast %239 : vector<1x64xf32> to vector<8x64xf32>
    %265 = arith.addf %263, %264 : vector<8x64xf32>
    %c0_129 = arith.constant 0 : index
    %c0_130 = arith.constant 0 : index
    %266 = vector.load %arg21[%c0_129, %c0_130] : memref<1x64xf32, #tpu.memory_space<vmem>>, vector<1x64xf32>
    %c0_131 = arith.constant 0 : index
    %c0_132 = arith.constant 0 : index
    %267 = vector.load %arg19[%c0_131, %c0_132] : memref<1x64xf32, #tpu.memory_space<vmem>>, vector<1x64xf32>
    %cst_133 = arith.constant dense<0.000000e+00> : vector<64xf32>
    %268 = vector.multi_reduction <add>, %265, %cst_133 [0] : vector<8x64xf32> to vector<64xf32>
    %269 = vector.shape_cast %268 : vector<64xf32> to vector<1x64xf32>
    %270 = arith.mulf %265, %265 : vector<8x64xf32>
    %cst_134 = arith.constant dense<0.000000e+00> : vector<64xf32>
    %271 = vector.multi_reduction <add>, %270, %cst_134 [0] : vector<8x64xf32> to vector<64xf32>
    %272 = vector.shape_cast %271 : vector<64xf32> to vector<1x64xf32>
    %cst_135 = arith.constant dense<0.000000e+00> : vector<1x64xf32>
    %273 = tpu.matmul %269, %0, %cst_135 {dimension_numbers = #tpu.dot_dimension_numbers<[1], [0], [0], [1], [0, 0, 1, 1], [], []>} : vector<1x64xf32>, vector<64x64xf32>, vector<1x64xf32> -> vector<1x64xf32>
    %cst_136 = arith.constant 1.562500e-02 : f32
    %274 = vector.broadcast %cst_136 : f32 to vector<1x64xf32>
    %275 = arith.mulf %273, %274 : vector<1x64xf32>
    %cst_137 = arith.constant dense<0.000000e+00> : vector<1x64xf32>
    %276 = tpu.matmul %272, %0, %cst_137 {dimension_numbers = #tpu.dot_dimension_numbers<[1], [0], [0], [1], [0, 0, 1, 1], [], []>} : vector<1x64xf32>, vector<64x64xf32>, vector<1x64xf32> -> vector<1x64xf32>
    %cst_138 = arith.constant 1.562500e-02 : f32
    %277 = vector.broadcast %cst_138 : f32 to vector<1x64xf32>
    %278 = arith.mulf %276, %277 : vector<1x64xf32>
    %279 = arith.mulf %275, %275 : vector<1x64xf32>
    %280 = arith.subf %278, %279 : vector<1x64xf32>
    %cst_139 = arith.constant 0.000000e+00 : f32
    %281 = vector.broadcast %cst_139 : f32 to vector<1x64xf32>
    %282 = arith.maximumf %280, %281 : vector<1x64xf32>
    %cst_140 = arith.constant 9.99999974E-6 : f32
    %283 = vector.broadcast %cst_140 : f32 to vector<1x64xf32>
    %284 = arith.addf %282, %283 : vector<1x64xf32>
    %285 = math.rsqrt %284 : vector<1x64xf32>
    %286 = vector.broadcast %275 : vector<1x64xf32> to vector<8x64xf32>
    %287 = arith.subf %265, %286 : vector<8x64xf32>
    %288 = vector.broadcast %285 : vector<1x64xf32> to vector<8x64xf32>
    %289 = arith.mulf %287, %288 : vector<8x64xf32>
    %290 = vector.broadcast %266 : vector<1x64xf32> to vector<8x64xf32>
    %291 = arith.mulf %289, %290 : vector<8x64xf32>
    %292 = vector.broadcast %267 : vector<1x64xf32> to vector<8x64xf32>
    %293 = arith.addf %291, %292 : vector<8x64xf32>
    %cst_141 = arith.constant 1.000000e+00 : f32
    %294 = vector.broadcast %cst_141 : f32 to vector<1x64xf32>
    %295 = arith.addf %294, %237 : vector<1x64xf32>
    %296 = vector.broadcast %295 : vector<1x64xf32> to vector<8x64xf32>
    %297 = arith.mulf %293, %296 : vector<8x64xf32>
    %298 = vector.broadcast %238 : vector<1x64xf32> to vector<8x64xf32>
    %299 = arith.addf %297, %298 : vector<8x64xf32>
    %cst_142 = arith.constant 2.000000e+01 : f32
    %300 = vector.broadcast %cst_142 : f32 to vector<8x64xf32>
    %301 = arith.minimumf %299, %300 : vector<8x64xf32>
    %302 = math.exp %301 : vector<8x64xf32>
    %cst_143 = arith.constant 1.000000e+00 : f32
    %303 = vector.broadcast %cst_143 : f32 to vector<8x64xf32>
    %304 = arith.addf %303, %302 : vector<8x64xf32>
    %cst_144 = arith.constant 1.000000e+00 : f32
    %305 = vector.broadcast %cst_144 : f32 to vector<8x64xf32>
    %306 = arith.addf %305, %302 : vector<8x64xf32>
    %307 = arith.mulf %304, %306 : vector<8x64xf32>
    %cst_145 = arith.constant 1.000000e+00 : f32
    %308 = vector.broadcast %cst_145 : f32 to vector<8x64xf32>
    %309 = arith.subf %307, %308 : vector<8x64xf32>
    %310 = arith.mulf %299, %309 : vector<8x64xf32>
    %cst_146 = arith.constant 1.000000e+00 : f32
    %311 = vector.broadcast %cst_146 : f32 to vector<8x64xf32>
    %312 = arith.addf %307, %311 : vector<8x64xf32>
    %313 = tpu.reciprocal %312 {approx = true} : vector<8x64xf32> -> vector<8x64xf32>
    %314 = arith.mulf %310, %313 : vector<8x64xf32>
    %c0_147 = arith.constant 0 : index
    %c0_148 = arith.constant 0 : index
    %315 = vector.load %arg18[%c0_147, %c0_148] : memref<1x64xf32, #tpu.memory_space<vmem>>, vector<1x64xf32>
    %c0_149 = arith.constant 0 : index
    %c0_150 = arith.constant 0 : index
    %c0_151 = arith.constant 0 : index
    %316 = vector.load %arg26[%c0_149, %c0_150, %c0_151] : memref<3x64x64xbf16, #tpu.memory_space<vmem>>, vector<1x64x64xbf16>
    %317 = vector.shape_cast %316 : vector<1x64x64xbf16> to vector<64x64xbf16>
    %c1_i32_152 = arith.constant 1 : i32
    %318 = tpu.dynamic_rotate %314 by %c1_i32_152 dim 0 : vector<8x64xf32>, i32 -> vector<8x64xf32>
    %cst_153 = arith.constant 0.000000e+00 : f32
    %319 = vector.broadcast %cst_153 : f32 to vector<8x64xf32>
    %320 = vector.shape_cast %3 : vector<8x1xi1> to vector<8x1xi1>
    %321 = vector.broadcast %320 : vector<8x1xi1> to vector<8x64xi1>
    %322 = arith.select %321, %318, %319 : vector<8x64xi1>, vector<8x64xf32>
    %323 = arith.truncf %322 : vector<8x64xf32> to vector<8x64xbf16>
    %cst_154 = arith.constant dense<0.000000e+00> : vector<8x64xf32>
    %324 = tpu.matmul %323, %317, %cst_154 {dimension_numbers = #tpu.dot_dimension_numbers<[1], [0], [0], [1], [0, 0, 1, 1], [], []>} : vector<8x64xbf16>, vector<64x64xbf16>, vector<8x64xf32> -> vector<8x64xf32>
    %c1_155 = arith.constant 1 : index
    %c0_156 = arith.constant 0 : index
    %c0_157 = arith.constant 0 : index
    %325 = vector.load %arg26[%c1_155, %c0_156, %c0_157] : memref<3x64x64xbf16, #tpu.memory_space<vmem>>, vector<1x64x64xbf16>
    %326 = vector.shape_cast %325 : vector<1x64x64xbf16> to vector<64x64xbf16>
    %327 = arith.truncf %314 : vector<8x64xf32> to vector<8x64xbf16>
    %cst_158 = arith.constant dense<0.000000e+00> : vector<8x64xf32>
    %328 = tpu.matmul %327, %326, %cst_158 {dimension_numbers = #tpu.dot_dimension_numbers<[1], [0], [0], [1], [0, 0, 1, 1], [], []>} : vector<8x64xbf16>, vector<64x64xbf16>, vector<8x64xf32> -> vector<8x64xf32>
    %329 = arith.addf %324, %328 : vector<8x64xf32>
    %c2_159 = arith.constant 2 : index
    %c0_160 = arith.constant 0 : index
    %c0_161 = arith.constant 0 : index
    %330 = vector.load %arg26[%c2_159, %c0_160, %c0_161] : memref<3x64x64xbf16, #tpu.memory_space<vmem>>, vector<1x64x64xbf16>
    %331 = vector.shape_cast %330 : vector<1x64x64xbf16> to vector<64x64xbf16>
    %c7_i32_162 = arith.constant 7 : i32
    %332 = tpu.dynamic_rotate %314 by %c7_i32_162 dim 0 : vector<8x64xf32>, i32 -> vector<8x64xf32>
    %cst_163 = arith.constant 0.000000e+00 : f32
    %333 = vector.broadcast %cst_163 : f32 to vector<8x64xf32>
    %334 = vector.shape_cast %5 : vector<8x1xi1> to vector<8x1xi1>
    %335 = vector.broadcast %334 : vector<8x1xi1> to vector<8x64xi1>
    %336 = arith.select %335, %332, %333 : vector<8x64xi1>, vector<8x64xf32>
    %337 = arith.truncf %336 : vector<8x64xf32> to vector<8x64xbf16>
    %cst_164 = arith.constant dense<0.000000e+00> : vector<8x64xf32>
    %338 = tpu.matmul %337, %331, %cst_164 {dimension_numbers = #tpu.dot_dimension_numbers<[1], [0], [0], [1], [0, 0, 1, 1], [], []>} : vector<8x64xbf16>, vector<64x64xbf16>, vector<8x64xf32> -> vector<8x64xf32>
    %339 = arith.addf %329, %338 : vector<8x64xf32>
    %340 = vector.broadcast %315 : vector<1x64xf32> to vector<8x64xf32>
    %341 = arith.addf %339, %340 : vector<8x64xf32>
    %c0_165 = arith.constant 0 : index
    %c0_166 = arith.constant 0 : index
    %342 = vector.load %arg22[%c0_165, %c0_166] : memref<1x64xf32, #tpu.memory_space<vmem>>, vector<1x64xf32>
    %c0_167 = arith.constant 0 : index
    %c0_168 = arith.constant 0 : index
    %343 = vector.load %arg20[%c0_167, %c0_168] : memref<1x64xf32, #tpu.memory_space<vmem>>, vector<1x64xf32>
    %cst_169 = arith.constant dense<0.000000e+00> : vector<64xf32>
    %344 = vector.multi_reduction <add>, %341, %cst_169 [0] : vector<8x64xf32> to vector<64xf32>
    %345 = vector.shape_cast %344 : vector<64xf32> to vector<1x64xf32>
    %346 = arith.mulf %341, %341 : vector<8x64xf32>
    %cst_170 = arith.constant dense<0.000000e+00> : vector<64xf32>
    %347 = vector.multi_reduction <add>, %346, %cst_170 [0] : vector<8x64xf32> to vector<64xf32>
    %348 = vector.shape_cast %347 : vector<64xf32> to vector<1x64xf32>
    %cst_171 = arith.constant dense<0.000000e+00> : vector<1x64xf32>
    %349 = tpu.matmul %345, %0, %cst_171 {dimension_numbers = #tpu.dot_dimension_numbers<[1], [0], [0], [1], [0, 0, 1, 1], [], []>} : vector<1x64xf32>, vector<64x64xf32>, vector<1x64xf32> -> vector<1x64xf32>
    %cst_172 = arith.constant 1.562500e-02 : f32
    %350 = vector.broadcast %cst_172 : f32 to vector<1x64xf32>
    %351 = arith.mulf %349, %350 : vector<1x64xf32>
    %cst_173 = arith.constant dense<0.000000e+00> : vector<1x64xf32>
    %352 = tpu.matmul %348, %0, %cst_173 {dimension_numbers = #tpu.dot_dimension_numbers<[1], [0], [0], [1], [0, 0, 1, 1], [], []>} : vector<1x64xf32>, vector<64x64xf32>, vector<1x64xf32> -> vector<1x64xf32>
    %cst_174 = arith.constant 1.562500e-02 : f32
    %353 = vector.broadcast %cst_174 : f32 to vector<1x64xf32>
    %354 = arith.mulf %352, %353 : vector<1x64xf32>
    %355 = arith.mulf %351, %351 : vector<1x64xf32>
    %356 = arith.subf %354, %355 : vector<1x64xf32>
    %cst_175 = arith.constant 0.000000e+00 : f32
    %357 = vector.broadcast %cst_175 : f32 to vector<1x64xf32>
    %358 = arith.maximumf %356, %357 : vector<1x64xf32>
    %cst_176 = arith.constant 9.99999974E-6 : f32
    %359 = vector.broadcast %cst_176 : f32 to vector<1x64xf32>
    %360 = arith.addf %358, %359 : vector<1x64xf32>
    %361 = math.rsqrt %360 : vector<1x64xf32>
    %362 = vector.broadcast %351 : vector<1x64xf32> to vector<8x64xf32>
    %363 = arith.subf %341, %362 : vector<8x64xf32>
    %364 = vector.broadcast %361 : vector<1x64xf32> to vector<8x64xf32>
    %365 = arith.mulf %363, %364 : vector<8x64xf32>
    %366 = vector.broadcast %342 : vector<1x64xf32> to vector<8x64xf32>
    %367 = arith.mulf %365, %366 : vector<8x64xf32>
    %368 = vector.broadcast %343 : vector<1x64xf32> to vector<8x64xf32>
    %369 = arith.addf %367, %368 : vector<8x64xf32>
    %cst_177 = arith.constant 2.000000e+01 : f32
    %370 = vector.broadcast %cst_177 : f32 to vector<8x64xf32>
    %371 = arith.minimumf %369, %370 : vector<8x64xf32>
    %372 = math.exp %371 : vector<8x64xf32>
    %cst_178 = arith.constant 1.000000e+00 : f32
    %373 = vector.broadcast %cst_178 : f32 to vector<8x64xf32>
    %374 = arith.addf %373, %372 : vector<8x64xf32>
    %cst_179 = arith.constant 1.000000e+00 : f32
    %375 = vector.broadcast %cst_179 : f32 to vector<8x64xf32>
    %376 = arith.addf %375, %372 : vector<8x64xf32>
    %377 = arith.mulf %374, %376 : vector<8x64xf32>
    %cst_180 = arith.constant 1.000000e+00 : f32
    %378 = vector.broadcast %cst_180 : f32 to vector<8x64xf32>
    %379 = arith.subf %377, %378 : vector<8x64xf32>
    %380 = arith.mulf %369, %379 : vector<8x64xf32>
    %cst_181 = arith.constant 1.000000e+00 : f32
    %381 = vector.broadcast %cst_181 : f32 to vector<8x64xf32>
    %382 = arith.addf %377, %381 : vector<8x64xf32>
    %383 = tpu.reciprocal %382 {approx = true} : vector<8x64xf32> -> vector<8x64xf32>
    %384 = arith.mulf %380, %383 : vector<8x64xf32>
    %385 = arith.addf %384, %216 : vector<8x64xf32>
    %c0_182 = arith.constant 0 : index
    %c0_183 = arith.constant 0 : index
    %c0_184 = arith.constant 0 : index
    %386 = vector.load %arg29[%c0_182, %c0_183, %c0_184] : memref<1x8x64xf32, #tpu.memory_space<vmem>>, vector<1x8x64xf32>
    %387 = vector.shape_cast %386 : vector<1x8x64xf32> to vector<8x64xf32>
    %388 = vector.shape_cast %216 : vector<8x64xf32> to vector<1x8x64xf32>
    tpu.vector_store %arg29[%c0_182, %c0_183, %c0_184], %388 {strides = array<i32>} : memref<1x8x64xf32, #tpu.memory_space<vmem>>, vector<1x8x64xf32>,
    %c0_185 = arith.constant 0 : index
    %c0_186 = arith.constant 0 : index
    %c0_187 = arith.constant 0 : index
    %389 = vector.load %arg30[%c0_185, %c0_186, %c0_187] : memref<1x8x64xf32, #tpu.memory_space<vmem>>, vector<1x8x64xf32>
    %390 = vector.shape_cast %389 : vector<1x8x64xf32> to vector<8x64xf32>
    %391 = vector.shape_cast %385 : vector<8x64xf32> to vector<1x8x64xf32>
    tpu.vector_store %arg30[%c0_185, %c0_186, %c0_187], %391 {strides = array<i32>} : memref<1x8x64xf32, #tpu.memory_space<vmem>>, vector<1x8x64xf32>,
    %c0_188 = arith.constant 0 : index
    %c0_189 = arith.constant 0 : index
    %392 = vector.load %arg27[%c0_188, %c0_189] : memref<1x64xf32, #tpu.memory_space<vmem>>, vector<1x64xf32>
    %393 = arith.truncf %385 : vector<8x64xf32> to vector<8x64xbf16>
    %c1_i32_190 = arith.constant 1 : i32
    %394 = tpu.dynamic_rotate %385 by %c1_i32_190 dim 0 : vector<8x64xf32>, i32 -> vector<8x64xf32>
    %cst_191 = arith.constant 0.000000e+00 : f32
    %395 = vector.broadcast %cst_191 : f32 to vector<8x64xf32>
    %396 = vector.shape_cast %3 : vector<8x1xi1> to vector<8x1xi1>
    %397 = vector.broadcast %396 : vector<8x1xi1> to vector<8x64xi1>
    %398 = arith.select %397, %394, %395 : vector<8x64xi1>, vector<8x64xf32>
    %399 = arith.truncf %398 : vector<8x64xf32> to vector<8x64xbf16>
    %c7_i32_192 = arith.constant 7 : i32
    %400 = tpu.dynamic_rotate %385 by %c7_i32_192 dim 0 : vector<8x64xf32>, i32 -> vector<8x64xf32>
    %cst_193 = arith.constant 0.000000e+00 : f32
    %401 = vector.broadcast %cst_193 : f32 to vector<8x64xf32>
    %402 = vector.shape_cast %5 : vector<8x1xi1> to vector<8x1xi1>
    %403 = vector.broadcast %402 : vector<8x1xi1> to vector<8x64xi1>
    %404 = arith.select %403, %400, %401 : vector<8x64xi1>, vector<8x64xf32>
    %405 = arith.truncf %404 : vector<8x64xf32> to vector<8x64xbf16>
    %c1_194 = arith.constant 1 : index
    %c0_195 = arith.constant 0 : index
    %c0_196 = arith.constant 0 : index
    %406 = vector.load %arg28[%c1_194, %c0_195, %c0_196] : memref<4x64x64xbf16, #tpu.memory_space<vmem>>, vector<1x64x64xbf16>
    %407 = vector.shape_cast %406 : vector<1x64x64xbf16> to vector<64x64xbf16>
    %cst_197 = arith.constant dense<0.000000e+00> : vector<8x64xf32>
    %408 = tpu.matmul %393, %407, %cst_197 {dimension_numbers = #tpu.dot_dimension_numbers<[1], [0], [0], [1], [0, 0, 1, 1], [], []>} : vector<8x64xbf16>, vector<64x64xbf16>, vector<8x64xf32> -> vector<8x64xf32>
    %c3 = arith.constant 3 : index
    %c0_198 = arith.constant 0 : index
    %c0_199 = arith.constant 0 : index
    %409 = vector.load %arg28[%c3, %c0_198, %c0_199] : memref<4x64x64xbf16, #tpu.memory_space<vmem>>, vector<1x64x64xbf16>
    %410 = vector.shape_cast %409 : vector<1x64x64xbf16> to vector<64x64xbf16>
    %cst_200 = arith.constant dense<0.000000e+00> : vector<8x64xf32>
    %411 = tpu.matmul %399, %410, %cst_200 {dimension_numbers = #tpu.dot_dimension_numbers<[1], [0], [0], [1], [0, 0, 1, 1], [], []>} : vector<8x64xbf16>, vector<64x64xbf16>, vector<8x64xf32> -> vector<8x64xf32>
    %412 = arith.addf %408, %411 : vector<8x64xf32>
    %413 = vector.broadcast %392 : vector<1x64xf32> to vector<8x64xf32>
    %414 = arith.addf %412, %413 : vector<8x64xf32>
    %c0_201 = arith.constant 0 : index
    %c0_202 = arith.constant 0 : index
    %c0_203 = arith.constant 0 : index
    %415 = vector.load %arg28[%c0_201, %c0_202, %c0_203] : memref<4x64x64xbf16, #tpu.memory_space<vmem>>, vector<1x64x64xbf16>
    %416 = vector.shape_cast %415 : vector<1x64x64xbf16> to vector<64x64xbf16>
    %cst_204 = arith.constant dense<0.000000e+00> : vector<8x64xf32>
    %417 = tpu.matmul %405, %416, %cst_204 {dimension_numbers = #tpu.dot_dimension_numbers<[1], [0], [0], [1], [0, 0, 1, 1], [], []>} : vector<8x64xbf16>, vector<64x64xbf16>, vector<8x64xf32> -> vector<8x64xf32>
    %c2_205 = arith.constant 2 : index
    %c0_206 = arith.constant 0 : index
    %c0_207 = arith.constant 0 : index
    %418 = vector.load %arg28[%c2_205, %c0_206, %c0_207] : memref<4x64x64xbf16, #tpu.memory_space<vmem>>, vector<1x64x64xbf16>
    %419 = vector.shape_cast %418 : vector<1x64x64xbf16> to vector<64x64xbf16>
    %cst_208 = arith.constant dense<0.000000e+00> : vector<8x64xf32>
    %420 = tpu.matmul %393, %419, %cst_208 {dimension_numbers = #tpu.dot_dimension_numbers<[1], [0], [0], [1], [0, 0, 1, 1], [], []>} : vector<8x64xbf16>, vector<64x64xbf16>, vector<8x64xf32> -> vector<8x64xf32>
    %421 = arith.addf %417, %420 : vector<8x64xf32>
    %422 = vector.broadcast %392 : vector<1x64xf32> to vector<8x64xf32>
    %423 = arith.addf %421, %422 : vector<8x64xf32>
    %c0_209 = arith.constant 0 : index
    %c0_210 = arith.constant 0 : index
    %c0_211 = arith.constant 0 : index
    %424 = vector.load %arg31[%c0_209, %c0_210, %c0_211] : memref<1x8x64xf32, #tpu.memory_space<vmem>>, vector<1x8x64xf32>
    %425 = vector.shape_cast %424 : vector<1x8x64xf32> to vector<8x64xf32>
    %426 = vector.shape_cast %414 : vector<8x64xf32> to vector<1x8x64xf32>
    tpu.vector_store %arg31[%c0_209, %c0_210, %c0_211], %426 {strides = array<i32>} : memref<1x8x64xf32, #tpu.memory_space<vmem>>, vector<1x8x64xf32>,
    %c0_212 = arith.constant 0 : index
    %c0_213 = arith.constant 0 : index
    %c0_214 = arith.constant 0 : index
    %427 = vector.load %arg32[%c0_212, %c0_213, %c0_214] : memref<1x8x64xf32, #tpu.memory_space<vmem>>, vector<1x8x64xf32>
    %428 = vector.shape_cast %427 : vector<1x8x64xf32> to vector<8x64xf32>
    %429 = vector.shape_cast %423 : vector<8x64xf32> to vector<1x8x64xf32>
    tpu.vector_store %arg32[%c0_212, %c0_213, %c0_214], %429 {strides = array<i32>} : memref<1x8x64xf32, #tpu.memory_space<vmem>>, vector<1x8x64xf32>,
    return
  }
  func.func @transform_0(%arg0: i32) -> (i32, i32, i32) {
    %c0_i32 = arith.constant 0 : i32
    %c0_i32_0 = arith.constant 0 : i32
    %c0_i32_1 = arith.constant 0 : i32
    return %arg0, %c0_i32, %c0_i32_0 : i32, i32, i32
  }
  func.func @transform_1(%arg0: i32) -> (i32, i32, i32) {
    %c0_i32 = arith.constant 0 : i32
    %c0_i32_0 = arith.constant 0 : i32
    %c0_i32_1 = arith.constant 0 : i32
    return %arg0, %c0_i32, %c0_i32_0 : i32, i32, i32
  }
  func.func @transform_2(%arg0: i32) -> (i32, i32, i32) {
    %c0_i32 = arith.constant 0 : i32
    %c0_i32_0 = arith.constant 0 : i32
    %c0_i32_1 = arith.constant 0 : i32
    return %arg0, %c0_i32, %c0_i32_0 : i32, i32, i32
  }
  func.func @transform_3(%arg0: i32) -> (i32, i32) {
    %c0_i32 = arith.constant 0 : i32
    %c0_i32_0 = arith.constant 0 : i32
    %c0_i32_1 = arith.constant 0 : i32
    return %c0_i32, %c0_i32_0 : i32, i32
  }
  func.func @transform_4(%arg0: i32) -> (i32, i32) {
    %c0_i32 = arith.constant 0 : i32
    %c0_i32_0 = arith.constant 0 : i32
    %c0_i32_1 = arith.constant 0 : i32
    return %c0_i32, %c0_i32_0 : i32, i32
  }
  func.func @transform_5(%arg0: i32) -> (i32, i32) {
    %c0_i32 = arith.constant 0 : i32
    %c0_i32_0 = arith.constant 0 : i32
    %c0_i32_1 = arith.constant 0 : i32
    return %c0_i32, %c0_i32_0 : i32, i32
  }
  func.func @transform_6(%arg0: i32) -> (i32, i32) {
    %c0_i32 = arith.constant 0 : i32
    %c0_i32_0 = arith.constant 0 : i32
    %c0_i32_1 = arith.constant 0 : i32
    return %c0_i32, %c0_i32_0 : i32, i32
  }
  func.func @transform_7(%arg0: i32) -> (i32, i32) {
    %c0_i32 = arith.constant 0 : i32
    %c0_i32_0 = arith.constant 0 : i32
    %c0_i32_1 = arith.constant 0 : i32
    return %c0_i32, %c0_i32_0 : i32, i32
  }
  func.func @transform_8(%arg0: i32) -> (i32, i32) {
    %c0_i32 = arith.constant 0 : i32
    %c0_i32_0 = arith.constant 0 : i32
    %c0_i32_1 = arith.constant 0 : i32
    return %c0_i32, %c0_i32_0 : i32, i32
  }
  func.func @transform_9(%arg0: i32) -> (i32, i32) {
    %c0_i32 = arith.constant 0 : i32
    %c0_i32_0 = arith.constant 0 : i32
    %c0_i32_1 = arith.constant 0 : i32
    return %c0_i32, %c0_i32_0 : i32, i32
  }
  func.func @transform_10(%arg0: i32) -> (i32, i32) {
    %c0_i32 = arith.constant 0 : i32
    %c0_i32_0 = arith.constant 0 : i32
    %c0_i32_1 = arith.constant 0 : i32
    return %c0_i32, %c0_i32_0 : i32, i32
  }
  func.func @transform_11(%arg0: i32) -> (i32, i32) {
    %c0_i32 = arith.constant 0 : i32
    %c0_i32_0 = arith.constant 0 : i32
    %c0_i32_1 = arith.constant 0 : i32
    return %c0_i32, %c0_i32_0 : i32, i32
  }
  func.func @transform_12(%arg0: i32) -> (i32, i32) {
    %c0_i32 = arith.constant 0 : i32
    %c0_i32_0 = arith.constant 0 : i32
    %c0_i32_1 = arith.constant 0 : i32
    return %c0_i32, %c0_i32_0 : i32, i32
  }
  func.func @transform_13(%arg0: i32) -> (i32, i32) {
    %c0_i32 = arith.constant 0 : i32
    %c0_i32_0 = arith.constant 0 : i32
    %c0_i32_1 = arith.constant 0 : i32
    return %c0_i32, %c0_i32_0 : i32, i32
  }
  func.func @transform_14(%arg0: i32) -> (i32, i32, i32) {
    %c0_i32 = arith.constant 0 : i32
    %c0_i32_0 = arith.constant 0 : i32
    %c0_i32_1 = arith.constant 0 : i32
    %c0_i32_2 = arith.constant 0 : i32
    return %c0_i32, %c0_i32_0, %c0_i32_1 : i32, i32, i32
  }
  func.func @transform_15(%arg0: i32) -> (i32, i32, i32) {
    %c0_i32 = arith.constant 0 : i32
    %c0_i32_0 = arith.constant 0 : i32
    %c0_i32_1 = arith.constant 0 : i32
    %c0_i32_2 = arith.constant 0 : i32
    return %c0_i32, %c0_i32_0, %c0_i32_1 : i32, i32, i32
  }
  func.func @transform_16(%arg0: i32) -> (i32, i32) {
    %c0_i32 = arith.constant 0 : i32
    %c0_i32_0 = arith.constant 0 : i32
    %c0_i32_1 = arith.constant 0 : i32
    return %c0_i32, %c0_i32_0 : i32, i32
  }
  func.func @transform_17(%arg0: i32) -> (i32, i32) {
    %c0_i32 = arith.constant 0 : i32
    %c0_i32_0 = arith.constant 0 : i32
    %c0_i32_1 = arith.constant 0 : i32
    return %c0_i32, %c0_i32_0 : i32, i32
  }
  func.func @transform_18(%arg0: i32) -> (i32, i32) {
    %c0_i32 = arith.constant 0 : i32
    %c0_i32_0 = arith.constant 0 : i32
    %c0_i32_1 = arith.constant 0 : i32
    return %c0_i32, %c0_i32_0 : i32, i32
  }
  func.func @transform_19(%arg0: i32) -> (i32, i32) {
    %c0_i32 = arith.constant 0 : i32
    %c0_i32_0 = arith.constant 0 : i32
    %c0_i32_1 = arith.constant 0 : i32
    return %c0_i32, %c0_i32_0 : i32, i32
  }
  func.func @transform_20(%arg0: i32) -> (i32, i32) {
    %c0_i32 = arith.constant 0 : i32
    %c0_i32_0 = arith.constant 0 : i32
    %c0_i32_1 = arith.constant 0 : i32
    return %c0_i32, %c0_i32_0 : i32, i32
  }
  func.func @transform_21(%arg0: i32) -> (i32, i32) {
    %c0_i32 = arith.constant 0 : i32
    %c0_i32_0 = arith.constant 0 : i32
    %c0_i32_1 = arith.constant 0 : i32
    return %c0_i32, %c0_i32_0 : i32, i32
  }
  func.func @transform_22(%arg0: i32) -> (i32, i32) {
    %c0_i32 = arith.constant 0 : i32
    %c0_i32_0 = arith.constant 0 : i32
    %c0_i32_1 = arith.constant 0 : i32
    return %c0_i32, %c0_i32_0 : i32, i32
  }
  func.func @transform_23(%arg0: i32) -> (i32, i32) {
    %c0_i32 = arith.constant 0 : i32
    %c0_i32_0 = arith.constant 0 : i32
    %c0_i32_1 = arith.constant 0 : i32
    return %c0_i32, %c0_i32_0 : i32, i32
  }
  func.func @transform_24(%arg0: i32) -> (i32, i32, i32) {
    %c0_i32 = arith.constant 0 : i32
    %c0_i32_0 = arith.constant 0 : i32
    %c0_i32_1 = arith.constant 0 : i32
    %c0_i32_2 = arith.constant 0 : i32
    return %c0_i32, %c0_i32_0, %c0_i32_1 : i32, i32, i32
  }
  func.func @transform_25(%arg0: i32) -> (i32, i32, i32) {
    %c0_i32 = arith.constant 0 : i32
    %c0_i32_0 = arith.constant 0 : i32
    %c0_i32_1 = arith.constant 0 : i32
    %c0_i32_2 = arith.constant 0 : i32
    return %c0_i32, %c0_i32_0, %c0_i32_1 : i32, i32, i32
  }
  func.func @transform_26(%arg0: i32) -> (i32, i32) {
    %c0_i32 = arith.constant 0 : i32
    %c0_i32_0 = arith.constant 0 : i32
    %c0_i32_1 = arith.constant 0 : i32
    return %c0_i32, %c0_i32_0 : i32, i32
  }
  func.func @transform_27(%arg0: i32) -> (i32, i32, i32) {
    %c0_i32 = arith.constant 0 : i32
    %c0_i32_0 = arith.constant 0 : i32
    %c0_i32_1 = arith.constant 0 : i32
    %c0_i32_2 = arith.constant 0 : i32
    return %c0_i32, %c0_i32_0, %c0_i32_1 : i32, i32, i32
  }
  func.func @transform_28(%arg0: i32) -> (i32, i32, i32) {
    %c0_i32 = arith.constant 0 : i32
    %c0_i32_0 = arith.constant 0 : i32
    %c0_i32_1 = arith.constant 0 : i32
    return %arg0, %c0_i32, %c0_i32_0 : i32, i32, i32
  }
  func.func @transform_29(%arg0: i32) -> (i32, i32, i32) {
    %c0_i32 = arith.constant 0 : i32
    %c0_i32_0 = arith.constant 0 : i32
    %c0_i32_1 = arith.constant 0 : i32
    return %arg0, %c0_i32, %c0_i32_0 : i32, i32, i32
  }
  func.func @transform_30(%arg0: i32) -> (i32, i32, i32) {
    %c0_i32 = arith.constant 0 : i32
    %c0_i32_0 = arith.constant 0 : i32
    %c0_i32_1 = arith.constant 0 : i32
    return %arg0, %c0_i32, %c0_i32_0 : i32, i32, i32
  }
  func.func @transform_31(%arg0: i32) -> (i32, i32, i32) {
    %c0_i32 = arith.constant 0 : i32
    %c0_i32_0 = arith.constant 0 : i32
    %c0_i32_1 = arith.constant 0 : i32
    return %arg0, %c0_i32, %c0_i32_0 : i32, i32, i32
  }
}

module attributes {stable_mosaic.version = 11 : i64} {
  func.func @_two_rtb_level_kernel(%arg0: i32, %arg1: memref<1x8x64xf32, #tpu.memory_space<vmem>>, %arg2: memref<1x1x32xf32, #tpu.memory_space<vmem>>, %arg3: memref<64x64xf32, #tpu.memory_space<vmem>>, %arg4: memref<1x64xf32, #tpu.memory_space<vmem>>, %arg5: memref<1x64xf32, #tpu.memory_space<vmem>>, %arg6: memref<1x64xf32, #tpu.memory_space<vmem>>, %arg7: memref<1x64xf32, #tpu.memory_space<vmem>>, %arg8: memref<1x64xf32, #tpu.memory_space<vmem>>, %arg9: memref<1x64xf32, #tpu.memory_space<vmem>>, %arg10: memref<1x128xf32, #tpu.memory_space<vmem>>, %arg11: memref<32x128xbf16, #tpu.memory_space<vmem>>, %arg12: memref<3x64x64xbf16, #tpu.memory_space<vmem>>, %arg13: memref<3x64x64xbf16, #tpu.memory_space<vmem>>, %arg14: memref<1x64xf32, #tpu.memory_space<vmem>>, %arg15: memref<1x64xf32, #tpu.memory_space<vmem>>, %arg16: memref<1x64xf32, #tpu.memory_space<vmem>>, %arg17: memref<1x64xf32, #tpu.memory_space<vmem>>, %arg18: memref<1x64xf32, #tpu.memory_space<vmem>>, %arg19: memref<1x64xf32, #tpu.memory_space<vmem>>, %arg20: memref<1x128xf32, #tpu.memory_space<vmem>>, %arg21: memref<32x128xbf16, #tpu.memory_space<vmem>>, %arg22: memref<3x64x64xbf16, #tpu.memory_space<vmem>>, %arg23: memref<3x64x64xbf16, #tpu.memory_space<vmem>>, %arg24: memref<1x8x64xf32, #tpu.memory_space<vmem>>, %arg25: memref<1x8x64xf32, #tpu.memory_space<vmem>>) attributes {dimension_semantics = [#tpu.dimension_semantics<parallel>], iteration_bounds = array<i64: 2>, scalar_prefetch = 0 : i64, scratch_operands = 0 : i64, tpu.core_type = #tpu.core_type<tc>, window_params = [{transform_indices = @transform_0, window_bounds = array<i64: 1, 8, 64>}, {transform_indices = @transform_1, window_bounds = array<i64: 1, 1, 32>}, {pipeline_mode = #tpu.pipeline_mode<synchronous>, transform_indices = @transform_2, window_bounds = array<i64: 64, 64>}, {pipeline_mode = #tpu.pipeline_mode<synchronous>, transform_indices = @transform_3, window_bounds = array<i64: 1, 64>}, {pipeline_mode = #tpu.pipeline_mode<synchronous>, transform_indices = @transform_4, window_bounds = array<i64: 1, 64>}, {pipeline_mode = #tpu.pipeline_mode<synchronous>, transform_indices = @transform_5, window_bounds = array<i64: 1, 64>}, {pipeline_mode = #tpu.pipeline_mode<synchronous>, transform_indices = @transform_6, window_bounds = array<i64: 1, 64>}, {pipeline_mode = #tpu.pipeline_mode<synchronous>, transform_indices = @transform_7, window_bounds = array<i64: 1, 64>}, {pipeline_mode = #tpu.pipeline_mode<synchronous>, transform_indices = @transform_8, window_bounds = array<i64: 1, 64>}, {pipeline_mode = #tpu.pipeline_mode<synchronous>, transform_indices = @transform_9, window_bounds = array<i64: 1, 128>}, {pipeline_mode = #tpu.pipeline_mode<synchronous>, transform_indices = @transform_10, window_bounds = array<i64: 32, 128>}, {pipeline_mode = #tpu.pipeline_mode<synchronous>, transform_indices = @transform_11, window_bounds = array<i64: 3, 64, 64>}, {pipeline_mode = #tpu.pipeline_mode<synchronous>, transform_indices = @transform_12, window_bounds = array<i64: 3, 64, 64>}, {pipeline_mode = #tpu.pipeline_mode<synchronous>, transform_indices = @transform_13, window_bounds = array<i64: 1, 64>}, {pipeline_mode = #tpu.pipeline_mode<synchronous>, transform_indices = @transform_14, window_bounds = array<i64: 1, 64>}, {pipeline_mode = #tpu.pipeline_mode<synchronous>, transform_indices = @transform_15, window_bounds = array<i64: 1, 64>}, {pipeline_mode = #tpu.pipeline_mode<synchronous>, transform_indices = @transform_16, window_bounds = array<i64: 1, 64>}, {pipeline_mode = #tpu.pipeline_mode<synchronous>, transform_indices = @transform_17, window_bounds = array<i64: 1, 64>}, {pipeline_mode = #tpu.pipeline_mode<synchronous>, transform_indices = @transform_18, window_bounds = array<i64: 1, 64>}, {pipeline_mode = #tpu.pipeline_mode<synchronous>, transform_indices = @transform_19, window_bounds = array<i64: 1, 128>}, {pipeline_mode = #tpu.pipeline_mode<synchronous>, transform_indices = @transform_20, window_bounds = array<i64: 32, 128>}, {pipeline_mode = #tpu.pipeline_mode<synchronous>, transform_indices = @transform_21, window_bounds = array<i64: 3, 64, 64>}, {pipeline_mode = #tpu.pipeline_mode<synchronous>, transform_indices = @transform_22, window_bounds = array<i64: 3, 64, 64>}, {transform_indices = @transform_23, window_bounds = array<i64: 1, 8, 64>}, {transform_indices = @transform_24, window_bounds = array<i64: 1, 8, 64>}]} {
    %c0 = arith.constant 0 : index
    %c0_0 = arith.constant 0 : index
    %0 = vector.load %arg3[%c0, %c0_0] : memref<64x64xf32, #tpu.memory_space<vmem>>, vector<64x64xf32>
    %1 = tpu.iota {dimensions = array<i32: 0>} : vector<8x1xi32>
    %c1_i32 = arith.constant 1 : i32
    %2 = vector.broadcast %c1_i32 : i32 to vector<8x1xi32>
    %3 = arith.cmpi sge, %1, %2 : vector<8x1xi32>
    %c7_i32 = arith.constant 7 : i32
    %4 = vector.broadcast %c7_i32 : i32 to vector<8x1xi32>
    %5 = arith.cmpi slt, %1, %4 : vector<8x1xi32>
    %c0_1 = arith.constant 0 : index
    %c0_2 = arith.constant 0 : index
    %c0_3 = arith.constant 0 : index
    %6 = vector.load %arg1[%c0_1, %c0_2, %c0_3] : memref<1x8x64xf32, #tpu.memory_space<vmem>>, vector<1x8x64xf32>
    %7 = vector.shape_cast %6 : vector<1x8x64xf32> to vector<8x64xf32>
    %c0_4 = arith.constant 0 : index
    %c0_5 = arith.constant 0 : index
    %c0_6 = arith.constant 0 : index
    %8 = vector.load %arg2[%c0_4, %c0_5, %c0_6] : memref<1x1x32xf32, #tpu.memory_space<vmem>>, vector<1x1x32xf32>
    %9 = vector.shape_cast %8 : vector<1x1x32xf32> to vector<1x32xf32>
    %cst = arith.constant 2.000000e+01 : f32
    %10 = vector.broadcast %cst : f32 to vector<1x32xf32>
    %11 = arith.minimumf %9, %10 : vector<1x32xf32>
    %12 = math.exp %11 : vector<1x32xf32>
    %cst_7 = arith.constant 1.000000e+00 : f32
    %13 = vector.broadcast %cst_7 : f32 to vector<1x32xf32>
    %14 = arith.addf %13, %12 : vector<1x32xf32>
    %cst_8 = arith.constant 1.000000e+00 : f32
    %15 = vector.broadcast %cst_8 : f32 to vector<1x32xf32>
    %16 = arith.addf %15, %12 : vector<1x32xf32>
    %17 = arith.mulf %14, %16 : vector<1x32xf32>
    %cst_9 = arith.constant 1.000000e+00 : f32
    %18 = vector.broadcast %cst_9 : f32 to vector<1x32xf32>
    %19 = arith.subf %17, %18 : vector<1x32xf32>
    %20 = arith.mulf %9, %19 : vector<1x32xf32>
    %cst_10 = arith.constant 1.000000e+00 : f32
    %21 = vector.broadcast %cst_10 : f32 to vector<1x32xf32>
    %22 = arith.addf %17, %21 : vector<1x32xf32>
    %23 = tpu.reciprocal %22 {approx = true} : vector<1x32xf32> -> vector<1x32xf32>
    %24 = arith.mulf %20, %23 : vector<1x32xf32>
    %25 = arith.truncf %24 : vector<1x32xf32> to vector<1x32xbf16>
    %c0_11 = arith.constant 0 : index
    %c0_12 = arith.constant 0 : index
    %26 = vector.load %arg11[%c0_11, %c0_12] : memref<32x128xbf16, #tpu.memory_space<vmem>>, vector<32x128xbf16>
    %cst_13 = arith.constant dense<0.000000e+00> : vector<1x128xf32>
    %27 = tpu.matmul %25, %26, %cst_13 {dimension_numbers = #tpu.dot_dimension_numbers<[1], [0], [0], [1], [0, 0, 1, 1], [], []>} : vector<1x32xbf16>, vector<32x128xbf16>, vector<1x128xf32> -> vector<1x128xf32>
    %c0_14 = arith.constant 0 : index
    %c0_15 = arith.constant 0 : index
    %28 = vector.load %arg10[%c0_14, %c0_15] : memref<1x128xf32, #tpu.memory_space<vmem>>, vector<1x128xf32>
    %29 = arith.addf %27, %28 : vector<1x128xf32>
    %30 = vector.extract_strided_slice %29 {offsets = [0, 0], sizes = [1, 64], strides = [1, 1]} : vector<1x128xf32> to vector<1x64xf32>
    %31 = vector.extract_strided_slice %29 {offsets = [0, 64], sizes = [1, 64], strides = [1, 1]} : vector<1x128xf32> to vector<1x64xf32>
    %c0_16 = arith.constant 0 : index
    %c0_17 = arith.constant 0 : index
    %32 = vector.load %arg4[%c0_16, %c0_17] : memref<1x64xf32, #tpu.memory_space<vmem>>, vector<1x64xf32>
    %c0_18 = arith.constant 0 : index
    %c0_19 = arith.constant 0 : index
    %c0_20 = arith.constant 0 : index
    %33 = vector.load %arg12[%c0_18, %c0_19, %c0_20] : memref<3x64x64xbf16, #tpu.memory_space<vmem>>, vector<1x64x64xbf16>
    %34 = vector.shape_cast %33 : vector<1x64x64xbf16> to vector<64x64xbf16>
    %c1_i32_21 = arith.constant 1 : i32
    %35 = tpu.dynamic_rotate %7 by %c1_i32_21 dim 0 : vector<8x64xf32>, i32 -> vector<8x64xf32>
    %cst_22 = arith.constant 0.000000e+00 : f32
    %36 = vector.broadcast %cst_22 : f32 to vector<8x64xf32>
    %37 = vector.shape_cast %3 : vector<8x1xi1> to vector<8x1xi1>
    %38 = vector.broadcast %37 : vector<8x1xi1> to vector<8x64xi1>
    %39 = arith.select %38, %35, %36 : vector<8x64xi1>, vector<8x64xf32>
    %40 = arith.truncf %39 : vector<8x64xf32> to vector<8x64xbf16>
    %cst_23 = arith.constant dense<0.000000e+00> : vector<8x64xf32>
    %41 = tpu.matmul %40, %34, %cst_23 {dimension_numbers = #tpu.dot_dimension_numbers<[1], [0], [0], [1], [0, 0, 1, 1], [], []>} : vector<8x64xbf16>, vector<64x64xbf16>, vector<8x64xf32> -> vector<8x64xf32>
    %c1 = arith.constant 1 : index
    %c0_24 = arith.constant 0 : index
    %c0_25 = arith.constant 0 : index
    %42 = vector.load %arg12[%c1, %c0_24, %c0_25] : memref<3x64x64xbf16, #tpu.memory_space<vmem>>, vector<1x64x64xbf16>
    %43 = vector.shape_cast %42 : vector<1x64x64xbf16> to vector<64x64xbf16>
    %44 = arith.truncf %7 : vector<8x64xf32> to vector<8x64xbf16>
    %cst_26 = arith.constant dense<0.000000e+00> : vector<8x64xf32>
    %45 = tpu.matmul %44, %43, %cst_26 {dimension_numbers = #tpu.dot_dimension_numbers<[1], [0], [0], [1], [0, 0, 1, 1], [], []>} : vector<8x64xbf16>, vector<64x64xbf16>, vector<8x64xf32> -> vector<8x64xf32>
    %46 = arith.addf %41, %45 : vector<8x64xf32>
    %c2 = arith.constant 2 : index
    %c0_27 = arith.constant 0 : index
    %c0_28 = arith.constant 0 : index
    %47 = vector.load %arg12[%c2, %c0_27, %c0_28] : memref<3x64x64xbf16, #tpu.memory_space<vmem>>, vector<1x64x64xbf16>
    %48 = vector.shape_cast %47 : vector<1x64x64xbf16> to vector<64x64xbf16>
    %c7_i32_29 = arith.constant 7 : i32
    %49 = tpu.dynamic_rotate %7 by %c7_i32_29 dim 0 : vector<8x64xf32>, i32 -> vector<8x64xf32>
    %cst_30 = arith.constant 0.000000e+00 : f32
    %50 = vector.broadcast %cst_30 : f32 to vector<8x64xf32>
    %51 = vector.shape_cast %5 : vector<8x1xi1> to vector<8x1xi1>
    %52 = vector.broadcast %51 : vector<8x1xi1> to vector<8x64xi1>
    %53 = arith.select %52, %49, %50 : vector<8x64xi1>, vector<8x64xf32>
    %54 = arith.truncf %53 : vector<8x64xf32> to vector<8x64xbf16>
    %cst_31 = arith.constant dense<0.000000e+00> : vector<8x64xf32>
    %55 = tpu.matmul %54, %48, %cst_31 {dimension_numbers = #tpu.dot_dimension_numbers<[1], [0], [0], [1], [0, 0, 1, 1], [], []>} : vector<8x64xbf16>, vector<64x64xbf16>, vector<8x64xf32> -> vector<8x64xf32>
    %56 = arith.addf %46, %55 : vector<8x64xf32>
    %57 = vector.broadcast %32 : vector<1x64xf32> to vector<8x64xf32>
    %58 = arith.addf %56, %57 : vector<8x64xf32>
    %c0_32 = arith.constant 0 : index
    %c0_33 = arith.constant 0 : index
    %59 = vector.load %arg8[%c0_32, %c0_33] : memref<1x64xf32, #tpu.memory_space<vmem>>, vector<1x64xf32>
    %c0_34 = arith.constant 0 : index
    %c0_35 = arith.constant 0 : index
    %60 = vector.load %arg6[%c0_34, %c0_35] : memref<1x64xf32, #tpu.memory_space<vmem>>, vector<1x64xf32>
    %cst_36 = arith.constant dense<0.000000e+00> : vector<64xf32>
    %61 = vector.multi_reduction <add>, %58, %cst_36 [0] : vector<8x64xf32> to vector<64xf32>
    %62 = vector.shape_cast %61 : vector<64xf32> to vector<1x64xf32>
    %63 = arith.mulf %58, %58 : vector<8x64xf32>
    %cst_37 = arith.constant dense<0.000000e+00> : vector<64xf32>
    %64 = vector.multi_reduction <add>, %63, %cst_37 [0] : vector<8x64xf32> to vector<64xf32>
    %65 = vector.shape_cast %64 : vector<64xf32> to vector<1x64xf32>
    %cst_38 = arith.constant dense<0.000000e+00> : vector<1x64xf32>
    %66 = tpu.matmul %62, %0, %cst_38 {dimension_numbers = #tpu.dot_dimension_numbers<[1], [0], [0], [1], [0, 0, 1, 1], [], []>} : vector<1x64xf32>, vector<64x64xf32>, vector<1x64xf32> -> vector<1x64xf32>
    %cst_39 = arith.constant 1.562500e-02 : f32
    %67 = vector.broadcast %cst_39 : f32 to vector<1x64xf32>
    %68 = arith.mulf %66, %67 : vector<1x64xf32>
    %cst_40 = arith.constant dense<0.000000e+00> : vector<1x64xf32>
    %69 = tpu.matmul %65, %0, %cst_40 {dimension_numbers = #tpu.dot_dimension_numbers<[1], [0], [0], [1], [0, 0, 1, 1], [], []>} : vector<1x64xf32>, vector<64x64xf32>, vector<1x64xf32> -> vector<1x64xf32>
    %cst_41 = arith.constant 1.562500e-02 : f32
    %70 = vector.broadcast %cst_41 : f32 to vector<1x64xf32>
    %71 = arith.mulf %69, %70 : vector<1x64xf32>
    %72 = arith.mulf %68, %68 : vector<1x64xf32>
    %73 = arith.subf %71, %72 : vector<1x64xf32>
    %cst_42 = arith.constant 0.000000e+00 : f32
    %74 = vector.broadcast %cst_42 : f32 to vector<1x64xf32>
    %75 = arith.maximumf %73, %74 : vector<1x64xf32>
    %cst_43 = arith.constant 9.99999974E-6 : f32
    %76 = vector.broadcast %cst_43 : f32 to vector<1x64xf32>
    %77 = arith.addf %75, %76 : vector<1x64xf32>
    %78 = math.rsqrt %77 : vector<1x64xf32>
    %79 = vector.broadcast %68 : vector<1x64xf32> to vector<8x64xf32>
    %80 = arith.subf %58, %79 : vector<8x64xf32>
    %81 = vector.broadcast %78 : vector<1x64xf32> to vector<8x64xf32>
    %82 = arith.mulf %80, %81 : vector<8x64xf32>
    %83 = vector.broadcast %59 : vector<1x64xf32> to vector<8x64xf32>
    %84 = arith.mulf %82, %83 : vector<8x64xf32>
    %85 = vector.broadcast %60 : vector<1x64xf32> to vector<8x64xf32>
    %86 = arith.addf %84, %85 : vector<8x64xf32>
    %cst_44 = arith.constant 1.000000e+00 : f32
    %87 = vector.broadcast %cst_44 : f32 to vector<1x64xf32>
    %88 = arith.addf %87, %30 : vector<1x64xf32>
    %89 = vector.broadcast %88 : vector<1x64xf32> to vector<8x64xf32>
    %90 = arith.mulf %86, %89 : vector<8x64xf32>
    %91 = vector.broadcast %31 : vector<1x64xf32> to vector<8x64xf32>
    %92 = arith.addf %90, %91 : vector<8x64xf32>
    %cst_45 = arith.constant 2.000000e+01 : f32
    %93 = vector.broadcast %cst_45 : f32 to vector<8x64xf32>
    %94 = arith.minimumf %92, %93 : vector<8x64xf32>
    %95 = math.exp %94 : vector<8x64xf32>
    %cst_46 = arith.constant 1.000000e+00 : f32
    %96 = vector.broadcast %cst_46 : f32 to vector<8x64xf32>
    %97 = arith.addf %96, %95 : vector<8x64xf32>
    %cst_47 = arith.constant 1.000000e+00 : f32
    %98 = vector.broadcast %cst_47 : f32 to vector<8x64xf32>
    %99 = arith.addf %98, %95 : vector<8x64xf32>
    %100 = arith.mulf %97, %99 : vector<8x64xf32>
    %cst_48 = arith.constant 1.000000e+00 : f32
    %101 = vector.broadcast %cst_48 : f32 to vector<8x64xf32>
    %102 = arith.subf %100, %101 : vector<8x64xf32>
    %103 = arith.mulf %92, %102 : vector<8x64xf32>
    %cst_49 = arith.constant 1.000000e+00 : f32
    %104 = vector.broadcast %cst_49 : f32 to vector<8x64xf32>
    %105 = arith.addf %100, %104 : vector<8x64xf32>
    %106 = tpu.reciprocal %105 {approx = true} : vector<8x64xf32> -> vector<8x64xf32>
    %107 = arith.mulf %103, %106 : vector<8x64xf32>
    %c0_50 = arith.constant 0 : index
    %c0_51 = arith.constant 0 : index
    %108 = vector.load %arg5[%c0_50, %c0_51] : memref<1x64xf32, #tpu.memory_space<vmem>>, vector<1x64xf32>
    %c0_52 = arith.constant 0 : index
    %c0_53 = arith.constant 0 : index
    %c0_54 = arith.constant 0 : index
    %109 = vector.load %arg13[%c0_52, %c0_53, %c0_54] : memref<3x64x64xbf16, #tpu.memory_space<vmem>>, vector<1x64x64xbf16>
    %110 = vector.shape_cast %109 : vector<1x64x64xbf16> to vector<64x64xbf16>
    %c1_i32_55 = arith.constant 1 : i32
    %111 = tpu.dynamic_rotate %107 by %c1_i32_55 dim 0 : vector<8x64xf32>, i32 -> vector<8x64xf32>
    %cst_56 = arith.constant 0.000000e+00 : f32
    %112 = vector.broadcast %cst_56 : f32 to vector<8x64xf32>
    %113 = vector.shape_cast %3 : vector<8x1xi1> to vector<8x1xi1>
    %114 = vector.broadcast %113 : vector<8x1xi1> to vector<8x64xi1>
    %115 = arith.select %114, %111, %112 : vector<8x64xi1>, vector<8x64xf32>
    %116 = arith.truncf %115 : vector<8x64xf32> to vector<8x64xbf16>
    %cst_57 = arith.constant dense<0.000000e+00> : vector<8x64xf32>
    %117 = tpu.matmul %116, %110, %cst_57 {dimension_numbers = #tpu.dot_dimension_numbers<[1], [0], [0], [1], [0, 0, 1, 1], [], []>} : vector<8x64xbf16>, vector<64x64xbf16>, vector<8x64xf32> -> vector<8x64xf32>
    %c1_58 = arith.constant 1 : index
    %c0_59 = arith.constant 0 : index
    %c0_60 = arith.constant 0 : index
    %118 = vector.load %arg13[%c1_58, %c0_59, %c0_60] : memref<3x64x64xbf16, #tpu.memory_space<vmem>>, vector<1x64x64xbf16>
    %119 = vector.shape_cast %118 : vector<1x64x64xbf16> to vector<64x64xbf16>
    %120 = arith.truncf %107 : vector<8x64xf32> to vector<8x64xbf16>
    %cst_61 = arith.constant dense<0.000000e+00> : vector<8x64xf32>
    %121 = tpu.matmul %120, %119, %cst_61 {dimension_numbers = #tpu.dot_dimension_numbers<[1], [0], [0], [1], [0, 0, 1, 1], [], []>} : vector<8x64xbf16>, vector<64x64xbf16>, vector<8x64xf32> -> vector<8x64xf32>
    %122 = arith.addf %117, %121 : vector<8x64xf32>
    %c2_62 = arith.constant 2 : index
    %c0_63 = arith.constant 0 : index
    %c0_64 = arith.constant 0 : index
    %123 = vector.load %arg13[%c2_62, %c0_63, %c0_64] : memref<3x64x64xbf16, #tpu.memory_space<vmem>>, vector<1x64x64xbf16>
    %124 = vector.shape_cast %123 : vector<1x64x64xbf16> to vector<64x64xbf16>
    %c7_i32_65 = arith.constant 7 : i32
    %125 = tpu.dynamic_rotate %107 by %c7_i32_65 dim 0 : vector<8x64xf32>, i32 -> vector<8x64xf32>
    %cst_66 = arith.constant 0.000000e+00 : f32
    %126 = vector.broadcast %cst_66 : f32 to vector<8x64xf32>
    %127 = vector.shape_cast %5 : vector<8x1xi1> to vector<8x1xi1>
    %128 = vector.broadcast %127 : vector<8x1xi1> to vector<8x64xi1>
    %129 = arith.select %128, %125, %126 : vector<8x64xi1>, vector<8x64xf32>
    %130 = arith.truncf %129 : vector<8x64xf32> to vector<8x64xbf16>
    %cst_67 = arith.constant dense<0.000000e+00> : vector<8x64xf32>
    %131 = tpu.matmul %130, %124, %cst_67 {dimension_numbers = #tpu.dot_dimension_numbers<[1], [0], [0], [1], [0, 0, 1, 1], [], []>} : vector<8x64xbf16>, vector<64x64xbf16>, vector<8x64xf32> -> vector<8x64xf32>
    %132 = arith.addf %122, %131 : vector<8x64xf32>
    %133 = vector.broadcast %108 : vector<1x64xf32> to vector<8x64xf32>
    %134 = arith.addf %132, %133 : vector<8x64xf32>
    %c0_68 = arith.constant 0 : index
    %c0_69 = arith.constant 0 : index
    %135 = vector.load %arg9[%c0_68, %c0_69] : memref<1x64xf32, #tpu.memory_space<vmem>>, vector<1x64xf32>
    %c0_70 = arith.constant 0 : index
    %c0_71 = arith.constant 0 : index
    %136 = vector.load %arg7[%c0_70, %c0_71] : memref<1x64xf32, #tpu.memory_space<vmem>>, vector<1x64xf32>
    %cst_72 = arith.constant dense<0.000000e+00> : vector<64xf32>
    %137 = vector.multi_reduction <add>, %134, %cst_72 [0] : vector<8x64xf32> to vector<64xf32>
    %138 = vector.shape_cast %137 : vector<64xf32> to vector<1x64xf32>
    %139 = arith.mulf %134, %134 : vector<8x64xf32>
    %cst_73 = arith.constant dense<0.000000e+00> : vector<64xf32>
    %140 = vector.multi_reduction <add>, %139, %cst_73 [0] : vector<8x64xf32> to vector<64xf32>
    %141 = vector.shape_cast %140 : vector<64xf32> to vector<1x64xf32>
    %cst_74 = arith.constant dense<0.000000e+00> : vector<1x64xf32>
    %142 = tpu.matmul %138, %0, %cst_74 {dimension_numbers = #tpu.dot_dimension_numbers<[1], [0], [0], [1], [0, 0, 1, 1], [], []>} : vector<1x64xf32>, vector<64x64xf32>, vector<1x64xf32> -> vector<1x64xf32>
    %cst_75 = arith.constant 1.562500e-02 : f32
    %143 = vector.broadcast %cst_75 : f32 to vector<1x64xf32>
    %144 = arith.mulf %142, %143 : vector<1x64xf32>
    %cst_76 = arith.constant dense<0.000000e+00> : vector<1x64xf32>
    %145 = tpu.matmul %141, %0, %cst_76 {dimension_numbers = #tpu.dot_dimension_numbers<[1], [0], [0], [1], [0, 0, 1, 1], [], []>} : vector<1x64xf32>, vector<64x64xf32>, vector<1x64xf32> -> vector<1x64xf32>
    %cst_77 = arith.constant 1.562500e-02 : f32
    %146 = vector.broadcast %cst_77 : f32 to vector<1x64xf32>
    %147 = arith.mulf %145, %146 : vector<1x64xf32>
    %148 = arith.mulf %144, %144 : vector<1x64xf32>
    %149 = arith.subf %147, %148 : vector<1x64xf32>
    %cst_78 = arith.constant 0.000000e+00 : f32
    %150 = vector.broadcast %cst_78 : f32 to vector<1x64xf32>
    %151 = arith.maximumf %149, %150 : vector<1x64xf32>
    %cst_79 = arith.constant 9.99999974E-6 : f32
    %152 = vector.broadcast %cst_79 : f32 to vector<1x64xf32>
    %153 = arith.addf %151, %152 : vector<1x64xf32>
    %154 = math.rsqrt %153 : vector<1x64xf32>
    %155 = vector.broadcast %144 : vector<1x64xf32> to vector<8x64xf32>
    %156 = arith.subf %134, %155 : vector<8x64xf32>
    %157 = vector.broadcast %154 : vector<1x64xf32> to vector<8x64xf32>
    %158 = arith.mulf %156, %157 : vector<8x64xf32>
    %159 = vector.broadcast %135 : vector<1x64xf32> to vector<8x64xf32>
    %160 = arith.mulf %158, %159 : vector<8x64xf32>
    %161 = vector.broadcast %136 : vector<1x64xf32> to vector<8x64xf32>
    %162 = arith.addf %160, %161 : vector<8x64xf32>
    %cst_80 = arith.constant 2.000000e+01 : f32
    %163 = vector.broadcast %cst_80 : f32 to vector<8x64xf32>
    %164 = arith.minimumf %162, %163 : vector<8x64xf32>
    %165 = math.exp %164 : vector<8x64xf32>
    %cst_81 = arith.constant 1.000000e+00 : f32
    %166 = vector.broadcast %cst_81 : f32 to vector<8x64xf32>
    %167 = arith.addf %166, %165 : vector<8x64xf32>
    %cst_82 = arith.constant 1.000000e+00 : f32
    %168 = vector.broadcast %cst_82 : f32 to vector<8x64xf32>
    %169 = arith.addf %168, %165 : vector<8x64xf32>
    %170 = arith.mulf %167, %169 : vector<8x64xf32>
    %cst_83 = arith.constant 1.000000e+00 : f32
    %171 = vector.broadcast %cst_83 : f32 to vector<8x64xf32>
    %172 = arith.subf %170, %171 : vector<8x64xf32>
    %173 = arith.mulf %162, %172 : vector<8x64xf32>
    %cst_84 = arith.constant 1.000000e+00 : f32
    %174 = vector.broadcast %cst_84 : f32 to vector<8x64xf32>
    %175 = arith.addf %170, %174 : vector<8x64xf32>
    %176 = tpu.reciprocal %175 {approx = true} : vector<8x64xf32> -> vector<8x64xf32>
    %177 = arith.mulf %173, %176 : vector<8x64xf32>
    %178 = arith.addf %177, %7 : vector<8x64xf32>
    %cst_85 = arith.constant 2.000000e+01 : f32
    %179 = vector.broadcast %cst_85 : f32 to vector<1x32xf32>
    %180 = arith.minimumf %9, %179 : vector<1x32xf32>
    %181 = math.exp %180 : vector<1x32xf32>
    %cst_86 = arith.constant 1.000000e+00 : f32
    %182 = vector.broadcast %cst_86 : f32 to vector<1x32xf32>
    %183 = arith.addf %182, %181 : vector<1x32xf32>
    %cst_87 = arith.constant 1.000000e+00 : f32
    %184 = vector.broadcast %cst_87 : f32 to vector<1x32xf32>
    %185 = arith.addf %184, %181 : vector<1x32xf32>
    %186 = arith.mulf %183, %185 : vector<1x32xf32>
    %cst_88 = arith.constant 1.000000e+00 : f32
    %187 = vector.broadcast %cst_88 : f32 to vector<1x32xf32>
    %188 = arith.subf %186, %187 : vector<1x32xf32>
    %189 = arith.mulf %9, %188 : vector<1x32xf32>
    %cst_89 = arith.constant 1.000000e+00 : f32
    %190 = vector.broadcast %cst_89 : f32 to vector<1x32xf32>
    %191 = arith.addf %186, %190 : vector<1x32xf32>
    %192 = tpu.reciprocal %191 {approx = true} : vector<1x32xf32> -> vector<1x32xf32>
    %193 = arith.mulf %189, %192 : vector<1x32xf32>
    %194 = arith.truncf %193 : vector<1x32xf32> to vector<1x32xbf16>
    %c0_90 = arith.constant 0 : index
    %c0_91 = arith.constant 0 : index
    %195 = vector.load %arg21[%c0_90, %c0_91] : memref<32x128xbf16, #tpu.memory_space<vmem>>, vector<32x128xbf16>
    %cst_92 = arith.constant dense<0.000000e+00> : vector<1x128xf32>
    %196 = tpu.matmul %194, %195, %cst_92 {dimension_numbers = #tpu.dot_dimension_numbers<[1], [0], [0], [1], [0, 0, 1, 1], [], []>} : vector<1x32xbf16>, vector<32x128xbf16>, vector<1x128xf32> -> vector<1x128xf32>
    %c0_93 = arith.constant 0 : index
    %c0_94 = arith.constant 0 : index
    %197 = vector.load %arg20[%c0_93, %c0_94] : memref<1x128xf32, #tpu.memory_space<vmem>>, vector<1x128xf32>
    %198 = arith.addf %196, %197 : vector<1x128xf32>
    %199 = vector.extract_strided_slice %198 {offsets = [0, 0], sizes = [1, 64], strides = [1, 1]} : vector<1x128xf32> to vector<1x64xf32>
    %200 = vector.extract_strided_slice %198 {offsets = [0, 64], sizes = [1, 64], strides = [1, 1]} : vector<1x128xf32> to vector<1x64xf32>
    %c0_95 = arith.constant 0 : index
    %c0_96 = arith.constant 0 : index
    %201 = vector.load %arg14[%c0_95, %c0_96] : memref<1x64xf32, #tpu.memory_space<vmem>>, vector<1x64xf32>
    %c0_97 = arith.constant 0 : index
    %c0_98 = arith.constant 0 : index
    %c0_99 = arith.constant 0 : index
    %202 = vector.load %arg22[%c0_97, %c0_98, %c0_99] : memref<3x64x64xbf16, #tpu.memory_space<vmem>>, vector<1x64x64xbf16>
    %203 = vector.shape_cast %202 : vector<1x64x64xbf16> to vector<64x64xbf16>
    %c1_i32_100 = arith.constant 1 : i32
    %204 = tpu.dynamic_rotate %178 by %c1_i32_100 dim 0 : vector<8x64xf32>, i32 -> vector<8x64xf32>
    %cst_101 = arith.constant 0.000000e+00 : f32
    %205 = vector.broadcast %cst_101 : f32 to vector<8x64xf32>
    %206 = vector.shape_cast %3 : vector<8x1xi1> to vector<8x1xi1>
    %207 = vector.broadcast %206 : vector<8x1xi1> to vector<8x64xi1>
    %208 = arith.select %207, %204, %205 : vector<8x64xi1>, vector<8x64xf32>
    %209 = arith.truncf %208 : vector<8x64xf32> to vector<8x64xbf16>
    %cst_102 = arith.constant dense<0.000000e+00> : vector<8x64xf32>
    %210 = tpu.matmul %209, %203, %cst_102 {dimension_numbers = #tpu.dot_dimension_numbers<[1], [0], [0], [1], [0, 0, 1, 1], [], []>} : vector<8x64xbf16>, vector<64x64xbf16>, vector<8x64xf32> -> vector<8x64xf32>
    %c1_103 = arith.constant 1 : index
    %c0_104 = arith.constant 0 : index
    %c0_105 = arith.constant 0 : index
    %211 = vector.load %arg22[%c1_103, %c0_104, %c0_105] : memref<3x64x64xbf16, #tpu.memory_space<vmem>>, vector<1x64x64xbf16>
    %212 = vector.shape_cast %211 : vector<1x64x64xbf16> to vector<64x64xbf16>
    %213 = arith.truncf %178 : vector<8x64xf32> to vector<8x64xbf16>
    %cst_106 = arith.constant dense<0.000000e+00> : vector<8x64xf32>
    %214 = tpu.matmul %213, %212, %cst_106 {dimension_numbers = #tpu.dot_dimension_numbers<[1], [0], [0], [1], [0, 0, 1, 1], [], []>} : vector<8x64xbf16>, vector<64x64xbf16>, vector<8x64xf32> -> vector<8x64xf32>
    %215 = arith.addf %210, %214 : vector<8x64xf32>
    %c2_107 = arith.constant 2 : index
    %c0_108 = arith.constant 0 : index
    %c0_109 = arith.constant 0 : index
    %216 = vector.load %arg22[%c2_107, %c0_108, %c0_109] : memref<3x64x64xbf16, #tpu.memory_space<vmem>>, vector<1x64x64xbf16>
    %217 = vector.shape_cast %216 : vector<1x64x64xbf16> to vector<64x64xbf16>
    %c7_i32_110 = arith.constant 7 : i32
    %218 = tpu.dynamic_rotate %178 by %c7_i32_110 dim 0 : vector<8x64xf32>, i32 -> vector<8x64xf32>
    %cst_111 = arith.constant 0.000000e+00 : f32
    %219 = vector.broadcast %cst_111 : f32 to vector<8x64xf32>
    %220 = vector.shape_cast %5 : vector<8x1xi1> to vector<8x1xi1>
    %221 = vector.broadcast %220 : vector<8x1xi1> to vector<8x64xi1>
    %222 = arith.select %221, %218, %219 : vector<8x64xi1>, vector<8x64xf32>
    %223 = arith.truncf %222 : vector<8x64xf32> to vector<8x64xbf16>
    %cst_112 = arith.constant dense<0.000000e+00> : vector<8x64xf32>
    %224 = tpu.matmul %223, %217, %cst_112 {dimension_numbers = #tpu.dot_dimension_numbers<[1], [0], [0], [1], [0, 0, 1, 1], [], []>} : vector<8x64xbf16>, vector<64x64xbf16>, vector<8x64xf32> -> vector<8x64xf32>
    %225 = arith.addf %215, %224 : vector<8x64xf32>
    %226 = vector.broadcast %201 : vector<1x64xf32> to vector<8x64xf32>
    %227 = arith.addf %225, %226 : vector<8x64xf32>
    %c0_113 = arith.constant 0 : index
    %c0_114 = arith.constant 0 : index
    %228 = vector.load %arg18[%c0_113, %c0_114] : memref<1x64xf32, #tpu.memory_space<vmem>>, vector<1x64xf32>
    %c0_115 = arith.constant 0 : index
    %c0_116 = arith.constant 0 : index
    %229 = vector.load %arg16[%c0_115, %c0_116] : memref<1x64xf32, #tpu.memory_space<vmem>>, vector<1x64xf32>
    %cst_117 = arith.constant dense<0.000000e+00> : vector<64xf32>
    %230 = vector.multi_reduction <add>, %227, %cst_117 [0] : vector<8x64xf32> to vector<64xf32>
    %231 = vector.shape_cast %230 : vector<64xf32> to vector<1x64xf32>
    %232 = arith.mulf %227, %227 : vector<8x64xf32>
    %cst_118 = arith.constant dense<0.000000e+00> : vector<64xf32>
    %233 = vector.multi_reduction <add>, %232, %cst_118 [0] : vector<8x64xf32> to vector<64xf32>
    %234 = vector.shape_cast %233 : vector<64xf32> to vector<1x64xf32>
    %cst_119 = arith.constant dense<0.000000e+00> : vector<1x64xf32>
    %235 = tpu.matmul %231, %0, %cst_119 {dimension_numbers = #tpu.dot_dimension_numbers<[1], [0], [0], [1], [0, 0, 1, 1], [], []>} : vector<1x64xf32>, vector<64x64xf32>, vector<1x64xf32> -> vector<1x64xf32>
    %cst_120 = arith.constant 1.562500e-02 : f32
    %236 = vector.broadcast %cst_120 : f32 to vector<1x64xf32>
    %237 = arith.mulf %235, %236 : vector<1x64xf32>
    %cst_121 = arith.constant dense<0.000000e+00> : vector<1x64xf32>
    %238 = tpu.matmul %234, %0, %cst_121 {dimension_numbers = #tpu.dot_dimension_numbers<[1], [0], [0], [1], [0, 0, 1, 1], [], []>} : vector<1x64xf32>, vector<64x64xf32>, vector<1x64xf32> -> vector<1x64xf32>
    %cst_122 = arith.constant 1.562500e-02 : f32
    %239 = vector.broadcast %cst_122 : f32 to vector<1x64xf32>
    %240 = arith.mulf %238, %239 : vector<1x64xf32>
    %241 = arith.mulf %237, %237 : vector<1x64xf32>
    %242 = arith.subf %240, %241 : vector<1x64xf32>
    %cst_123 = arith.constant 0.000000e+00 : f32
    %243 = vector.broadcast %cst_123 : f32 to vector<1x64xf32>
    %244 = arith.maximumf %242, %243 : vector<1x64xf32>
    %cst_124 = arith.constant 9.99999974E-6 : f32
    %245 = vector.broadcast %cst_124 : f32 to vector<1x64xf32>
    %246 = arith.addf %244, %245 : vector<1x64xf32>
    %247 = math.rsqrt %246 : vector<1x64xf32>
    %248 = vector.broadcast %237 : vector<1x64xf32> to vector<8x64xf32>
    %249 = arith.subf %227, %248 : vector<8x64xf32>
    %250 = vector.broadcast %247 : vector<1x64xf32> to vector<8x64xf32>
    %251 = arith.mulf %249, %250 : vector<8x64xf32>
    %252 = vector.broadcast %228 : vector<1x64xf32> to vector<8x64xf32>
    %253 = arith.mulf %251, %252 : vector<8x64xf32>
    %254 = vector.broadcast %229 : vector<1x64xf32> to vector<8x64xf32>
    %255 = arith.addf %253, %254 : vector<8x64xf32>
    %cst_125 = arith.constant 1.000000e+00 : f32
    %256 = vector.broadcast %cst_125 : f32 to vector<1x64xf32>
    %257 = arith.addf %256, %199 : vector<1x64xf32>
    %258 = vector.broadcast %257 : vector<1x64xf32> to vector<8x64xf32>
    %259 = arith.mulf %255, %258 : vector<8x64xf32>
    %260 = vector.broadcast %200 : vector<1x64xf32> to vector<8x64xf32>
    %261 = arith.addf %259, %260 : vector<8x64xf32>
    %cst_126 = arith.constant 2.000000e+01 : f32
    %262 = vector.broadcast %cst_126 : f32 to vector<8x64xf32>
    %263 = arith.minimumf %261, %262 : vector<8x64xf32>
    %264 = math.exp %263 : vector<8x64xf32>
    %cst_127 = arith.constant 1.000000e+00 : f32
    %265 = vector.broadcast %cst_127 : f32 to vector<8x64xf32>
    %266 = arith.addf %265, %264 : vector<8x64xf32>
    %cst_128 = arith.constant 1.000000e+00 : f32
    %267 = vector.broadcast %cst_128 : f32 to vector<8x64xf32>
    %268 = arith.addf %267, %264 : vector<8x64xf32>
    %269 = arith.mulf %266, %268 : vector<8x64xf32>
    %cst_129 = arith.constant 1.000000e+00 : f32
    %270 = vector.broadcast %cst_129 : f32 to vector<8x64xf32>
    %271 = arith.subf %269, %270 : vector<8x64xf32>
    %272 = arith.mulf %261, %271 : vector<8x64xf32>
    %cst_130 = arith.constant 1.000000e+00 : f32
    %273 = vector.broadcast %cst_130 : f32 to vector<8x64xf32>
    %274 = arith.addf %269, %273 : vector<8x64xf32>
    %275 = tpu.reciprocal %274 {approx = true} : vector<8x64xf32> -> vector<8x64xf32>
    %276 = arith.mulf %272, %275 : vector<8x64xf32>
    %c0_131 = arith.constant 0 : index
    %c0_132 = arith.constant 0 : index
    %277 = vector.load %arg15[%c0_131, %c0_132] : memref<1x64xf32, #tpu.memory_space<vmem>>, vector<1x64xf32>
    %c0_133 = arith.constant 0 : index
    %c0_134 = arith.constant 0 : index
    %c0_135 = arith.constant 0 : index
    %278 = vector.load %arg23[%c0_133, %c0_134, %c0_135] : memref<3x64x64xbf16, #tpu.memory_space<vmem>>, vector<1x64x64xbf16>
    %279 = vector.shape_cast %278 : vector<1x64x64xbf16> to vector<64x64xbf16>
    %c1_i32_136 = arith.constant 1 : i32
    %280 = tpu.dynamic_rotate %276 by %c1_i32_136 dim 0 : vector<8x64xf32>, i32 -> vector<8x64xf32>
    %cst_137 = arith.constant 0.000000e+00 : f32
    %281 = vector.broadcast %cst_137 : f32 to vector<8x64xf32>
    %282 = vector.shape_cast %3 : vector<8x1xi1> to vector<8x1xi1>
    %283 = vector.broadcast %282 : vector<8x1xi1> to vector<8x64xi1>
    %284 = arith.select %283, %280, %281 : vector<8x64xi1>, vector<8x64xf32>
    %285 = arith.truncf %284 : vector<8x64xf32> to vector<8x64xbf16>
    %cst_138 = arith.constant dense<0.000000e+00> : vector<8x64xf32>
    %286 = tpu.matmul %285, %279, %cst_138 {dimension_numbers = #tpu.dot_dimension_numbers<[1], [0], [0], [1], [0, 0, 1, 1], [], []>} : vector<8x64xbf16>, vector<64x64xbf16>, vector<8x64xf32> -> vector<8x64xf32>
    %c1_139 = arith.constant 1 : index
    %c0_140 = arith.constant 0 : index
    %c0_141 = arith.constant 0 : index
    %287 = vector.load %arg23[%c1_139, %c0_140, %c0_141] : memref<3x64x64xbf16, #tpu.memory_space<vmem>>, vector<1x64x64xbf16>
    %288 = vector.shape_cast %287 : vector<1x64x64xbf16> to vector<64x64xbf16>
    %289 = arith.truncf %276 : vector<8x64xf32> to vector<8x64xbf16>
    %cst_142 = arith.constant dense<0.000000e+00> : vector<8x64xf32>
    %290 = tpu.matmul %289, %288, %cst_142 {dimension_numbers = #tpu.dot_dimension_numbers<[1], [0], [0], [1], [0, 0, 1, 1], [], []>} : vector<8x64xbf16>, vector<64x64xbf16>, vector<8x64xf32> -> vector<8x64xf32>
    %291 = arith.addf %286, %290 : vector<8x64xf32>
    %c2_143 = arith.constant 2 : index
    %c0_144 = arith.constant 0 : index
    %c0_145 = arith.constant 0 : index
    %292 = vector.load %arg23[%c2_143, %c0_144, %c0_145] : memref<3x64x64xbf16, #tpu.memory_space<vmem>>, vector<1x64x64xbf16>
    %293 = vector.shape_cast %292 : vector<1x64x64xbf16> to vector<64x64xbf16>
    %c7_i32_146 = arith.constant 7 : i32
    %294 = tpu.dynamic_rotate %276 by %c7_i32_146 dim 0 : vector<8x64xf32>, i32 -> vector<8x64xf32>
    %cst_147 = arith.constant 0.000000e+00 : f32
    %295 = vector.broadcast %cst_147 : f32 to vector<8x64xf32>
    %296 = vector.shape_cast %5 : vector<8x1xi1> to vector<8x1xi1>
    %297 = vector.broadcast %296 : vector<8x1xi1> to vector<8x64xi1>
    %298 = arith.select %297, %294, %295 : vector<8x64xi1>, vector<8x64xf32>
    %299 = arith.truncf %298 : vector<8x64xf32> to vector<8x64xbf16>
    %cst_148 = arith.constant dense<0.000000e+00> : vector<8x64xf32>
    %300 = tpu.matmul %299, %293, %cst_148 {dimension_numbers = #tpu.dot_dimension_numbers<[1], [0], [0], [1], [0, 0, 1, 1], [], []>} : vector<8x64xbf16>, vector<64x64xbf16>, vector<8x64xf32> -> vector<8x64xf32>
    %301 = arith.addf %291, %300 : vector<8x64xf32>
    %302 = vector.broadcast %277 : vector<1x64xf32> to vector<8x64xf32>
    %303 = arith.addf %301, %302 : vector<8x64xf32>
    %c0_149 = arith.constant 0 : index
    %c0_150 = arith.constant 0 : index
    %304 = vector.load %arg19[%c0_149, %c0_150] : memref<1x64xf32, #tpu.memory_space<vmem>>, vector<1x64xf32>
    %c0_151 = arith.constant 0 : index
    %c0_152 = arith.constant 0 : index
    %305 = vector.load %arg17[%c0_151, %c0_152] : memref<1x64xf32, #tpu.memory_space<vmem>>, vector<1x64xf32>
    %cst_153 = arith.constant dense<0.000000e+00> : vector<64xf32>
    %306 = vector.multi_reduction <add>, %303, %cst_153 [0] : vector<8x64xf32> to vector<64xf32>
    %307 = vector.shape_cast %306 : vector<64xf32> to vector<1x64xf32>
    %308 = arith.mulf %303, %303 : vector<8x64xf32>
    %cst_154 = arith.constant dense<0.000000e+00> : vector<64xf32>
    %309 = vector.multi_reduction <add>, %308, %cst_154 [0] : vector<8x64xf32> to vector<64xf32>
    %310 = vector.shape_cast %309 : vector<64xf32> to vector<1x64xf32>
    %cst_155 = arith.constant dense<0.000000e+00> : vector<1x64xf32>
    %311 = tpu.matmul %307, %0, %cst_155 {dimension_numbers = #tpu.dot_dimension_numbers<[1], [0], [0], [1], [0, 0, 1, 1], [], []>} : vector<1x64xf32>, vector<64x64xf32>, vector<1x64xf32> -> vector<1x64xf32>
    %cst_156 = arith.constant 1.562500e-02 : f32
    %312 = vector.broadcast %cst_156 : f32 to vector<1x64xf32>
    %313 = arith.mulf %311, %312 : vector<1x64xf32>
    %cst_157 = arith.constant dense<0.000000e+00> : vector<1x64xf32>
    %314 = tpu.matmul %310, %0, %cst_157 {dimension_numbers = #tpu.dot_dimension_numbers<[1], [0], [0], [1], [0, 0, 1, 1], [], []>} : vector<1x64xf32>, vector<64x64xf32>, vector<1x64xf32> -> vector<1x64xf32>
    %cst_158 = arith.constant 1.562500e-02 : f32
    %315 = vector.broadcast %cst_158 : f32 to vector<1x64xf32>
    %316 = arith.mulf %314, %315 : vector<1x64xf32>
    %317 = arith.mulf %313, %313 : vector<1x64xf32>
    %318 = arith.subf %316, %317 : vector<1x64xf32>
    %cst_159 = arith.constant 0.000000e+00 : f32
    %319 = vector.broadcast %cst_159 : f32 to vector<1x64xf32>
    %320 = arith.maximumf %318, %319 : vector<1x64xf32>
    %cst_160 = arith.constant 9.99999974E-6 : f32
    %321 = vector.broadcast %cst_160 : f32 to vector<1x64xf32>
    %322 = arith.addf %320, %321 : vector<1x64xf32>
    %323 = math.rsqrt %322 : vector<1x64xf32>
    %324 = vector.broadcast %313 : vector<1x64xf32> to vector<8x64xf32>
    %325 = arith.subf %303, %324 : vector<8x64xf32>
    %326 = vector.broadcast %323 : vector<1x64xf32> to vector<8x64xf32>
    %327 = arith.mulf %325, %326 : vector<8x64xf32>
    %328 = vector.broadcast %304 : vector<1x64xf32> to vector<8x64xf32>
    %329 = arith.mulf %327, %328 : vector<8x64xf32>
    %330 = vector.broadcast %305 : vector<1x64xf32> to vector<8x64xf32>
    %331 = arith.addf %329, %330 : vector<8x64xf32>
    %cst_161 = arith.constant 2.000000e+01 : f32
    %332 = vector.broadcast %cst_161 : f32 to vector<8x64xf32>
    %333 = arith.minimumf %331, %332 : vector<8x64xf32>
    %334 = math.exp %333 : vector<8x64xf32>
    %cst_162 = arith.constant 1.000000e+00 : f32
    %335 = vector.broadcast %cst_162 : f32 to vector<8x64xf32>
    %336 = arith.addf %335, %334 : vector<8x64xf32>
    %cst_163 = arith.constant 1.000000e+00 : f32
    %337 = vector.broadcast %cst_163 : f32 to vector<8x64xf32>
    %338 = arith.addf %337, %334 : vector<8x64xf32>
    %339 = arith.mulf %336, %338 : vector<8x64xf32>
    %cst_164 = arith.constant 1.000000e+00 : f32
    %340 = vector.broadcast %cst_164 : f32 to vector<8x64xf32>
    %341 = arith.subf %339, %340 : vector<8x64xf32>
    %342 = arith.mulf %331, %341 : vector<8x64xf32>
    %cst_165 = arith.constant 1.000000e+00 : f32
    %343 = vector.broadcast %cst_165 : f32 to vector<8x64xf32>
    %344 = arith.addf %339, %343 : vector<8x64xf32>
    %345 = tpu.reciprocal %344 {approx = true} : vector<8x64xf32> -> vector<8x64xf32>
    %346 = arith.mulf %342, %345 : vector<8x64xf32>
    %347 = arith.addf %346, %178 : vector<8x64xf32>
    %c0_166 = arith.constant 0 : index
    %c0_167 = arith.constant 0 : index
    %c0_168 = arith.constant 0 : index
    %348 = vector.load %arg24[%c0_166, %c0_167, %c0_168] : memref<1x8x64xf32, #tpu.memory_space<vmem>>, vector<1x8x64xf32>
    %349 = vector.shape_cast %348 : vector<1x8x64xf32> to vector<8x64xf32>
    %350 = vector.shape_cast %178 : vector<8x64xf32> to vector<1x8x64xf32>
    tpu.vector_store %arg24[%c0_166, %c0_167, %c0_168], %350 {strides = array<i32>} : memref<1x8x64xf32, #tpu.memory_space<vmem>>, vector<1x8x64xf32>,
    %c0_169 = arith.constant 0 : index
    %c0_170 = arith.constant 0 : index
    %c0_171 = arith.constant 0 : index
    %351 = vector.load %arg25[%c0_169, %c0_170, %c0_171] : memref<1x8x64xf32, #tpu.memory_space<vmem>>, vector<1x8x64xf32>
    %352 = vector.shape_cast %351 : vector<1x8x64xf32> to vector<8x64xf32>
    %353 = vector.shape_cast %347 : vector<8x64xf32> to vector<1x8x64xf32>
    tpu.vector_store %arg25[%c0_169, %c0_170, %c0_171], %353 {strides = array<i32>} : memref<1x8x64xf32, #tpu.memory_space<vmem>>, vector<1x8x64xf32>,
    return
  }
  func.func @transform_0(%arg0: i32) -> (i32, i32, i32) {
    %c0_i32 = arith.constant 0 : i32
    %c0_i32_0 = arith.constant 0 : i32
    %c0_i32_1 = arith.constant 0 : i32
    return %arg0, %c0_i32, %c0_i32_0 : i32, i32, i32
  }
  func.func @transform_1(%arg0: i32) -> (i32, i32, i32) {
    %c0_i32 = arith.constant 0 : i32
    %c0_i32_0 = arith.constant 0 : i32
    %c0_i32_1 = arith.constant 0 : i32
    return %arg0, %c0_i32, %c0_i32_0 : i32, i32, i32
  }
  func.func @transform_2(%arg0: i32) -> (i32, i32) {
    %c0_i32 = arith.constant 0 : i32
    %c0_i32_0 = arith.constant 0 : i32
    %c0_i32_1 = arith.constant 0 : i32
    return %c0_i32, %c0_i32_0 : i32, i32
  }
  func.func @transform_3(%arg0: i32) -> (i32, i32) {
    %c0_i32 = arith.constant 0 : i32
    %c0_i32_0 = arith.constant 0 : i32
    %c0_i32_1 = arith.constant 0 : i32
    return %c0_i32, %c0_i32_0 : i32, i32
  }
  func.func @transform_4(%arg0: i32) -> (i32, i32) {
    %c0_i32 = arith.constant 0 : i32
    %c0_i32_0 = arith.constant 0 : i32
    %c0_i32_1 = arith.constant 0 : i32
    return %c0_i32, %c0_i32_0 : i32, i32
  }
  func.func @transform_5(%arg0: i32) -> (i32, i32) {
    %c0_i32 = arith.constant 0 : i32
    %c0_i32_0 = arith.constant 0 : i32
    %c0_i32_1 = arith.constant 0 : i32
    return %c0_i32, %c0_i32_0 : i32, i32
  }
  func.func @transform_6(%arg0: i32) -> (i32, i32) {
    %c0_i32 = arith.constant 0 : i32
    %c0_i32_0 = arith.constant 0 : i32
    %c0_i32_1 = arith.constant 0 : i32
    return %c0_i32, %c0_i32_0 : i32, i32
  }
  func.func @transform_7(%arg0: i32) -> (i32, i32) {
    %c0_i32 = arith.constant 0 : i32
    %c0_i32_0 = arith.constant 0 : i32
    %c0_i32_1 = arith.constant 0 : i32
    return %c0_i32, %c0_i32_0 : i32, i32
  }
  func.func @transform_8(%arg0: i32) -> (i32, i32) {
    %c0_i32 = arith.constant 0 : i32
    %c0_i32_0 = arith.constant 0 : i32
    %c0_i32_1 = arith.constant 0 : i32
    return %c0_i32, %c0_i32_0 : i32, i32
  }
  func.func @transform_9(%arg0: i32) -> (i32, i32) {
    %c0_i32 = arith.constant 0 : i32
    %c0_i32_0 = arith.constant 0 : i32
    %c0_i32_1 = arith.constant 0 : i32
    return %c0_i32, %c0_i32_0 : i32, i32
  }
  func.func @transform_10(%arg0: i32) -> (i32, i32) {
    %c0_i32 = arith.constant 0 : i32
    %c0_i32_0 = arith.constant 0 : i32
    %c0_i32_1 = arith.constant 0 : i32
    return %c0_i32, %c0_i32_0 : i32, i32
  }
  func.func @transform_11(%arg0: i32) -> (i32, i32, i32) {
    %c0_i32 = arith.constant 0 : i32
    %c0_i32_0 = arith.constant 0 : i32
    %c0_i32_1 = arith.constant 0 : i32
    %c0_i32_2 = arith.constant 0 : i32
    return %c0_i32, %c0_i32_0, %c0_i32_1 : i32, i32, i32
  }
  func.func @transform_12(%arg0: i32) -> (i32, i32, i32) {
    %c0_i32 = arith.constant 0 : i32
    %c0_i32_0 = arith.constant 0 : i32
    %c0_i32_1 = arith.constant 0 : i32
    %c0_i32_2 = arith.constant 0 : i32
    return %c0_i32, %c0_i32_0, %c0_i32_1 : i32, i32, i32
  }
  func.func @transform_13(%arg0: i32) -> (i32, i32) {
    %c0_i32 = arith.constant 0 : i32
    %c0_i32_0 = arith.constant 0 : i32
    %c0_i32_1 = arith.constant 0 : i32
    return %c0_i32, %c0_i32_0 : i32, i32
  }
  func.func @transform_14(%arg0: i32) -> (i32, i32) {
    %c0_i32 = arith.constant 0 : i32
    %c0_i32_0 = arith.constant 0 : i32
    %c0_i32_1 = arith.constant 0 : i32
    return %c0_i32, %c0_i32_0 : i32, i32
  }
  func.func @transform_15(%arg0: i32) -> (i32, i32) {
    %c0_i32 = arith.constant 0 : i32
    %c0_i32_0 = arith.constant 0 : i32
    %c0_i32_1 = arith.constant 0 : i32
    return %c0_i32, %c0_i32_0 : i32, i32
  }
  func.func @transform_16(%arg0: i32) -> (i32, i32) {
    %c0_i32 = arith.constant 0 : i32
    %c0_i32_0 = arith.constant 0 : i32
    %c0_i32_1 = arith.constant 0 : i32
    return %c0_i32, %c0_i32_0 : i32, i32
  }
  func.func @transform_17(%arg0: i32) -> (i32, i32) {
    %c0_i32 = arith.constant 0 : i32
    %c0_i32_0 = arith.constant 0 : i32
    %c0_i32_1 = arith.constant 0 : i32
    return %c0_i32, %c0_i32_0 : i32, i32
  }
  func.func @transform_18(%arg0: i32) -> (i32, i32) {
    %c0_i32 = arith.constant 0 : i32
    %c0_i32_0 = arith.constant 0 : i32
    %c0_i32_1 = arith.constant 0 : i32
    return %c0_i32, %c0_i32_0 : i32, i32
  }
  func.func @transform_19(%arg0: i32) -> (i32, i32) {
    %c0_i32 = arith.constant 0 : i32
    %c0_i32_0 = arith.constant 0 : i32
    %c0_i32_1 = arith.constant 0 : i32
    return %c0_i32, %c0_i32_0 : i32, i32
  }
  func.func @transform_20(%arg0: i32) -> (i32, i32) {
    %c0_i32 = arith.constant 0 : i32
    %c0_i32_0 = arith.constant 0 : i32
    %c0_i32_1 = arith.constant 0 : i32
    return %c0_i32, %c0_i32_0 : i32, i32
  }
  func.func @transform_21(%arg0: i32) -> (i32, i32, i32) {
    %c0_i32 = arith.constant 0 : i32
    %c0_i32_0 = arith.constant 0 : i32
    %c0_i32_1 = arith.constant 0 : i32
    %c0_i32_2 = arith.constant 0 : i32
    return %c0_i32, %c0_i32_0, %c0_i32_1 : i32, i32, i32
  }
  func.func @transform_22(%arg0: i32) -> (i32, i32, i32) {
    %c0_i32 = arith.constant 0 : i32
    %c0_i32_0 = arith.constant 0 : i32
    %c0_i32_1 = arith.constant 0 : i32
    %c0_i32_2 = arith.constant 0 : i32
    return %c0_i32, %c0_i32_0, %c0_i32_1 : i32, i32, i32
  }
  func.func @transform_23(%arg0: i32) -> (i32, i32, i32) {
    %c0_i32 = arith.constant 0 : i32
    %c0_i32_0 = arith.constant 0 : i32
    %c0_i32_1 = arith.constant 0 : i32
    return %arg0, %c0_i32, %c0_i32_0 : i32, i32, i32
  }
  func.func @transform_24(%arg0: i32) -> (i32, i32, i32) {
    %c0_i32 = arith.constant 0 : i32
    %c0_i32_0 = arith.constant 0 : i32
    %c0_i32_1 = arith.constant 0 : i32
    return %arg0, %c0_i32, %c0_i32_0 : i32, i32, i32
  }
}

module attributes {stable_mosaic.version = 11 : i64} {
  func.func @_final_kernel(%arg0: i32, %arg1: memref<1x16x64xf32, #tpu.memory_space<vmem>>, %arg2: memref<64x64xf32, #tpu.memory_space<vmem>>, %arg3: memref<1x64xf32, #tpu.memory_space<vmem>>, %arg4: memref<1x8xf32, #tpu.memory_space<vmem>>, %arg5: memref<1x64xf32, #tpu.memory_space<vmem>>, %arg6: memref<1x64xf32, #tpu.memory_space<vmem>>, %arg7: memref<5x64x64xbf16, #tpu.memory_space<vmem>>, %arg8: memref<64x8xbf16, #tpu.memory_space<vmem>>, %arg9: memref<1x16x8xf32, #tpu.memory_space<vmem>>) attributes {dimension_semantics = [#tpu.dimension_semantics<parallel>], iteration_bounds = array<i64: 2>, scalar_prefetch = 0 : i64, scratch_operands = 0 : i64, tpu.core_type = #tpu.core_type<tc>, window_params = [{transform_indices = @transform_0, window_bounds = array<i64: 1, 16, 64>}, {pipeline_mode = #tpu.pipeline_mode<synchronous>, transform_indices = @transform_1, window_bounds = array<i64: 64, 64>}, {pipeline_mode = #tpu.pipeline_mode<synchronous>, transform_indices = @transform_2, window_bounds = array<i64: 1, 64>}, {pipeline_mode = #tpu.pipeline_mode<synchronous>, transform_indices = @transform_3, window_bounds = array<i64: 1, 8>}, {pipeline_mode = #tpu.pipeline_mode<synchronous>, transform_indices = @transform_4, window_bounds = array<i64: 1, 64>}, {pipeline_mode = #tpu.pipeline_mode<synchronous>, transform_indices = @transform_5, window_bounds = array<i64: 1, 64>}, {pipeline_mode = #tpu.pipeline_mode<synchronous>, transform_indices = @transform_6, window_bounds = array<i64: 5, 64, 64>}, {pipeline_mode = #tpu.pipeline_mode<synchronous>, transform_indices = @transform_7, window_bounds = array<i64: 64, 8>}, {transform_indices = @transform_8, window_bounds = array<i64: 1, 16, 8>}]} {
    %c0 = arith.constant 0 : index
    %c0_0 = arith.constant 0 : index
    %0 = vector.load %arg2[%c0, %c0_0] : memref<64x64xf32, #tpu.memory_space<vmem>>, vector<64x64xf32>
    %c0_1 = arith.constant 0 : index
    %c0_2 = arith.constant 0 : index
    %c0_3 = arith.constant 0 : index
    %1 = vector.load %arg1[%c0_1, %c0_2, %c0_3] : memref<1x16x64xf32, #tpu.memory_space<vmem>>, vector<1x16x64xf32>
    %2 = vector.shape_cast %1 : vector<1x16x64xf32> to vector<16x64xf32>
    %3 = tpu.iota {dimensions = array<i32: 0>} : vector<16x1xi32>
    %c2_i32 = arith.constant 2 : i32
    %4 = vector.broadcast %c2_i32 : i32 to vector<16x1xi32>
    %5 = arith.cmpi sge, %3, %4 : vector<16x1xi32>
    %c1_i32 = arith.constant 1 : i32
    %6 = vector.broadcast %c1_i32 : i32 to vector<16x1xi32>
    %7 = arith.cmpi sge, %3, %6 : vector<16x1xi32>
    %c15_i32 = arith.constant 15 : i32
    %8 = vector.broadcast %c15_i32 : i32 to vector<16x1xi32>
    %9 = arith.cmpi slt, %3, %8 : vector<16x1xi32>
    %c14_i32 = arith.constant 14 : i32
    %10 = vector.broadcast %c14_i32 : i32 to vector<16x1xi32>
    %11 = arith.cmpi slt, %3, %10 : vector<16x1xi32>
    %c0_4 = arith.constant 0 : index
    %c0_5 = arith.constant 0 : index
    %12 = vector.load %arg3[%c0_4, %c0_5] : memref<1x64xf32, #tpu.memory_space<vmem>>, vector<1x64xf32>
    %c0_6 = arith.constant 0 : index
    %c0_7 = arith.constant 0 : index
    %c0_8 = arith.constant 0 : index
    %13 = vector.load %arg7[%c0_6, %c0_7, %c0_8] : memref<5x64x64xbf16, #tpu.memory_space<vmem>>, vector<1x64x64xbf16>
    %14 = vector.shape_cast %13 : vector<1x64x64xbf16> to vector<64x64xbf16>
    %c2_i32_9 = arith.constant 2 : i32
    %15 = tpu.dynamic_rotate %2 by %c2_i32_9 dim 0 : vector<16x64xf32>, i32 -> vector<16x64xf32>
    %cst = arith.constant 0.000000e+00 : f32
    %16 = vector.broadcast %cst : f32 to vector<16x64xf32>
    %17 = vector.shape_cast %5 : vector<16x1xi1> to vector<16x1xi1>
    %18 = vector.broadcast %17 : vector<16x1xi1> to vector<16x64xi1>
    %19 = arith.select %18, %15, %16 : vector<16x64xi1>, vector<16x64xf32>
    %20 = arith.truncf %19 : vector<16x64xf32> to vector<16x64xbf16>
    %cst_10 = arith.constant dense<0.000000e+00> : vector<16x64xf32>
    %21 = tpu.matmul %20, %14, %cst_10 {dimension_numbers = #tpu.dot_dimension_numbers<[1], [0], [0], [1], [0, 0, 1, 1], [], []>} : vector<16x64xbf16>, vector<64x64xbf16>, vector<16x64xf32> -> vector<16x64xf32>
    %c1 = arith.constant 1 : index
    %c0_11 = arith.constant 0 : index
    %c0_12 = arith.constant 0 : index
    %22 = vector.load %arg7[%c1, %c0_11, %c0_12] : memref<5x64x64xbf16, #tpu.memory_space<vmem>>, vector<1x64x64xbf16>
    %23 = vector.shape_cast %22 : vector<1x64x64xbf16> to vector<64x64xbf16>
    %c1_i32_13 = arith.constant 1 : i32
    %24 = tpu.dynamic_rotate %2 by %c1_i32_13 dim 0 : vector<16x64xf32>, i32 -> vector<16x64xf32>
    %cst_14 = arith.constant 0.000000e+00 : f32
    %25 = vector.broadcast %cst_14 : f32 to vector<16x64xf32>
    %26 = vector.shape_cast %7 : vector<16x1xi1> to vector<16x1xi1>
    %27 = vector.broadcast %26 : vector<16x1xi1> to vector<16x64xi1>
    %28 = arith.select %27, %24, %25 : vector<16x64xi1>, vector<16x64xf32>
    %29 = arith.truncf %28 : vector<16x64xf32> to vector<16x64xbf16>
    %cst_15 = arith.constant dense<0.000000e+00> : vector<16x64xf32>
    %30 = tpu.matmul %29, %23, %cst_15 {dimension_numbers = #tpu.dot_dimension_numbers<[1], [0], [0], [1], [0, 0, 1, 1], [], []>} : vector<16x64xbf16>, vector<64x64xbf16>, vector<16x64xf32> -> vector<16x64xf32>
    %31 = arith.addf %21, %30 : vector<16x64xf32>
    %c2 = arith.constant 2 : index
    %c0_16 = arith.constant 0 : index
    %c0_17 = arith.constant 0 : index
    %32 = vector.load %arg7[%c2, %c0_16, %c0_17] : memref<5x64x64xbf16, #tpu.memory_space<vmem>>, vector<1x64x64xbf16>
    %33 = vector.shape_cast %32 : vector<1x64x64xbf16> to vector<64x64xbf16>
    %34 = arith.truncf %2 : vector<16x64xf32> to vector<16x64xbf16>
    %cst_18 = arith.constant dense<0.000000e+00> : vector<16x64xf32>
    %35 = tpu.matmul %34, %33, %cst_18 {dimension_numbers = #tpu.dot_dimension_numbers<[1], [0], [0], [1], [0, 0, 1, 1], [], []>} : vector<16x64xbf16>, vector<64x64xbf16>, vector<16x64xf32> -> vector<16x64xf32>
    %36 = arith.addf %31, %35 : vector<16x64xf32>
    %c3 = arith.constant 3 : index
    %c0_19 = arith.constant 0 : index
    %c0_20 = arith.constant 0 : index
    %37 = vector.load %arg7[%c3, %c0_19, %c0_20] : memref<5x64x64xbf16, #tpu.memory_space<vmem>>, vector<1x64x64xbf16>
    %38 = vector.shape_cast %37 : vector<1x64x64xbf16> to vector<64x64xbf16>
    %c15_i32_21 = arith.constant 15 : i32
    %39 = tpu.dynamic_rotate %2 by %c15_i32_21 dim 0 : vector<16x64xf32>, i32 -> vector<16x64xf32>
    %cst_22 = arith.constant 0.000000e+00 : f32
    %40 = vector.broadcast %cst_22 : f32 to vector<16x64xf32>
    %41 = vector.shape_cast %9 : vector<16x1xi1> to vector<16x1xi1>
    %42 = vector.broadcast %41 : vector<16x1xi1> to vector<16x64xi1>
    %43 = arith.select %42, %39, %40 : vector<16x64xi1>, vector<16x64xf32>
    %44 = arith.truncf %43 : vector<16x64xf32> to vector<16x64xbf16>
    %cst_23 = arith.constant dense<0.000000e+00> : vector<16x64xf32>
    %45 = tpu.matmul %44, %38, %cst_23 {dimension_numbers = #tpu.dot_dimension_numbers<[1], [0], [0], [1], [0, 0, 1, 1], [], []>} : vector<16x64xbf16>, vector<64x64xbf16>, vector<16x64xf32> -> vector<16x64xf32>
    %46 = arith.addf %36, %45 : vector<16x64xf32>
    %c4 = arith.constant 4 : index
    %c0_24 = arith.constant 0 : index
    %c0_25 = arith.constant 0 : index
    %47 = vector.load %arg7[%c4, %c0_24, %c0_25] : memref<5x64x64xbf16, #tpu.memory_space<vmem>>, vector<1x64x64xbf16>
    %48 = vector.shape_cast %47 : vector<1x64x64xbf16> to vector<64x64xbf16>
    %c14_i32_26 = arith.constant 14 : i32
    %49 = tpu.dynamic_rotate %2 by %c14_i32_26 dim 0 : vector<16x64xf32>, i32 -> vector<16x64xf32>
    %cst_27 = arith.constant 0.000000e+00 : f32
    %50 = vector.broadcast %cst_27 : f32 to vector<16x64xf32>
    %51 = vector.shape_cast %11 : vector<16x1xi1> to vector<16x1xi1>
    %52 = vector.broadcast %51 : vector<16x1xi1> to vector<16x64xi1>
    %53 = arith.select %52, %49, %50 : vector<16x64xi1>, vector<16x64xf32>
    %54 = arith.truncf %53 : vector<16x64xf32> to vector<16x64xbf16>
    %cst_28 = arith.constant dense<0.000000e+00> : vector<16x64xf32>
    %55 = tpu.matmul %54, %48, %cst_28 {dimension_numbers = #tpu.dot_dimension_numbers<[1], [0], [0], [1], [0, 0, 1, 1], [], []>} : vector<16x64xbf16>, vector<64x64xbf16>, vector<16x64xf32> -> vector<16x64xf32>
    %56 = arith.addf %46, %55 : vector<16x64xf32>
    %57 = vector.broadcast %12 : vector<1x64xf32> to vector<16x64xf32>
    %58 = arith.addf %56, %57 : vector<16x64xf32>
    %c0_29 = arith.constant 0 : index
    %c0_30 = arith.constant 0 : index
    %59 = vector.load %arg6[%c0_29, %c0_30] : memref<1x64xf32, #tpu.memory_space<vmem>>, vector<1x64xf32>
    %c0_31 = arith.constant 0 : index
    %c0_32 = arith.constant 0 : index
    %60 = vector.load %arg5[%c0_31, %c0_32] : memref<1x64xf32, #tpu.memory_space<vmem>>, vector<1x64xf32>
    %cst_33 = arith.constant dense<0.000000e+00> : vector<64xf32>
    %61 = vector.multi_reduction <add>, %58, %cst_33 [0] : vector<16x64xf32> to vector<64xf32>
    %62 = vector.shape_cast %61 : vector<64xf32> to vector<1x64xf32>
    %63 = arith.mulf %58, %58 : vector<16x64xf32>
    %cst_34 = arith.constant dense<0.000000e+00> : vector<64xf32>
    %64 = vector.multi_reduction <add>, %63, %cst_34 [0] : vector<16x64xf32> to vector<64xf32>
    %65 = vector.shape_cast %64 : vector<64xf32> to vector<1x64xf32>
    %cst_35 = arith.constant dense<0.000000e+00> : vector<1x64xf32>
    %66 = tpu.matmul %62, %0, %cst_35 {dimension_numbers = #tpu.dot_dimension_numbers<[1], [0], [0], [1], [0, 0, 1, 1], [], []>} : vector<1x64xf32>, vector<64x64xf32>, vector<1x64xf32> -> vector<1x64xf32>
    %cst_36 = arith.constant 7.812500e-03 : f32
    %67 = vector.broadcast %cst_36 : f32 to vector<1x64xf32>
    %68 = arith.mulf %66, %67 : vector<1x64xf32>
    %cst_37 = arith.constant dense<0.000000e+00> : vector<1x64xf32>
    %69 = tpu.matmul %65, %0, %cst_37 {dimension_numbers = #tpu.dot_dimension_numbers<[1], [0], [0], [1], [0, 0, 1, 1], [], []>} : vector<1x64xf32>, vector<64x64xf32>, vector<1x64xf32> -> vector<1x64xf32>
    %cst_38 = arith.constant 7.812500e-03 : f32
    %70 = vector.broadcast %cst_38 : f32 to vector<1x64xf32>
    %71 = arith.mulf %69, %70 : vector<1x64xf32>
    %72 = arith.mulf %68, %68 : vector<1x64xf32>
    %73 = arith.subf %71, %72 : vector<1x64xf32>
    %cst_39 = arith.constant 0.000000e+00 : f32
    %74 = vector.broadcast %cst_39 : f32 to vector<1x64xf32>
    %75 = arith.maximumf %73, %74 : vector<1x64xf32>
    %cst_40 = arith.constant 9.99999974E-6 : f32
    %76 = vector.broadcast %cst_40 : f32 to vector<1x64xf32>
    %77 = arith.addf %75, %76 : vector<1x64xf32>
    %78 = math.rsqrt %77 : vector<1x64xf32>
    %79 = vector.broadcast %68 : vector<1x64xf32> to vector<16x64xf32>
    %80 = arith.subf %58, %79 : vector<16x64xf32>
    %81 = vector.broadcast %78 : vector<1x64xf32> to vector<16x64xf32>
    %82 = arith.mulf %80, %81 : vector<16x64xf32>
    %83 = vector.broadcast %59 : vector<1x64xf32> to vector<16x64xf32>
    %84 = arith.mulf %82, %83 : vector<16x64xf32>
    %85 = vector.broadcast %60 : vector<1x64xf32> to vector<16x64xf32>
    %86 = arith.addf %84, %85 : vector<16x64xf32>
    %cst_41 = arith.constant 2.000000e+01 : f32
    %87 = vector.broadcast %cst_41 : f32 to vector<16x64xf32>
    %88 = arith.minimumf %86, %87 : vector<16x64xf32>
    %89 = math.exp %88 : vector<16x64xf32>
    %cst_42 = arith.constant 1.000000e+00 : f32
    %90 = vector.broadcast %cst_42 : f32 to vector<16x64xf32>
    %91 = arith.addf %90, %89 : vector<16x64xf32>
    %cst_43 = arith.constant 1.000000e+00 : f32
    %92 = vector.broadcast %cst_43 : f32 to vector<16x64xf32>
    %93 = arith.addf %92, %89 : vector<16x64xf32>
    %94 = arith.mulf %91, %93 : vector<16x64xf32>
    %cst_44 = arith.constant 1.000000e+00 : f32
    %95 = vector.broadcast %cst_44 : f32 to vector<16x64xf32>
    %96 = arith.subf %94, %95 : vector<16x64xf32>
    %97 = arith.mulf %86, %96 : vector<16x64xf32>
    %cst_45 = arith.constant 1.000000e+00 : f32
    %98 = vector.broadcast %cst_45 : f32 to vector<16x64xf32>
    %99 = arith.addf %94, %98 : vector<16x64xf32>
    %100 = tpu.reciprocal %99 {approx = true} : vector<16x64xf32> -> vector<16x64xf32>
    %101 = arith.mulf %97, %100 : vector<16x64xf32>
    %102 = arith.truncf %101 : vector<16x64xf32> to vector<16x64xbf16>
    %c0_46 = arith.constant 0 : index
    %c0_47 = arith.constant 0 : index
    %103 = vector.load %arg8[%c0_46, %c0_47] : memref<64x8xbf16, #tpu.memory_space<vmem>>, vector<64x8xbf16>
    %cst_48 = arith.constant dense<0.000000e+00> : vector<16x8xf32>
    %104 = tpu.matmul %102, %103, %cst_48 {dimension_numbers = #tpu.dot_dimension_numbers<[1], [0], [0], [1], [0, 0, 1, 1], [], []>} : vector<16x64xbf16>, vector<64x8xbf16>, vector<16x8xf32> -> vector<16x8xf32>
    %c0_49 = arith.constant 0 : index
    %c0_50 = arith.constant 0 : index
    %105 = vector.load %arg4[%c0_49, %c0_50] : memref<1x8xf32, #tpu.memory_space<vmem>>, vector<1x8xf32>
    %106 = vector.broadcast %105 : vector<1x8xf32> to vector<16x8xf32>
    %107 = arith.addf %104, %106 : vector<16x8xf32>
    %c0_51 = arith.constant 0 : index
    %c0_52 = arith.constant 0 : index
    %c0_53 = arith.constant 0 : index
    %108 = vector.load %arg9[%c0_51, %c0_52, %c0_53] : memref<1x16x8xf32, #tpu.memory_space<vmem>>, vector<1x16x8xf32>
    %109 = vector.shape_cast %108 : vector<1x16x8xf32> to vector<16x8xf32>
    %110 = vector.shape_cast %107 : vector<16x8xf32> to vector<1x16x8xf32>
    tpu.vector_store %arg9[%c0_51, %c0_52, %c0_53], %110 {strides = array<i32>} : memref<1x16x8xf32, #tpu.memory_space<vmem>>, vector<1x16x8xf32>,
    return
  }
  func.func @transform_0(%arg0: i32) -> (i32, i32, i32) {
    %c0_i32 = arith.constant 0 : i32
    %c0_i32_0 = arith.constant 0 : i32
    %c0_i32_1 = arith.constant 0 : i32
    return %arg0, %c0_i32, %c0_i32_0 : i32, i32, i32
  }
  func.func @transform_1(%arg0: i32) -> (i32, i32) {
    %c0_i32 = arith.constant 0 : i32
    %c0_i32_0 = arith.constant 0 : i32
    %c0_i32_1 = arith.constant 0 : i32
    return %c0_i32, %c0_i32_0 : i32, i32
  }
  func.func @transform_2(%arg0: i32) -> (i32, i32) {
    %c0_i32 = arith.constant 0 : i32
    %c0_i32_0 = arith.constant 0 : i32
    %c0_i32_1 = arith.constant 0 : i32
    return %c0_i32, %c0_i32_0 : i32, i32
  }
  func.func @transform_3(%arg0: i32) -> (i32, i32) {
    %c0_i32 = arith.constant 0 : i32
    %c0_i32_0 = arith.constant 0 : i32
    %c0_i32_1 = arith.constant 0 : i32
    return %c0_i32, %c0_i32_0 : i32, i32
  }
  func.func @transform_4(%arg0: i32) -> (i32, i32) {
    %c0_i32 = arith.constant 0 : i32
    %c0_i32_0 = arith.constant 0 : i32
    %c0_i32_1 = arith.constant 0 : i32
    return %c0_i32, %c0_i32_0 : i32, i32
  }
  func.func @transform_5(%arg0: i32) -> (i32, i32) {
    %c0_i32 = arith.constant 0 : i32
    %c0_i32_0 = arith.constant 0 : i32
    %c0_i32_1 = arith.constant 0 : i32
    return %c0_i32, %c0_i32_0 : i32, i32
  }
  func.func @transform_6(%arg0: i32) -> (i32, i32, i32) {
    %c0_i32 = arith.constant 0 : i32
    %c0_i32_0 = arith.constant 0 : i32
    %c0_i32_1 = arith.constant 0 : i32
    %c0_i32_2 = arith.constant 0 : i32
    return %c0_i32, %c0_i32_0, %c0_i32_1 : i32, i32, i32
  }
  func.func @transform_7(%arg0: i32) -> (i32, i32) {
    %c0_i32 = arith.constant 0 : i32
    %c0_i32_0 = arith.constant 0 : i32
    %c0_i32_1 = arith.constant 0 : i32
    return %c0_i32, %c0_i32_0 : i32, i32
  }
  func.func @transform_8(%arg0: i32) -> (i32, i32, i32) {
    %c0_i32 = arith.constant 0 : i32
    %c0_i32_0 = arith.constant 0 : i32
    %c0_i32_1 = arith.constant 0 : i32
    return %arg0, %c0_i32, %c0_i32_0 : i32, i32, i32
  }
}

</mosaic_0001>

<bundles_post_ra>
// kernel: temporal_control_unet_forward.6
= control target key start
LH: loop header
LB: loop body
LE: loop exit
PB: predicated region body
PF: predicated region fallthrough
CT: control target
= control target key end

     0   :  { %10 = vsyncpa [#allocation3], 0  ;;  %s459_s0 = inlined_call_operand.hbm [shape: f32[2,16], index: 0, kind: input, shape index: {}]   ;;  %s460_s1 = inlined_call_operand.hbm [shape: bf16[16,128], index: 1, kind: input, shape index: {}]   ;;  %s461_s2 = inlined_call_operand.vmem [shape: f32[1,128], index: 2, kind: input, shape index: {}]   ;;  %s462_s3 = inlined_call_operand.vmem [shape: bf16[128,32], index: 3, kind: input, shape index: {}]   ;;  %s463_s4 = inlined_call_operand.hbm [shape: f32[1,32], index: 4, kind: input, shape index: {}]   ;;  %s464_s5 = inlined_call_operand.vmem [shape: f32[2,32], index: 5, kind: output, shape index: {}]  }
   0x1   :  { %11 = vsyncpa [#allocation5], 0  ;;  %s383_s18 = smov [#allocation4]  }
   0x2   :  { %s27_s19 = sshll.u32 %s383_s18, 4  ;;  %s28_s19 = int_to_ptr.vmem [resolvable:$true] %s27_s19 }
   0x3   :  { %s327_s20 = scalar_lea.vmem %s28_s19, 128  ;;  %p332_p1 = scmp.lt.s32.totalorder %s28_s19, %s28_s19 }
   0x4   :  { %p328_p0 = scmp.ne.s32.totalorder %s28_s19, %s327_s20  ;;  %p333_p2 = scmp.lt.s32.totalorder %s327_s20, %s327_s20 }
   0x6   :  { %p334_p3 = por %p333_p2, %p332_p1 }
   0x8   :  { %p335_p4 = pnand %p334_p3, %p328_p0 }
   0xa   :  { %338 = shalt.err (!%p335_p4)
}
   0xb   :  { %s384_s21 = smov 64   ;;  %s385_s22 = smov 4  }
   0xc   :  { %33 = dma.hbm_to_vmem [thread:$0]  %s460_s1, 128, %s28_s19, [#allocation5], %s384_s21, %s384_s21, %s385_s22  }
   0xd   :  { %s386_s25 = smov [#allocation2]   ;;  %s387_s27 = smov [#allocation6]  }
   0xe   :  { %s18_s26 = sshll.u32 %s386_s25, 4  ;;  %s44_s28 = sshll.u32 %s387_s27, 4  ;;  %s19_s26 = int_to_ptr.vmem [resolvable:$true] %s18_s26  ;;  %s45_s28 = int_to_ptr.vmem [resolvable:$true] %s44_s28 }
   0xf   :  { %s347_s29 = scalar_lea.vmem %s19_s26, 32  ;;  %p352_p6 = scmp.lt.s32.totalorder %s19_s26, %s19_s26 }
  0x10   :  { %p348_p5 = scmp.ne.s32.totalorder %s19_s26, %s347_s29  ;;  %p353_p7 = scmp.lt.s32.totalorder %s347_s29, %s347_s29 }
  0x12   :  { %p354_p8 = por %p353_p7, %p352_p6 }
  0x14   :  { %p355_p9 = pnand %p354_p8, %p348_p5 }
  0x16   :  { %358 = shalt.err (!%p355_p9)
}
  0x17   :  { %21 = dma.hbm_to_vmem [thread:$0]  %s459_s0, 32, %s19_s26, [#allocation3]  }
  0x18   :  { %s367_s7 = scalar_lea.vmem %s45_s28, 16  ;;  %s371_s1 = scalar_lea.vmem %s45_s28, 32 }
  0x19   :  { %p368_p10 = scmp.ne.s32.totalorder %s45_s28, %s367_s7  ;;  %p372_p11 = scmp.lt.s32.totalorder %s45_s28, %s45_s28 }
  0x1a   :  { %p373_p12 = scmp.lt.s32.totalorder %s371_s1, %s367_s7 }
  0x1c   :  { %p374_p13 = por %p373_p12, %p372_p11 }
  0x1e   :  { %p375_p0 = pnand %p374_p13, %p368_p10 }
  0x20   :  { %378 = shalt.err (!%p375_p0)
}
  0x21   :  { %47 = dma.hbm_to_vmem [thread:$0]  %s463_s4, 16, %s45_s28, [#allocation5]  }
  0x22   :  { %379 = dma.done.wait [#allocation3], 32  }
  0x23   :  { %380 = vsyncadd [#allocation3], 4294967264 }
  0x24   :  { %381 = dma.done.wait [#allocation5], 144  }
  0x25   :  { %382 = vsyncadd [#allocation5], 4294967152  ;;  %v388_v0 = vmov 0.0   ;;  %vm389_vm0 = vmmov 0   ;;  %v306_v1 = vld [vmem:[#allocation4] sm:$0xff]   ;;  %vm75_vm1 = vcmask 130048  }
  0x26   :  { %273 = vmatprep.subr.bf16.mxu0 %v388_v0  ;;  %275 = vmatprep.mubr.msk.bf16.mxu0 %vm389_vm0, %v388_v0  ;;  %v58_v2 = vld [vmem:[#allocation2] sm:$0x3]  ;;  %v307_v4 = vld [vmem:[%s462_s3 + $0x38] sm:$0xff]   ;;  %v308_v5 = vld [vmem:[%s462_s3 + $0x30] sm:$0xff]   ;;  %vm241_vm2 = vcmask 254976  }
  0x27   :  { %279 = vmatprep.subr.bf16.mxu1 %v388_v0  ;;  %295 = vmatprep.mubr.msk.bf16.mxu1 %vm389_vm0, %v388_v0  ;;  %v59_v3 = vpack.c.bf16 %v58_v2, %v58_v2  ;;  %v309_v6 = vld [vmem:[%s462_s3 + $0x28] sm:$0xff]   ;;  %v310_v7 = vld [vmem:[%s462_s3 + $0x20] sm:$0xff]   ;;  %v311_v8 = vld [vmem:[%s462_s3 + $0x18] sm:$0xff]  }
  0x28   :  { %274 = vmatpush3.bf16.msra.mxu0 %v306_v1  ;;  %280 = vmatpush3.bf16.msra.mxu1 %v307_v4  ;;  %v312_v9 = vld [vmem:[%s462_s3 + $0x10] sm:$0xff]   ;;  %v313_v10 = vld [vmem:[%s462_s3 + $0x8] sm:$0xff]   ;;  %v314_v11 = vld [vmem:[%s462_s3] sm:$0xff]  }
  0x29   :  { %281 = vmatprep.subr.bf16.mxu1 %v388_v0  ;;  %v249_v12 = vld [vmem:[%s461_s2] ss:$0 sm:$0xff]  ;;  %v253_v29 = vld [vmem:[#allocation6] ss:$0 sm:$0xff] }
  0x2b   :  { %276 = vmatmul.mubr.msk.bf16.vlgmr.msra.gmra.mxu0 %vm75_vm1, %v59_v3 }
  0x2c   :  { %282 = vmatpush3.bf16.msra.mxu1 %v308_v5 }
  0x2d   :  { %283 = vmatprep.subr.bf16.mxu1 %v388_v0 }
  0x30   :  { %284 = vmatpush3.bf16.msra.mxu1 %v309_v6 }
  0x31   :  { %285 = vmatprep.subr.bf16.mxu1 %v388_v0 }
  0x34   :  { %286 = vmatpush3.bf16.msra.mxu1 %v310_v7 }
  0x35   :  { %287 = vmatprep.subr.bf16.mxu1 %v388_v0 }
  0x38   :  { %288 = vmatpush3.bf16.msra.mxu1 %v311_v8 }
  0x39   :  { %289 = vmatprep.subr.bf16.mxu1 %v388_v0 }
  0x3c   :  { %290 = vmatpush3.bf16.msra.mxu1 %v312_v9 }
  0x3d   :  { %291 = vmatprep.subr.bf16.mxu1 %v388_v0 }
  0x40   :  { %292 = vmatpush3.bf16.msra.mxu1 %v313_v10 }
  0x41   :  { %293 = vmatprep.subr.bf16.mxu1 %v388_v0 }
  0x44   :  { %294 = vmatpush3.bf16.msra.mxu1 %v314_v11 }
  0xeb   :  { %v113_v13 = vpop.f32.mrf.mxu0 }
  0xec   :  { %v114_v14 = vadd.f32 %v249_v12, %v113_v13 }
  0xed   :  { %v277_v15 = vpop.f32.mrf.mxu0 }
  0xee   :  { %v119_v16 = vmin.f32 %v114_v14, 20.0 }
  0xef   :  { %v116_v17 = vpop.f32.mrf.mxu0 }
  0xf0   :  { %v120_v18 = vmul.f32 1.442695, %v119_v16 }
  0xf1   :  { %v278_v19 = vpop.f32.mrf.mxu0 }
  0xf2   :  { %315 = vpow2.f32 %v120_v18 }
  0xff   :  { %v316_v20 = vpop.eup %315 }
 0x100   :  { %v122_v21 = vadd.f32 1.0, %v316_v20 }
 0x102   :  { %v123_v22 = vmul.f32 %v122_v21, %v122_v21 }
 0x104   :  { %v126_v23 = vadd.f32 1.0, %v123_v22  ;;  %v252_v24 = vadd.f32 -1.0, %v123_v22 }
 0x106   :  { %317 = vrcp.f32 %v126_v23  ;;  %v125_v25 = vmul.f32 %v252_v24, %v114_v14 }
 0x113   :  { %v318_v26 = vpop.eup %317 }
 0x114   :  { %v128_v27 = vmul.f32 %v318_v26, %v125_v25 }
 0x116   :  { %v129_v28 = vpack.c.bf16 %v128_v27, %v128_v27 }
 0x118   :  { %296 = vmatmul.mubr.bf16.vlgmr.msra.gmra.mxu1 %v129_v28 }
 0x1d8   :  { %v235_v30 = vpop.f32.mrf.mxu1 }
 0x1d9   :  { %v236_v31 = vadd.f32 %v253_v29, %v235_v30 }
 0x1da   :  { %v297_v32 = vpop.f32.mrf.mxu1 }
 0x1db   :  { %242 = vst.msk [vmem:[%s464_s5] sm:$0x3] %vm241_vm2, %v236_v31 }
 0x1dc   :  { %v238_v33 = vpop.f32.mrf.mxu1 }
 0x1de   :  { %v298_v34 = vpop.f32.mrf.mxu1 }
 0x1df   :  { %247 = vsyncpa [#allocation3], 1 }
 0x1e0   :  { %248 = vsyncpa [#allocation5], 1 }

// kernel: temporal_control_unet_forward.7
= control target key start
LH: loop header
LB: loop body
LE: loop exit
PB: predicated region body
PF: predicated region fallthrough
CT: control target
= control target key end

     0   :  { %s5204_s6 = smov 1   ;;  %s5205_s10 = smov 2   ;;  %s6186_s0 = inlined_call_operand.smem [shape: u32[30], index: -1, kind: input, shape index: {}] }
   0x1   :  { %s5263_s5 = sld [smem:[%s6186_s0]]   ;;  %s5206_s14 = smov 3  }
   0x2   :  { %s5268_s9 = sld [smem:[%s6186_s0 + %s5204_s6]]   ;;  %s5207_s18 = smov 4  }
   0x3   :  { %s5273_s13 = sld [smem:[%s6186_s0 + %s5205_s10]]   ;;  %s5208_s22 = smov 5  }
   0x4   :  { %s5278_s17 = sld [smem:[%s6186_s0 + %s5206_s14]]   ;;  %s5209_s26 = smov 6  }
   0x5   :  { %s5283_s21 = sld [smem:[%s6186_s0 + %s5207_s18]]   ;;  %s5210_s30 = smov 7  }
   0x6   :  { %s5288_s25 = sld [smem:[%s6186_s0 + %s5208_s22]]   ;;  %s5211_s4 = smov 8  }
   0x7   :  { %6207 = sst [smem:[#allocation35_spill]] %s5263_s5  ;;  %s5212_s10 = smov 9  }
   0x8   :  { %6208 = sst [smem:[#allocation36_spill]] %s5268_s9  ;;  %s5213_s15 = smov 10  }
   0x9   :  { %6209 = sst [smem:[#allocation37_spill]] %s5273_s13  ;;  %s5214_s20 = smov 11  }
   0xa   :  { %s5293_s29 = sld [smem:[%s6186_s0 + %s5209_s26]]   ;;  %s5215_s26 = smov 12  }
   0xb   :  { %6210 = sst [smem:[#allocation38_spill]] %s5283_s21  ;;  %s5216_s1 = smov 13  }
   0xc   :  { %s5298_s3 = sld [smem:[%s6186_s0 + %s5210_s30]]   ;;  %s5217_s7 = smov 14  }
   0xd   :  { %s5303_s8 = sld [smem:[%s6186_s0 + %s5211_s4]]   ;;  %s5219_s22 = smov 16  }
   0xe   :  { %s5308_s14 = sld [smem:[%s6186_s0 + %s5212_s10]]   ;;  %s5220_s28 = smov 17  }
   0xf   :  { %s5313_s19 = sld [smem:[%s6186_s0 + %s5213_s15]]   ;;  %s5218_s15 = smov 15  }
  0x10   :  { %s5318_s24 = sld [smem:[%s6186_s0 + %s5214_s20]]  }
  0x11   :  { %s5323_s30 = sld [smem:[%s6186_s0 + %s5215_s26]]  }
  0x12   :  { %6211 = sst [smem:[#allocation39_spill]] %s5298_s3 }
  0x13   :  { %6212 = sst [smem:[#allocation40_spill]] %s5303_s8 }
  0x14   :  { %6213 = sst [smem:[#allocation41_spill]] %s5308_s14 }
  0x15   :  { %6214 = sst [smem:[#allocation42_spill]] %s5313_s19 }
  0x16   :  { %6215 = sst [smem:[#allocation43_spill]] %s5318_s24 }
  0x17   :  { %s5328_s6 = sld [smem:[%s6186_s0 + %s5216_s1]]  }
  0x18   :  { %s5333_s12 = sld [smem:[%s6186_s0 + %s5217_s7]]   ;;  %s5221_s7 = smov 18  }
  0x19   :  { %s5338_s20 = sld [smem:[%s6186_s0 + %s5218_s15]]   ;;  %s5222_s15 = smov 19  }
  0x1a   :  { %s5343_s27 = sld [smem:[%s6186_s0 + %s5219_s22]]   ;;  %s5223_s22 = smov 20  }
  0x1b   :  { %s5348_s4 = sld [smem:[%s6186_s0 + %s5220_s28]]   ;;  %s5224_s28 = smov 21  }
  0x1c   :  { %s5353_s21 = sld [smem:[%s6186_s0 + %s5221_s7]]   ;;  %s5225_s7 = smov 22  }
  0x1d   :  { %6216 = sst [smem:[#allocation44_spill]] %s5328_s6 }
  0x1e   :  { %6217 = sst [smem:[#allocation45_spill]] %s5333_s12 }
  0x1f   :  { %s5358_s8 = sld [smem:[%s6186_s0 + %s5222_s15]]   ;;  %s5226_s15 = smov 23  }
  0x20   :  { %s5363_s19 = sld [smem:[%s6186_s0 + %s5223_s22]]   ;;  %s5227_s22 = smov 24  }
  0x21   :  { %6218 = sst [smem:[#allocation46_spill]] %s5348_s4 }
  0x22   :  { %s5368_s3 = sld [smem:[%s6186_s0 + %s5224_s28]]   ;;  %s5228_s28 = smov 25  }
  0x23   :  { %s5373_s14 = sld [smem:[%s6186_s0 + %s5225_s7]]   ;;  %s5229_s7 = smov 26  }
  0x25   :  { %6219 = sst [smem:[#allocation47_spill]] %s5358_s8 }
  0x26   :  { %6220 = sst [smem:[#allocation48_spill]] %s5363_s19 }
  0x27   :  { %s5378_s8 = sld [smem:[%s6186_s0 + %s5226_s15]]   ;;  %s5230_s15 = smov 27  }
  0x28   :  { %6221 = sst [smem:[#allocation49_spill]] %s5368_s3 }
  0x29   :  { %6222 = sst [smem:[#allocation50_spill]] %s5373_s14 }
  0x2a   :  { %s5383_s19 = sld [smem:[%s6186_s0 + %s5227_s22]]   ;;  %s5231_s22 = smov 28  }
  0x2b   :  { %s5388_s3 = sld [smem:[%s6186_s0 + %s5228_s28]]   ;;  %s5232_s28 = smov 29  }
  0x2c   :  { %s5393_s14 = sld [smem:[%s6186_s0 + %s5229_s7]]  }
  0x2d   :  { %6223 = sst [smem:[#allocation51_spill]] %s5378_s8 }
  0x2e   :  { %s5398_s13 = sld [smem:[%s6186_s0 + %s5230_s15]]  }
  0x2f   :  { %s5403_s9 = sld [smem:[%s6186_s0 + %s5231_s22]]  }
  0x30   :  { %s5408_s12 = sld [smem:[%s6186_s0 + %s5232_s28]]  }
  0x31   :  { %6224 = sst [smem:[#allocation52_spill]] %s5388_s3 }
  0x32   :  { %6225 = sst [smem:[#allocation53_spill]] %s5393_s14 }
  0x34   :  { %6226 = sst [smem:[#allocation54_spill]] %s5398_s13 }
  0x35   :  { %65 = vsyncpa [#allocation3], 0 }
  0x36   :  { %66 = vsyncpa [#allocation6], 0 }
  0x37   :  { %67 = vsyncpa [#allocation9], 0 }
  0x38   :  { %68 = vsyncpa [#allocation12], 0 }
  0x39   :  { %69 = vsyncpa [#allocation15], 0 }
  0x3a   :  { %70 = vsyncpa [#allocation18], 0 }
  0x3b   :  { %71 = vsyncpa [#allocation21], 0 }
  0x3c   :  { %72 = vsyncpa [#allocation4], 0 }
  0x3d   :  { %74 = vsyncpa [#allocation4 + $0x1], 0 }
  0x3e   :  { %75 = vsyncpa [#allocation25], 0 }
  0x3f   :  { %77 = vsyncpa [#allocation25 + $0x1], 0  ;;  %s5410_s7 = smov 0   ;;  %s5412_s10 = smov 0  }
  0x40   :  { %s5414_s11 = smov 0   ;;  %s5416_s15 = smov 0  }
  0x41 LB: > { %s6227_s13 = sld [smem:[#allocation54_spill]]  ;;  %s5431_s0 = sadd.s32 4294967295, %s5202_s15   ;;  %s5190_s7 = sphi %s5410_s7, %s6286_s7   ;;  %s5202_s15 = sphi %s5416_s15, %s6283_s15   ;;  %s5198_s11 = sphi %s5414_s11, %s6285_s11   ;;  %s5194_s10 = sphi %s5412_s10, %s6287_s10  }
  0x42   : > { %6228 = sst [smem:[#allocation55_spill]] %s5190_s7  ;;  %s3782_s16 = sadd.s32 4294967294, %s5202_s15  }
  0x43   : > { %6229 = sst [smem:[#allocation56_spill]] %s5198_s11  ;;  %s5435_s18 = sadd.s32 1, %s5202_s15  }
  0x44   : > { %6230 = sst [smem:[#allocation57_spill]] %s5202_s15  ;;  %s667_s22 = sadd.s32 1, %s5198_s11 }
  0x45   : > { %6231 = sst [smem:[#allocation58_spill]] %s5435_s18  ;;  %s664_s23 = ssub.s32 %s5202_s15, %s5435_s18 }
  0x46   : > { %p677_p0 = scmp.ne.s32.totalorder %s5198_s11, %s5194_s10  ;;  %p665_p1 = scmp.eq.s32.totalorder %s664_s23, 0 }
  0x47   : > { %p678_p2 = scmp.eq.s32.totalorder %s5431_s0, 1  ;;  %p683_p3 = scmp.ne.s32.totalorder %s5194_s10, %s5190_s7 }
  0x48   : > { %p684_p4 = scmp.eq.s32.totalorder %s3782_s16, 1  ;;  %p3783_p7 = scmp.ge.s32.totalorder %s5202_s15, 1 }
  0x49   : > { %s5446_s26 = scalar_select %p665_p1, %s5198_s11, %s667_s22  }
  0x4a   : > { %p5448_p5 = por %p678_p2, %p677_p0  ;;  %p5452_p6 = por %p684_p4, %p683_p3 }
  0x4b   : > { %6232 = sst [smem:[#allocation59_spill]] %s5446_s26  ;;  %p743_p8 = scmp.lt.s32.totalorder %s5202_s15, 3 }
  0x4c   : > { %s6233_s28 = scalar_select %p5448_p5, 1, 0 }
  0x4d   : > { %s6234_s1 = scalar_select %p5452_p6, 1, 0 }
  0x4e   : > { %p6195_p9 = scmp.eq.s32.totalorder %s5431_s0, 0  ;;  %p5459_p10 = pnand %p3783_p7, %p743_p8 }
  0x4f   : > { %6235 = sst [smem:[#allocation60_spill]] %s6234_s1  ;;  %s5233_s23 = smov [#allocation5]  }
  0x50   : > { %s6236_s2 = scalar_select %p5459_p10, 1, 0 }
  0x51   : > { %s773_s16 = sshll.u32 %s5233_s23, 4  ;;  %p4487_p11 = pneg %p5459_p10  ;;  %s774_s16 = int_to_ptr.vmem [resolvable:$true] %s773_s16 }
  0x52   : > { %s5234_s22 = smov [#allocation8]   ;;  %s5235_s18 = smov [#allocation11]  }
  0x53   : > { %s807_s26 = sshll.u32 %s5234_s22, 4  ;;  %p5467_p12 = pnand %p6195_p9, %p4487_p11  ;;  %s808_s26 = int_to_ptr.vmem [resolvable:$true] %s807_s26 }
  0x54   : > { %s829_s1 = sshll.u32 %s5235_s18, 4  ;;  %s4757_s23 = scalar_lea.vmem %s774_s16, 16  ;;  %s5471_s1 = int_to_ptr.vmem [resolvable:$true] %s829_s1 }
  0x55   : > { %p5475_p13 = pneg %p5467_p12  ;;  %p4758_p0 = scmp.ne.s32.totalorder %s774_s16, %s4757_s23 }
  0x56   : > { %s4764_s22 = scalar_lea.vmem %s774_s16, 32  ;;  %p4765_p3 = scmp.lt.s32.totalorder %s774_s16, %s774_s16 }
  0x57   : > { %p4760_p1 = pnand %p4758_p0, %p5475_p13  ;;  %p4766_p4 = scmp.lt.s32.totalorder %s4764_s22, %s4757_s23 }
  0x59   : > { %p4761_p2 = pneg %p4760_p1  ;;  %p4767_p7 = por %p4766_p4, %p4765_p3 }
  0x5b   : > { %p4768_p8 = pnand %p4767_p7, %p4761_p2 }
  0x5d   : > { %4771 = shalt.err (!%p4768_p8)
}
  0x5e   : > { %4493 = dma.hbm_to_vmem [thread:$0]  (!%p5467_p12), %s5288_s25, 16, %s774_s16, [#allocation6]  }
  0x5f   : > { %s4783_s18 = scalar_lea.vmem %s808_s26, 16  ;;  %s4790_s15 = scalar_lea.vmem %s808_s26, 32 }
  0x60   : > { %p4784_p11 = scmp.ne.s32.totalorder %s808_s26, %s4783_s18  ;;  %p4791_p5 = scmp.lt.s32.totalorder %s808_s26, %s808_s26 }
  0x61   : > { %p4792_p0 = scmp.lt.s32.totalorder %s4790_s15, %s4783_s18 }
  0x62   : > { %p4786_p9 = pnand %p4784_p11, %p5475_p13 }
  0x63   : > { %p4793_p1 = por %p4792_p0, %p4791_p5 }
  0x64   : > { %p4787_p6 = pneg %p4786_p9 }
  0x66   : > { %p4794_p10 = pnand %p4793_p1, %p4787_p6 }
  0x68   : > { %4797 = shalt.err (!%p4794_p10)
}
  0x69   : > { %s6239_s24 = sld [smem:[#allocation43_spill]]  ;;  %s4809_s16 = scalar_lea.vmem %s5471_s1, 16 }
  0x6a   : > { %p4810_p2 = scmp.ne.s32.totalorder %s5471_s1, %s4809_s16  ;;  %s4816_s23 = scalar_lea.vmem %s5471_s1, 32 }
  0x6b   : > { %p4817_p4 = scmp.lt.s32.totalorder %s5471_s1, %s5471_s1  ;;  %p4818_p5 = scmp.lt.s32.totalorder %s4816_s23, %s4809_s16 }
  0x6c   : > { %p4812_p3 = pnand %p4810_p2, %p5475_p13 }
  0x6d   : > { %p4819_p6 = por %p4818_p5, %p4817_p4 }
  0x6e   : > { %p4813_p9 = pneg %p4812_p3 }
  0x6f   : > { %4499 = dma.hbm_to_vmem [thread:$0]  (!%p5467_p12), %s6239_s24, 16, %s808_s26, [#allocation9]  }
  0x70   : > { %p4820_p10 = pnand %p4819_p6, %p4813_p9 }
  0x72   : > { %4823 = shalt.err (!%p4820_p10)
}
  0x73   : > { %s6240_s6 = sld [smem:[#allocation44_spill]]  ;;  %s5236_s15 = smov [#allocation14]  }
  0x74   : > { %s859_s26 = sshll.u32 %s5236_s15, 4  ;;  %s5237_s22 = smov [#allocation17]   ;;  %s860_s26 = int_to_ptr.vmem [resolvable:$true] %s859_s26 }
  0x75   : > { %s893_s18 = sshll.u32 %s5237_s22, 4  ;;  %s4835_s24 = scalar_lea.vmem %s860_s26, 16  ;;  %s894_s18 = int_to_ptr.vmem [resolvable:$true] %s893_s18 }
  0x76   : > { %p4836_p7 = scmp.ne.s32.totalorder %s860_s26, %s4835_s24  ;;  %s4842_s16 = scalar_lea.vmem %s860_s26, 32 }
  0x77   : > { %p4843_p0 = scmp.lt.s32.totalorder %s860_s26, %s860_s26  ;;  %p4844_p1 = scmp.lt.s32.totalorder %s4842_s16, %s4835_s24 }
  0x78   : > { %p4838_p8 = pnand %p4836_p7, %p5475_p13 }
  0x79   : > { %4505 = dma.hbm_to_vmem [thread:$0]  (!%p5467_p12), %s6240_s6, 16, %s5471_s1, [#allocation12]  }
  0x7a   : > { %p4839_p11 = pneg %p4838_p8  ;;  %p4845_p2 = por %p4844_p1, %p4843_p0 }
  0x7c   : > { %p4846_p3 = pnand %p4845_p2, %p4839_p11 }
  0x7e   : > { %4849 = shalt.err (!%p4846_p3)
}
  0x7f   : > { %s6241_s4 = sld [smem:[#allocation46_spill]]  ;;  %s4861_s1 = scalar_lea.vmem %s894_s18, 16 }
  0x80   : > { %p4862_p9 = scmp.ne.s32.totalorder %s894_s18, %s4861_s1  ;;  %s4868_s23 = scalar_lea.vmem %s894_s18, 32 }
  0x81   : > { %p4869_p6 = scmp.lt.s32.totalorder %s894_s18, %s894_s18  ;;  %p4870_p10 = scmp.lt.s32.totalorder %s4868_s23, %s4861_s1 }
  0x82   : > { %p4864_p4 = pnand %p4862_p9, %p5475_p13 }
  0x83   : > { %p4871_p7 = por %p4870_p10, %p4869_p6 }
  0x84   : > { %p4865_p5 = pneg %p4864_p4 }
  0x85   : > { %4511 = dma.hbm_to_vmem [thread:$0]  (!%p5467_p12), %s6241_s4, 16, %s860_s26, [#allocation15]  }
  0x86   : > { %p4872_p8 = pnand %p4871_p7, %p4865_p5 }
  0x88   : > { %4875 = shalt.err (!%p4872_p8)
}
  0x89   : > { %s6242_s8 = sld [smem:[#allocation51_spill]]  ;;  %s5238_s24 = smov [#allocation20]  }
  0x8a   : > { %s916_s15 = sshll.u32 %s5238_s24, 4  ;;  %s5239_s26 = smov [#allocation2]   ;;  %s917_s15 = int_to_ptr.vmem [resolvable:$true] %s916_s15 }
  0x8b   : > { %s759_s22 = sshll.u32 %s5239_s26, 4  ;;  %s4887_s16 = scalar_lea.vmem %s917_s15, 1536  ;;  %s760_s22 = int_to_ptr.vmem [resolvable:$true] %s759_s22 }
  0x8c   : > { %p4888_p11 = scmp.ne.s32.totalorder %s917_s15, %s4887_s16  ;;  %p4895_p2 = scmp.lt.s32.totalorder %s917_s15, %s917_s15 }
  0x8d   : > { %p4896_p3 = scmp.lt.s32.totalorder %s4887_s16, %s4887_s16 }
  0x8e   : > { %p4890_p0 = pnand %p4888_p11, %p5475_p13 }
  0x8f   : > { %4517 = dma.hbm_to_vmem [thread:$0]  (!%p5467_p12), %s6242_s8, 16, %s894_s18, [#allocation18]  }
  0x90   : > { %p4891_p1 = pneg %p4890_p0  ;;  %p4897_p9 = por %p4896_p3, %p4895_p2 }
  0x92   : > { %p4898_p4 = pnand %p4897_p9, %p4891_p1 }
  0x94   : > { %4901 = shalt.err (!%p4898_p4)
}
  0x95   : > { %s6199_s1 = smov 64   ;;  %s6243_s3 = sld [smem:[#allocation52_spill]] }
  0x96   : > { %s6201_s18 = smov 4   ;;  %s4913_s23 = scalar_lea.vmem %s760_s22, 16 }
  0x97   : > { %p4914_p5 = scmp.ne.s32.totalorder %s760_s22, %s4913_s23  ;;  %s4920_s24 = scalar_lea.vmem %s760_s22, 32 }
  0x98   : > { %p4921_p7 = scmp.lt.s32.totalorder %s760_s22, %s760_s22  ;;  %p4922_p8 = scmp.lt.s32.totalorder %s4920_s24, %s4913_s23 }
  0x99   : > { %p4916_p6 = pnand %p4914_p5, %p5475_p13 }
  0x9a   : > { %p4923_p11 = por %p4922_p8, %p4921_p7 }
  0x9b   : > { %4523 = dma.hbm_to_vmem [thread:$0]  (!%p5467_p12), %s6243_s3, 1536, %s917_s15, [#allocation21], %s6199_s1, %s6199_s1, %s6201_s18  }
  0x9c   : > { %p4917_p10 = pneg %p4916_p6 }
  0x9e   : > { %p4924_p0 = pnand %p4923_p11, %p4917_p10 }
  0xa0   : > { %4927 = shalt.err (!%p4924_p0)
}
  0xa1   : > { %4490 = dma.hbm_to_vmem [thread:$0]  (!%p5467_p12), %s5278_s17, 16, %s760_s22, [#allocation3]  }
  0xa2   : > { %s5242_s26 = smov [#allocation7]   ;;  %s5243_s15 = smov [#allocation10]  }
  0xa3   : > { %s784_s16 = sshll.u32 %s5242_s26, 4  ;;  %s818_s1 = sshll.u32 %s5243_s15, 4  ;;  %s785_s16 = int_to_ptr.vmem [resolvable:$true] %s784_s16  ;;  %s819_s1 = int_to_ptr.vmem [resolvable:$true] %s818_s1 }
  0xa4   : > { %s4939_s18 = scalar_lea.vmem %s785_s16, 16  ;;  %s4946_s3 = scalar_lea.vmem %s785_s16, 32 }
  0xa5   : > { %p4940_p1 = scmp.ne.s32.totalorder %s785_s16, %s4939_s18  ;;  %p4947_p9 = scmp.lt.s32.totalorder %s785_s16, %s785_s16 }
  0xa6   : > { %p4948_p4 = scmp.lt.s32.totalorder %s4946_s3, %s4939_s18 }
  0xa7   : > { %p4942_p2 = pnand %p4940_p1, %p5475_p13 }
  0xa8   : > { %p4949_p5 = por %p4948_p4, %p4947_p9 }
  0xa9   : > { %p4943_p3 = pneg %p4942_p2 }
  0xab   : > { %p4950_p6 = pnand %p4949_p5, %p4943_p3 }
  0xad   : > { %4953 = shalt.err (!%p4950_p6)
}
  0xae   : > { %4496 = dma.hbm_to_vmem [thread:$0]  (!%p5467_p12), %s5293_s29, 16, %s785_s16, [#allocation6]  }
  0xaf   : > { %s4965_s22 = scalar_lea.vmem %s819_s1, 64  ;;  %p4973_p11 = scmp.lt.s32.totalorder %s819_s1, %s819_s1 }
  0xb0   : > { %p4966_p10 = scmp.ne.s32.totalorder %s819_s1, %s4965_s22  ;;  %p4974_p0 = scmp.lt.s32.totalorder %s4965_s22, %s4965_s22 }
  0xb2   : > { %p4968_p7 = pnand %p4966_p10, %p5475_p13  ;;  %p4975_p1 = por %p4974_p0, %p4973_p11 }
  0xb4   : > { %p4969_p8 = pneg %p4968_p7 }
  0xb6   : > { %p4976_p2 = pnand %p4975_p1, %p4969_p8 }
  0xb8   : > { %4979 = shalt.err (!%p4976_p2)
}
  0xb9   : > { %4502 = dma.hbm_to_vmem [thread:$0]  (!%p5467_p12), %s5323_s30, 64, %s819_s1, [#allocation9]  }
  0xba   : > { %s5244_s3 = smov [#allocation13]   ;;  %s5245_s23 = smov [#allocation16]  }
  0xbb   : > { %s845_s18 = sshll.u32 %s5244_s3, 4  ;;  %s870_s24 = sshll.u32 %s5245_s23, 4  ;;  %s846_s18 = int_to_ptr.vmem [resolvable:$true] %s845_s18  ;;  %s871_s24 = int_to_ptr.vmem [resolvable:$true] %s870_s24 }
  0xbc   : > { %s4991_s26 = scalar_lea.vmem %s846_s18, 1536  ;;  %p4999_p5 = scmp.lt.s32.totalorder %s846_s18, %s846_s18 }
  0xbd   : > { %p4992_p3 = scmp.ne.s32.totalorder %s846_s18, %s4991_s26  ;;  %p5000_p6 = scmp.lt.s32.totalorder %s4991_s26, %s4991_s26 }
  0xbf   : > { %p4994_p9 = pnand %p4992_p3, %p5475_p13  ;;  %p5001_p10 = por %p5000_p6, %p4999_p5 }
  0xc1   : > { %p4995_p4 = pneg %p4994_p9 }
  0xc3   : > { %p5002_p7 = pnand %p5001_p10, %p4995_p4 }
  0xc5   : > { %5005 = shalt.err (!%p5002_p7)
}
  0xc6   : > { %s6244_s16 = smov 4   ;;  %s6245_s15 = smov 64  }
  0xc7   : > { %4508 = dma.hbm_to_vmem [thread:$0]  (!%p5467_p12), %s5343_s27, 1536, %s846_s18, [#allocation12], %s6245_s15, %s6245_s15, %s6244_s16  }
  0xc8   : > { %s5017_s1 = scalar_lea.vmem %s871_s24, 16  ;;  %s5024_s22 = scalar_lea.vmem %s871_s24, 32 }
  0xc9   : > { %p5018_p8 = scmp.ne.s32.totalorder %s871_s24, %s5017_s1  ;;  %p5025_p1 = scmp.lt.s32.totalorder %s871_s24, %s871_s24 }
  0xca   : > { %p5026_p2 = scmp.lt.s32.totalorder %s5024_s22, %s5017_s1 }
  0xcb   : > { %p5020_p11 = pnand %p5018_p8, %p5475_p13 }
  0xcc   : > { %p5027_p3 = por %p5026_p2, %p5025_p1 }
  0xcd   : > { %p5021_p0 = pneg %p5020_p11 }
  0xcf   : > { %p5028_p9 = pnand %p5027_p3, %p5021_p0 }
  0xd1   : > { %5031 = shalt.err (!%p5028_p9)
}
  0xd2   : > { %4514 = dma.hbm_to_vmem [thread:$0]  (!%p5467_p12), %s5353_s21, 16, %s871_s24, [#allocation15]  }
  0xd3   : > { %s5246_s3 = smov [#allocation19]   ;;  %s5247_s18 = smov [#allocation22]  }
  0xd4   : > { %s903_s23 = sshll.u32 %s5246_s3, 4  ;;  %s929_s26 = sshll.u32 %s5247_s18, 4  ;;  %s904_s23 = int_to_ptr.vmem [resolvable:$true] %s903_s23  ;;  %s930_s26 = int_to_ptr.vmem [resolvable:$true] %s929_s26 }
  0xd5   : > { %s5043_s4 = scalar_lea.vmem %s904_s23, 256  ;;  %p5051_p10 = scmp.lt.s32.totalorder %s904_s23, %s904_s23 }
  0xd6   : > { %p5044_p4 = scmp.ne.s32.totalorder %s904_s23, %s5043_s4  ;;  %p5052_p7 = scmp.lt.s32.totalorder %s5043_s4, %s5043_s4 }
  0xd8   : > { %p5046_p5 = pnand %p5044_p4, %p5475_p13  ;;  %p5053_p8 = por %p5052_p7, %p5051_p10 }
  0xda   : > { %p5047_p6 = pneg %p5046_p5 }
  0xdc   : > { %p5054_p11 = pnand %p5053_p8, %p5047_p6 }
  0xde   : > { %5057 = shalt.err (!%p5054_p11)
}
  0xdf   : > { %4520 = dma.hbm_to_vmem [thread:$0]  (!%p5467_p12), %s5383_s19, 256, %s904_s23, [#allocation18], %s6245_s15, %s6245_s15, %s6244_s16  }
  0xe0   : > { %s5069_s24 = scalar_lea.vmem %s930_s26, 1536  ;;  %p5077_p3 = scmp.lt.s32.totalorder %s930_s26, %s930_s26 }
  0xe1   : > { %p5070_p0 = scmp.ne.s32.totalorder %s930_s26, %s5069_s24  ;;  %p5078_p9 = scmp.lt.s32.totalorder %s5069_s24, %s5069_s24 }
  0xe3   : > { %p5072_p1 = pnand %p5070_p0, %p5475_p13  ;;  %p5079_p4 = por %p5078_p9, %p5077_p3 }
  0xe5   : > { %p5073_p2 = pneg %p5072_p1 }
  0xe7   : > { %p5080_p5 = pnand %p5079_p4, %p5073_p2 }
  0xe9   : > { %5083 = shalt.err (!%p5080_p5)
}
  0xea   : > { %s6246_s14 = sld [smem:[#allocation53_spill]]  ;;  %p6247_p6 = scmp.ne.s32.totalorder %s6236_s2, 0 }
  0xeb   : > { %p6248_p10 = scmp.eq.s32.totalorder (!%p6247_p6), %s5431_s0, 0 }
  0xec   : > { %959 = sbr.rel (%p6247_p6) target bundleno = 2500 (0x9c4), region = 128 }
  0xf0   : > { %4526 = dma.hbm_to_vmem [thread:$0]  (!%p5467_p12), %s6246_s14, 1536, %s930_s26, [#allocation21], %s6245_s15, %s6245_s15, %s6244_s16  }
  0xf1   : > { %5153 = dma.done.wait (%p6248_p10), [#allocation3], 16   ;;  %p6249_p13 = pmov %p6248_p10 }
  0xf2   : > { %p6250_p7 = pmov %p6248_p10 }
  0xf3   : > { %5155 = vsyncadd (%p6249_p13), [#allocation3], 4294967280 }
  0xf4   : > { %5157 = dma.done.wait (%p6250_p7), [#allocation6], 32   ;;  %p6251_p8 = pmov %p6250_p7 }
  0xf5   : > { %p6252_p11 = pmov %p6250_p7 }
  0xf6   : > { %5159 = vsyncadd (%p6251_p8), [#allocation6], 4294967264 }
  0xf7   : > { %5161 = dma.done.wait (%p6252_p11), [#allocation9], 80   ;;  %p6253_p12 = pmov %p6250_p7 }
  0xf8   : > { %p6254_p0 = pmov %p6250_p7 }
  0xf9   : > { %5163 = vsyncadd (%p6253_p12), [#allocation9], 4294967216 }
  0xfa   : > { %5165 = dma.done.wait (%p6254_p0), [#allocation12], 1552   ;;  %p6255_p1 = pmov %p6254_p0 }
  0xfb   : > { %p6256_p2 = pmov %p6254_p0 }
  0xfc   : > { %5167 = vsyncadd (%p6255_p1), [#allocation12], 4294965744 }
  0xfd   : > { %5169 = dma.done.wait (%p6256_p2), [#allocation15], 32   ;;  %p6257_p3 = pmov %p6254_p0 }
  0xfe   : > { %p6258_p9 = pmov %p6254_p0 }
  0xff   : > { %5171 = vsyncadd (%p6257_p3), [#allocation15], 4294967264 }
 0x100   : > { %5173 = dma.done.wait (%p6258_p9), [#allocation18], 272   ;;  %p6259_p4 = pmov %p6254_p0 }
 0x101   : > { %p6260_p5 = pmov %p6254_p0 }
 0x102   : > { %5175 = vsyncadd (%p6259_p4), [#allocation18], 4294967024 }
 0x103   : > { %5177 = dma.done.wait (%p6260_p5), [#allocation21], 3072   ;;  %p6261_p6 = pmov %p6254_p0 }
 0x104   : > { %s6262_s5 = sld [smem:[#allocation35_spill]]  ;;  %p1096_p10 = scmp.lt.s32.totalorder %s5431_s0, 1  ;;  %v1118_v0 = vlaneseq  ;;  %v5248_v1 = vmov 0.0   ;;  %vm5249_vm0 = vmmov 0   ;;  %vm1221_vm1 = vcmask 1043456  }
 0x105   : > { %5179 = vsyncadd (%p6261_p6), [#allocation21], 4294964224  ;;  %4103 = vmatprep.subr.bf16.mxu1 %v5248_v1  ;;  %4105 = vmatprep.mubr.msk.bf16.mxu1 %vm5249_vm0, %v5248_v1  ;;  %s6263_s7 = sld [smem:[#allocation45_spill]]  ;;  %vm1217_vm2 = vcmask 64512   ;;  %v3822_v4 = vld [vmem:[%s5338_s20 + $0x4] sm:$0xf] }
 0x106   : > { %s5597_s4 = scalar_select %p1096_p10, %s5431_s0, 1  ;;  %4095 = vmatprep.subr.bf16.mxu0 %v5248_v1  ;;  %4099 = vmatprep.mubr.msk.bf16.mxu0 %vm5249_vm0, %v5248_v1  ;;  %v5602_v2 = vshrl.u32 %v1118_v0, 7  ;;  %v1223_v7 = vsel %vm1221_vm1, %v3822_v4, 0  ;;  %v1201_v11 = vld [vmem:[%s5338_s20] sm:$0xf]  ;;  %vm1156_vm7 = vcmask 261120  }
 0x107   : > { %s6265_s15 = sld [smem:[#allocation36_spill]]  ;;  %4104 = vmatpush3.bf16.msra.mxu1 %v1223_v7  ;;  %v3825_v15 = vld [vmem:[%s5338_s20 + $0x8] sm:$0xf]  ;;  %v1270_v16 = vsel %vm1221_vm1, %v1201_v11, 0  ;;  %v3827_v56 = vld [vmem:[#allocation5] ss:$0 sm:$0xff] }
 0x108   : > { %s6203_s11 = sshll.u32 %s5597_s4, 4  ;;  %v5609_v3 = vadd.s32 8, %v5602_v2  ;;  %vm1204_vm3 = vcmp.lt.s32.totalorder %v5602_v2, 1  ;;  %vm1317_vm4 = vcmp.lt.s32.totalorder %v5602_v2, 7  ;;  %vm1121_vm5 = vcmp.ge.s32.totalorder %v5602_v2, 1  ;;  %4109 = vmatprep.subr.bf16.mxu1 %v5248_v1  ;;  %s6266_s22 = sld [smem:[#allocation37_spill]] }
 0x109   : > { %v1331_v21 = vsel %vm1221_vm1, %v3825_v15, 0  ;;  %vm1386_vm8 = vcmask 523264   ;;  %s5250_s3 = smov 64   ;;  %s6267_s23 = sld [smem:[#allocation41_spill]] }
 0x10a   : > { %s1100_s16 = scalar_lea.vmem %s6262_s5, %s6203_s11  ;;  %vm1124_vm6 = vcmp.lt.s32.totalorder %v5609_v3, 15  ;;  %s6268_s18 = sld [smem:[#allocation39_spill]] }
 0x10b   : > { %s6264_s2 = smov %s6263_s7  ;;  %v1125_v5 = vld [vmem:[%s1100_s16] sm:$0xff]  ;;  %v1126_v6 = vld [vmem:[%s1100_s16 + $0x8] sm:$0xff]  ;;  %s6269_s26 = sld [smem:[#allocation42_spill]] }
 0x10c   : > { %v1202_v8 = vrot.slane %v1125_v5, 7  ;;  %v1203_v9 = vrot.slane %v1126_v6, 7  ;;  %v5615_v10 = vpack.c.bf16 %v1126_v6, %v1125_v5  ;;  %v4642_v12 = vld [vmem:[%s6263_s7 + $0x8] sm:$0xff]   ;;  %v1315_v13 = vrot.slane %v1125_v5, 1  ;;  %v4643_v18 = vld [vmem:[%s6264_s2] sm:$0xff]   ;;  %s6270_s24 = sld [smem:[#allocation40_spill]] }
 0x10d   : > { %v1316_v14 = vrot.slane %v1126_v6, 1  ;;  %s1103_s1 = scalar_lea.vmem %s6265_s15, %s5597_s4  ;;  %4096 = vmatpush3.bf16.msra.mxu0 %v4642_v12  ;;  %s5860_s7 = sand.u32 1, %s5194_s10  }
 0x10e   : > { %v1206_v17 = vsel %vm1204_vm3, %v1203_v9, %v1202_v8  ;;  %4097 = vmatprep.subr.bf16.mxu0 %v5248_v1  ;;  %4106 = vmatmul.mubr.msk.bf16.vlgmr.msra.gmra.mxu1 %vm1217_vm2, %v5615_v10  ;;  %v1127_v22 = vld [vmem:[%s1103_s1] sm:$0x1]  ;;  %v1205_v23 = vsel %vm1204_vm3, %v1202_v8, %v1203_v9  ;;  %v5661_v39 = vld [vmem:[%s6266_s22 + $0x38] sm:$0xff]  ;;  %v5667_v40 = vld [vmem:[%s6266_s22 + $0x30] sm:$0xff]  ;;  %s3812_s16 = sshll.u32 %s5860_s7, 4  ;;  %s6271_s1 = sld [smem:[#allocation49_spill]] }
 0x10f   : > { %v1319_v19 = vsel %vm1317_vm4, %v1316_v14, %v1315_v13  ;;  %v1211_v20 = vsel %vm1121_vm5, %v1206_v17, 0.0  ;;  %4110 = vmatpush3.bf16.msra.mxu1 %v1270_v16  ;;  %4111 = vmatprep.mubr.msk.bf16.mxu1 %vm5249_vm0, %v5248_v1  ;;  %v1128_v25 = vmin.f32 %v1127_v22, 20.0  ;;  %v1318_v28 = vsel %vm1317_vm4, %v1315_v13, %v1316_v14  ;;  %v5674_v41 = vld [vmem:[%s6266_s22 + $0x28] sm:$0xff]  ;;  %v5681_v42 = vld [vmem:[%s6266_s22 + $0x20] sm:$0xff]  ;;  %v5688_v43 = vld [vmem:[%s6266_s22 + $0x18] sm:$0xff]  ;;  %s5870_s15 = scalar_lea.vmem [#allocation23], %s3812_s16 }
 0x110   : > { %v1325_v24 = vsel %vm1124_vm6, %v1319_v19, 0.0  ;;  %4115 = vmatprep.subr.bf16.mxu1 %v5248_v1  ;;  %v1213_v27 = vpack.c.bf16 %v1205_v23, %v1211_v20  ;;  %v5695_v44 = vld [vmem:[%s6266_s22 + $0x10] sm:$0xff]  ;;  %v5699_v45 = vld [vmem:[%s6266_s22 + $0x8] sm:$0xff]  ;;  %v5706_v46 = vld [vmem:[%s6266_s22] sm:$0xff]  ;;  %p6276_p7 = scmp.ne.s32.totalorder %s6233_s28, 0  ;;  %s5251_s11 = smov [#allocation23]  }
 0x111   : > { %4098 = vmatpush3.bf16.msra.mxu0 %v4643_v18  ;;  %v1129_v26 = vmul.f32 1.442695, %v1128_v25  ;;  %v1326_v29 = vpack.c.bf16 %v1325_v24, %v1318_v28  ;;  %s5088_s2 = sshll.u32 %s5251_s11, 4  ;;  %s5089_s2 = int_to_ptr.vmem [resolvable:$false] %s5088_s2 }
 0x112   : > { %4140 = vmatprep.subr.mxu0 %v5248_v1  ;;  %s5090_s5 = scalar_lea.vmem %s5089_s2, 512 }
 0x113   : > { %4694 = vpow2.f32 %v1129_v26  ;;  %v1143_v26 = vld [vmem:[#allocation11] sm:$0x1] }
 0x116   : > { %4112 = vmatmul.mubr.msk.bf16.vlgmr.msra.gmra.mxu1 %vm1217_vm2, %v1213_v27  ;;  %v5734_v27 = vsub.s32 0, %v5602_v2 }
 0x117   : > { %4116 = vmatpush3.bf16.msra.mxu1 %v1331_v21  ;;  %4117 = vmatprep.mubr.msk.bf16.mxu1 %vm5249_vm0, %v5248_v1 }
 0x118   : > { %4121 = vmatprep.subr.mxu1 %v5248_v1 }
 0x11e   : > { %4118 = vmatmul.mubr.msk.bf16.vlgmr.msra.gmra.mxu1 %vm1217_vm2, %v1326_v29 }
 0x11f   : > { %4137 = vmatprep.mubr.msk.f32.mxu1 %vm5249_vm0, %v5248_v1  ;;  %4122 = vmatpush3.msra.mxu1 %v5661_v39 }
 0x120   : > { %v4695_v30 = vpop.eup %4694  ;;  %4123 = vmatprep.subr.mxu1 %v5248_v1 }
 0x121   : > { %v1131_v31 = vadd.f32 1.0, %v4695_v30  ;;  %4124 = vmatpush3.msra.mxu1 %v5667_v40 }
 0x122   : > { %4125 = vmatprep.subr.mxu1 %v5248_v1 }
 0x123   : > { %v1132_v32 = vmul.f32 %v1131_v31, %v1131_v31  ;;  %4126 = vmatpush3.msra.mxu1 %v5674_v41 }
 0x124   : > { %4127 = vmatprep.subr.mxu1 %v5248_v1 }
 0x125   : > { %v3818_v33 = vadd.f32 -1.0, %v1132_v32  ;;  %v1135_v34 = vadd.f32 1.0, %v1132_v32  ;;  %4128 = vmatpush3.msra.mxu1 %v5681_v42 }
 0x126   : > { %4129 = vmatprep.subr.mxu1 %v5248_v1 }
 0x127   : > { %4696 = vrcp.f32 %v1135_v34  ;;  %v1134_v35 = vmul.f32 %v3818_v33, %v1127_v22  ;;  %4130 = vmatpush3.msra.mxu1 %v5688_v43  ;;  %v4644_v34 = vld [vmem:[#allocation13 + $0x38] sm:$0xff]  }
 0x128   : > { %4131 = vmatprep.subr.mxu1 %v5248_v1 }
 0x129   : > { %4132 = vmatpush3.msra.mxu1 %v5695_v44 }
 0x12a   : > { %4133 = vmatprep.subr.mxu1 %v5248_v1 }
 0x12b   : > { %4134 = vmatpush3.msra.mxu1 %v5699_v45 }
 0x12c   : > { %4135 = vmatprep.subr.mxu1 %v5248_v1 }
 0x12d   : > { %4136 = vmatpush3.msra.mxu1 %v5706_v46 }
 0x12e   : > { %4159 = vmatprep.subr.bf16.mxu1 %v5248_v1 }
 0x134   : > { %v4697_v36 = vpop.eup %4696 }
 0x135   : > { %v1137_v37 = vmul.f32 %v4697_v36, %v1134_v35  ;;  %v4645_v35 = vld [vmem:[#allocation13 + $0x30] sm:$0xff]   ;;  %v4646_v36 = vld [vmem:[#allocation13 + $0x18] sm:$0xff]  }
 0x137   : > { %v5654_v38 = vpack.c.bf16 %v1137_v37, %v1137_v37  ;;  %v4647_v37 = vld [vmem:[#allocation13 + $0x28] sm:$0xff]  }
 0x139   : > { %4100 = vmatmul.mubr.msk.bf16.vlgmr.msra.gmra.mxu0 %vm1156_vm7, %v5654_v38 }
 0x13a   : > { %4156 = vmatprep.mubr.msk.f32.mxu0 %vm5249_vm0, %v5248_v1  ;;  %4141 = vmatpush3.msra.mxu0 %v5661_v39 }
 0x13b   : > { %4142 = vmatprep.subr.mxu0 %v5248_v1 }
 0x13c   : > { %4143 = vmatpush3.msra.mxu0 %v5667_v40 }
 0x13d   : > { %4144 = vmatprep.subr.mxu0 %v5248_v1 }
 0x13e   : > { %4145 = vmatpush3.msra.mxu0 %v5674_v41 }
 0x13f   : > { %4146 = vmatprep.subr.mxu0 %v5248_v1 }
 0x140   : > { %4147 = vmatpush3.msra.mxu0 %v5681_v42 }
 0x141   : > { %4148 = vmatprep.subr.mxu0 %v5248_v1 }
 0x142   : > { %4149 = vmatpush3.msra.mxu0 %v5688_v43 }
 0x143   : > { %4150 = vmatprep.subr.mxu0 %v5248_v1 }
 0x144   : > { %4151 = vmatpush3.msra.mxu0 %v5695_v44 }
 0x145   : > { %4152 = vmatprep.subr.mxu0 %v5248_v1 }
 0x146   : > { %4153 = vmatpush3.msra.mxu0 %v5699_v45 }
 0x147   : > { %4154 = vmatprep.subr.mxu0 %v5248_v1 }
 0x148   : > { %4155 = vmatpush3.msra.mxu0 %v5706_v46 }
 0x149   : > { %4171 = vmatprep.subr.bf16.mxu0 %v5248_v1 }
 0x1ce   : > { %v1259_v47 = vpop.f32.mrf.mxu1 }
 0x1d0   : > { %v4107_v48 = vpop.f32.mrf.mxu1 }
 0x1d1   : > { %v4649_v48 = vld [vmem:[#allocation13 + $0x20] sm:$0xff]  }
 0x1d2   : > { %v1262_v49 = vpop.f32.mrf.mxu1 }
 0x1d4   : > { %v4108_v50 = vpop.f32.mrf.mxu1 }
 0x1d5   : > { %v4652_v50 = vld [vmem:[#allocation13] sm:$0xff]  }
 0x1d6   : > { %v1306_v51 = vpop.f32.mrf.mxu1 }
 0x1d7   : > { %v1307_v55 = vadd.f32 %v1306_v51, %v1259_v47  ;;  %v4648_v47 = vld [vmem:[#allocation13 + $0x10] sm:$0xff]  }
 0x1d8   : > { %v4113_v52 = vpop.f32.mrf.mxu1 }
 0x1da   : > { %v1309_v53 = vpop.f32.mrf.mxu1 }
 0x1db   : > { %v1310_v60 = vadd.f32 %v1309_v53, %v1262_v49  ;;  %v4650_v49 = vld [vmem:[#allocation13 + $0x8] sm:$0xff]  }
 0x1dc   : > { %v4114_v54 = vpop.f32.mrf.mxu1 }
 0x1de   : > { %v1367_v57 = vpop.f32.mrf.mxu1 }
 0x1df   : > { %v1374_v58 = vadd.f32 %v1367_v57, %v1307_v55 }
 0x1e0   : > { %v4119_v59 = vpop.f32.mrf.mxu1 }
 0x1e1   : > { %v5716_v61 = vadd.f32 %v3827_v56, %v1374_v58 }
 0x1e2   : > { %v1370_v62 = vpop.f32.mrf.mxu1 }
 0x1e3   : > { %v1375_v63 = vadd.f32 %v1370_v62, %v1310_v60  ;;  %v1396_v4 = vmul.f32 %v5716_v61, %v5716_v61  ;;  %v1387_v6 = vsel %vm1386_vm8, %v5716_v61, 0.0 }
 0x1e4   : > { %v4120_v0 = vpop.f32.mrf.mxu1 }
 0x1e5   : > { %v5720_v5 = vadd.f32 %v3827_v56, %v1375_v63  ;;  %v1398_v11 = vsel %vm1386_vm8, %v1396_v4, 0.0 }
 0x1e7   : > { %v1388_v7 = vsel %vm1386_vm8, %v5720_v5, 0.0  ;;  %v1397_v8 = vmul.f32 %v5720_v5, %v5720_v5 }
 0x1e8   : > { %v1389_v9 = vadd.f32 %v1388_v7, %v1387_v6  ;;  %v3830_v7 = vld [vmem:[%s6267_s23] ss:$0 sm:$0xff]  ;;  %s6273_s23 = sld [smem:[#allocation38_spill]] }
 0x1e9   : > { %v1399_v12 = vsel %vm1386_vm8, %v1397_v8, 0.0 }
 0x1ea   : > { %v1390_v13 = vrot.slane %v1389_v9, 4  ;;  %v1400_v14 = vadd.f32 %v1399_v12, %v1398_v11  ;;  %v3831_v12 = vld [vmem:[%s6268_s18] ss:$0 sm:$0xff]  ;;  %s6274_s18 = sld [smem:[#allocation50_spill]] }
 0x1ec   : > { %v1391_v15 = vadd.f32 %v1390_v13, %v1389_v9  ;;  %v1401_v16 = vrot.slane %v1400_v14, 4 }
 0x1ee   : > { %v1392_v17 = vrot.slane %v1391_v15, 2  ;;  %v1402_v18 = vadd.f32 %v1401_v16, %v1400_v14 }
 0x1f0   : > { %v1393_v19 = vadd.f32 %v1392_v17, %v1391_v15  ;;  %v1403_v20 = vrot.slane %v1402_v18, 2 }
 0x1f2   : > { %v1394_v21 = vrot.slane %v1393_v19, 1  ;;  %v1404_v22 = vadd.f32 %v1403_v20, %v1402_v18 }
 0x1f4   : > { %v1395_v23 = vadd.f32 %v1394_v21, %v1393_v19  ;;  %v1405_v24 = vrot.slane %v1404_v22, 1 }
 0x1f6   : > { %4138 = vmatmul.mubr.msk.f32.vlgmr.msra.gmra.mxu1 %vm1386_vm8, %v1395_v23  ;;  %v1406_v25 = vadd.f32 %v1405_v24, %v1404_v22 }
 0x1f7   : > { %4167 = vmatprep.mubr.msk.bf16.mxu1 %vm5249_vm0, %v5248_v1  ;;  %4160 = vmatpush3.bf16.msra.mxu1 %v4644_v34 }
 0x1f8   : > { %4157 = vmatmul.mubr.msk.f32.vlgmr.msra.gmra.mxu0 %vm1386_vm8, %v1406_v25  ;;  %4161 = vmatprep.subr.bf16.mxu1 %v5248_v1 }
 0x1f9   : > { %v1194_v28 = vpop.f32.mrf.mxu0  ;;  %4179 = vmatprep.mubr.msk.bf16.mxu0 %vm5249_vm0, %v5248_v1  ;;  %4172 = vmatpush3.bf16.msra.mxu0 %v4646_v36 }
 0x1fa   : > { %v1195_v29 = vadd.f32 %v1194_v28, %v1143_v26  ;;  %4173 = vmatprep.subr.bf16.mxu0 %v5248_v1 }
 0x1fb   : > { %v4101_v30 = vpop.f32.mrf.mxu0  ;;  %4162 = vmatpush3.bf16.msra.mxu1 %v4645_v35 }
 0x1fc   : > { %v1598_v31 = vrot.slane %v1195_v29, %v5734_v27  ;;  %4163 = vmatprep.subr.bf16.mxu1 %v5248_v1  ;;  %v1588_v8 = vadd.f32 1.0, %v1195_v29 }
 0x1fd   : > { %v1197_v32 = vpop.f32.mrf.mxu0  ;;  %4174 = vmatpush3.bf16.msra.mxu0 %v4648_v47 }
 0x1fe   : > { %1600 = vrot.lane.b32.xlu0 %v1598_v31, %s5250_s3  ;;  %4175 = vmatprep.subr.bf16.mxu0 %v5248_v1  ;;  %v1592_v15 = vrot.slane %v1588_v8, %v5734_v27 }
 0x1ff   : > { %v4102_v33 = vpop.f32.mrf.mxu0  ;;  %4164 = vmatpush3.bf16.msra.mxu1 %v4647_v37 }
 0x200   : > { %4165 = vmatprep.subr.bf16.mxu1 %v5248_v1 }
 0x201   : > { %4176 = vmatpush3.bf16.msra.mxu0 %v4650_v49 }
 0x202   : > { %4177 = vmatprep.subr.bf16.mxu0 %v5248_v1 }
 0x203   : > { %4166 = vmatpush3.bf16.msra.mxu1 %v4649_v48 }
 0x204   : > { %4183 = vmatprep.subr.bf16.mxu1 %v5248_v1 }
 0x205   : > { %4178 = vmatpush3.bf16.msra.mxu0 %v4652_v50 }
 0x206   : > { %4195 = vmatprep.subr.mxu0 %v5248_v1 }
 0x270   : > { %v1601_v18 = vpop.permute.xlu0 %1600 }
 0x2b6   : > { %v1476_v51 = vpop.f32.mrf.mxu1 }
 0x2b7   : > { %v1480_v52 = vmul.f32 0.0078125, %v1476_v51 }
 0x2b8   : > { %v4139_v53 = vpop.f32.mrf.mxu1  ;;  %v1550_v54 = vpop.f32.mrf.mxu0 }
 0x2b9   : > { %v1555_v55 = vmul.f32 %v1480_v52, %v1480_v52  ;;  %v1554_v56 = vmul.f32 0.0078125, %v1550_v54  ;;  %v1563_v62 = vrot.slane %v1480_v52, %v5734_v27  ;;  %v4651_v52 = vld [vmem:[#allocation13 + $0x58] sm:$0xff]  }
 0x2ba   : > { %v4158_v57 = vpop.f32.mrf.mxu0 }
 0x2bb   : > { %v1556_v58 = vsub.f32 %v1554_v56, %v1555_v55  ;;  %v1564_v0 = vsub.f32 %v5716_v61, %v1563_v62  ;;  %v1565_v4 = vsub.f32 %v5720_v5, %v1563_v62 }
 0x2bd   : > { %v1557_v59 = vmax.f32 %v1556_v58, 0.0  ;;  %v4653_v58 = vld [vmem:[#allocation13 + $0x50] sm:$0xff]  }
 0x2bf   : > { %v1558_v60 = vadd.f32 1e-05, %v1557_v59 }
 0x2c1   : > { %4698 = vrsqrt.f32 %v1558_v60 }
 0x2ce   : > { %v4699_v63 = vpop.eup %4698 }
 0x2cf   : > { %v1569_v6 = vrot.slane %v4699_v63, %v5734_v27  ;;  %v4654_v63 = vld [vmem:[#allocation13 + $0x48] sm:$0xff]  }
 0x2d1   : > { %v1570_v9 = vmul.f32 %v1569_v6, %v1564_v0  ;;  %v1571_v11 = vmul.f32 %v1569_v6, %v1565_v4  ;;  %v4655_v4 = vld [vmem:[#allocation13 + $0x40] sm:$0xff]  }
 0x2d3   : > { %v1578_v13 = vmul.f32 %v3830_v7, %v1570_v9  ;;  %v1579_v14 = vmul.f32 %v3830_v7, %v1571_v11 }
 0x2d5   : > { %v1586_v16 = vadd.f32 %v3831_v12, %v1578_v13  ;;  %v1587_v17 = vadd.f32 %v3831_v12, %v1579_v14 }
 0x2d7   : > { %v1593_v19 = vmul.f32 %v1592_v15, %v1586_v16  ;;  %v1594_v20 = vmul.f32 %v1592_v15, %v1587_v17 }
 0x2d9   : > { %v1603_v21 = vadd.f32 %v1601_v18, %v1593_v19  ;;  %v1604_v61 = vadd.f32 %v1601_v18, %v1594_v20  ;;  %v3849_v19 = vld [vmem:[#allocation7] ss:$0 sm:$0xff] }
 0x2db   : > { %v1605_v22 = vmin.f32 %v1603_v21, 20.0  ;;  %v1606_v5 = vmin.f32 %v1604_v61, 20.0 }
 0x2dd   : > { %v1607_v23 = vmul.f32 1.442695, %v1605_v22  ;;  %v1609_v24 = vmul.f32 1.442695, %v1606_v5 }
 0x2df   : > { %4700 = vpow2.f32 %v1607_v23 }
 0x2e0   : > { %4702 = vpow2.f32 %v1609_v24 }
 0x2ec   : > { %v4701_v25 = vpop.eup %4700 }
 0x2ed   : > { %v4703_v26 = vpop.eup %4702  ;;  %v1611_v28 = vadd.f32 1.0, %v4701_v25 }
 0x2ee   : > { %v1612_v29 = vadd.f32 1.0, %v4703_v26 }
 0x2ef   : > { %v1613_v30 = vmul.f32 %v1611_v28, %v1611_v28 }
 0x2f0   : > { %v1614_v31 = vmul.f32 %v1612_v29, %v1612_v29 }
 0x2f1   : > { %v1619_v32 = vadd.f32 1.0, %v1613_v30  ;;  %v3832_v34 = vadd.f32 -1.0, %v1613_v30 }
 0x2f2   : > { %v1620_v33 = vadd.f32 1.0, %v1614_v31  ;;  %v3833_v35 = vadd.f32 -1.0, %v1614_v31 }
 0x2f3   : > { %4704 = vrcp.f32 %v1619_v32  ;;  %v1617_v36 = vmul.f32 %v3832_v34, %v1603_v21 }
 0x2f4   : > { %4706 = vrcp.f32 %v1620_v33  ;;  %v1618_v47 = vmul.f32 %v3833_v35, %v1604_v61 }
 0x300   : > { %v4705_v37 = vpop.eup %4704 }
 0x301   : > { %v4707_v48 = vpop.eup %4706  ;;  %v1623_v49 = vmul.f32 %v4705_v37, %v1617_v36 }
 0x302   : > { %v1624_v50 = vmul.f32 %v4707_v48, %v1618_v47 }
 0x303   : > { %v1634_v51 = vrot.slane %v1623_v49, 7  ;;  %v1796_v60 = vrot.slane %v1623_v49, 1 }
 0x304   : > { %v1635_v53 = vrot.slane %v1624_v50, 7  ;;  %v1650_v54 = vpack.c.bf16 %v1624_v50, %v1623_v49  ;;  %v1797_v62 = vrot.slane %v1624_v50, 1 }
 0x306   : > { %4168 = vmatmul.mubr.msk.bf16.vlgmr.msra.gmra.mxu1 %vm1386_vm8, %v1650_v54  ;;  %v1636_v55 = vsel %vm1204_vm3, %v1634_v51, %v1635_v53  ;;  %v1637_v56 = vsel %vm1204_vm3, %v1635_v53, %v1634_v51  ;;  %v1799_v0 = vsel %vm1317_vm4, %v1797_v62, %v1796_v60  ;;  %v1798_v6 = vsel %vm1317_vm4, %v1796_v60, %v1797_v62  ;;  %v4657_v60 = vld [vmem:[#allocation19] sm:$0xff]   ;;  %v4658_v62 = vld [vmem:[#allocation20 + $0x38] sm:$0xff]  }
 0x307   : > { %4184 = vmatpush3.bf16.msra.mxu1 %v4651_v52  ;;  %v1638_v57 = vsel %vm1121_vm5, %v1637_v56, 0.0  ;;  %4191 = vmatprep.mubr.msk.bf16.mxu1 %vm5249_vm0, %v5248_v1  ;;  %v1801_v7 = vsel %vm1124_vm6, %v1799_v0, 0.0  ;;  %v2104_v52 = vld [vmem:[#allocation10] sm:$0xf]  ;;  %v4661_v0 = vld [vmem:[#allocation20 + $0x28] sm:$0xff]  }
 0x308   : > { %4185 = vmatprep.subr.bf16.mxu1 %v5248_v1  ;;  %v1640_v59 = vpack.c.bf16 %v1636_v55, %v1638_v57  ;;  %v1802_v8 = vpack.c.bf16 %v1801_v7, %v1798_v6  ;;  %v2107_v57 = vsel %vm1221_vm1, %v2104_v52, 0  ;;  %v4664_v6 = vld [vmem:[#allocation20 + $0x8] sm:$0xff]   ;;  %v4666_v7 = vld [vmem:[#allocation20] sm:$0xff]  }
 0x30a   : > { %4180 = vmatmul.mubr.msk.bf16.vlgmr.msra.gmra.mxu0 %vm1386_vm8, %v1640_v59  ;;  %v4656_v59 = vld [vmem:[#allocation19 + $0x8] sm:$0xff]  }
 0x30b   : > { %4186 = vmatpush3.bf16.msra.mxu1 %v4653_v58  ;;  %4196 = vmatpush3.msra.mxu0 %v5661_v39 }
 0x30c   : > { %4187 = vmatprep.subr.bf16.mxu1 %v5248_v1  ;;  %4197 = vmatprep.subr.mxu0 %v5248_v1 }
 0x30d   : > { %4198 = vmatpush3.msra.mxu0 %v5667_v40  ;;  %4211 = vmatprep.mubr.msk.f32.mxu0 %vm5249_vm0, %v5248_v1 }
 0x30e   : > { %4199 = vmatprep.subr.mxu0 %v5248_v1 }
 0x30f   : > { %4188 = vmatpush3.bf16.msra.mxu1 %v4654_v63  ;;  %4200 = vmatpush3.msra.mxu0 %v5674_v41  ;;  %v4660_v63 = vld [vmem:[#allocation20 + $0x18] sm:$0xff]  }
 0x310   : > { %4189 = vmatprep.subr.bf16.mxu1 %v5248_v1  ;;  %4201 = vmatprep.subr.mxu0 %v5248_v1 }
 0x311   : > { %4202 = vmatpush3.msra.mxu0 %v5681_v42 }
 0x312   : > { %4203 = vmatprep.subr.mxu0 %v5248_v1 }
 0x313   : > { %4190 = vmatpush3.bf16.msra.mxu1 %v4655_v4  ;;  %4204 = vmatpush3.msra.mxu0 %v5688_v43  ;;  %v4662_v4 = vld [vmem:[#allocation20 + $0x10] sm:$0xff]  }
 0x314   : > { %4214 = vmatprep.subr.mxu1 %v5248_v1  ;;  %4205 = vmatprep.subr.mxu0 %v5248_v1 }
 0x315   : > { %4206 = vmatpush3.msra.mxu0 %v5695_v44 }
 0x316   : > { %4192 = vmatmul.mubr.msk.bf16.vlgmr.msra.gmra.mxu1 %vm1386_vm8, %v1802_v8  ;;  %4207 = vmatprep.subr.mxu0 %v5248_v1 }
 0x317   : > { %4215 = vmatpush3.msra.mxu1 %v5661_v39  ;;  %4208 = vmatpush3.msra.mxu0 %v5699_v45 }
 0x318   : > { %4216 = vmatprep.subr.mxu1 %v5248_v1  ;;  %4209 = vmatprep.subr.mxu0 %v5248_v1 }
 0x319   : > { %4217 = vmatpush3.msra.mxu1 %v5667_v40  ;;  %4210 = vmatpush3.msra.mxu0 %v5706_v46 }
 0x31a   : > { %4218 = vmatprep.subr.mxu1 %v5248_v1  ;;  %4230 = vmatprep.mubr.msk.f32.mxu1 %vm5249_vm0, %v5248_v1 }
 0x31b   : > { %4219 = vmatpush3.msra.mxu1 %v5674_v41  ;;  %4233 = vmatprep.subr.bf16.mxu0 %v5248_v1 }
 0x31c   : > { %4220 = vmatprep.subr.mxu1 %v5248_v1 }
 0x31d   : > { %4221 = vmatpush3.msra.mxu1 %v5681_v42 }
 0x31e   : > { %4222 = vmatprep.subr.mxu1 %v5248_v1 }
 0x31f   : > { %4223 = vmatpush3.msra.mxu1 %v5688_v43 }
 0x320   : > { %4224 = vmatprep.subr.mxu1 %v5248_v1 }
 0x321   : > { %4225 = vmatpush3.msra.mxu1 %v5695_v44 }
 0x322   : > { %4226 = vmatprep.subr.mxu1 %v5248_v1 }
 0x323   : > { %4227 = vmatpush3.msra.mxu1 %v5699_v45 }
 0x324   : > { %4228 = vmatprep.subr.mxu1 %v5248_v1 }
 0x325   : > { %4229 = vmatpush3.msra.mxu1 %v5706_v46 }
 0x326   : > { %4259 = vmatprep.subr.bf16.mxu1 %v5248_v1 }
 0x3c6   : > { %v1712_v9 = vpop.f32.mrf.mxu1 }
 0x3c8   : > { %v4169_v11 = vpop.f32.mrf.mxu1 }
 0x3ca   : > { %v1715_v12 = vpop.f32.mrf.mxu1  ;;  %v1780_v13 = vpop.f32.mrf.mxu0 }
 0x3cb   : > { %v1781_v18 = vadd.f32 %v1780_v13, %v1712_v9 }
 0x3cc   : > { %v4170_v14 = vpop.f32.mrf.mxu1  ;;  %v4181_v15 = vpop.f32.mrf.mxu0 }
 0x3ce   : > { %v1783_v16 = vpop.f32.mrf.mxu0 }
 0x3cf   : > { %v1784_v22 = vadd.f32 %v1783_v16, %v1715_v12 }
 0x3d0   : > { %v4182_v17 = vpop.f32.mrf.mxu0 }
 0x3d6   : > { %v1864_v20 = vpop.f32.mrf.mxu1 }
 0x3d7   : > { %v1871_v21 = vadd.f32 %v1864_v20, %v1781_v18 }
 0x3d8   : > { %v4193_v61 = vpop.f32.mrf.mxu1 }
 0x3d9   : > { %v5813_v5 = vadd.f32 %v3849_v19, %v1871_v21 }
 0x3da   : > { %v1867_v23 = vpop.f32.mrf.mxu1 }
 0x3db   : > { %v1872_v24 = vadd.f32 %v1867_v23, %v1784_v22  ;;  %v1892_v26 = vmul.f32 %v5813_v5, %v5813_v5  ;;  %v1883_v29 = vsel %vm1386_vm8, %v5813_v5, 0.0 }
 0x3dc   : > { %v4194_v25 = vpop.f32.mrf.mxu1 }
 0x3dd   : > { %v5817_v28 = vadd.f32 %v3849_v19, %v1872_v24  ;;  %v1894_v33 = vsel %vm1386_vm8, %v1892_v26, 0.0 }
 0x3df   : > { %v1884_v30 = vsel %vm1386_vm8, %v5817_v28, 0.0  ;;  %v1893_v31 = vmul.f32 %v5817_v28, %v5817_v28 }
 0x3e0   : > { %v1885_v32 = vadd.f32 %v1884_v30, %v1883_v29  ;;  %v3852_v29 = vld [vmem:[%s6269_s26] ss:$0 sm:$0xff]  ;;  %s6275_s26 = sld [smem:[#allocation48_spill]] }
 0x3e1   : > { %v1895_v34 = vsel %vm1386_vm8, %v1893_v31, 0.0 }
 0x3e2   : > { %v1886_v35 = vrot.slane %v1885_v32, 4  ;;  %v1896_v36 = vadd.f32 %v1895_v34, %v1894_v33 }
 0x3e4   : > { %v1887_v37 = vadd.f32 %v1886_v35, %v1885_v32  ;;  %v1897_v47 = vrot.slane %v1896_v36, 4  ;;  %v3853_v32 = vld [vmem:[%s6270_s24] ss:$0 sm:$0xff]  ;;  %s6076_s24 = scalar_lea.vmem [#allocation24], %s3812_s16  ;;  %s6205_s16 = sshll.u32 %s5431_s0, 8 }
 0x3e6   : > { %v1888_v48 = vrot.slane %v1887_v37, 2  ;;  %v1898_v49 = vadd.f32 %v1897_v47, %v1896_v36 }
 0x3e8   : > { %v1889_v50 = vadd.f32 %v1888_v48, %v1887_v37  ;;  %v1899_v51 = vrot.slane %v1898_v49, 2 }
 0x3ea   : > { %v1890_v53 = vrot.slane %v1889_v50, 1  ;;  %v1900_v54 = vadd.f32 %v1899_v51, %v1898_v49 }
 0x3ec   : > { %v1891_v55 = vadd.f32 %v1890_v53, %v1889_v50  ;;  %v1901_v56 = vrot.slane %v1900_v54, 1 }
 0x3ee   : > { %4212 = vmatmul.mubr.msk.f32.vlgmr.msra.gmra.mxu0 %vm1386_vm8, %v1891_v55  ;;  %v1902_v58 = vadd.f32 %v1901_v56, %v1900_v54 }
 0x3ef   : > { %4234 = vmatpush3.bf16.msra.mxu0 %v2107_v57  ;;  %4235 = vmatprep.mubr.msk.bf16.mxu0 %vm5249_vm0, %v5248_v1 }
 0x3f0   : > { %4231 = vmatmul.mubr.msk.f32.vlgmr.msra.gmra.mxu1 %vm1386_vm8, %v1902_v58  ;;  %4239 = vmatprep.subr.bf16.mxu0 %v5248_v1  ;;  %v3857_v58 = vld [vmem:[#allocation8] ss:$0 sm:$0xff] }
 0x3f1   : > { %4267 = vmatprep.mubr.msk.bf16.mxu1 %vm5249_vm0, %v5248_v1  ;;  %4260 = vmatpush3.bf16.msra.mxu1 %v4660_v63 }
 0x3f2   : > { %4236 = vmatmul.mubr.msk.bf16.vlgmr.msra.gmra.mxu0 %vm1217_vm2, %v5615_v10  ;;  %v4659_v10 = vld [vmem:[#allocation20 + $0x30] sm:$0xff]   ;;  %4261 = vmatprep.subr.bf16.mxu1 %v5248_v1 }
 0x3f3   : > { %4243 = vmatprep.mubr.msk.bf16.mxu0 %vm5249_vm0, %v5248_v1  ;;  %4240 = vmatpush3.bf16.msra.mxu0 %v4656_v59 }
 0x3f4   : > { %4241 = vmatprep.subr.bf16.mxu0 %v5248_v1 }
 0x3f5   : > { %4262 = vmatpush3.bf16.msra.mxu1 %v4662_v4 }
 0x3f6   : > { %4263 = vmatprep.subr.bf16.mxu1 %v5248_v1 }
 0x3f7   : > { %4242 = vmatpush3.bf16.msra.mxu0 %v4657_v60 }
 0x3f8   : > { %4247 = vmatprep.subr.bf16.mxu0 %v5248_v1 }
 0x3f9   : > { %4264 = vmatpush3.bf16.msra.mxu1 %v4664_v6 }
 0x3fa   : > { %4244 = vmatmul.mubr.msk.bf16.vlgmr.msra.gmra.mxu0 %vm1156_vm7, %v5654_v38  ;;  %v4663_v38 = vld [vmem:[#allocation20 + $0x20] sm:$0xff]   ;;  %4265 = vmatprep.subr.bf16.mxu1 %v5248_v1 }
 0x3fb   : > { %4255 = vmatprep.mubr.msk.bf16.mxu0 %vm5249_vm0, %v5248_v1  ;;  %4248 = vmatpush3.bf16.msra.mxu0 %v4658_v62 }
 0x3fc   : > { %4249 = vmatprep.subr.bf16.mxu0 %v5248_v1 }
 0x3fd   : > { %4266 = vmatpush3.bf16.msra.mxu1 %v4666_v7 }
 0x3fe   : > { %4283 = vmatprep.subr.mxu1 %v5248_v1 }
 0x3ff   : > { %4250 = vmatpush3.bf16.msra.mxu0 %v4659_v10 }
 0x400   : > { %4251 = vmatprep.subr.bf16.mxu0 %v5248_v1 }
 0x403   : > { %4252 = vmatpush3.bf16.msra.mxu0 %v4661_v0 }
 0x404   : > { %4253 = vmatprep.subr.bf16.mxu0 %v5248_v1 }
 0x407   : > { %4254 = vmatpush3.bf16.msra.mxu0 %v4663_v38 }
 0x408   : > { %4271 = vmatprep.subr.bf16.mxu0 %v5248_v1 }
 0x4ae   : > { %v1972_v8 = vpop.f32.mrf.mxu0 }
 0x4af   : > { %v1976_v9 = vmul.f32 0.0078125, %v1972_v8 }
 0x4b0   : > { %v4213_v11 = vpop.f32.mrf.mxu0  ;;  %v2046_v12 = vpop.f32.mrf.mxu1 }
 0x4b1   : > { %v2051_v13 = vmul.f32 %v1976_v9, %v1976_v9  ;;  %v2050_v14 = vmul.f32 0.0078125, %v2046_v12  ;;  %v2059_v22 = vrot.slane %v1976_v9, %v5734_v27  ;;  %v4665_v9 = vld [vmem:[#allocation20 + $0x58] sm:$0xff]  }
 0x4b2   : > { %v4232_v15 = vpop.f32.mrf.mxu1  ;;  %v2143_v16 = vpop.f32.mrf.mxu0 }
 0x4b3   : > { %v2052_v17 = vsub.f32 %v2050_v14, %v2051_v13  ;;  %v2060_v24 = vsub.f32 %v5813_v5, %v2059_v22  ;;  %v2061_v25 = vsub.f32 %v5817_v28, %v2059_v22  ;;  %v2156_v0 = vadd.f32 %v3857_v58, %v2143_v16  ;;  %v4667_v16 = vld [vmem:[#allocation20 + $0x50] sm:$0xff]  }
 0x4b4   : > { %v4237_v18 = vpop.f32.mrf.mxu0 }
 0x4b5   : > { %v2053_v19 = vmax.f32 %v2052_v17, 0.0 }
 0x4b6   : > { %v2146_v20 = vpop.f32.mrf.mxu0 }
 0x4b7   : > { %v2054_v21 = vadd.f32 1e-05, %v2053_v19  ;;  %v2157_v38 = vadd.f32 %v3857_v58, %v2146_v20  ;;  %v2164_v20 = vld [vmem:[#allocation17] sm:$0x1] }
 0x4b8   : > { %v4238_v61 = vpop.f32.mrf.mxu0 }
 0x4b9   : > { %4708 = vrsqrt.f32 %v2054_v21  ;;  %v4668_v21 = vld [vmem:[#allocation20 + $0x48] sm:$0xff]  }
 0x4ba   : > { %v2211_v61 = vpop.f32.mrf.mxu0 }
 0x4bb   : > { %v5897_v22 = vadd.f32 %v2211_v61, %v2164_v20  ;;  %v4675_v20 = vld [vmem:[#allocation22 + $0x20] sm:$0xff]  }
 0x4c6   : > { %v4709_v23 = vpop.eup %4708 }
 0x4c7   : > { %v2065_v26 = vrot.slane %v4709_v23, %v5734_v27 }
 0x4c9   : > { %v2066_v30 = vmul.f32 %v2065_v26, %v2060_v24  ;;  %v2067_v31 = vmul.f32 %v2065_v26, %v2061_v25  ;;  %v4245_v24 = vpop.f32.mrf.mxu0  ;;  %v4669_v25 = vld [vmem:[#allocation20 + $0x40] sm:$0xff]   ;;  %v2686_v26 = vrot.slane %v5897_v22, %v5734_v27 }
 0x4cb   : > { %v2074_v33 = vmul.f32 %v3852_v29, %v2066_v30  ;;  %v2075_v34 = vmul.f32 %v3852_v29, %v2067_v31  ;;  %v2214_v29 = vpop.f32.mrf.mxu0  ;;  %2688 = vrot.lane.b32.xlu0 %v2686_v26, %s5250_s3  ;;  %s6272_s3 = sld [smem:[#allocation47_spill]] }
 0x4cd   : > { %v2082_v35 = vadd.f32 %v3853_v32, %v2074_v33  ;;  %v2083_v36 = vadd.f32 %v3853_v32, %v2075_v34  ;;  %v4246_v32 = vpop.f32.mrf.mxu0 }
 0x4cf   : > { %v2084_v37 = vmin.f32 %v2082_v35, 20.0  ;;  %v2085_v47 = vmin.f32 %v2083_v36, 20.0 }
 0x4d1   : > { %v2086_v48 = vmul.f32 1.442695, %v2084_v37  ;;  %v2088_v49 = vmul.f32 1.442695, %v2085_v47 }
 0x4d3   : > { %4710 = vpow2.f32 %v2086_v48 }
 0x4d4   : > { %4712 = vpow2.f32 %v2088_v49 }
 0x4e0   : > { %v4711_v5 = vpop.eup %4710 }
 0x4e1   : > { %v4713_v50 = vpop.eup %4712  ;;  %v2090_v28 = vadd.f32 1.0, %v4711_v5 }
 0x4e2   : > { %v2091_v51 = vadd.f32 1.0, %v4713_v50 }
 0x4e3   : > { %v2092_v52 = vmul.f32 %v2090_v28, %v2090_v28 }
 0x4e4   : > { %v2093_v53 = vmul.f32 %v2091_v51, %v2091_v51 }
 0x4e5   : > { %v2098_v54 = vadd.f32 1.0, %v2092_v52  ;;  %v3854_v56 = vadd.f32 -1.0, %v2092_v52 }
 0x4e6   : > { %v2099_v55 = vadd.f32 1.0, %v2093_v53  ;;  %v3855_v57 = vadd.f32 -1.0, %v2093_v53 }
 0x4e7   : > { %4714 = vrcp.f32 %v2098_v54  ;;  %v2096_v59 = vmul.f32 %v3854_v56, %v2082_v35 }
 0x4e8   : > { %4716 = vrcp.f32 %v2099_v55  ;;  %v2097_v62 = vmul.f32 %v3855_v57, %v2083_v36 }
 0x4f4   : > { %v4715_v60 = vpop.eup %4714 }
 0x4f5   : > { %v4717_v10 = vpop.eup %4716  ;;  %v2102_v63 = vmul.f32 %v4715_v60, %v2096_v59 }
 0x4f6   : > { %v2103_v4 = vmul.f32 %v4717_v10, %v2097_v62 }
 0x4f7   : > { %v5863_v6 = vadd.f32 %v2156_v0, %v2102_v63 }
 0x4f8   : > { %v5865_v7 = vadd.f32 %v2157_v38, %v2103_v4 }
 0x4f9   : > { %v2226_v8 = vrot.slane %v5863_v6, 7  ;;  %3194 = vst.msk [vmem:[%s5870_s15] sm:$0xff] %vm1386_vm8, %v5863_v6  ;;  %v2388_v18 = vrot.slane %v5863_v6, 1 }
 0x4fa   : > { %v2227_v11 = vrot.slane %v5865_v7, 7  ;;  %3195 = vst.msk [vmem:[%s5870_s15 + $0x8] sm:$0xff] %vm1386_vm8, %v5865_v7  ;;  %v2242_v12 = vpack.c.bf16 %v5865_v7, %v5863_v6  ;;  %v2389_v19 = vrot.slane %v5865_v7, 1 }
 0x4fc   : > { %4256 = vmatmul.mubr.msk.bf16.vlgmr.msra.gmra.mxu0 %vm1386_vm8, %v2242_v12  ;;  %v2228_v13 = vsel %vm1204_vm3, %v2226_v8, %v2227_v11  ;;  %v2229_v14 = vsel %vm1204_vm3, %v2227_v11, %v2226_v8  ;;  %v2391_v23 = vsel %vm1317_vm4, %v2389_v19, %v2388_v18  ;;  %v2390_v30 = vsel %vm1317_vm4, %v2388_v18, %v2389_v19  ;;  %v4673_v18 = vld [vmem:[#allocation22 + $0x28] sm:$0xff]  }
 0x4fd   : > { %4272 = vmatpush3.bf16.msra.mxu0 %v4665_v9  ;;  %v2230_v15 = vsel %vm1121_vm5, %v2229_v14, 0.0  ;;  %4279 = vmatprep.mubr.msk.bf16.mxu0 %vm5249_vm0, %v5248_v1  ;;  %v2393_v31 = vsel %vm1124_vm6, %v2391_v23, 0.0  ;;  %v4670_v14 = vld [vmem:[#allocation22 + $0x38] sm:$0xff]   ;;  %v4676_v19 = vld [vmem:[#allocation22 + $0x8] sm:$0xff]  }
 0x4fe   : > { %4273 = vmatprep.subr.bf16.mxu0 %v5248_v1  ;;  %v2232_v17 = vpack.c.bf16 %v2228_v13, %v2230_v15  ;;  %v2394_v33 = vpack.c.bf16 %v2393_v31, %v2390_v30  ;;  %v4672_v15 = vld [vmem:[#allocation22 + $0x18] sm:$0xff]  }
 0x500   : > { %4268 = vmatmul.mubr.msk.bf16.vlgmr.msra.gmra.mxu1 %vm1386_vm8, %v2232_v17  ;;  %v4674_v17 = vld [vmem:[#allocation22 + $0x10] sm:$0xff]  }
 0x501   : > { %4274 = vmatpush3.bf16.msra.mxu0 %v4667_v16  ;;  %4284 = vmatpush3.msra.mxu1 %v5661_v39  ;;  %v4671_v16 = vld [vmem:[#allocation22 + $0x30] sm:$0xff]  }
 0x502   : > { %4275 = vmatprep.subr.bf16.mxu0 %v5248_v1  ;;  %4285 = vmatprep.subr.mxu1 %v5248_v1 }
 0x503   : > { %4286 = vmatpush3.msra.mxu1 %v5667_v40  ;;  %4299 = vmatprep.mubr.msk.f32.mxu1 %vm5249_vm0, %v5248_v1 }
 0x504   : > { %4287 = vmatprep.subr.mxu1 %v5248_v1 }
 0x505   : > { %4276 = vmatpush3.bf16.msra.mxu0 %v4668_v21  ;;  %4288 = vmatpush3.msra.mxu1 %v5674_v41  ;;  %v4678_v21 = vld [vmem:[#allocation22] sm:$0xff]  }
 0x506   : > { %4277 = vmatprep.subr.bf16.mxu0 %v5248_v1  ;;  %4289 = vmatprep.subr.mxu1 %v5248_v1 }
 0x507   : > { %4290 = vmatpush3.msra.mxu1 %v5681_v42 }
 0x508   : > { %4291 = vmatprep.subr.mxu1 %v5248_v1 }
 0x509   : > { %4278 = vmatpush3.bf16.msra.mxu0 %v4669_v25  ;;  %4292 = vmatpush3.msra.mxu1 %v5688_v43 }
 0x50a   : > { %4302 = vmatprep.subr.mxu0 %v5248_v1  ;;  %4293 = vmatprep.subr.mxu1 %v5248_v1 }
 0x50b   : > { %4294 = vmatpush3.msra.mxu1 %v5695_v44 }
 0x50c   : > { %4280 = vmatmul.mubr.msk.bf16.vlgmr.msra.gmra.mxu0 %vm1386_vm8, %v2394_v33  ;;  %4295 = vmatprep.subr.mxu1 %v5248_v1 }
 0x50d   : > { %4303 = vmatpush3.msra.mxu0 %v5661_v39  ;;  %4296 = vmatpush3.msra.mxu1 %v5699_v45 }
 0x50e   : > { %4304 = vmatprep.subr.mxu0 %v5248_v1  ;;  %4297 = vmatprep.subr.mxu1 %v5248_v1 }
 0x50f   : > { %4305 = vmatpush3.msra.mxu0 %v5667_v40  ;;  %4298 = vmatpush3.msra.mxu1 %v5706_v46 }
 0x510   : > { %4306 = vmatprep.subr.mxu0 %v5248_v1  ;;  %4318 = vmatprep.mubr.msk.f32.mxu0 %vm5249_vm0, %v5248_v1 }
 0x511   : > { %4307 = vmatpush3.msra.mxu0 %v5674_v41  ;;  %4321 = vmatprep.subr.bf16.mxu1 %v5248_v1 }
 0x512   : > { %4308 = vmatprep.subr.mxu0 %v5248_v1 }
 0x513   : > { %4309 = vmatpush3.msra.mxu0 %v5681_v42 }
 0x514   : > { %4310 = vmatprep.subr.mxu0 %v5248_v1 }
 0x515   : > { %4311 = vmatpush3.msra.mxu0 %v5688_v43 }
 0x516   : > { %4312 = vmatprep.subr.mxu0 %v5248_v1 }
 0x517   : > { %4313 = vmatpush3.msra.mxu0 %v5695_v44  ;;  %v3876_v44 = vld [vmem:[#allocation14] ss:$0 sm:$0xff] }
 0x518   : > { %4314 = vmatprep.subr.mxu0 %v5248_v1 }
 0x519   : > { %4315 = vmatpush3.msra.mxu0 %v5699_v45 }
 0x51a   : > { %4316 = vmatprep.subr.mxu0 %v5248_v1 }
 0x51b   : > { %4317 = vmatpush3.msra.mxu0 %v5706_v46 }
 0x51c   : > { %4333 = vmatprep.subr.bf16.mxu0 %v5248_v1 }
 0x5bc   : > { %v2304_v39 = vpop.f32.mrf.mxu0 }
 0x5be   : > { %v4257_v40 = vpop.f32.mrf.mxu0 }
 0x5c0   : > { %v2307_v41 = vpop.f32.mrf.mxu0  ;;  %v2372_v42 = vpop.f32.mrf.mxu1 }
 0x5c1   : > { %v2373_v37 = vadd.f32 %v2372_v42, %v2304_v39 }
 0x5c2   : > { %v4258_v34 = vpop.f32.mrf.mxu0  ;;  %v4269_v43 = vpop.f32.mrf.mxu1 }
 0x5c3   : > { %v3879_v43 = vld [vmem:[%s6271_s1] ss:$0 sm:$0xff]  ;;  %s3480_s1 = sshll.u32 %s5870_s15, 4  ;;  %s6112_s1 = int_to_ptr.vmem [resolvable:$true] %s3480_s1 }
 0x5c4   : > { %v2375_v35 = vpop.f32.mrf.mxu1  ;;  %p5091_p12 = scmp.lt.s32.totalorder %s6112_s1, %s5089_s2 }
 0x5c5   : > { %v2376_v45 = vadd.f32 %v2375_v35, %v2307_v41  ;;  %v2676_v35 = vadd.f32 1.0, %v5897_v22 }
 0x5c6   : > { %v4270_v36 = vpop.f32.mrf.mxu1 }
 0x5cc   : > { %v2456_v47 = vpop.f32.mrf.mxu0 }
 0x5cd   : > { %v2463_v48 = vadd.f32 %v2456_v47, %v2373_v37 }
 0x5ce   : > { %v4281_v49 = vpop.f32.mrf.mxu0 }
 0x5cf   : > { %v5945_v5 = vadd.f32 %v3876_v44, %v2463_v48  ;;  %v2680_v49 = vrot.slane %v2676_v35, %v5734_v27  ;;  %v4745_v35 = vld [vmem:[%s6266_s22] sm:$0xff] }
 0x5d0   : > { %v2459_v50 = vpop.f32.mrf.mxu0 }
 0x5d1   : > { %v2464_v46 = vadd.f32 %v2459_v50, %v2376_v45  ;;  %v2484_v51 = vmul.f32 %v5945_v5, %v5945_v5  ;;  %v2475_v53 = vsel %vm1386_vm8, %v5945_v5, 0.0 }
 0x5d2   : > { %v4282_v28 = vpop.f32.mrf.mxu0 }
 0x5d3   : > { %v5949_v52 = vadd.f32 %v3876_v44, %v2464_v46  ;;  %v2486_v57 = vsel %vm1386_vm8, %v2484_v51, 0.0  ;;  %v3880_v44 = vld [vmem:[%s6272_s3] ss:$0 sm:$0xff]  ;;  %v2689_v51 = vpop.permute.xlu0 %2688  ;;  %s6110_s3 = scalar_lea.hbm %s6227_s13, %s6205_s16 }
 0x5d5   : > { %v2476_v54 = vsel %vm1386_vm8, %v5949_v52, 0.0  ;;  %v2485_v55 = vmul.f32 %v5949_v52, %v5949_v52 }
 0x5d6   : > { %v2477_v56 = vadd.f32 %v2476_v54, %v2475_v53 }
 0x5d7   : > { %v2487_v58 = vsel %vm1386_vm8, %v2485_v55, 0.0 }
 0x5d8   : > { %v2478_v59 = vrot.slane %v2477_v56, 4  ;;  %v2488_v60 = vadd.f32 %v2487_v58, %v2486_v57 }
 0x5da   : > { %v2479_v62 = vadd.f32 %v2478_v59, %v2477_v56  ;;  %v2489_v10 = vrot.slane %v2488_v60, 4 }
 0x5dc   : > { %v2480_v63 = vrot.slane %v2479_v62, 2  ;;  %v2490_v0 = vadd.f32 %v2489_v10, %v2488_v60 }
 0x5de   : > { %v2481_v4 = vadd.f32 %v2480_v63, %v2479_v62  ;;  %v2491_v38 = vrot.slane %v2490_v0, 2 }
 0x5e0   : > { %v2482_v8 = vrot.slane %v2481_v4, 1  ;;  %v2492_v9 = vadd.f32 %v2491_v38, %v2490_v0 }
 0x5e2   : > { %v2483_v11 = vadd.f32 %v2482_v8, %v2481_v4  ;;  %v2493_v12 = vrot.slane %v2492_v9, 1 }
 0x5e4   : > { %4300 = vmatmul.mubr.msk.f32.vlgmr.msra.gmra.mxu1 %vm1386_vm8, %v2483_v11  ;;  %v2494_v13 = vadd.f32 %v2493_v12, %v2492_v9 }
 0x5e5   : > { %4329 = vmatprep.mubr.msk.bf16.mxu1 %vm5249_vm0, %v5248_v1  ;;  %4322 = vmatpush3.bf16.msra.mxu1 %v4670_v14  ;;  %v4677_v14 = vld [vmem:[#allocation22 + $0x58] sm:$0xff]  }
 0x5e6   : > { %4319 = vmatmul.mubr.msk.f32.vlgmr.msra.gmra.mxu0 %vm1386_vm8, %v2494_v13  ;;  %4323 = vmatprep.subr.bf16.mxu1 %v5248_v1 }
 0x5e7   : > { %4341 = vmatprep.mubr.msk.bf16.mxu0 %vm5249_vm0, %v5248_v1  ;;  %4334 = vmatpush3.bf16.msra.mxu0 %v4672_v15 }
 0x5e8   : > { %4335 = vmatprep.subr.bf16.mxu0 %v5248_v1 }
 0x5e9   : > { %4324 = vmatpush3.bf16.msra.mxu1 %v4671_v16 }
 0x5ea   : > { %4325 = vmatprep.subr.bf16.mxu1 %v5248_v1 }
 0x5eb   : > { %4336 = vmatpush3.bf16.msra.mxu0 %v4674_v17 }
 0x5ec   : > { %4337 = vmatprep.subr.bf16.mxu0 %v5248_v1 }
 0x5ed   : > { %4326 = vmatpush3.bf16.msra.mxu1 %v4673_v18 }
 0x5ee   : > { %4327 = vmatprep.subr.bf16.mxu1 %v5248_v1 }
 0x5ef   : > { %4338 = vmatpush3.bf16.msra.mxu0 %v4676_v19 }
 0x5f0   : > { %4339 = vmatprep.subr.bf16.mxu0 %v5248_v1 }
 0x5f1   : > { %4328 = vmatpush3.bf16.msra.mxu1 %v4675_v20 }
 0x5f2   : > { %4345 = vmatprep.subr.bf16.mxu1 %v5248_v1 }
 0x5f3   : > { %4340 = vmatpush3.bf16.msra.mxu0 %v4678_v21  ;;  %v4679_v21 = vld [vmem:[#allocation22 + $0x50] sm:$0xff]  }
 0x5f4   : > { %4357 = vmatprep.subr.mxu0 %v5248_v1 }
 0x6a4   : > { %v2564_v61 = vpop.f32.mrf.mxu1 }
 0x6a5   : > { %v2568_v23 = vmul.f32 0.0078125, %v2564_v61 }
 0x6a6   : > { %v4301_v24 = vpop.f32.mrf.mxu1  ;;  %v2638_v25 = vpop.f32.mrf.mxu0 }
 0x6a7   : > { %v2643_v26 = vmul.f32 %v2568_v23, %v2568_v23  ;;  %v2642_v29 = vmul.f32 0.0078125, %v2638_v25  ;;  %v2651_v39 = vrot.slane %v2568_v23, %v5734_v27  ;;  %v4680_v25 = vld [vmem:[#allocation22 + $0x48] sm:$0xff]  }
 0x6a8   : > { %v4320_v30 = vpop.f32.mrf.mxu0 }
 0x6a9   : > { %v2644_v31 = vsub.f32 %v2642_v29, %v2643_v26  ;;  %v2652_v41 = vsub.f32 %v5945_v5, %v2651_v39  ;;  %v2653_v42 = vsub.f32 %v5949_v52, %v2651_v39  ;;  %v4738_v26 = vld [vmem:[%s6266_s22 + $0x38] sm:$0xff]  ;;  %v4739_v29 = vld [vmem:[%s6266_s22 + $0x30] sm:$0xff] }
 0x6ab   : > { %v2645_v32 = vmax.f32 %v2644_v31, 0.0  ;;  %v4681_v31 = vld [vmem:[#allocation22 + $0x40] sm:$0xff]  }
 0x6ad   : > { %v2646_v33 = vadd.f32 1e-05, %v2645_v32  ;;  %v4740_v32 = vld [vmem:[%s6266_s22 + $0x28] sm:$0xff] }
 0x6af   : > { %4718 = vrsqrt.f32 %v2646_v33 }
 0x6bc   : > { %v4719_v40 = vpop.eup %4718 }
 0x6bd   : > { %v2657_v34 = vrot.slane %v4719_v40, %v5734_v27  ;;  %v4741_v40 = vld [vmem:[%s6266_s22 + $0x20] sm:$0xff] }
 0x6bf   : > { %v2658_v36 = vmul.f32 %v2657_v34, %v2652_v41  ;;  %v2659_v37 = vmul.f32 %v2657_v34, %v2653_v42  ;;  %v4742_v41 = vld [vmem:[%s6266_s22 + $0x18] sm:$0xff]  ;;  %v4743_v34 = vld [vmem:[%s6266_s22 + $0x10] sm:$0xff] }
 0x6c1   : > { %v2666_v47 = vmul.f32 %v3879_v43, %v2658_v36  ;;  %v2667_v48 = vmul.f32 %v3879_v43, %v2659_v37  ;;  %v4744_v43 = vld [vmem:[%s6266_s22 + $0x8] sm:$0xff] }
 0x6c3   : > { %v2674_v45 = vadd.f32 %v3880_v44, %v2666_v47  ;;  %v2675_v50 = vadd.f32 %v3880_v44, %v2667_v48 }
 0x6c5   : > { %v2681_v46 = vmul.f32 %v2680_v49, %v2674_v45  ;;  %v2682_v28 = vmul.f32 %v2680_v49, %v2675_v50 }
 0x6c7   : > { %v2691_v5 = vadd.f32 %v2689_v51, %v2681_v46  ;;  %v2692_v53 = vadd.f32 %v2689_v51, %v2682_v28  ;;  %v3898_v28 = vld [vmem:[#allocation16] ss:$0 sm:$0xff] }
 0x6c9   : > { %v2693_v52 = vmin.f32 %v2691_v5, 20.0  ;;  %v2694_v54 = vmin.f32 %v2692_v53, 20.0 }
 0x6cb   : > { %v2695_v55 = vmul.f32 1.442695, %v2693_v52  ;;  %v2697_v56 = vmul.f32 1.442695, %v2694_v54 }
 0x6cd   : > { %4720 = vpow2.f32 %v2695_v55 }
 0x6ce   : > { %4722 = vpow2.f32 %v2697_v56 }
 0x6da   : > { %v4721_v22 = vpop.eup %4720 }
 0x6db   : > { %v4723_v57 = vpop.eup %4722  ;;  %v2699_v58 = vadd.f32 1.0, %v4721_v22 }
 0x6dc   : > { %v2700_v59 = vadd.f32 1.0, %v4723_v57 }
 0x6dd   : > { %v2701_v60 = vmul.f32 %v2699_v58, %v2699_v58 }
 0x6de   : > { %v2702_v62 = vmul.f32 %v2700_v59, %v2700_v59 }
 0x6df   : > { %v2707_v10 = vadd.f32 1.0, %v2701_v60  ;;  %v3881_v0 = vadd.f32 -1.0, %v2701_v60 }
 0x6e0   : > { %v2708_v63 = vadd.f32 1.0, %v2702_v62  ;;  %v3882_v4 = vadd.f32 -1.0, %v2702_v62 }
 0x6e1   : > { %4724 = vrcp.f32 %v2707_v10  ;;  %v2705_v38 = vmul.f32 %v3881_v0, %v2691_v5 }
 0x6e2   : > { %4726 = vrcp.f32 %v2708_v63  ;;  %v2706_v9 = vmul.f32 %v3882_v4, %v2692_v53 }
 0x6ee   : > { %v4725_v8 = vpop.eup %4724 }
 0x6ef   : > { %v4727_v11 = vpop.eup %4726  ;;  %v2711_v12 = vmul.f32 %v4725_v8, %v2705_v38 }
 0x6f0   : > { %v2712_v13 = vmul.f32 %v4727_v11, %v2706_v9 }
 0x6f1   : > { %v2722_v15 = vrot.slane %v2711_v12, 7  ;;  %v2884_v23 = vrot.slane %v2711_v12, 1 }
 0x6f2   : > { %v2738_v16 = vpack.c.bf16 %v2712_v13, %v2711_v12  ;;  %v2723_v17 = vrot.slane %v2712_v13, 7  ;;  %v2885_v24 = vrot.slane %v2712_v13, 1 }
 0x6f4   : > { %4330 = vmatmul.mubr.msk.bf16.vlgmr.msra.gmra.mxu1 %vm1386_vm8, %v2738_v16  ;;  %v2724_v18 = vsel %vm1204_vm3, %v2722_v15, %v2723_v17  ;;  %v2725_v19 = vsel %vm1204_vm3, %v2723_v17, %v2722_v15  ;;  %v2887_v30 = vsel %vm1317_vm4, %v2885_v24, %v2884_v23  ;;  %v2886_v33 = vsel %vm1317_vm4, %v2884_v23, %v2885_v24  ;;  %v4686_v23 = vld [vmem:[%s6273_s23 + $0x10] sm:$0xff]   ;;  %v4685_v24 = vld [vmem:[%s6273_s23 + $0x28] sm:$0xff]  }
 0x6f5   : > { %4346 = vmatpush3.bf16.msra.mxu1 %v4677_v14  ;;  %v2726_v20 = vsel %vm1121_vm5, %v2725_v19, 0.0  ;;  %4353 = vmatprep.mubr.msk.bf16.mxu1 %vm5249_vm0, %v5248_v1  ;;  %v2889_v39 = vsel %vm1124_vm6, %v2887_v30, 0.0 }
 0x6f6   : > { %4347 = vmatprep.subr.bf16.mxu1 %v5248_v1  ;;  %v2728_v61 = vpack.c.bf16 %v2724_v18, %v2726_v20  ;;  %v2890_v42 = vpack.c.bf16 %v2889_v39, %v2886_v33  ;;  %v4682_v20 = vld [vmem:[%s6273_s23 + $0x38] sm:$0xff]  }
 0x6f8   : > { %4342 = vmatmul.mubr.msk.bf16.vlgmr.msra.gmra.mxu0 %vm1386_vm8, %v2728_v61  ;;  %v4683_v61 = vld [vmem:[%s6273_s23 + $0x30] sm:$0xff]  }
 0x6f9   : > { %4348 = vmatpush3.bf16.msra.mxu1 %v4679_v21  ;;  %4358 = vmatpush3.msra.mxu0 %v4738_v26  ;;  %v4684_v21 = vld [vmem:[%s6273_s23 + $0x18] sm:$0xff]  }
 0x6fa   : > { %4349 = vmatprep.subr.bf16.mxu1 %v5248_v1  ;;  %4359 = vmatprep.subr.mxu0 %v5248_v1 }
 0x6fb   : > { %4360 = vmatpush3.msra.mxu0 %v4739_v29  ;;  %4373 = vmatprep.mubr.msk.f32.mxu0 %vm5249_vm0, %v5248_v1 }
 0x6fc   : > { %4361 = vmatprep.subr.mxu0 %v5248_v1 }
 0x6fd   : > { %4350 = vmatpush3.bf16.msra.mxu1 %v4680_v25  ;;  %4362 = vmatpush3.msra.mxu0 %v4740_v32  ;;  %v4688_v25 = vld [vmem:[%s6273_s23 + $0x8] sm:$0xff]  }
 0x6fe   : > { %4351 = vmatprep.subr.bf16.mxu1 %v5248_v1  ;;  %4363 = vmatprep.subr.mxu0 %v5248_v1 }
 0x6ff   : > { %4364 = vmatpush3.msra.mxu0 %v4741_v40 }
 0x700   : > { %4365 = vmatprep.subr.mxu0 %v5248_v1 }
 0x701   : > { %4352 = vmatpush3.bf16.msra.mxu1 %v4681_v31  ;;  %4366 = vmatpush3.msra.mxu0 %v4742_v41 }
 0x702   : > { %4376 = vmatprep.subr.mxu1 %v5248_v1  ;;  %4367 = vmatprep.subr.mxu0 %v5248_v1 }
 0x703   : > { %4368 = vmatpush3.msra.mxu0 %v4743_v34 }
 0x704   : > { %4354 = vmatmul.mubr.msk.bf16.vlgmr.msra.gmra.mxu1 %vm1386_vm8, %v2890_v42  ;;  %4369 = vmatprep.subr.mxu0 %v5248_v1 }
 0x705   : > { %4377 = vmatpush3.msra.mxu1 %v4738_v26  ;;  %4370 = vmatpush3.msra.mxu0 %v4744_v43  ;;  %v4687_v26 = vld [vmem:[%s6273_s23 + $0x20] sm:$0xff]  }
 0x706   : > { %4378 = vmatprep.subr.mxu1 %v5248_v1  ;;  %4371 = vmatprep.subr.mxu0 %v5248_v1 }
 0x707   : > { %4379 = vmatpush3.msra.mxu1 %v4739_v29  ;;  %4372 = vmatpush3.msra.mxu0 %v4745_v35  ;;  %v4690_v29 = vld [vmem:[%s6273_s23] sm:$0xff]  }
 0x708   : > { %4380 = vmatprep.subr.mxu1 %v5248_v1  ;;  %4392 = vmatprep.mubr.msk.f32.mxu1 %vm5249_vm0, %v5248_v1 }
 0x709   : > { %4381 = vmatpush3.msra.mxu1 %v4740_v32  ;;  %4395 = vmatprep.subr.bf16.mxu0 %v5248_v1 }
 0x70a   : > { %4382 = vmatprep.subr.mxu1 %v5248_v1 }
 0x70b   : > { %4383 = vmatpush3.msra.mxu1 %v4741_v40 }
 0x70c   : > { %4384 = vmatprep.subr.mxu1 %v5248_v1 }
 0x70d   : > { %4385 = vmatpush3.msra.mxu1 %v4742_v41 }
 0x70e   : > { %4386 = vmatprep.subr.mxu1 %v5248_v1 }
 0x70f   : > { %4387 = vmatpush3.msra.mxu1 %v4743_v34 }
 0x710   : > { %4388 = vmatprep.subr.mxu1 %v5248_v1 }
 0x711   : > { %4389 = vmatpush3.msra.mxu1 %v4744_v43 }
 0x712   : > { %4390 = vmatprep.subr.mxu1 %v5248_v1 }
 0x713   : > { %4391 = vmatpush3.msra.mxu1 %v4745_v35 }
 0x714   : > { %4407 = vmatprep.subr.bf16.mxu1 %v5248_v1 }
 0x7b4   : > { %v2800_v36 = vpop.f32.mrf.mxu1 }
 0x7b6   : > { %v4331_v37 = vpop.f32.mrf.mxu1 }
 0x7b8   : > { %v2803_v44 = vpop.f32.mrf.mxu1  ;;  %v2868_v47 = vpop.f32.mrf.mxu0 }
 0x7b9   : > { %v2869_v46 = vadd.f32 %v2868_v47, %v2800_v36 }
 0x7ba   : > { %v4332_v48 = vpop.f32.mrf.mxu1  ;;  %v4343_v49 = vpop.f32.mrf.mxu0 }
 0x7bb   : > { %v3901_v48 = vld [vmem:[%s6274_s18] ss:$0 sm:$0xff]  ;;  %s3457_s18 = scalar_lea.sflag [#allocation4], %s5860_s7 }
 0x7bc   : > { %v2871_v45 = vpop.f32.mrf.mxu0 }
 0x7bd   : > { %v2872_v52 = vadd.f32 %v2871_v45, %v2803_v44 }
 0x7be   : > { %v4344_v50 = vpop.f32.mrf.mxu0 }
 0x7bf   : > { %v3902_v50 = vld [vmem:[%s6275_s26] ss:$0 sm:$0xff]  ;;  %s5084_s26 = scalar_lea.vmem %s6112_s1, 256 }
 0x7c0   : > { %p5085_p13 = scmp.ne.s32.totalorder %s6112_s1, %s5084_s26  ;;  %p5092_p0 = scmp.lt.s32.totalorder %s5090_s5, %s5084_s26 }
 0x7c2   : > { %p5086_p8 = pnand %p5085_p13, %p6276_p7  ;;  %p5093_p1 = por %p5092_p0, %p5091_p12 }
 0x7c4   : > { %v2952_v51 = vpop.f32.mrf.mxu1  ;;  %p5087_p11 = pneg %p5086_p8 }
 0x7c5   : > { %v2959_v5 = vadd.f32 %v2952_v51, %v2869_v46 }
 0x7c6   : > { %v4355_v53 = vpop.f32.mrf.mxu1  ;;  %p5094_p2 = pnand %p5093_p1, %p5087_p11 }
 0x7c7   : > { %v6030_v54 = vadd.f32 %v3898_v28, %v2959_v5 }
 0x7c8   : > { %v2955_v55 = vpop.f32.mrf.mxu1 }
 0x7c9   : > { %v2960_v56 = vadd.f32 %v2955_v55, %v2872_v52  ;;  %v2980_v57 = vmul.f32 %v6030_v54, %v6030_v54  ;;  %v2971_v59 = vsel %vm1386_vm8, %v6030_v54, 0.0 }
 0x7ca   : > { %v4356_v22 = vpop.f32.mrf.mxu1 }
 0x7cb   : > { %v6034_v58 = vadd.f32 %v3898_v28, %v2960_v56  ;;  %v2982_v63 = vsel %vm1386_vm8, %v2980_v57, 0.0 }
 0x7cd   : > { %v2972_v60 = vsel %vm1386_vm8, %v6034_v58, 0.0  ;;  %v2981_v62 = vmul.f32 %v6034_v58, %v6034_v58 }
 0x7ce   : > { %v2973_v10 = vadd.f32 %v2972_v60, %v2971_v59 }
 0x7cf   : > { %v2983_v0 = vsel %vm1386_vm8, %v2981_v62, 0.0 }
 0x7d0   : > { %v2974_v4 = vrot.slane %v2973_v10, 4  ;;  %v2984_v38 = vadd.f32 %v2983_v0, %v2982_v63 }
 0x7d2   : > { %v2975_v8 = vadd.f32 %v2974_v4, %v2973_v10  ;;  %v2985_v9 = vrot.slane %v2984_v38, 4 }
 0x7d4   : > { %v2976_v11 = vrot.slane %v2975_v8, 2  ;;  %v2986_v12 = vadd.f32 %v2985_v9, %v2984_v38 }
 0x7d6   : > { %v2977_v13 = vadd.f32 %v2976_v11, %v2975_v8  ;;  %v2987_v14 = vrot.slane %v2986_v12, 2 }
 0x7d8   : > { %v2978_v15 = vrot.slane %v2977_v13, 1  ;;  %v2988_v16 = vadd.f32 %v2987_v14, %v2986_v12  ;;  %v4689_v14 = vld [vmem:[%s6273_s23 + $0x58] sm:$0xff]  }
 0x7da   : > { %v2979_v17 = vadd.f32 %v2978_v15, %v2977_v13  ;;  %v2989_v18 = vrot.slane %v2988_v16, 1 }
 0x7dc   : > { %4374 = vmatmul.mubr.msk.f32.vlgmr.msra.gmra.mxu0 %vm1386_vm8, %v2979_v17  ;;  %v2990_v19 = vadd.f32 %v2989_v18, %v2988_v16 }
 0x7dd   : > { %4403 = vmatprep.mubr.msk.bf16.mxu0 %vm5249_vm0, %v5248_v1  ;;  %4396 = vmatpush3.bf16.msra.mxu0 %v4682_v20 }
 0x7de   : > { %4393 = vmatmul.mubr.msk.f32.vlgmr.msra.gmra.mxu1 %vm1386_vm8, %v2990_v19  ;;  %4397 = vmatprep.subr.bf16.mxu0 %v5248_v1  ;;  %v4691_v19 = vld [vmem:[%s6273_s23 + $0x50] sm:$0xff]  }
 0x7df   : > { %4415 = vmatprep.mubr.msk.bf16.mxu1 %vm5249_vm0, %v5248_v1  ;;  %4408 = vmatpush3.bf16.msra.mxu1 %v4684_v21 }
 0x7e0   : > { %4409 = vmatprep.subr.bf16.mxu1 %v5248_v1 }
 0x7e1   : > { %4398 = vmatpush3.bf16.msra.mxu0 %v4683_v61 }
 0x7e2   : > { %4399 = vmatprep.subr.bf16.mxu0 %v5248_v1 }
 0x7e3   : > { %4410 = vmatpush3.bf16.msra.mxu1 %v4686_v23  ;;  %v4692_v23 = vld [vmem:[%s6273_s23 + $0x48] sm:$0xff]  }
 0x7e4   : > { %4411 = vmatprep.subr.bf16.mxu1 %v5248_v1 }
 0x7e5   : > { %4400 = vmatpush3.bf16.msra.mxu0 %v4685_v24 }
 0x7e6   : > { %4401 = vmatprep.subr.bf16.mxu0 %v5248_v1 }
 0x7e7   : > { %4412 = vmatpush3.bf16.msra.mxu1 %v4688_v25  ;;  %v4693_v25 = vld [vmem:[%s6273_s23 + $0x40] sm:$0xff]  }
 0x7e8   : > { %4413 = vmatprep.subr.bf16.mxu1 %v5248_v1 }
 0x7e9   : > { %4402 = vmatpush3.bf16.msra.mxu0 %v4687_v26 }
 0x7ea   : > { %4419 = vmatprep.subr.bf16.mxu0 %v5248_v1 }
 0x7eb   : > { %4414 = vmatpush3.bf16.msra.mxu1 %v4690_v29 }
 0x89c   : > { %v3060_v30 = vpop.f32.mrf.mxu0 }
 0x89d   : > { %v3064_v31 = vmul.f32 0.0078125, %v3060_v30 }
 0x89e   : > { %v4375_v32 = vpop.f32.mrf.mxu0  ;;  %v3134_v33 = vpop.f32.mrf.mxu1 }
 0x89f   : > { %v3139_v39 = vmul.f32 %v3064_v31, %v3064_v31  ;;  %v3138_v40 = vmul.f32 0.0078125, %v3134_v33  ;;  %v3147_v35 = vrot.slane %v3064_v31, %v5734_v27 }
 0x8a0   : > { %v4394_v41 = vpop.f32.mrf.mxu1 }
 0x8a1   : > { %v3140_v42 = vsub.f32 %v3138_v40, %v3139_v39  ;;  %v3148_v37 = vsub.f32 %v6030_v54, %v3147_v35  ;;  %v3149_v44 = vsub.f32 %v6034_v58, %v3147_v35 }
 0x8a3   : > { %v3141_v34 = vmax.f32 %v3140_v42, 0.0 }
 0x8a5   : > { %v3142_v43 = vadd.f32 1e-05, %v3141_v34 }
 0x8a7   : > { %4728 = vrsqrt.f32 %v3142_v43 }
 0x8b4   : > { %v4729_v36 = vpop.eup %4728 }
 0x8b5   : > { %v3153_v47 = vrot.slane %v4729_v36, %v5734_v27 }
 0x8b7   : > { %v3154_v49 = vmul.f32 %v3153_v47, %v3148_v37  ;;  %v3155_v45 = vmul.f32 %v3153_v47, %v3149_v44 }
 0x8b9   : > { %v3162_v46 = vmul.f32 %v3901_v48, %v3154_v49  ;;  %v3163_v28 = vmul.f32 %v3901_v48, %v3155_v45 }
 0x8bb   : > { %v3170_v51 = vadd.f32 %v3902_v50, %v3162_v46  ;;  %v3171_v5 = vadd.f32 %v3902_v50, %v3163_v28 }
 0x8bd   : > { %v3172_v53 = vmin.f32 %v3170_v51, 20.0  ;;  %v3173_v52 = vmin.f32 %v3171_v5, 20.0 }
 0x8bf   : > { %v3174_v55 = vmul.f32 1.442695, %v3172_v53  ;;  %v3176_v56 = vmul.f32 1.442695, %v3173_v52 }
 0x8c1   : > { %4730 = vpow2.f32 %v3174_v55 }
 0x8c2   : > { %4732 = vpow2.f32 %v3176_v56 }
 0x8ce   : > { %v4731_v22 = vpop.eup %4730 }
 0x8cf   : > { %v4733_v54 = vpop.eup %4732  ;;  %v3178_v57 = vadd.f32 1.0, %v4731_v22 }
 0x8d0   : > { %v3179_v58 = vadd.f32 1.0, %v4733_v54 }
 0x8d1   : > { %v3180_v59 = vmul.f32 %v3178_v57, %v3178_v57 }
 0x8d2   : > { %v3181_v27 = vmul.f32 %v3179_v58, %v3179_v58 }
 0x8d3   : > { %v3186_v60 = vadd.f32 1.0, %v3180_v59  ;;  %v3903_v10 = vadd.f32 -1.0, %v3180_v59 }
 0x8d4   : > { %v3187_v62 = vadd.f32 1.0, %v3181_v27  ;;  %v3904_v63 = vadd.f32 -1.0, %v3181_v27 }
 0x8d5   : > { %4734 = vrcp.f32 %v3186_v60  ;;  %v3184_v0 = vmul.f32 %v3903_v10, %v3170_v51 }
 0x8d6   : > { %4736 = vrcp.f32 %v3187_v62  ;;  %v3185_v38 = vmul.f32 %v3904_v63, %v3171_v5 }
 0x8e2   : > { %v4735_v4 = vpop.eup %4734 }
 0x8e3   : > { %v4737_v8 = vpop.eup %4736  ;;  %v3190_v9 = vmul.f32 %v4735_v4, %v3184_v0 }
 0x8e4   : > { %v3191_v11 = vmul.f32 %v4737_v8, %v3185_v38 }
 0x8e5   : > { %v3192_v12 = vadd.f32 %v3190_v9, %v5863_v6 }
 0x8e6   : > { %v3193_v13 = vadd.f32 %v3191_v11, %v5865_v7 }
 0x8e7   : > { %v3207_v15 = vrot.slane %v3192_v12, 7  ;;  %3196 = vst.msk [vmem:[%s6076_s24] sm:$0xff] %vm1386_vm8, %v3192_v12  ;;  %v3369_v21 = vrot.slane %v3192_v12, 1 }
 0x8e8   : > { %v3223_v16 = vpack.c.bf16 %v3193_v13, %v3192_v12  ;;  %v3208_v17 = vrot.slane %v3193_v13, 7  ;;  %3197 = vst.msk [vmem:[%s6076_s24 + $0x8] sm:$0xff] %vm1386_vm8, %v3193_v13  ;;  %v3370_v61 = vrot.slane %v3193_v13, 1 }
 0x8ea   : > { %4404 = vmatmul.mubr.msk.bf16.vlgmr.msra.gmra.mxu0 %vm1386_vm8, %v3223_v16  ;;  %v3209_v6 = vsel %vm1204_vm3, %v3207_v15, %v3208_v17  ;;  %v3210_v7 = vsel %vm1204_vm3, %v3208_v17, %v3207_v15  ;;  %v3372_v24 = vsel %vm1317_vm4, %v3370_v61, %v3369_v21  ;;  %v3371_v26 = vsel %vm1317_vm4, %v3369_v21, %v3370_v61 }
 0x8eb   : > { %4420 = vmatpush3.bf16.msra.mxu0 %v4689_v14  ;;  %v3211_v18 = vsel %vm1121_vm5, %v3210_v7, 0.0  ;;  %4427 = vmatprep.mubr.msk.bf16.mxu0 %vm5249_vm0, %v5248_v1  ;;  %v3374_v29 = vsel %vm1124_vm6, %v3372_v24, 0.0 }
 0x8ec   : > { %4421 = vmatprep.subr.bf16.mxu0 %v5248_v1  ;;  %v3213_v20 = vpack.c.bf16 %v3209_v6, %v3211_v18  ;;  %v3375_v30 = vpack.c.bf16 %v3374_v29, %v3371_v26 }
 0x8ee   : > { %4416 = vmatmul.mubr.msk.bf16.vlgmr.msra.gmra.mxu1 %vm1386_vm8, %v3213_v20 }
 0x8ef   : > { %4422 = vmatpush3.bf16.msra.mxu0 %v4691_v19 }
 0x8f0   : > { %4423 = vmatprep.subr.bf16.mxu0 %v5248_v1 }
 0x8f3   : > { %4424 = vmatpush3.bf16.msra.mxu0 %v4692_v23 }
 0x8f4   : > { %4425 = vmatprep.subr.bf16.mxu0 %v5248_v1 }
 0x8f7   : > { %4426 = vmatpush3.bf16.msra.mxu0 %v4693_v25 }
 0x8fa   : > { %4428 = vmatmul.mubr.msk.bf16.vlgmr.msra.gmra.mxu0 %vm1386_vm8, %v3375_v30 }
 0x8fb   : > { %5097 = shalt.err (!%p5094_p2)
}
 0x8fc   : > { %s5098_s15 = scalar_lea.hbm %s6110_s3, 256  ;;  %s5102_s16 = scalar_lea.hbm %s6227_s13, 512 }
 0x8fd   : > { %p5099_p3 = scmp.ne.s32.totalorder %s6110_s3, %s5098_s15  ;;  %p5103_p5 = scmp.lt.s32.totalorder %s6110_s3, %s6227_s13 }
 0x8fe   : > { %p5104_p6 = scmp.lt.s32.totalorder %s5102_s16, %s5098_s15 }
 0x8ff   : > { %p5100_p9 = pnand %p5099_p3, %p6276_p7 }
 0x900   : > { %p5105_p10 = por %p5104_p6, %p5103_p5 }
 0x901   : > { %p5101_p4 = pneg %p5100_p9 }
 0x903   : > { %p5106_p13 = pnand %p5105_p10, %p5101_p4 }
 0x905   : > { %5109 = shalt.err (!%p5106_p13)
}
 0x906   : > { %s5252_s5 = smov 128   ;;  %s5253_s2 = smov 8  }
 0x907   : > { %4483 = dma.vmem_to_hbm [thread:$0]  (%p6276_p7), %s6112_s1, 256, %s6110_s3, %s3457_s18, %s5252_s5, %s5252_s5, %s5253_s2  }
 0x908   : > { %s6277_s11 = sshll.u32 %s5431_s0, 8  ;;  %s3496_s26 = sshll.u32 %s6076_s24, 4  ;;  %s6142_s26 = int_to_ptr.vmem [resolvable:$true] %s3496_s26 }
 0x909   : > { %s6139_s16 = scalar_lea.hbm %s5403_s9, %s6277_s11  ;;  %s3462_s15 = scalar_lea.sflag [#allocation25], %s5860_s7 }
 0x90a   : > { %s5110_s6 = scalar_lea.vmem %s6142_s26, 256  ;;  %s5254_s8 = smov [#allocation24]  }
 0x90b   : > { %p5111_p8 = scmp.ne.s32.totalorder %s6142_s26, %s5110_s6  ;;  %s5114_s13 = sshll.u32 %s5254_s8, 4  ;;  %s5115_s13 = int_to_ptr.vmem [resolvable:$false] %s5114_s13 }
 0x90c   : > { %s5116_s14 = scalar_lea.vmem %s5115_s13, 512  ;;  %p5117_p0 = scmp.lt.s32.totalorder %s6142_s26, %s5115_s13 }
 0x90d   : > { %p5112_p11 = pnand %p5111_p8, %p6276_p7  ;;  %p5118_p1 = scmp.lt.s32.totalorder %s5116_s14, %s5110_s6 }
 0x90f   : > { %p5113_p12 = pneg %p5112_p11  ;;  %p5119_p2 = por %p5118_p1, %p5117_p0 }
 0x911   : > { %p5120_p3 = pnand %p5119_p2, %p5113_p12 }
 0x913   : > { %5123 = shalt.err (!%p5120_p3)
}
 0x914   : > { %s5124_s0 = scalar_lea.hbm %s6139_s16, 256  ;;  %s5128_s7 = scalar_lea.hbm %s5403_s9, 512 }
 0x915   : > { %p5125_p9 = scmp.ne.s32.totalorder %s6139_s16, %s5124_s0  ;;  %p5129_p6 = scmp.lt.s32.totalorder %s6139_s16, %s5403_s9 }
 0x916   : > { %p5130_p10 = scmp.lt.s32.totalorder %s5128_s7, %s5124_s0 }
 0x917   : > { %p5126_p4 = pnand %p5125_p9, %p6276_p7 }
 0x918   : > { %p5131_p13 = por %p5130_p10, %p5129_p6 }
 0x919   : > { %p5127_p5 = pneg %p5126_p4 }
 0x91b   : > { %p5132_p8 = pnand %p5131_p13, %p5127_p5 }
 0x91d   : > { %5135 = shalt.err (!%p5132_p8)
}
 0x91e   : > { %4484 = dma.vmem_to_hbm [thread:$0]  (%p6276_p7), %s6142_s26, 256, %s6139_s16, %s3462_s15, %s5252_s5, %s5252_s5, %s5253_s2   ;;  %v3936_v42 = vld [vmem:[#allocation2] ss:$0 sm:$0xff] }
 0x91f   : > { %s6278_s13 = sshll.u32 %s5597_s4, 4 }
 0x920   : > { %s1108_s8 = scalar_lea.vmem %s5408_s12, %s6278_s13 }
 0x9aa   : > { %v3285_v1 = vpop.f32.mrf.mxu0 }
 0x9ac   : > { %v4405_v2 = vpop.f32.mrf.mxu0 }
 0x9ae   : > { %v3288_v3 = vpop.f32.mrf.mxu0  ;;  %v3353_v31 = vpop.f32.mrf.mxu1 }
 0x9af   : > { %v3354_v41 = vadd.f32 %v3353_v31, %v3285_v1 }
 0x9b0   : > { %v4406_v32 = vpop.f32.mrf.mxu0  ;;  %v4417_v33 = vpop.f32.mrf.mxu1 }
 0x9b2   : > { %v3356_v39 = vpop.f32.mrf.mxu1 }
 0x9b3   : > { %v3357_v36 = vadd.f32 %v3356_v39, %v3288_v3 }
 0x9b4   : > { %v4418_v40 = vpop.f32.mrf.mxu1 }
 0x9ba   : > { %v3437_v34 = vpop.f32.mrf.mxu0 }
 0x9bb   : > { %v3444_v43 = vadd.f32 %v3437_v34, %v3354_v41 }
 0x9bc   : > { %v4429_v35 = vpop.f32.mrf.mxu0 }
 0x9bd   : > { %v3452_v37 = vadd.f32 %v3936_v42, %v3444_v43 }
 0x9be   : > { %v3440_v44 = vpop.f32.mrf.mxu0 }
 0x9bf   : > { %3454 = vst.msk [vmem:[%s1108_s8] sm:$0xff] %vm1386_vm8, %v3452_v37  ;;  %v3445_v47 = vadd.f32 %v3440_v44, %v3357_v36 }
 0x9c0   : > { %v4430_v48 = vpop.f32.mrf.mxu0 }
 0x9c1   : > { %v3453_v49 = vadd.f32 %v3936_v42, %v3445_v47 }
 0x9c3   : > { %3455 = vst.msk [vmem:[%s1108_s8 + $0x8] sm:$0xff] %vm1386_vm8, %v3453_v49 }
 0x9c4 PF: > { %s6279_s14 = sld [smem:[#allocation57_spill]] }
 0x9c5   : > { %s6280_s6 = sld [smem:[#allocation55_spill]] }
 0x9c6   : > { %s6281_s28 = sld [smem:[#allocation60_spill]] }
 0x9ca   : > { %p4560_p7 = scmp.ge.s32.totalorder %s6279_s14, 2 }
 0x9cb   : > { %s3514_s24 = sand.u32 1, %s6280_s6  }
 0x9cc   : > { %p6282_p11 = scmp.ne.s32.totalorder %s6281_s28, 0  ;;  %s3515_s4 = scalar_lea.sflag [#allocation4], %s3514_s24 }
 0x9ce   : > { %p4528_p12 = pnand %p4560_p7, %p6282_p11 }
 0x9d0   : > { %p4529_p0 = pneg %p4528_p12 }
 0x9d2   : > { %5181 = dma.done.wait (%p4529_p0), %s3515_s4, 256  }
 0x9d3   : > { %5183 = vsyncadd (%p4529_p0), %s3515_s4, 4294967040  ;;  %s3524_s1 = scalar_lea.sflag [#allocation25], %s3514_s24 }
 0x9d4   : > { %5185 = dma.done.wait (%p4529_p0), %s3524_s1, 256  }
 0x9d5   : > { %5187 = vsyncadd (%p4529_p0), %s3524_s1, 4294967040  ;;  %s6283_s15 = sld [smem:[#allocation58_spill]]  ;;  %s6286_s7 = smov %s5194_s10 }
 0x9d6   : > { %s6284_s3 = sld [smem:[#allocation56_spill]] }
 0x9d7   : > { %s6285_s11 = sld [smem:[#allocation59_spill]] }
 0x9db   : > { %p80_p1 = scmp.ge.s32.totalorder %s6283_s15, 4  }
 0x9dc   : > { %s6287_s10 = smov %s6284_s3 }
 0x9dd   :  { %82 = sbr.rel (!%p80_p1) target bundleno = 65 (0x41), region = 287 }
 0x9e2   :  { %3537 = vsyncpa [#allocation3], 1 }
 0x9e3   :  { %3539 = vsyncpa [#allocation3 + $0x1], 1 }
 0x9e4   :  { %3540 = vsyncpa [#allocation6], 1 }
 0x9e5   :  { %3541 = vsyncpa [#allocation9], 1 }
 0x9e6   :  { %3542 = vsyncpa [#allocation12], 1 }
 0x9e7   :  { %3543 = vsyncpa [#allocation15], 1 }
 0x9e8   :  { %3544 = vsyncpa [#allocation18], 1 }
 0x9e9   :  { %3545 = vsyncpa [#allocation21], 1 }
 0x9ea   :  { %3546 = vsyncpa [#allocation4], 1 }
 0x9eb   :  { %3548 = vsyncpa [#allocation4 + $0x1], 1 }
 0x9ec   :  { %3549 = vsyncpa [#allocation25], 1 }
 0x9ed   :  { %3551 = vsyncpa [#allocation25 + $0x1], 1 }

// kernel: temporal_control_unet_forward.8
= control target key start
LH: loop header
LB: loop body
LE: loop exit
PB: predicated region body
PF: predicated region fallthrough
CT: control target
= control target key end

     0   :  { %s4447_s0 = inlined_call_operand.vmem [shape: f32[2,8,64], index: 0, kind: input, shape index: {}]   ;;  %s4448_s1 = inlined_call_operand.vmem [shape: f32[2,1,32], index: 1, kind: input, shape index: {}]   ;;  %s4449_s2 = inlined_call_operand.vmem [shape: f32[64,64], index: 2, kind: input, shape index: {}]   ;;  %s4450_s3 = inlined_call_operand.vmem [shape: f32[1,64], index: 3, kind: input, shape index: {}]   ;;  %s4451_s4 = inlined_call_operand.vmem [shape: f32[1,64], index: 4, kind: input, shape index: {}]   ;;  %s4452_s5 = inlined_call_operand.vmem [shape: f32[1,64], index: 5, kind: input, shape index: {}, may-alias: {5,6,15,16}]   ;;  %s4453_s6 = inlined_call_operand.vmem [shape: f32[1,64], index: 6, kind: input, shape index: {}, may-alias: {5,6,15,16}]   ;;  %s4454_s7 = inlined_call_operand.vmem [shape: f32[1,64], index: 7, kind: input, shape index: {}, may-alias: {7,8,17,18}]   ;;  %s4455_s8 = inlined_call_operand.vmem [shape: f32[1,64], index: 8, kind: input, shape index: {}, may-alias: {7,8,17,18}]   ;;  %s4456_s9 = inlined_call_operand.vmem [shape: f32[1,128], index: 9, kind: input, shape index: {}]   ;;  %s4457_s10 = inlined_call_operand.vmem [shape: bf16[32,128], index: 10, kind: input, shape index: {}]   ;;  %s4458_s11 = inlined_call_operand.vmem [shape: bf16[3,64,64], index: 11, kind: input, shape index: {}]   ;;  %s4459_s12 = inlined_call_operand.vmem [shape: bf16[3,64,64], index: 12, kind: input, shape index: {}]   ;;  %s4460_s13 = inlined_call_operand.vmem [shape: f32[1,64], index: 13, kind: input, shape index: {}]   ;;  %s4461_s14 = inlined_call_operand.vmem [shape: f32[1,64], index: 14, kind: input, shape index: {}]   ;;  %s4462_s15 = inlined_call_operand.vmem [shape: f32[1,64], index: 15, kind: input, shape index: {}, may-alias: {5,6,15,16}]   ;;  %s4463_s16 = inlined_call_operand.vmem [shape: f32[1,64], index: 16, kind: input, shape index: {}, may-alias: {5,6,15,16}]   ;;  %s4464_s17 = inlined_call_operand.vmem [shape: f32[1,64], index: 17, kind: input, shape index: {}, may-alias: {7,8,17,18}]   ;;  %s4465_s18 = inlined_call_operand.vmem [shape: f32[1,64], index: 18, kind: input, shape index: {}, may-alias: {7,8,17,18}]   ;;  %s4466_s19 = inlined_call_operand.vmem [shape: f32[1,128], index: 19, kind: input, shape index: {}]   ;;  %s4467_s20 = inlined_call_operand.vmem [shape: bf16[32,128], index: 20, kind: input, shape index: {}]   ;;  %s4468_s21 = inlined_call_operand.vmem [shape: bf16[3,64,64], index: 21, kind: input, shape index: {}]   ;;  %s4469_s22 = inlined_call_operand.vmem [shape: bf16[3,64,64], index: 22, kind: input, shape index: {}]   ;;  %s4470_s23 = inlined_call_operand.hbm [shape: f32[2,8,64], index: 23, kind: output, shape index: {0}]   ;;  %s4471_s24 = inlined_call_operand.vmem [shape: f32[2,8,64], index: 24, kind: output, shape index: {1}]  }
   0x1   :  { %4481 = sst [smem:[#allocation11_spill]] %s4447_s0 }
   0x2   :  { %4482 = sst [smem:[#allocation12_spill]] %s4448_s1 }
   0x3   :  { %4483 = sst [smem:[#allocation13_spill]] %s4449_s2 }
   0x4   :  { %4484 = sst [smem:[#allocation14_spill]] %s4450_s3 }
   0x5   :  { %4485 = sst [smem:[#allocation15_spill]] %s4451_s4 }
   0x6   :  { %4486 = sst [smem:[#allocation16_spill]] %s4452_s5 }
   0x7   :  { %4487 = sst [smem:[#allocation17_spill]] %s4453_s6 }
   0x8   :  { %4488 = sst [smem:[#allocation18_spill]] %s4454_s7 }
   0x9   :  { %4489 = sst [smem:[#allocation19_spill]] %s4455_s8 }
   0xa   :  { %4490 = sst [smem:[#allocation20_spill]] %s4456_s9 }
   0xb   :  { %4491 = sst [smem:[#allocation21_spill]] %s4471_s24 }
   0xc   :  { %30 = vsyncpa [#allocation3], 0 }
   0xd   :  { %32 = vsyncpa [#allocation3 + $0x1], 0  ;;  %s3771_s5 = smov 0   ;;  %s3773_s26 = smov 0  }
   0xe   :  { %s3775_s27 = smov 0   ;;  %s3777_s28 = smov 0  }
   0xf LB: > { %4492 = sst [smem:[#allocation5_spill]] %s3628_s5  ;;  %s3792_s6 = sadd.s32 4294967295, %s3640_s28   ;;  %s3640_s28 = sphi %s3777_s28, %s4515_s28   ;;  %s3636_s27 = sphi %s3775_s27, %s4517_s27   ;;  %s3632_s26 = sphi %s3773_s26, %s4519_s26   ;;  %s3628_s5 = sphi %s3771_s5, %s4518_s5  }
  0x10   : > { %4493 = sst [smem:[#allocation6_spill]] %s3636_s27  ;;  %s2842_s2 = sadd.s32 4294967294, %s3640_s28  }
  0x11   : > { %4494 = sst [smem:[#allocation7_spill]] %s3640_s28  ;;  %s3796_s29 = sadd.s32 1, %s3640_s28  }
  0x12   : > { %4495 = sst [smem:[#allocation8_spill]] %s3796_s29  ;;  %s538_s0 = sadd.s32 1, %s3636_s27 }
  0x13   : > { %s535_s7 = ssub.s32 %s3640_s28, %s3796_s29  ;;  %p548_p0 = scmp.ne.s32.totalorder %s3636_s27, %s3632_s26 }
  0x14   : > { %p536_p1 = scmp.eq.s32.totalorder %s535_s7, 0  ;;  %p549_p2 = scmp.eq.s32.totalorder %s3792_s6, 1 }
  0x15   : > { %p554_p3 = scmp.ne.s32.totalorder %s3632_s26, %s3628_s5  ;;  %p555_p4 = scmp.eq.s32.totalorder %s2842_s2, 1 }
  0x16   : > { %s3807_s30 = scalar_select %p536_p1, %s3636_s27, %s538_s0  }
  0x17   : > { %p3809_p5 = por %p549_p2, %p548_p0  ;;  %p3813_p6 = por %p555_p4, %p554_p3 }
  0x18   : > { %4496 = sst [smem:[#allocation9_spill]] %s3807_s30  ;;  %p2845_p7 = scmp.ge.s32.totalorder %s3640_s28, 1 }
  0x19   : > { %s4498_s25 = scalar_select %p3813_p6, 1, 0 }
  0x1a   : > { %p675_p8 = scmp.lt.s32.totalorder %s3640_s28, 3 }
  0x1b   : > { %4499 = sst [smem:[#allocation10_spill]] %s4498_s25 }
  0x1c   : > { %p676_p9 = pnand %p2845_p7, %p675_p8 }
  0x1d   : > { %p747_p10 = scmp.lt.s32.totalorder (!%p676_p9), %s3792_s6, 1  ;;  %s4500_s29 = sld [smem:[#allocation12_spill]] (!%p676_p9) }
  0x1e   : > { %679 = sbr.rel (%p676_p9) target bundleno = 2066 (0x812), region = 112  ;;  %s4501_s24 = sld [smem:[#allocation11_spill]] (!%p676_p9) }
  0x1f   : > { %s4502_s7 = sld [smem:[#allocation13_spill]] (!%p676_p9)  ;;  %s3644_s28 = smov (!%p676_p9), 64  }
  0x20   : > { %s4503_s9 = sld [smem:[#allocation20_spill]] (!%p676_p9)  ;;  %s3645_s1 = smov (!%p676_p9), [#allocation2]  }
  0x21   : > { %s4504_s2 = sld [smem:[#allocation14_spill]] (!%p676_p9) }
  0x22   : > { %s4507_s27 = sld [smem:[#allocation15_spill]] (!%p676_p9) }
  0x23   : > { %v3500_v0 = vld [vmem:[%s4458_s11 + $0x38] sm:$0xff]   ;;  %v3642_v1 = vmov 0.0   ;;  %v3501_v2 = vld [vmem:[%s4458_s11 + $0x30] sm:$0xff]   ;;  %vm3643_vm0 = vmmov 0   ;;  %v3503_v3 = vld [vmem:[%s4457_s10 + $0x8] sm:$0xff]   ;;  %s3837_s8 = scalar_select %p747_p10, %s3792_s6, 1  ;;  %v767_v8 = vlaneseq }
  0x24   : > { %3154 = vmatprep.subr.bf16.mxu1 %v3642_v1  ;;  %3146 = vmatprep.subr.bf16.mxu0 %v3642_v1  ;;  %v3505_v4 = vld [vmem:[%s4457_s10] sm:$0xff]   ;;  %v3502_v5 = vld [vmem:[%s4458_s11 + $0x28] sm:$0xff]   ;;  %vm893_vm1 = vcmask 523264   ;;  %v3506_v14 = vld [vmem:[%s4458_s11 + $0x58] sm:$0xff]   ;;  %vm801_vm3 = vcmask 261120   ;;  %s4508_s30 = sld [smem:[#allocation19_spill]] }
  0x25   : > { %3155 = vmatpush3.bf16.msra.mxu1 %v3500_v0  ;;  %3162 = vmatprep.mubr.msk.bf16.mxu1 %vm3643_vm0, %v3642_v1  ;;  %s4479_s0 = sshll.u32 %s3837_s8, 3  ;;  %s753_s25 = scalar_lea.vmem %s4500_s29, %s3837_s8  ;;  %v3504_v9 = vld [vmem:[%s4458_s11 + $0x20] sm:$0xff]   ;;  %v3864_v12 = vshrl.u32 %v767_v8, 7  ;;  %v3508_v15 = vld [vmem:[%s4458_s11 + $0x50] sm:$0xff]   ;;  %v3510_v17 = vld [vmem:[%s4458_s11 + $0x48] sm:$0xff]  }
  0x26   : > { %3156 = vmatprep.subr.bf16.mxu1 %v3642_v1  ;;  %3150 = vmatprep.mubr.msk.bf16.mxu0 %vm3643_vm0, %v3642_v1  ;;  %s750_s4 = scalar_lea.vmem %s4501_s24, %s4479_s0  ;;  %v772_v6 = vld [vmem:[%s753_s25] sm:$0x1]  ;;  %v3507_v29 = vld [vmem:[%s4458_s11 + $0x18] sm:$0xff]   ;;  %v3509_v31 = vld [vmem:[%s4458_s11 + $0x10] sm:$0xff]   ;;  %s4506_s24 = sld [smem:[#allocation16_spill]] }
  0x27   : > { %3147 = vmatpush3.bf16.msra.mxu0 %v3503_v3  ;;  %v773_v7 = vmin.f32 %v772_v6, 20.0  ;;  %v3860_v10 = vld [vmem:[%s750_s4] sm:$0xff]  ;;  %vm770_vm2 = vcmp.lt.s32.totalorder %v3864_v12, 7  ;;  %v3511_v32 = vld [vmem:[%s4458_s11 + $0x8] sm:$0xff]   ;;  %vm769_vm4 = vcmp.ge.s32.totalorder %v3864_v12, 1  ;;  %v3927_v37 = vld [vmem:[%s4502_s7 + $0x38] sm:$0xff] }
  0x28   : > { %3148 = vmatprep.subr.bf16.mxu0 %v3642_v1  ;;  %v868_v13 = vpack.c.bf16 %v3860_v10, %v3860_v10  ;;  %v1013_v16 = vrot.slane %v3860_v10, 1  ;;  %v3512_v18 = vld [vmem:[%s4458_s11 + $0x40] sm:$0xff]   ;;  %v854_v33 = vrot.slane %v3860_v10, 7  ;;  %v3935_v38 = vld [vmem:[%s4502_s7 + $0x30] sm:$0xff]  ;;  %v3944_v39 = vld [vmem:[%s4502_s7 + $0x28] sm:$0xff]  ;;  %v4000_v54 = vsub.s32 0, %v3864_v12 }
  0x29   : > { %3157 = vmatpush3.bf16.msra.mxu1 %v3501_v2  ;;  %v774_v11 = vmul.f32 1.442695, %v773_v7  ;;  %v3513_v34 = vld [vmem:[%s4458_s11] sm:$0xff]   ;;  %v3962_v41 = vld [vmem:[%s4502_s7 + $0x18] sm:$0xff]  ;;  %v3971_v42 = vld [vmem:[%s4502_s7 + $0x10] sm:$0xff]  ;;  %s4505_s4 = sld [smem:[#allocation18_spill]] }
  0x2a   : > { %3158 = vmatprep.subr.bf16.mxu1 %v3642_v1  ;;  %v1016_v21 = vsel %vm770_vm2, %v1013_v16, 0.0  ;;  %v857_v35 = vsel %vm769_vm4, %v854_v33, 0.0  ;;  %v3953_v40 = vld [vmem:[%s4502_s7 + $0x20] sm:$0xff]  ;;  %v3977_v43 = vld [vmem:[%s4502_s7 + $0x8] sm:$0xff]  ;;  %s4509_s5 = sld [smem:[#allocation17_spill]] }
  0x2b   : > { %3149 = vmatpush3.bf16.msra.mxu0 %v3505_v4  ;;  %3552 = vpow2.f32 %v774_v11  ;;  %v1017_v23 = vpack.c.bf16 %v1016_v21, %v1016_v21  ;;  %v858_v36 = vpack.c.bf16 %v857_v35, %v857_v35  ;;  %v3986_v44 = vld [vmem:[%s4502_s7] sm:$0xff]  ;;  %s3584_s7 = sshll.u32 %s3645_s1, 4  ;;  %s3585_s7 = int_to_ptr.vmem [resolvable:$false] %s3584_s7 }
  0x2c   : > { %3166 = vmatprep.subr.bf16.mxu0 %v3642_v1  ;;  %v788_v53 = vld [vmem:[%s4503_s9] sm:$0x1]  ;;  %s3586_s9 = scalar_lea.vmem %s3585_s7, 256 }
  0x2d   : > { %3159 = vmatpush3.bf16.msra.mxu1 %v3502_v5  ;;  %v2884_v63 = vld [vmem:[%s4504_s2] ss:$0 sm:$0xff] }
  0x2e   : > { %3160 = vmatprep.subr.bf16.mxu1 %v3642_v1 }
  0x31   : > { %3161 = vmatpush3.bf16.msra.mxu1 %v3504_v9 }
  0x32   : > { %3178 = vmatprep.subr.bf16.mxu1 %v3642_v1 }
  0x34   : > { %3163 = vmatmul.mubr.msk.bf16.vlgmr.msra.gmra.mxu1 %vm893_vm1, %v868_v13 }
  0x35   : > { %3179 = vmatpush3.bf16.msra.mxu1 %v3506_v14  ;;  %3186 = vmatprep.mubr.msk.bf16.mxu1 %vm3643_vm0, %v3642_v1 }
  0x36   : > { %3180 = vmatprep.subr.bf16.mxu1 %v3642_v1 }
  0x38   : > { %v3553_v19 = vpop.eup %3552 }
  0x39   : > { %3181 = vmatpush3.bf16.msra.mxu1 %v3508_v15  ;;  %v776_v20 = vadd.f32 1.0, %v3553_v19 }
  0x3a   : > { %3182 = vmatprep.subr.bf16.mxu1 %v3642_v1 }
  0x3b   : > { %v777_v22 = vmul.f32 %v776_v20, %v776_v20 }
  0x3d   : > { %3183 = vmatpush3.bf16.msra.mxu1 %v3510_v17  ;;  %v2849_v24 = vadd.f32 -1.0, %v777_v22  ;;  %v780_v25 = vadd.f32 1.0, %v777_v22 }
  0x3e   : > { %3184 = vmatprep.subr.bf16.mxu1 %v3642_v1 }
  0x3f   : > { %3554 = vrcp.f32 %v780_v25  ;;  %v779_v26 = vmul.f32 %v2849_v24, %v772_v6  ;;  %v3516_v24 = vld [vmem:[%s4459_s12 + $0x18] sm:$0xff]   ;;  %v3515_v25 = vld [vmem:[%s4459_s12 + $0x30] sm:$0xff]  }
  0x41   : > { %3185 = vmatpush3.bf16.msra.mxu1 %v3512_v18 }
  0x42   : > { %3209 = vmatprep.subr.mxu1 %v3642_v1 }
  0x44   : > { %3187 = vmatmul.mubr.msk.bf16.vlgmr.msra.gmra.mxu1 %vm893_vm1, %v1017_v23  ;;  %v3514_v23 = vld [vmem:[%s4459_s12 + $0x38] sm:$0xff]  }
  0x45   : > { %3225 = vmatprep.mubr.msk.f32.mxu1 %vm3643_vm0, %v3642_v1  ;;  %3210 = vmatpush3.msra.mxu1 %v3927_v37 }
  0x46   : > { %3211 = vmatprep.subr.mxu1 %v3642_v1 }
  0x47   : > { %3212 = vmatpush3.msra.mxu1 %v3935_v38 }
  0x48   : > { %3213 = vmatprep.subr.mxu1 %v3642_v1 }
  0x49   : > { %3214 = vmatpush3.msra.mxu1 %v3944_v39 }
  0x4a   : > { %3215 = vmatprep.subr.mxu1 %v3642_v1 }
  0x4b   : > { %3216 = vmatpush3.msra.mxu1 %v3953_v40 }
  0x4c   : > { %v3555_v27 = vpop.eup %3554  ;;  %3217 = vmatprep.subr.mxu1 %v3642_v1 }
  0x4d   : > { %v782_v28 = vmul.f32 %v3555_v27, %v779_v26  ;;  %3218 = vmatpush3.msra.mxu1 %v3962_v41  ;;  %v3518_v26 = vld [vmem:[%s4459_s12 + $0x10] sm:$0xff]   ;;  %v3517_v27 = vld [vmem:[%s4459_s12 + $0x28] sm:$0xff]  }
  0x4e   : > { %3219 = vmatprep.subr.mxu1 %v3642_v1 }
  0x4f   : > { %v3898_v30 = vpack.c.bf16 %v782_v28, %v782_v28  ;;  %3220 = vmatpush3.msra.mxu1 %v3971_v42  ;;  %v3520_v28 = vld [vmem:[%s4459_s12 + $0x8] sm:$0xff]  }
  0x50   : > { %3221 = vmatprep.subr.mxu1 %v3642_v1 }
  0x51   : > { %3151 = vmatmul.mubr.msk.bf16.vlgmr.msra.gmra.mxu0 %vm801_vm3, %v3898_v30  ;;  %3222 = vmatpush3.msra.mxu1 %v3977_v43 }
  0x52   : > { %3167 = vmatpush3.bf16.msra.mxu0 %v3507_v29  ;;  %3174 = vmatprep.mubr.msk.bf16.mxu0 %vm3643_vm0, %v3642_v1  ;;  %v3519_v29 = vld [vmem:[%s4459_s12 + $0x20] sm:$0xff]  }
  0x53   : > { %3168 = vmatprep.subr.bf16.mxu0 %v3642_v1  ;;  %3223 = vmatprep.subr.mxu1 %v3642_v1 }
  0x54   : > { %3224 = vmatpush3.msra.mxu1 %v3986_v44 }
  0x55   : > { %3240 = vmatprep.subr.bf16.mxu1 %v3642_v1 }
  0x56   : > { %3169 = vmatpush3.bf16.msra.mxu0 %v3509_v31  ;;  %v3521_v31 = vld [vmem:[%s4459_s12] sm:$0xff]  }
  0x57   : > { %3170 = vmatprep.subr.bf16.mxu0 %v3642_v1 }
  0x5a   : > { %3171 = vmatpush3.bf16.msra.mxu0 %v3511_v32 }
  0x5b   : > { %3172 = vmatprep.subr.bf16.mxu0 %v3642_v1 }
  0x5e   : > { %3173 = vmatpush3.bf16.msra.mxu0 %v3513_v34 }
  0x5f   : > { %3190 = vmatprep.subr.mxu0 %v3642_v1 }
  0x61   : > { %3175 = vmatmul.mubr.msk.bf16.vlgmr.msra.gmra.mxu0 %vm893_vm1, %v858_v36 }
  0x62   : > { %3206 = vmatprep.mubr.msk.f32.mxu0 %vm3643_vm0, %v3642_v1  ;;  %3191 = vmatpush3.msra.mxu0 %v3927_v37 }
  0x63   : > { %3192 = vmatprep.subr.mxu0 %v3642_v1 }
  0x64   : > { %3193 = vmatpush3.msra.mxu0 %v3935_v38 }
  0x65   : > { %3194 = vmatprep.subr.mxu0 %v3642_v1 }
  0x66   : > { %3195 = vmatpush3.msra.mxu0 %v3944_v39 }
  0x67   : > { %3196 = vmatprep.subr.mxu0 %v3642_v1 }
  0x68   : > { %3197 = vmatpush3.msra.mxu0 %v3953_v40 }
  0x69   : > { %3198 = vmatprep.subr.mxu0 %v3642_v1 }
  0x6a   : > { %3199 = vmatpush3.msra.mxu0 %v3962_v41 }
  0x6b   : > { %3200 = vmatprep.subr.mxu0 %v3642_v1 }
  0x6c   : > { %3201 = vmatpush3.msra.mxu0 %v3971_v42 }
  0x6d   : > { %3202 = vmatprep.subr.mxu0 %v3642_v1 }
  0x6e   : > { %3203 = vmatpush3.msra.mxu0 %v3977_v43 }
  0x6f   : > { %3204 = vmatprep.subr.mxu0 %v3642_v1 }
  0x70   : > { %3205 = vmatpush3.msra.mxu0 %v3986_v44 }
  0x71   : > { %3228 = vmatprep.subr.bf16.mxu0 %v3642_v1 }
  0xf4   : > { %v931_v45 = vpop.f32.mrf.mxu1 }
  0xf6   : > { %v3164_v46 = vpop.f32.mrf.mxu1 }
  0xf8   : > { %v934_v47 = vpop.f32.mrf.mxu1 }
  0xfa   : > { %v3165_v48 = vpop.f32.mrf.mxu1 }
 0x104   : > { %v1079_v49 = vpop.f32.mrf.mxu1 }
 0x106   : > { %v3188_v50 = vpop.f32.mrf.mxu1 }
 0x108   : > { %v1082_v51 = vpop.f32.mrf.mxu1 }
 0x10a   : > { %v3189_v52 = vpop.f32.mrf.mxu1 }
 0x111   : > { %v839_v55 = vpop.f32.mrf.mxu0 }
 0x112   : > { %v4002_v56 = vadd.f32 %v839_v55, %v788_v53  ;;  %v2887_v55 = vld [vmem:[%s4505_s4] ss:$0 sm:$0xff] }
 0x113   : > { %v3152_v57 = vpop.f32.mrf.mxu0 }
 0x114   : > { %v1296_v58 = vrot.slane %v4002_v56, %v4000_v54  ;;  %v1287_v57 = vadd.f32 1.0, %v4002_v56 }
 0x115   : > { %v842_v59 = vpop.f32.mrf.mxu0 }
 0x116   : > { %1298 = vrot.lane.b32.xlu0 %v1296_v58, %s3644_s28  ;;  %v2888_v59 = vld [vmem:[%s4506_s24] ss:$0 sm:$0xff]  ;;  %s3005_s24 = sshll.u32 %s3792_s6, 7 }
 0x117   : > { %v3153_v60 = vpop.f32.mrf.mxu0  ;;  %s2745_s2 = scalar_lea.hbm %s4470_s23, %s3005_s24 }
 0x121   : > { %v998_v61 = vpop.f32.mrf.mxu0 }
 0x122   : > { %v999_v62 = vadd.f32 %v998_v61, %v931_v45  ;;  %v1291_v61 = vrot.slane %v1287_v57, %v4000_v54 }
 0x123   : > { %v3176_v0 = vpop.f32.mrf.mxu0 }
 0x124   : > { %v1085_v2 = vadd.f32 %v1079_v49, %v999_v62 }
 0x125   : > { %v1001_v3 = vpop.f32.mrf.mxu0 }
 0x126   : > { %v1092_v4 = vadd.f32 %v2884_v63, %v1085_v2 }
 0x127   : > { %v3177_v5 = vpop.f32.mrf.mxu0 }
 0x128   : > { %v1095_v6 = vsel %vm893_vm1, %v1092_v4, 0.0  ;;  %v1102_v7 = vmul.f32 %v1092_v4, %v1092_v4 }
 0x129   : > { %v1096_v8 = vrot.slane %v1095_v6, 4 }
 0x12a   : > { %v1103_v9 = vsel %vm893_vm1, %v1102_v7, 0.0 }
 0x12b   : > { %v1097_v11 = vadd.f32 %v1096_v8, %v1095_v6  ;;  %v1104_v13 = vrot.slane %v1103_v9, 4 }
 0x12d   : > { %v1098_v14 = vrot.slane %v1097_v11, 2  ;;  %v1105_v15 = vadd.f32 %v1104_v13, %v1103_v9 }
 0x12f   : > { %v1099_v16 = vadd.f32 %v1098_v14, %v1097_v11  ;;  %v1106_v17 = vrot.slane %v1105_v15, 2  ;;  %v3522_v14 = vld [vmem:[%s4459_s12 + $0x58] sm:$0xff]  }
 0x131   : > { %v1100_v18 = vrot.slane %v1099_v16, 1  ;;  %v1107_v19 = vadd.f32 %v1106_v17, %v1105_v15 }
 0x133   : > { %v1101_v20 = vadd.f32 %v1100_v18, %v1099_v16  ;;  %v1108_v21 = vrot.slane %v1107_v19, 1 }
 0x135   : > { %3207 = vmatmul.mubr.msk.f32.vlgmr.msra.gmra.mxu0 %vm893_vm1, %v1101_v20  ;;  %v1109_v22 = vadd.f32 %v1108_v21, %v1107_v19  ;;  %v3523_v19 = vld [vmem:[%s4459_s12 + $0x50] sm:$0xff]   ;;  %v3524_v20 = vld [vmem:[%s4459_s12 + $0x48] sm:$0xff]  }
 0x136   : > { %3236 = vmatprep.mubr.msk.bf16.mxu0 %vm3643_vm0, %v3642_v1  ;;  %3229 = vmatpush3.bf16.msra.mxu0 %v3514_v23 }
 0x137   : > { %3226 = vmatmul.mubr.msk.f32.vlgmr.msra.gmra.mxu1 %vm893_vm1, %v1109_v22  ;;  %3230 = vmatprep.subr.bf16.mxu0 %v3642_v1  ;;  %v3525_v22 = vld [vmem:[%s4459_s12 + $0x40] sm:$0xff]  }
 0x138   : > { %3248 = vmatprep.mubr.msk.bf16.mxu1 %vm3643_vm0, %v3642_v1  ;;  %3241 = vmatpush3.bf16.msra.mxu1 %v3516_v24 }
 0x139   : > { %3242 = vmatprep.subr.bf16.mxu1 %v3642_v1 }
 0x13a   : > { %3231 = vmatpush3.bf16.msra.mxu0 %v3515_v25 }
 0x13b   : > { %3232 = vmatprep.subr.bf16.mxu0 %v3642_v1 }
 0x13c   : > { %3243 = vmatpush3.bf16.msra.mxu1 %v3518_v26 }
 0x13d   : > { %3244 = vmatprep.subr.bf16.mxu1 %v3642_v1 }
 0x13e   : > { %3233 = vmatpush3.bf16.msra.mxu0 %v3517_v27 }
 0x13f   : > { %3234 = vmatprep.subr.bf16.mxu0 %v3642_v1 }
 0x140   : > { %3245 = vmatpush3.bf16.msra.mxu1 %v3520_v28 }
 0x141   : > { %3246 = vmatprep.subr.bf16.mxu1 %v3642_v1 }
 0x142   : > { %3235 = vmatpush3.bf16.msra.mxu0 %v3519_v29 }
 0x143   : > { %3252 = vmatprep.subr.bf16.mxu0 %v3642_v1 }
 0x144   : > { %3247 = vmatpush3.bf16.msra.mxu1 %v3521_v31 }
 0x145   : > { %3264 = vmatprep.subr.mxu1 %v3642_v1 }
 0x188   : > { %v1299_v0 = vpop.permute.xlu0 %1298 }
 0x1f5   : > { %v1179_v32 = vpop.f32.mrf.mxu0 }
 0x1f6   : > { %v1183_v33 = vmul.f32 0.015625, %v1179_v32 }
 0x1f7   : > { %v3208_v34 = vpop.f32.mrf.mxu0  ;;  %v1253_v35 = vpop.f32.mrf.mxu1 }
 0x1f8   : > { %v1258_v36 = vmul.f32 %v1183_v33, %v1183_v33  ;;  %v1257_v45 = vmul.f32 0.015625, %v1253_v35  ;;  %v1266_v50 = vrot.slane %v1183_v33, %v4000_v54  ;;  %v2921_v35 = vld [vmem:[%s4507_s27] ss:$0 sm:$0xff]  ;;  %s738_s27 = sand.u32 1, %s3632_s26  }
 0x1f9   : > { %v3227_v46 = vpop.f32.mrf.mxu1  ;;  %s4193_s29 = sshll.u32 %s738_s27, 3 }
 0x1fa   : > { %v1259_v47 = vsub.f32 %v1257_v45, %v1258_v36  ;;  %v1267_v52 = vsub.f32 %v1092_v4, %v1266_v50  ;;  %s740_s4 = scalar_lea.vmem [#allocation2], %s4193_s29 }
 0x1fc   : > { %v1260_v48 = vmax.f32 %v1259_v47, 0.0 }
 0x1fe   : > { %v1261_v49 = vadd.f32 1e-05, %v1260_v48 }
 0x200   : > { %3556 = vrsqrt.f32 %v1261_v49 }
 0x20d   : > { %v3557_v51 = vpop.eup %3556 }
 0x20e   : > { %v1271_v53 = vrot.slane %v3557_v51, %v4000_v54 }
 0x210   : > { %v1272_v58 = vmul.f32 %v1271_v53, %v1267_v52 }
 0x212   : > { %v1279_v60 = vmul.f32 %v2887_v55, %v1272_v58 }
 0x214   : > { %v1286_v62 = vadd.f32 %v2888_v59, %v1279_v60 }
 0x216   : > { %v1292_v63 = vmul.f32 %v1291_v61, %v1286_v62 }
 0x218   : > { %v1301_v2 = vadd.f32 %v1299_v0, %v1292_v63 }
 0x21a   : > { %v1302_v3 = vmin.f32 %v1301_v2, 20.0 }
 0x21c   : > { %v1303_v4 = vmul.f32 1.442695, %v1302_v3 }
 0x21e   : > { %3558 = vpow2.f32 %v1303_v4  ;;  %v3526_v4 = vld [vmem:[%s4467_s20 + $0x8] sm:$0xff]  }
 0x22b   : > { %v3559_v5 = vpop.eup %3558 }
 0x22c   : > { %v1305_v6 = vadd.f32 1.0, %v3559_v5  ;;  %v3527_v5 = vld [vmem:[%s4467_s20] sm:$0xff]  }
 0x22e   : > { %v1306_v7 = vmul.f32 %v1305_v6, %v1305_v6  ;;  %v3528_v6 = vld [vmem:[%s4468_s21 + $0x38] sm:$0xff]  }
 0x230   : > { %v1309_v8 = vadd.f32 1.0, %v1306_v7  ;;  %v2889_v56 = vadd.f32 -1.0, %v1306_v7  ;;  %v3529_v7 = vld [vmem:[%s4468_s21 + $0x30] sm:$0xff]  }
 0x232   : > { %3560 = vrcp.f32 %v1309_v8  ;;  %v1308_v9 = vmul.f32 %v2889_v56, %v1301_v2  ;;  %v3530_v8 = vld [vmem:[%s4468_s21 + $0x18] sm:$0xff]   ;;  %v3531_v56 = vld [vmem:[%s4468_s21 + $0x28] sm:$0xff]  }
 0x23f   : > { %v3561_v11 = vpop.eup %3560 }
 0x240   : > { %v1311_v13 = vmul.f32 %v3561_v11, %v1308_v9  ;;  %v3532_v9 = vld [vmem:[%s4468_s21 + $0x10] sm:$0xff]   ;;  %v3533_v11 = vld [vmem:[%s4468_s21 + $0x20] sm:$0xff]  }
 0x242   : > { %v1333_v15 = vpack.c.bf16 %v1311_v13, %v1311_v13  ;;  %v1321_v16 = vrot.slane %v1311_v13, 7  ;;  %v1477_v21 = vrot.slane %v1311_v13, 1  ;;  %v3535_v13 = vld [vmem:[%s4468_s21] sm:$0xff]  }
 0x244   : > { %3237 = vmatmul.mubr.msk.bf16.vlgmr.msra.gmra.mxu0 %vm893_vm1, %v1333_v15  ;;  %v1322_v17 = vsel %vm769_vm4, %v1321_v16, 0.0  ;;  %v1478_v23 = vsel %vm770_vm2, %v1477_v21, 0.0 }
 0x245   : > { %3253 = vmatpush3.bf16.msra.mxu0 %v3522_v14  ;;  %v1323_v18 = vpack.c.bf16 %v1322_v17, %v1322_v17  ;;  %3260 = vmatprep.mubr.msk.bf16.mxu0 %vm3643_vm0, %v3642_v1  ;;  %v1479_v24 = vpack.c.bf16 %v1478_v23, %v1478_v23 }
 0x246   : > { %3254 = vmatprep.subr.bf16.mxu0 %v3642_v1 }
 0x247   : > { %3249 = vmatmul.mubr.msk.bf16.vlgmr.msra.gmra.mxu1 %vm893_vm1, %v1323_v18 }
 0x248   : > { %3265 = vmatpush3.msra.mxu1 %v3927_v37  ;;  %3280 = vmatprep.mubr.msk.f32.mxu1 %vm3643_vm0, %v3642_v1 }
 0x249   : > { %3255 = vmatpush3.bf16.msra.mxu0 %v3523_v19  ;;  %3266 = vmatprep.subr.mxu1 %v3642_v1 }
 0x24a   : > { %3256 = vmatprep.subr.bf16.mxu0 %v3642_v1  ;;  %3267 = vmatpush3.msra.mxu1 %v3935_v38 }
 0x24b   : > { %3268 = vmatprep.subr.mxu1 %v3642_v1 }
 0x24c   : > { %3269 = vmatpush3.msra.mxu1 %v3944_v39 }
 0x24d   : > { %3257 = vmatpush3.bf16.msra.mxu0 %v3524_v20  ;;  %3270 = vmatprep.subr.mxu1 %v3642_v1 }
 0x24e   : > { %3258 = vmatprep.subr.bf16.mxu0 %v3642_v1  ;;  %3271 = vmatpush3.msra.mxu1 %v3953_v40 }
 0x24f   : > { %3272 = vmatprep.subr.mxu1 %v3642_v1 }
 0x250   : > { %3273 = vmatpush3.msra.mxu1 %v3962_v41 }
 0x251   : > { %3259 = vmatpush3.bf16.msra.mxu0 %v3525_v22  ;;  %3274 = vmatprep.subr.mxu1 %v3642_v1 }
 0x252   : > { %3283 = vmatprep.subr.mxu0 %v3642_v1  ;;  %3275 = vmatpush3.msra.mxu1 %v3971_v42 }
 0x253   : > { %3276 = vmatprep.subr.mxu1 %v3642_v1 }
 0x254   : > { %3261 = vmatmul.mubr.msk.bf16.vlgmr.msra.gmra.mxu0 %vm893_vm1, %v1479_v24  ;;  %3277 = vmatpush3.msra.mxu1 %v3977_v43 }
 0x255   : > { %3284 = vmatpush3.msra.mxu0 %v3927_v37  ;;  %3278 = vmatprep.subr.mxu1 %v3642_v1 }
 0x256   : > { %3285 = vmatprep.subr.mxu0 %v3642_v1  ;;  %3279 = vmatpush3.msra.mxu1 %v3986_v44 }
 0x257   : > { %3286 = vmatpush3.msra.mxu0 %v3935_v38  ;;  %3299 = vmatprep.mubr.msk.f32.mxu0 %vm3643_vm0, %v3642_v1 }
 0x258   : > { %3287 = vmatprep.subr.mxu0 %v3642_v1  ;;  %3302 = vmatprep.subr.bf16.mxu1 %v3642_v1 }
 0x259   : > { %3288 = vmatpush3.msra.mxu0 %v3944_v39 }
 0x25a   : > { %3289 = vmatprep.subr.mxu0 %v3642_v1 }
 0x25b   : > { %3290 = vmatpush3.msra.mxu0 %v3953_v40 }
 0x25c   : > { %3291 = vmatprep.subr.mxu0 %v3642_v1 }
 0x25d   : > { %3292 = vmatpush3.msra.mxu0 %v3962_v41 }
 0x25e   : > { %3293 = vmatprep.subr.mxu0 %v3642_v1 }
 0x25f   : > { %3294 = vmatpush3.msra.mxu0 %v3971_v42 }
 0x260   : > { %3295 = vmatprep.subr.mxu0 %v3642_v1 }
 0x261   : > { %3296 = vmatpush3.msra.mxu0 %v3977_v43 }
 0x262   : > { %3297 = vmatprep.subr.mxu0 %v3642_v1 }
 0x263   : > { %3298 = vmatpush3.msra.mxu0 %v3986_v44 }
 0x264   : > { %3310 = vmatprep.subr.bf16.mxu0 %v3642_v1 }
 0x304   : > { %v1395_v25 = vpop.f32.mrf.mxu0 }
 0x306   : > { %v3238_v26 = vpop.f32.mrf.mxu0 }
 0x307   : > { %v1462_v27 = vpop.f32.mrf.mxu1 }
 0x308   : > { %v1398_v28 = vpop.f32.mrf.mxu0  ;;  %v1463_v34 = vadd.f32 %v1462_v27, %v1395_v25 }
 0x309   : > { %v3250_v29 = vpop.f32.mrf.mxu1  ;;  %v2924_v28 = vld [vmem:[%s4508_s30] ss:$0 sm:$0xff]  ;;  %s2730_s30 = scalar_lea.sflag [#allocation3], %s738_s27 }
 0x30a   : > { %v3239_v31 = vpop.f32.mrf.mxu0 }
 0x30b   : > { %v1465_v32 = vpop.f32.mrf.mxu1  ;;  %v2925_v31 = vld [vmem:[%s4509_s5] ss:$0 sm:$0xff]  ;;  %s2747_s5 = sshll.u32 %s740_s4, 4  ;;  %s2748_s5 = int_to_ptr.vmem [resolvable:$true] %s2747_s5 }
 0x30c   : > { %s3580_s0 = scalar_lea.vmem %s2748_s5, 128  ;;  %p3587_p0 = scmp.lt.s32.totalorder %s2748_s5, %s3585_s7 }
 0x30d   : > { %v3251_v33 = vpop.f32.mrf.mxu1  ;;  %p3581_p11 = scmp.ne.s32.totalorder %s2748_s5, %s3580_s0  ;;  %p3588_p1 = scmp.lt.s32.totalorder %s3586_s9, %s3580_s0 }
 0x30f   : > { %p3582_p12 = pnand %p3581_p11, %p3809_p5  ;;  %p3589_p2 = por %p3588_p1, %p3587_p0 }
 0x311   : > { %p3583_p13 = pneg %p3582_p12 }
 0x313   : > { %p3590_p3 = pnand %p3589_p2, %p3583_p13 }
 0x314   : > { %v1541_v36 = vpop.f32.mrf.mxu0 }
 0x315   : > { %v1547_v45 = vadd.f32 %v1541_v36, %v1463_v34 }
 0x316   : > { %v3262_v46 = vpop.f32.mrf.mxu0 }
 0x317   : > { %v4124_v47 = vadd.f32 %v2921_v35, %v1547_v45 }
 0x318   : > { %v1544_v48 = vpop.f32.mrf.mxu0 }
 0x319   : > { %v1557_v49 = vsel %vm893_vm1, %v4124_v47, 0.0  ;;  %v1564_v50 = vmul.f32 %v4124_v47, %v4124_v47 }
 0x31a   : > { %v1558_v51 = vrot.slane %v1557_v49, 4  ;;  %v3263_v52 = vpop.f32.mrf.mxu0 }
 0x31b   : > { %v1565_v53 = vsel %vm893_vm1, %v1564_v50, 0.0 }
 0x31c   : > { %v1559_v55 = vadd.f32 %v1558_v51, %v1557_v49  ;;  %v1566_v57 = vrot.slane %v1565_v53, 4 }
 0x31e   : > { %v1560_v58 = vrot.slane %v1559_v55, 2  ;;  %v1567_v59 = vadd.f32 %v1566_v57, %v1565_v53  ;;  %v3536_v53 = vld [vmem:[%s4468_s21 + $0x58] sm:$0xff]  }
 0x320   : > { %v1561_v60 = vadd.f32 %v1560_v58, %v1559_v55  ;;  %v1568_v61 = vrot.slane %v1567_v59, 2 }
 0x322   : > { %v1562_v62 = vrot.slane %v1561_v60, 1  ;;  %v1569_v63 = vadd.f32 %v1568_v61, %v1567_v59  ;;  %v3537_v59 = vld [vmem:[%s4468_s21 + $0x50] sm:$0xff]  }
 0x324   : > { %v1563_v0 = vadd.f32 %v1562_v62, %v1561_v60  ;;  %v1570_v2 = vrot.slane %v1569_v63, 1  ;;  %v3538_v60 = vld [vmem:[%s4468_s21 + $0x48] sm:$0xff]   ;;  %v3539_v62 = vld [vmem:[%s4468_s21 + $0x40] sm:$0xff]  }
 0x326   : > { %3281 = vmatmul.mubr.msk.f32.vlgmr.msra.gmra.mxu1 %vm893_vm1, %v1563_v0  ;;  %v1571_v3 = vadd.f32 %v1570_v2, %v1569_v63  ;;  %v1764_v2 = vld [vmem:[%s4466_s19] sm:$0x1] }
 0x327   : > { %3306 = vmatprep.mubr.msk.bf16.mxu1 %vm3643_vm0, %v3642_v1  ;;  %3303 = vmatpush3.bf16.msra.mxu1 %v3526_v4 }
 0x328   : > { %3300 = vmatmul.mubr.msk.f32.vlgmr.msra.gmra.mxu0 %vm893_vm1, %v1571_v3  ;;  %3304 = vmatprep.subr.bf16.mxu1 %v3642_v1 }
 0x329   : > { %3318 = vmatprep.mubr.msk.bf16.mxu0 %vm3643_vm0, %v3642_v1  ;;  %3311 = vmatpush3.bf16.msra.mxu0 %v3528_v6 }
 0x32a   : > { %3312 = vmatprep.subr.bf16.mxu0 %v3642_v1 }
 0x32b   : > { %3305 = vmatpush3.bf16.msra.mxu1 %v3527_v5 }
 0x32c   : > { %3322 = vmatprep.subr.bf16.mxu1 %v3642_v1 }
 0x32d   : > { %3313 = vmatpush3.bf16.msra.mxu0 %v3529_v7 }
 0x32e   : > { %3307 = vmatmul.mubr.msk.bf16.vlgmr.msra.gmra.mxu1 %vm801_vm3, %v3898_v30  ;;  %3314 = vmatprep.subr.bf16.mxu0 %v3642_v1  ;;  %v3534_v30 = vld [vmem:[%s4468_s21 + $0x8] sm:$0xff]  }
 0x32f   : > { %3323 = vmatpush3.bf16.msra.mxu1 %v3530_v8  ;;  %3330 = vmatprep.mubr.msk.bf16.mxu1 %vm3643_vm0, %v3642_v1 }
 0x330   : > { %3324 = vmatprep.subr.bf16.mxu1 %v3642_v1 }
 0x331   : > { %3315 = vmatpush3.bf16.msra.mxu0 %v3531_v56 }
 0x332   : > { %3316 = vmatprep.subr.bf16.mxu0 %v3642_v1 }
 0x333   : > { %3325 = vmatpush3.bf16.msra.mxu1 %v3532_v9 }
 0x334   : > { %3326 = vmatprep.subr.bf16.mxu1 %v3642_v1 }
 0x335   : > { %3317 = vmatpush3.bf16.msra.mxu0 %v3533_v11 }
 0x336   : > { %3334 = vmatprep.subr.bf16.mxu0 %v3642_v1 }
 0x337   : > { %3327 = vmatpush3.bf16.msra.mxu1 %v3534_v30 }
 0x338   : > { %3328 = vmatprep.subr.bf16.mxu1 %v3642_v1 }
 0x33b   : > { %3329 = vmatpush3.bf16.msra.mxu1 %v3535_v13 }
 0x33c   : > { %3346 = vmatprep.subr.mxu1 %v3642_v1 }
 0x3e6   : > { %v1641_v14 = vpop.f32.mrf.mxu1 }
 0x3e7   : > { %v1645_v15 = vmul.f32 0.015625, %v1641_v14 }
 0x3e8   : > { %v3282_v16 = vpop.f32.mrf.mxu1  ;;  %v1715_v17 = vpop.f32.mrf.mxu0 }
 0x3e9   : > { %v1720_v18 = vmul.f32 %v1645_v15, %v1645_v15  ;;  %v1719_v19 = vmul.f32 0.015625, %v1715_v17  ;;  %v1728_v24 = vrot.slane %v1645_v15, %v4000_v54 }
 0x3ea   : > { %v3301_v20 = vpop.f32.mrf.mxu0 }
 0x3eb   : > { %v1721_v21 = vsub.f32 %v1719_v19, %v1720_v18  ;;  %v1729_v26 = vsub.f32 %v4124_v47, %v1728_v24  ;;  %v2961_v18 = vld [vmem:[%s4460_s13] ss:$0 sm:$0xff] }
 0x3ed   : > { %v1722_v22 = vmax.f32 %v1721_v21, 0.0 }
 0x3ee   : > { %v1811_v3 = vpop.f32.mrf.mxu1 }
 0x3ef   : > { %v1723_v23 = vadd.f32 1e-05, %v1722_v22  ;;  %v4271_v4 = vadd.f32 %v1811_v3, %v1764_v2 }
 0x3f0   : > { %v3308_v5 = vpop.f32.mrf.mxu1 }
 0x3f1   : > { %3562 = vrsqrt.f32 %v1723_v23  ;;  %v2263_v6 = vrot.slane %v4271_v4, %v4000_v54 }
 0x3f2   : > { %v1814_v7 = vpop.f32.mrf.mxu1 }
 0x3f3   : > { %2265 = vrot.lane.b32.xlu0 %v2263_v6, %s3644_s28 }
 0x3f4   : > { %v3309_v8 = vpop.f32.mrf.mxu1 }
 0x3fe   : > { %v3563_v25 = vpop.eup %3562 }
 0x3ff   : > { %v1733_v27 = vrot.slane %v3563_v25, %v4000_v54 }
 0x401   : > { %v1734_v29 = vmul.f32 %v1733_v27, %v1729_v26 }
 0x403   : > { %v1741_v32 = vmul.f32 %v2924_v28, %v1734_v29 }
 0x405   : > { %v1748_v33 = vadd.f32 %v2925_v31, %v1741_v32 }
 0x407   : > { %v1749_v34 = vmin.f32 %v1748_v33, 20.0 }
 0x409   : > { %v1750_v35 = vmul.f32 1.442695, %v1749_v34 }
 0x40b   : > { %3564 = vpow2.f32 %v1750_v35 }
 0x418   : > { %v3565_v36 = vpop.eup %3564 }
 0x419   : > { %v1752_v45 = vadd.f32 1.0, %v3565_v36 }
 0x41b   : > { %v1753_v46 = vmul.f32 %v1752_v45, %v1752_v45 }
 0x41d   : > { %v1756_v47 = vadd.f32 1.0, %v1753_v46  ;;  %v2926_v48 = vadd.f32 -1.0, %v1753_v46 }
 0x41f   : > { %3566 = vrcp.f32 %v1756_v47  ;;  %v1755_v49 = vmul.f32 %v2926_v48, %v1748_v33 }
 0x42c   : > { %v3567_v50 = vpop.eup %3566 }
 0x42d   : > { %v1758_v51 = vmul.f32 %v3567_v50, %v1755_v49  ;;  %v3540_v49 = vld [vmem:[%s4469_s22 + $0x38] sm:$0xff]  }
 0x42e   : > { %v3542_v50 = vld [vmem:[%s4469_s22 + $0x18] sm:$0xff]  }
 0x42f   : > { %v4196_v52 = vadd.f32 %v1758_v51, %v3860_v10  ;;  %v3541_v51 = vld [vmem:[%s4469_s22 + $0x30] sm:$0xff]  }
 0x431   : > { %v1838_v55 = vpack.c.bf16 %v4196_v52, %v4196_v52  ;;  %v1826_v57 = vrot.slane %v4196_v52, 7  ;;  %2727 = vst.msk [vmem:[%s740_s4] sm:$0xff] %vm893_vm1, %v4196_v52  ;;  %v1982_v61 = vrot.slane %v4196_v52, 1 }
 0x433   : > { %3319 = vmatmul.mubr.msk.bf16.vlgmr.msra.gmra.mxu0 %vm893_vm1, %v1838_v55  ;;  %v1827_v10 = vsel %vm769_vm4, %v1826_v57, 0.0  ;;  %v1983_v63 = vsel %vm770_vm2, %v1982_v61, 0.0  ;;  %v3543_v55 = vld [vmem:[%s4469_s22 + $0x28] sm:$0xff]  }
 0x434   : > { %3335 = vmatpush3.bf16.msra.mxu0 %v3536_v53  ;;  %v1828_v58 = vpack.c.bf16 %v1827_v10, %v1827_v10  ;;  %3342 = vmatprep.mubr.msk.bf16.mxu0 %vm3643_vm0, %v3642_v1  ;;  %v1984_v0 = vpack.c.bf16 %v1983_v63, %v1983_v63  ;;  %v3544_v53 = vld [vmem:[%s4469_s22 + $0x10] sm:$0xff]   ;;  %v3546_v57 = vld [vmem:[%s4469_s22 + $0x8] sm:$0xff]   ;;  %v3545_v10 = vld [vmem:[%s4469_s22 + $0x20] sm:$0xff]  }
 0x435   : > { %3336 = vmatprep.subr.bf16.mxu0 %v3642_v1 }
 0x436   : > { %3331 = vmatmul.mubr.msk.bf16.vlgmr.msra.gmra.mxu1 %vm893_vm1, %v1828_v58  ;;  %v3547_v58 = vld [vmem:[%s4469_s22] sm:$0xff]  }
 0x437   : > { %3347 = vmatpush3.msra.mxu1 %v3927_v37  ;;  %3362 = vmatprep.mubr.msk.f32.mxu1 %vm3643_vm0, %v3642_v1 }
 0x438   : > { %3337 = vmatpush3.bf16.msra.mxu0 %v3537_v59  ;;  %3348 = vmatprep.subr.mxu1 %v3642_v1 }
 0x439   : > { %3338 = vmatprep.subr.bf16.mxu0 %v3642_v1  ;;  %3349 = vmatpush3.msra.mxu1 %v3935_v38 }
 0x43a   : > { %3350 = vmatprep.subr.mxu1 %v3642_v1 }
 0x43b   : > { %3351 = vmatpush3.msra.mxu1 %v3944_v39 }
 0x43c   : > { %3339 = vmatpush3.bf16.msra.mxu0 %v3538_v60  ;;  %3352 = vmatprep.subr.mxu1 %v3642_v1 }
 0x43d   : > { %3340 = vmatprep.subr.bf16.mxu0 %v3642_v1  ;;  %3353 = vmatpush3.msra.mxu1 %v3953_v40 }
 0x43e   : > { %3354 = vmatprep.subr.mxu1 %v3642_v1 }
 0x43f   : > { %3355 = vmatpush3.msra.mxu1 %v3962_v41 }
 0x440   : > { %3341 = vmatpush3.bf16.msra.mxu0 %v3539_v62  ;;  %3356 = vmatprep.subr.mxu1 %v3642_v1 }
 0x441   : > { %3365 = vmatprep.subr.mxu0 %v3642_v1  ;;  %3357 = vmatpush3.msra.mxu1 %v3971_v42 }
 0x442   : > { %3358 = vmatprep.subr.mxu1 %v3642_v1 }
 0x443   : > { %3343 = vmatmul.mubr.msk.bf16.vlgmr.msra.gmra.mxu0 %vm893_vm1, %v1984_v0  ;;  %3359 = vmatpush3.msra.mxu1 %v3977_v43 }
 0x444   : > { %3366 = vmatpush3.msra.mxu0 %v3927_v37  ;;  %3360 = vmatprep.subr.mxu1 %v3642_v1 }
 0x445   : > { %3367 = vmatprep.subr.mxu0 %v3642_v1  ;;  %3361 = vmatpush3.msra.mxu1 %v3986_v44 }
 0x446   : > { %3368 = vmatpush3.msra.mxu0 %v3935_v38  ;;  %3381 = vmatprep.mubr.msk.f32.mxu0 %vm3643_vm0, %v3642_v1 }
 0x447   : > { %3369 = vmatprep.subr.mxu0 %v3642_v1  ;;  %3384 = vmatprep.subr.bf16.mxu1 %v3642_v1 }
 0x448   : > { %3370 = vmatpush3.msra.mxu0 %v3944_v39 }
 0x449   : > { %3371 = vmatprep.subr.mxu0 %v3642_v1 }
 0x44a   : > { %3372 = vmatpush3.msra.mxu0 %v3953_v40 }
 0x44b   : > { %3373 = vmatprep.subr.mxu0 %v3642_v1 }
 0x44c   : > { %3374 = vmatpush3.msra.mxu0 %v3962_v41 }
 0x44d   : > { %3375 = vmatprep.subr.mxu0 %v3642_v1 }
 0x44e   : > { %3376 = vmatpush3.msra.mxu0 %v3971_v42 }
 0x44f   : > { %3377 = vmatprep.subr.mxu0 %v3642_v1 }
 0x450   : > { %3378 = vmatpush3.msra.mxu0 %v3977_v43 }
 0x451   : > { %3379 = vmatprep.subr.mxu0 %v3642_v1 }
 0x452   : > { %3380 = vmatpush3.msra.mxu0 %v3986_v44 }
 0x453   : > { %3396 = vmatprep.subr.bf16.mxu0 %v3642_v1 }
 0x4f3   : > { %v1900_v56 = vpop.f32.mrf.mxu0 }
 0x4f5   : > { %v3320_v9 = vpop.f32.mrf.mxu0 }
 0x4f6   : > { %v1967_v11 = vpop.f32.mrf.mxu1 }
 0x4f7   : > { %v1903_v30 = vpop.f32.mrf.mxu0  ;;  %v1968_v17 = vadd.f32 %v1967_v11, %v1900_v56  ;;  %v2964_v11 = vld [vmem:[%s4464_s17] ss:$0 sm:$0xff] }
 0x4f8   : > { %v3332_v13 = vpop.f32.mrf.mxu1  ;;  %v2254_v30 = vadd.f32 1.0, %v4271_v4 }
 0x4f9   : > { %v3321_v14 = vpop.f32.mrf.mxu0 }
 0x4fa   : > { %v1970_v15 = vpop.f32.mrf.mxu1  ;;  %v2965_v14 = vld [vmem:[%s4462_s15] ss:$0 sm:$0xff] }
 0x4fc   : > { %v3333_v16 = vpop.f32.mrf.mxu1 }
 0x4fd   : > { %v2258_v16 = vrot.slane %v2254_v30, %v4000_v54 }
 0x503   : > { %v2046_v19 = vpop.f32.mrf.mxu0 }
 0x504   : > { %v2052_v20 = vadd.f32 %v2046_v19, %v1968_v17  ;;  %v2266_v19 = vpop.permute.xlu0 %2265 }
 0x505   : > { %v3344_v21 = vpop.f32.mrf.mxu0 }
 0x506   : > { %v2059_v22 = vadd.f32 %v2961_v18, %v2052_v20 }
 0x507   : > { %v2049_v23 = vpop.f32.mrf.mxu0 }
 0x508   : > { %v2062_v24 = vsel %vm893_vm1, %v2059_v22, 0.0  ;;  %v2069_v25 = vmul.f32 %v2059_v22, %v2059_v22 }
 0x509   : > { %v2063_v26 = vrot.slane %v2062_v24, 4  ;;  %v3345_v27 = vpop.f32.mrf.mxu0 }
 0x50a   : > { %v2070_v28 = vsel %vm893_vm1, %v2069_v25, 0.0 }
 0x50b   : > { %v2064_v29 = vadd.f32 %v2063_v26, %v2062_v24  ;;  %v2071_v31 = vrot.slane %v2070_v28, 4 }
 0x50d   : > { %v2065_v32 = vrot.slane %v2064_v29, 2  ;;  %v2072_v33 = vadd.f32 %v2071_v31, %v2070_v28  ;;  %v3548_v31 = vld [vmem:[%s4469_s22 + $0x58] sm:$0xff]  }
 0x50f   : > { %v2066_v34 = vadd.f32 %v2065_v32, %v2064_v29  ;;  %v2073_v35 = vrot.slane %v2072_v33, 2 }
 0x511   : > { %v2067_v36 = vrot.slane %v2066_v34, 1  ;;  %v2074_v45 = vadd.f32 %v2073_v35, %v2072_v33 }
 0x513   : > { %v2068_v46 = vadd.f32 %v2067_v36, %v2066_v34  ;;  %v2075_v47 = vrot.slane %v2074_v45, 1  ;;  %v3549_v36 = vld [vmem:[%s4469_s22 + $0x50] sm:$0xff]  }
 0x515   : > { %3363 = vmatmul.mubr.msk.f32.vlgmr.msra.gmra.mxu1 %vm893_vm1, %v2068_v46  ;;  %v2076_v48 = vadd.f32 %v2075_v47, %v2074_v45  ;;  %v3550_v45 = vld [vmem:[%s4469_s22 + $0x48] sm:$0xff]   ;;  %v3551_v47 = vld [vmem:[%s4469_s22 + $0x40] sm:$0xff]  }
 0x516   : > { %3392 = vmatprep.mubr.msk.bf16.mxu1 %vm3643_vm0, %v3642_v1  ;;  %3385 = vmatpush3.bf16.msra.mxu1 %v3540_v49 }
 0x517   : > { %3382 = vmatmul.mubr.msk.f32.vlgmr.msra.gmra.mxu0 %vm893_vm1, %v2076_v48  ;;  %3386 = vmatprep.subr.bf16.mxu1 %v3642_v1 }
 0x518   : > { %3404 = vmatprep.mubr.msk.bf16.mxu0 %vm3643_vm0, %v3642_v1  ;;  %3397 = vmatpush3.bf16.msra.mxu0 %v3542_v50 }
 0x519   : > { %3398 = vmatprep.subr.bf16.mxu0 %v3642_v1 }
 0x51a   : > { %3387 = vmatpush3.bf16.msra.mxu1 %v3541_v51 }
 0x51b   : > { %3388 = vmatprep.subr.bf16.mxu1 %v3642_v1 }
 0x51c   : > { %3399 = vmatpush3.bf16.msra.mxu0 %v3544_v53 }
 0x51d   : > { %3400 = vmatprep.subr.bf16.mxu0 %v3642_v1 }
 0x51e   : > { %3389 = vmatpush3.bf16.msra.mxu1 %v3543_v55 }
 0x51f   : > { %3390 = vmatprep.subr.bf16.mxu1 %v3642_v1 }
 0x520   : > { %3401 = vmatpush3.bf16.msra.mxu0 %v3546_v57 }
 0x521   : > { %3402 = vmatprep.subr.bf16.mxu0 %v3642_v1 }
 0x522   : > { %3391 = vmatpush3.bf16.msra.mxu1 %v3545_v10 }
 0x523   : > { %3408 = vmatprep.subr.bf16.mxu1 %v3642_v1 }
 0x524   : > { %3403 = vmatpush3.bf16.msra.mxu0 %v3547_v58 }
 0x525   : > { %3420 = vmatprep.subr.mxu0 %v3642_v1 }
 0x5d5   : > { %v2146_v59 = vpop.f32.mrf.mxu1 }
 0x5d6   : > { %v2150_v60 = vmul.f32 0.015625, %v2146_v59 }
 0x5d7   : > { %v3364_v61 = vpop.f32.mrf.mxu1  ;;  %v2220_v62 = vpop.f32.mrf.mxu0 }
 0x5d8   : > { %v2225_v63 = vmul.f32 %v2150_v60, %v2150_v60  ;;  %v2224_v0 = vmul.f32 0.015625, %v2220_v62  ;;  %v2233_v7 = vrot.slane %v2150_v60, %v4000_v54 }
 0x5d9   : > { %v3383_v2 = vpop.f32.mrf.mxu0 }
 0x5da   : > { %v2226_v3 = vsub.f32 %v2224_v0, %v2225_v63  ;;  %v2234_v56 = vsub.f32 %v2059_v22, %v2233_v7 }
 0x5dc   : > { %v2227_v5 = vmax.f32 %v2226_v3, 0.0 }
 0x5de   : > { %v2228_v6 = vadd.f32 1e-05, %v2227_v5 }
 0x5e0   : > { %3568 = vrsqrt.f32 %v2228_v6 }
 0x5ed   : > { %v3569_v8 = vpop.eup %3568 }
 0x5ee   : > { %v2238_v9 = vrot.slane %v3569_v8, %v4000_v54 }
 0x5f0   : > { %v2239_v13 = vmul.f32 %v2238_v9, %v2234_v56 }
 0x5f2   : > { %v2246_v15 = vmul.f32 %v2964_v11, %v2239_v13 }
 0x5f4   : > { %v2253_v17 = vadd.f32 %v2965_v14, %v2246_v15 }
 0x5f6   : > { %v2259_v18 = vmul.f32 %v2258_v16, %v2253_v17 }
 0x5f8   : > { %v2268_v20 = vadd.f32 %v2266_v19, %v2259_v18 }
 0x5fa   : > { %v2269_v21 = vmin.f32 %v2268_v20, 20.0 }
 0x5fc   : > { %v2270_v22 = vmul.f32 1.442695, %v2269_v21 }
 0x5fe   : > { %3570 = vpow2.f32 %v2270_v22 }
 0x60b   : > { %v3571_v23 = vpop.eup %3570 }
 0x60c   : > { %v2272_v24 = vadd.f32 1.0, %v3571_v23 }
 0x60e   : > { %v2273_v25 = vmul.f32 %v2272_v24, %v2272_v24 }
 0x610   : > { %v2276_v26 = vadd.f32 1.0, %v2273_v25  ;;  %v2966_v4 = vadd.f32 -1.0, %v2273_v25 }
 0x612   : > { %3572 = vrcp.f32 %v2276_v26  ;;  %v2275_v27 = vmul.f32 %v2966_v4, %v2268_v20 }
 0x61f   : > { %v3573_v28 = vpop.eup %3572 }
 0x620   : > { %v2278_v29 = vmul.f32 %v3573_v28, %v2275_v27 }
 0x622   : > { %v2300_v32 = vpack.c.bf16 %v2278_v29, %v2278_v29  ;;  %v2288_v33 = vrot.slane %v2278_v29, 7  ;;  %v2444_v46 = vrot.slane %v2278_v29, 1 }
 0x624   : > { %3393 = vmatmul.mubr.msk.bf16.vlgmr.msra.gmra.mxu1 %vm893_vm1, %v2300_v32  ;;  %v2289_v34 = vsel %vm769_vm4, %v2288_v33, 0.0  ;;  %v2445_v48 = vsel %vm770_vm2, %v2444_v46, 0.0 }
 0x625   : > { %3409 = vmatpush3.bf16.msra.mxu1 %v3548_v31  ;;  %v2290_v35 = vpack.c.bf16 %v2289_v34, %v2289_v34  ;;  %3416 = vmatprep.mubr.msk.bf16.mxu1 %vm3643_vm0, %v3642_v1  ;;  %v2446_v49 = vpack.c.bf16 %v2445_v48, %v2445_v48 }
 0x626   : > { %3410 = vmatprep.subr.bf16.mxu1 %v3642_v1 }
 0x627   : > { %3405 = vmatmul.mubr.msk.bf16.vlgmr.msra.gmra.mxu0 %vm893_vm1, %v2290_v35 }
 0x628   : > { %3421 = vmatpush3.msra.mxu0 %v3927_v37  ;;  %3436 = vmatprep.mubr.msk.f32.mxu0 %vm3643_vm0, %v3642_v1 }
 0x629   : > { %3411 = vmatpush3.bf16.msra.mxu1 %v3549_v36  ;;  %3422 = vmatprep.subr.mxu0 %v3642_v1 }
 0x62a   : > { %3412 = vmatprep.subr.bf16.mxu1 %v3642_v1  ;;  %3423 = vmatpush3.msra.mxu0 %v3935_v38 }
 0x62b   : > { %3424 = vmatprep.subr.mxu0 %v3642_v1 }
 0x62c   : > { %3425 = vmatpush3.msra.mxu0 %v3944_v39 }
 0x62d   : > { %3413 = vmatpush3.bf16.msra.mxu1 %v3550_v45  ;;  %3426 = vmatprep.subr.mxu0 %v3642_v1 }
 0x62e   : > { %3414 = vmatprep.subr.bf16.mxu1 %v3642_v1  ;;  %3427 = vmatpush3.msra.mxu0 %v3953_v40 }
 0x62f   : > { %3428 = vmatprep.subr.mxu0 %v3642_v1 }
 0x630   : > { %3429 = vmatpush3.msra.mxu0 %v3962_v41 }
 0x631   : > { %3415 = vmatpush3.bf16.msra.mxu1 %v3551_v47  ;;  %3430 = vmatprep.subr.mxu0 %v3642_v1 }
 0x632   : > { %3439 = vmatprep.subr.mxu1 %v3642_v1  ;;  %3431 = vmatpush3.msra.mxu0 %v3971_v42 }
 0x633   : > { %3432 = vmatprep.subr.mxu0 %v3642_v1 }
 0x634   : > { %3417 = vmatmul.mubr.msk.bf16.vlgmr.msra.gmra.mxu1 %vm893_vm1, %v2446_v49  ;;  %3433 = vmatpush3.msra.mxu0 %v3977_v43 }
 0x635   : > { %3440 = vmatpush3.msra.mxu1 %v3927_v37  ;;  %3434 = vmatprep.subr.mxu0 %v3642_v1 }
 0x636   : > { %3441 = vmatprep.subr.mxu1 %v3642_v1  ;;  %3435 = vmatpush3.msra.mxu0 %v3986_v44 }
 0x637   : > { %3442 = vmatpush3.msra.mxu1 %v3935_v38  ;;  %3455 = vmatprep.mubr.msk.f32.mxu1 %vm3643_vm0, %v3642_v1 }
 0x638   : > { %3443 = vmatprep.subr.mxu1 %v3642_v1 }
 0x639   : > { %3444 = vmatpush3.msra.mxu1 %v3944_v39 }
 0x63a   : > { %3445 = vmatprep.subr.mxu1 %v3642_v1 }
 0x63b   : > { %3446 = vmatpush3.msra.mxu1 %v3953_v40 }
 0x63c   : > { %3447 = vmatprep.subr.mxu1 %v3642_v1 }
 0x63d   : > { %3448 = vmatpush3.msra.mxu1 %v3962_v41 }
 0x63e   : > { %3449 = vmatprep.subr.mxu1 %v3642_v1 }
 0x63f   : > { %3450 = vmatpush3.msra.mxu1 %v3971_v42  ;;  %v2998_v42 = vld [vmem:[%s4461_s14] ss:$0 sm:$0xff] }
 0x640   : > { %3451 = vmatprep.subr.mxu1 %v3642_v1 }
 0x641   : > { %3452 = vmatpush3.msra.mxu1 %v3977_v43 }
 0x642   : > { %3453 = vmatprep.subr.mxu1 %v3642_v1 }
 0x643   : > { %3454 = vmatpush3.msra.mxu1 %v3986_v44 }
 0x6e4   : > { %v2362_v12 = vpop.f32.mrf.mxu1 }
 0x6e6   : > { %v3394_v37 = vpop.f32.mrf.mxu1 }
 0x6e7   : > { %v2429_v38 = vpop.f32.mrf.mxu0 }
 0x6e8   : > { %v2365_v39 = vpop.f32.mrf.mxu1  ;;  %v2430_v53 = vadd.f32 %v2429_v38, %v2362_v12 }
 0x6e9   : > { %v3406_v40 = vpop.f32.mrf.mxu0 }
 0x6ea   : > { %v3395_v50 = vpop.f32.mrf.mxu1 }
 0x6eb   : > { %v2432_v51 = vpop.f32.mrf.mxu0 }
 0x6ed   : > { %v3407_v41 = vpop.f32.mrf.mxu0 }
 0x6f4   : > { %v2508_v55 = vpop.f32.mrf.mxu1 }
 0x6f5   : > { %v2514_v57 = vadd.f32 %v2508_v55, %v2430_v53 }
 0x6f6   : > { %v3418_v43 = vpop.f32.mrf.mxu1 }
 0x6f7   : > { %v2521_v10 = vadd.f32 %v2998_v42, %v2514_v57 }
 0x6f8   : > { %v2511_v1 = vpop.f32.mrf.mxu1 }
 0x6f9   : > { %v2524_v44 = vsel %vm893_vm1, %v2521_v10, 0.0  ;;  %v2531_v58 = vmul.f32 %v2521_v10, %v2521_v10 }
 0x6fa   : > { %v2525_v59 = vrot.slane %v2524_v44, 4  ;;  %v3419_v60 = vpop.f32.mrf.mxu1 }
 0x6fb   : > { %v2532_v61 = vsel %vm893_vm1, %v2531_v58, 0.0 }
 0x6fc   : > { %v2526_v62 = vadd.f32 %v2525_v59, %v2524_v44  ;;  %v2533_v63 = vrot.slane %v2532_v61, 4 }
 0x6fe   : > { %v2527_v0 = vrot.slane %v2526_v62, 2  ;;  %v2534_v2 = vadd.f32 %v2533_v63, %v2532_v61 }
 0x700   : > { %v2528_v3 = vadd.f32 %v2527_v0, %v2526_v62  ;;  %v2535_v5 = vrot.slane %v2534_v2, 2 }
 0x702   : > { %v2529_v6 = vrot.slane %v2528_v3, 1  ;;  %v2536_v7 = vadd.f32 %v2535_v5, %v2534_v2 }
 0x704   : > { %v2530_v8 = vadd.f32 %v2529_v6, %v2528_v3  ;;  %v2537_v56 = vrot.slane %v2536_v7, 1 }
 0x706   : > { %3437 = vmatmul.mubr.msk.f32.vlgmr.msra.gmra.mxu0 %vm893_vm1, %v2530_v8  ;;  %v2538_v9 = vadd.f32 %v2537_v56, %v2536_v7 }
 0x708   : > { %3456 = vmatmul.mubr.msk.f32.vlgmr.msra.gmra.mxu1 %vm893_vm1, %v2538_v9 }
 0x709   : > { %3593 = shalt.err (!%p3590_p3)
}
 0x70a   : > { %s3594_s6 = scalar_lea.hbm %s2745_s2, 128  ;;  %s3598_s4 = scalar_lea.hbm %s4470_s23, 256 }
 0x70b   : > { %p3595_p4 = scmp.ne.s32.totalorder %s2745_s2, %s3594_s6  ;;  %p3599_p9 = scmp.lt.s32.totalorder %s2745_s2, %s4470_s23 }
 0x70c   : > { %p3600_p10 = scmp.lt.s32.totalorder %s3598_s4, %s3594_s6 }
 0x70d   : > { %p3596_p7 = pnand %p3595_p4, %p3809_p5 }
 0x70e   : > { %p3601_p11 = por %p3600_p10, %p3599_p9 }
 0x70f   : > { %p3597_p8 = pneg %p3596_p7 }
 0x711   : > { %p3602_p12 = pnand %p3601_p11, %p3597_p8 }
 0x713   : > { %3605 = shalt.err (!%p3602_p12)
}
 0x714   : > { %3458 = dma.vmem_to_hbm [thread:$0]  (%p3809_p5), %s2748_s5, 128, %s2745_s2, %s2730_s30   ;;  %v3001_v25 = vld [vmem:[%s4465_s18] ss:$0 sm:$0xff] }
 0x715   : > { %v3002_v4 = vld [vmem:[%s4463_s16] ss:$0 sm:$0xff]  ;;  %s4510_s25 = sshll.u32 %s3837_s8, 3  ;;  %s4511_s0 = sld [smem:[#allocation21_spill]] }
 0x71b   : > { %s757_s1 = scalar_lea.vmem %s4511_s0, %s4510_s25 }
 0x7c6   : > { %v2608_v11 = vpop.f32.mrf.mxu0 }
 0x7c7   : > { %v2612_v30 = vmul.f32 0.015625, %v2608_v11 }
 0x7c8   : > { %v3438_v13 = vpop.f32.mrf.mxu0  ;;  %v2682_v14 = vpop.f32.mrf.mxu1 }
 0x7c9   : > { %v2687_v15 = vmul.f32 %v2612_v30, %v2612_v30  ;;  %v2686_v16 = vmul.f32 0.015625, %v2682_v14  ;;  %v2695_v21 = vrot.slane %v2612_v30, %v4000_v54 }
 0x7ca   : > { %v3457_v17 = vpop.f32.mrf.mxu1 }
 0x7cb   : > { %v2688_v18 = vsub.f32 %v2686_v16, %v2687_v15  ;;  %v2696_v23 = vsub.f32 %v2521_v10, %v2695_v21 }
 0x7cd   : > { %v2689_v19 = vmax.f32 %v2688_v18, 0.0 }
 0x7cf   : > { %v2690_v20 = vadd.f32 1e-05, %v2689_v19 }
 0x7d1   : > { %3574 = vrsqrt.f32 %v2690_v20 }
 0x7de   : > { %v3575_v22 = vpop.eup %3574 }
 0x7df   : > { %v2700_v24 = vrot.slane %v3575_v22, %v4000_v54 }
 0x7e1   : > { %v2701_v26 = vmul.f32 %v2700_v24, %v2696_v23 }
 0x7e3   : > { %v2708_v27 = vmul.f32 %v3001_v25, %v2701_v26 }
 0x7e5   : > { %v2715_v28 = vadd.f32 %v3002_v4, %v2708_v27 }
 0x7e7   : > { %v2716_v29 = vmin.f32 %v2715_v28, 20.0 }
 0x7e9   : > { %v2717_v31 = vmul.f32 1.442695, %v2716_v29 }
 0x7eb   : > { %3576 = vpow2.f32 %v2717_v31 }
 0x7f8   : > { %v3577_v32 = vpop.eup %3576 }
 0x7f9   : > { %v2719_v33 = vadd.f32 1.0, %v3577_v32 }
 0x7fb   : > { %v2720_v34 = vmul.f32 %v2719_v33, %v2719_v33 }
 0x7fd   : > { %v2723_v35 = vadd.f32 1.0, %v2720_v34  ;;  %v3003_v54 = vadd.f32 -1.0, %v2720_v34 }
 0x7ff   : > { %3578 = vrcp.f32 %v2723_v35  ;;  %v2722_v36 = vmul.f32 %v3003_v54, %v2715_v28 }
 0x80c   : > { %v3579_v45 = vpop.eup %3578 }
 0x80d   : > { %v2725_v46 = vmul.f32 %v3579_v45, %v2722_v36 }
 0x80f   : > { %v2726_v47 = vadd.f32 %v2725_v46, %v4196_v52 }
 0x811   : > { %2728 = vst.msk [vmem:[%s757_s1] sm:$0xff] %vm893_vm1, %v2726_v47 }
 0x812 PF: > { %s4512_s6 = sld [smem:[#allocation7_spill]] }
 0x813   : > { %s4513_s27 = sld [smem:[#allocation5_spill]] }
 0x818   : > { %p3464_p5 = scmp.ge.s32.totalorder %s4512_s6, 2 }
 0x819   : > { %s2762_s4 = sand.u32 1, %s4513_s27  }
 0x81a   : > { %p3461_p13 = pnand %p3464_p5, %p3813_p6  ;;  %s2763_s24 = scalar_lea.sflag [#allocation3], %s2762_s4 }
 0x81c   : > { %p3462_p0 = pneg %p3461_p13 }
 0x81e   : > { %3623 = dma.done.wait (%p3462_p0), %s2763_s24, 128  }
 0x81f   : > { %3625 = vsyncadd (%p3462_p0), %s2763_s24, 4294967168  ;;  %s4515_s28 = sld [smem:[#allocation8_spill]]  ;;  %s4518_s5 = smov %s3632_s26 }
 0x820   : > { %s4516_s8 = sld [smem:[#allocation6_spill]] }
 0x821   : > { %s4517_s27 = sld [smem:[#allocation9_spill]] }
 0x825   : > { %p35_p1 = scmp.ge.s32.totalorder %s4515_s28, 4  }
 0x826   : > { %s4519_s26 = smov %s4516_s8 }
 0x827   :  { %37 = sbr.rel (!%p35_p1) target bundleno = 15 (0xf), region = 170 }
 0x82c   :  { %2775 = vsyncpa [#allocation3], 1 }
 0x82d   :  { %2777 = vsyncpa [#allocation3 + $0x1], 1 }

// kernel: temporal_control_unet_forward.11
= control target key start
LH: loop header
LB: loop body
LE: loop exit
PB: predicated region body
PF: predicated region fallthrough
CT: control target
= control target key end

     0   :  { %s1482_s27 = smov 0   ;;  %s1710_s0 = inlined_call_operand.vmem [shape: f32[2,16,64], index: 0, kind: input, shape index: {}]   ;;  %s1711_s1 = inlined_call_operand.vmem [shape: f32[64,64], index: 1, kind: input, shape index: {}]   ;;  %s1712_s2 = inlined_call_operand.vmem [shape: f32[1,64], index: 2, kind: input, shape index: {}]   ;;  %s1713_s3 = inlined_call_operand.vmem [shape: f32[1,8], index: 3, kind: input, shape index: {}]   ;;  %s1714_s4 = inlined_call_operand.vmem [shape: f32[1,64], index: 4, kind: input, shape index: {}]   ;;  %s1715_s5 = inlined_call_operand.vmem [shape: f32[1,64], index: 5, kind: input, shape index: {}]   ;;  %s1716_s6 = inlined_call_operand.vmem [shape: bf16[5,64,64], index: 6, kind: input, shape index: {}]   ;;  %s1717_s7 = inlined_call_operand.vmem [shape: bf16[64,8], index: 7, kind: input, shape index: {}]   ;;  %s1718_s8 = inlined_call_operand.vmem [shape: f32[2,16,8], index: 8, kind: output, shape index: {}]  }
   0x1 LB: > { %s1142_s28 = sadd.s32 4294967295, %s1433_s27   ;;  %p1146_p0 = scmp.ge.s32.totalorder %s1433_s27, 1  ;;  %s1433_s27 = sphi %s1482_s27, %s18_s27  }
   0x2   : > { %p262_p1 = scmp.lt.s32.totalorder %s1433_s27, 3 }
   0x4   : > { %p263_p2 = pnand %p1146_p0, %p262_p1 }
   0x5   : > { %p296_p3 = scmp.lt.s32.totalorder (!%p263_p2), %s1142_s28, 1 }
   0x6   : > { %266 = sbr.rel (%p263_p2) target bundleno = 744 (0x2e8), region = 52 }
   0xb   : > { %v1393_v0 = vld [vmem:[%s1716_s6 + $0x38] sm:$0xff]   ;;  %v317_v1 = vlaneseq  ;;  %v1435_v2 = vmov 0.0   ;;  %v1395_v4 = vld [vmem:[%s1716_s6 + $0x30] sm:$0xff]   ;;  %vm1436_vm0 = vmmov 0   ;;  %s1720_s28 = smov (!%p296_p3, %s1142_s28), 1  ;;  %v1397_v7 = vld [vmem:[%s1716_s6 + $0x28] sm:$0xff]  }
   0xc   : > { %1273 = vmatprep.subr.bf16.mxu0 %v1435_v2  ;;  %1285 = vmatprep.subr.bf16.mxu1 %v1435_v2  ;;  %v1394_v3 = vld [vmem:[%s1716_s6 + $0x18] sm:$0xff]   ;;  %v1396_v5 = vld [vmem:[%s1716_s6 + $0x10] sm:$0xff]   ;;  %s1223_s17 = sshll.u32 %s1720_s28, 4  ;;  %v1398_v8 = vld [vmem:[%s1716_s6 + $0x8] sm:$0xff]   ;;  %vm394_vm5 = vcmask 523264   ;;  %vm1084_vm10 = vcmask 64512  }
   0xd   : > { %1274 = vmatpush3.bf16.msra.mxu0 %v1393_v0  ;;  %1281 = vmatprep.mubr.msk.bf16.mxu0 %vm1436_vm0, %v1435_v2  ;;  %v1507_v6 = vshrl.u32 %v317_v1, 7  ;;  %s300_s22 = scalar_lea.vmem %s1710_s0, %s1223_s17  ;;  %v1399_v9 = vld [vmem:[%s1716_s6 + $0x20] sm:$0xff]   ;;  %v1401_v25 = vld [vmem:[%s1716_s6 + $0x58] sm:$0xff]   ;;  %v1403_v27 = vld [vmem:[%s1716_s6 + $0x50] sm:$0xff]   ;;  %s305_s30 = scalar_lea.vmem %s1718_s8, %s1223_s17 }
   0xe   : > { %1286 = vmatpush3.bf16.msra.mxu1 %v1394_v3  ;;  %1275 = vmatprep.subr.bf16.mxu0 %v1435_v2  ;;  %v1532_v10 = vld [vmem:[%s300_s22] sm:$0xff]  ;;  %v1534_v11 = vld [vmem:[%s300_s22 + $0x8] sm:$0xff]  ;;  %v1402_v26 = vld [vmem:[%s1716_s6 + $0x78] sm:$0xff]  }
   0xf   : > { %1287 = vmatprep.subr.bf16.mxu1 %v1435_v2  ;;  %1293 = vmatprep.mubr.msk.bf16.mxu1 %vm1436_vm0, %v1435_v2  ;;  %vm322_vm1 = vcmp.ge.s32.totalorder %v1507_v6, 1  ;;  %vm360_vm2 = vcmp.lt.s32.totalorder %v1507_v6, 1  ;;  %vm320_vm3 = vcmp.ge.s32.totalorder %v1507_v6, 2  ;;  %vm339_vm4 = vcmp.lt.s32.totalorder %v1507_v6, 2  ;;  %v1400_v16 = vld [vmem:[%s1716_s6] sm:$0xff]   ;;  %v1404_v28 = vld [vmem:[%s1716_s6 + $0x70] sm:$0xff]  }
  0x10   : > { %v358_v12 = vrot.slane %v1532_v10, 7  ;;  %v359_v13 = vrot.slane %v1534_v11, 7  ;;  %v337_v14 = vrot.slane %v1532_v10, 6  ;;  %v338_v15 = vrot.slane %v1534_v11, 6  ;;  %v1405_v32 = vld [vmem:[%s1716_s6 + $0x48] sm:$0xff]   ;;  %v1407_v35 = vld [vmem:[%s1716_s6 + $0x40] sm:$0xff]  }
  0x11   : > { %1276 = vmatpush3.bf16.msra.mxu0 %v1395_v4  ;;  %v319_v29 = vadd.s32 8, %v1507_v6  ;;  %v596_v30 = vrot.slane %v1532_v10, 1  ;;  %v597_v31 = vrot.slane %v1534_v11, 1  ;;  %v1406_v33 = vld [vmem:[%s1716_s6 + $0x68] sm:$0xff]   ;;  %vm598_vm6 = vcmp.lt.s32.totalorder %v1507_v6, 7  ;;  %v1408_v36 = vld [vmem:[%s1716_s6 + $0x60] sm:$0xff]  }
  0x12   : > { %1288 = vmatpush3.bf16.msra.mxu1 %v1396_v5  ;;  %1277 = vmatprep.subr.bf16.mxu0 %v1435_v2  ;;  %v361_v17 = vsel %vm360_vm2, %v358_v12, %v359_v13  ;;  %v362_v18 = vsel %vm360_vm2, %v359_v13, %v358_v12  ;;  %v340_v19 = vsel %vm339_vm4, %v337_v14, %v338_v15  ;;  %v1409_v40 = vld [vmem:[%s1716_s6 + $0x98] sm:$0xff]   ;;  %v1410_v42 = vld [vmem:[%s1716_s6 + $0x90] sm:$0xff]   ;;  %v687_v43 = vrot.slane %v1532_v10, 2  ;;  %v1411_v45 = vld [vmem:[%s1716_s6 + $0x88] sm:$0xff]  }
  0x13   : > { %1289 = vmatprep.subr.bf16.mxu1 %v1435_v2  ;;  %v367_v20 = vsel %vm322_vm1, %v362_v18, 0.0  ;;  %v341_v21 = vsel %vm339_vm4, %v338_v15, %v337_v14  ;;  %vm325_vm7 = vcmp.lt.s32.totalorder %v319_v29, 15  ;;  %v600_v34 = vsel %vm598_vm6, %v597_v31, %v596_v30  ;;  %v1412_v47 = vld [vmem:[%s1716_s6 + $0x80] sm:$0xff]   ;;  %v314_v51 = vld [vmem:[%s1711_s1 + $0x38] sm:$0xff]  ;;  %v313_v52 = vld [vmem:[%s1711_s1 + $0x30] sm:$0xff] }
  0x14   : > { %v369_v22 = vpack.c.bf16 %v361_v17, %v367_v20  ;;  %v346_v23 = vsel %vm320_vm3, %v341_v21, 0.0  ;;  %v599_v37 = vsel %vm598_vm6, %v596_v30, %v597_v31  ;;  %v606_v38 = vsel %vm325_vm7, %v600_v34, 0.0  ;;  %v312_v53 = vld [vmem:[%s1711_s1 + $0x28] sm:$0xff]  ;;  %v311_v54 = vld [vmem:[%s1711_s1 + $0x20] sm:$0xff]  ;;  %v310_v55 = vld [vmem:[%s1711_s1 + $0x18] sm:$0xff] }
  0x15   : > { %1278 = vmatpush3.bf16.msra.mxu0 %v1397_v7  ;;  %v348_v24 = vpack.c.bf16 %v340_v19, %v346_v23  ;;  %v516_v39 = vpack.c.bf16 %v1534_v11, %v1532_v10  ;;  %v607_v41 = vpack.c.bf16 %v606_v38, %v599_v37  ;;  %v688_v44 = vrot.slane %v1534_v11, 2  ;;  %v309_v56 = vld [vmem:[%s1711_s1 + $0x10] sm:$0xff]  ;;  %v308_v57 = vld [vmem:[%s1711_s1 + $0x8] sm:$0xff]  ;;  %v307_v58 = vld [vmem:[%s1711_s1] sm:$0xff] }
  0x16   : > { %1290 = vmatpush3.bf16.msra.mxu1 %v1398_v8  ;;  %1279 = vmatprep.subr.bf16.mxu0 %v1435_v2  ;;  %vm689_vm8 = vcmp.lt.s32.totalorder %v1507_v6, 6  ;;  %vm327_vm9 = vcmp.lt.s32.totalorder %v319_v29, 14  ;;  %v1208_v18 = vld [vmem:[%s1712_s2] ss:$0 sm:$0xff] }
  0x17   : > { %1291 = vmatprep.subr.bf16.mxu1 %v1435_v2  ;;  %v691_v46 = vsel %vm689_vm8, %v688_v44, %v687_v43  ;;  %v690_v48 = vsel %vm689_vm8, %v687_v43, %v688_v44 }
  0x18   : > { %v697_v49 = vsel %vm327_vm9, %v691_v46, 0.0 }
  0x19   : > { %1280 = vmatpush3.bf16.msra.mxu0 %v1399_v9  ;;  %v698_v50 = vpack.c.bf16 %v697_v49, %v690_v48  ;;  %v1413_v48 = vld [vmem:[%s1717_s7 + $0x18] sm:$0xff]   ;;  %v1414_v49 = vld [vmem:[%s1717_s7 + $0x10] sm:$0xff]  }
  0x1a   : > { %1292 = vmatpush3.bf16.msra.mxu1 %v1400_v16  ;;  %1297 = vmatprep.subr.bf16.mxu0 %v1435_v2 }
  0x1b   : > { %1309 = vmatprep.subr.bf16.mxu1 %v1435_v2 }
  0x1c   : > { %1282 = vmatmul.mubr.msk.bf16.vlgmr.msra.gmra.mxu0 %vm394_vm5, %v369_v22 }
  0x1d   : > { %1294 = vmatmul.mubr.msk.bf16.vlgmr.msra.gmra.mxu1 %vm394_vm5, %v348_v24  ;;  %1298 = vmatpush3.bf16.msra.mxu0 %v1401_v25 }
  0x1e   : > { %1310 = vmatpush3.bf16.msra.mxu1 %v1402_v26  ;;  %1299 = vmatprep.subr.bf16.mxu0 %v1435_v2 }
  0x1f   : > { %1311 = vmatprep.subr.bf16.mxu1 %v1435_v2  ;;  %1305 = vmatprep.mubr.msk.bf16.mxu0 %vm1436_vm0, %v1435_v2 }
  0x20   : > { %1317 = vmatprep.mubr.msk.bf16.mxu1 %vm1436_vm0, %v1435_v2 }
  0x21   : > { %1300 = vmatpush3.bf16.msra.mxu0 %v1403_v27 }
  0x22   : > { %1312 = vmatpush3.bf16.msra.mxu1 %v1404_v28  ;;  %1301 = vmatprep.subr.bf16.mxu0 %v1435_v2 }
  0x23   : > { %1313 = vmatprep.subr.bf16.mxu1 %v1435_v2 }
  0x25   : > { %1302 = vmatpush3.bf16.msra.mxu0 %v1405_v32 }
  0x26   : > { %1314 = vmatpush3.bf16.msra.mxu1 %v1406_v33  ;;  %1303 = vmatprep.subr.bf16.mxu0 %v1435_v2 }
  0x27   : > { %1315 = vmatprep.subr.bf16.mxu1 %v1435_v2 }
  0x29   : > { %1304 = vmatpush3.bf16.msra.mxu0 %v1407_v35 }
  0x2a   : > { %1316 = vmatpush3.bf16.msra.mxu1 %v1408_v36  ;;  %1321 = vmatprep.subr.bf16.mxu0 %v1435_v2 }
  0x2b   : > { %1333 = vmatprep.subr.mxu1 %v1435_v2 }
  0x2c   : > { %1306 = vmatmul.mubr.msk.bf16.vlgmr.msra.gmra.mxu0 %vm394_vm5, %v516_v39 }
  0x2d   : > { %1322 = vmatpush3.bf16.msra.mxu0 %v1409_v40  ;;  %1318 = vmatmul.mubr.msk.bf16.vlgmr.msra.gmra.mxu1 %vm394_vm5, %v607_v41 }
  0x2e   : > { %1323 = vmatprep.subr.bf16.mxu0 %v1435_v2  ;;  %1329 = vmatprep.mubr.msk.bf16.mxu0 %vm1436_vm0, %v1435_v2 }
  0x2f   : > { %1349 = vmatprep.mubr.msk.f32.mxu1 %vm1436_vm0, %v1435_v2  ;;  %1334 = vmatpush3.msra.mxu1 %v314_v51 }
  0x30   : > { %1335 = vmatprep.subr.mxu1 %v1435_v2 }
  0x31   : > { %1324 = vmatpush3.bf16.msra.mxu0 %v1410_v42  ;;  %1336 = vmatpush3.msra.mxu1 %v313_v52 }
  0x32   : > { %1325 = vmatprep.subr.bf16.mxu0 %v1435_v2  ;;  %1337 = vmatprep.subr.mxu1 %v1435_v2 }
  0x33   : > { %1338 = vmatpush3.msra.mxu1 %v312_v53 }
  0x34   : > { %1339 = vmatprep.subr.mxu1 %v1435_v2 }
  0x35   : > { %1326 = vmatpush3.bf16.msra.mxu0 %v1411_v45  ;;  %1340 = vmatpush3.msra.mxu1 %v311_v54 }
  0x36   : > { %1327 = vmatprep.subr.bf16.mxu0 %v1435_v2  ;;  %1341 = vmatprep.subr.mxu1 %v1435_v2 }
  0x37   : > { %1342 = vmatpush3.msra.mxu1 %v310_v55 }
  0x38   : > { %1343 = vmatprep.subr.mxu1 %v1435_v2 }
  0x39   : > { %1328 = vmatpush3.bf16.msra.mxu0 %v1412_v47  ;;  %1344 = vmatpush3.msra.mxu1 %v309_v56 }
  0x3a   : > { %1352 = vmatprep.subr.mxu0 %v1435_v2  ;;  %1345 = vmatprep.subr.mxu1 %v1435_v2 }
  0x3b   : > { %1346 = vmatpush3.msra.mxu1 %v308_v57 }
  0x3c   : > { %1330 = vmatmul.mubr.msk.bf16.vlgmr.msra.gmra.mxu0 %vm394_vm5, %v698_v50  ;;  %1347 = vmatprep.subr.mxu1 %v1435_v2  ;;  %v1415_v50 = vld [vmem:[%s1717_s7 + $0x8] sm:$0xff]  }
  0x3d   : > { %1368 = vmatprep.mubr.msk.f32.mxu0 %vm1436_vm0, %v1435_v2  ;;  %1353 = vmatpush3.msra.mxu0 %v314_v51  ;;  %v1416_v51 = vld [vmem:[%s1717_s7] sm:$0xff]  }
  0x3e   : > { %1354 = vmatprep.subr.mxu0 %v1435_v2  ;;  %1348 = vmatpush3.msra.mxu1 %v307_v58 }
  0x3f   : > { %1355 = vmatpush3.msra.mxu0 %v313_v52  ;;  %1371 = vmatprep.subr.bf16.mxu1 %v1435_v2 }
  0x40   : > { %1356 = vmatprep.subr.mxu0 %v1435_v2 }
  0x41   : > { %1357 = vmatpush3.msra.mxu0 %v312_v53 }
  0x42   : > { %1358 = vmatprep.subr.mxu0 %v1435_v2 }
  0x43   : > { %1359 = vmatpush3.msra.mxu0 %v311_v54 }
  0x44   : > { %1360 = vmatprep.subr.mxu0 %v1435_v2 }
  0x45   : > { %1361 = vmatpush3.msra.mxu0 %v310_v55 }
  0x46   : > { %1362 = vmatprep.subr.mxu0 %v1435_v2 }
  0x47   : > { %1363 = vmatpush3.msra.mxu0 %v309_v56 }
  0x48   : > { %1364 = vmatprep.subr.mxu0 %v1435_v2 }
  0x49   : > { %1365 = vmatpush3.msra.mxu0 %v308_v57 }
  0x4a   : > { %1366 = vmatprep.subr.mxu0 %v1435_v2 }
  0x4b   : > { %1367 = vmatpush3.msra.mxu0 %v307_v58 }
  0xdc   : > { %v432_v59 = vpop.f32.mrf.mxu0 }
  0xdd   : > { %v500_v60 = vpop.f32.mrf.mxu1 }
  0xde   : > { %v1283_v61 = vpop.f32.mrf.mxu0  ;;  %v501_v13 = vadd.f32 %v500_v60, %v432_v59 }
  0xdf   : > { %v1295_v62 = vpop.f32.mrf.mxu1 }
  0xe0   : > { %v435_v63 = vpop.f32.mrf.mxu0  ;;  %v954_v62 = vsub.s32 0, %v1507_v6 }
  0xe1   : > { %v503_v0 = vpop.f32.mrf.mxu1 }
  0xe2   : > { %v1284_v1 = vpop.f32.mrf.mxu0  ;;  %v504_v15 = vadd.f32 %v503_v0, %v435_v63 }
  0xe3   : > { %v1296_v3 = vpop.f32.mrf.mxu1 }
  0xec   : > { %v578_v4 = vpop.f32.mrf.mxu0 }
  0xed   : > { %v669_v5 = vpop.f32.mrf.mxu1  ;;  %v585_v14 = vadd.f32 %v578_v4, %v501_v13 }
  0xee   : > { %v1307_v7 = vpop.f32.mrf.mxu0 }
  0xef   : > { %v1319_v8 = vpop.f32.mrf.mxu1  ;;  %v676_v16 = vadd.f32 %v669_v5, %v585_v14 }
  0xf0   : > { %v581_v9 = vpop.f32.mrf.mxu0  ;;  %v1212_v8 = vld [vmem:[%s1714_s4] ss:$0 sm:$0xff] }
  0xf1   : > { %v672_v10 = vpop.f32.mrf.mxu1  ;;  %v586_v17 = vadd.f32 %v581_v9, %v504_v15 }
  0xf2   : > { %v1308_v11 = vpop.f32.mrf.mxu0 }
  0xf3   : > { %v1320_v12 = vpop.f32.mrf.mxu1  ;;  %v677_v22 = vadd.f32 %v672_v10, %v586_v17 }
  0xfc   : > { %v760_v19 = vpop.f32.mrf.mxu0 }
  0xfd   : > { %v767_v20 = vadd.f32 %v760_v19, %v676_v16 }
  0xfe   : > { %v1331_v21 = vpop.f32.mrf.mxu0 }
  0xff   : > { %v775_v23 = vadd.f32 %v1208_v18, %v767_v20 }
 0x100   : > { %v763_v24 = vpop.f32.mrf.mxu0 }
 0x101   : > { %v768_v25 = vadd.f32 %v763_v24, %v677_v22  ;;  %v788_v27 = vmul.f32 %v775_v23, %v775_v23  ;;  %v779_v29 = vsel %vm394_vm5, %v775_v23, 0.0 }
 0x102   : > { %v1332_v26 = vpop.f32.mrf.mxu0 }
 0x103   : > { %v776_v28 = vadd.f32 %v1208_v18, %v768_v25  ;;  %v790_v33 = vsel %vm394_vm5, %v788_v27, 0.0 }
 0x105   : > { %v780_v30 = vsel %vm394_vm5, %v776_v28, 0.0  ;;  %v789_v31 = vmul.f32 %v776_v28, %v776_v28 }
 0x106   : > { %v781_v32 = vadd.f32 %v780_v30, %v779_v29 }
 0x107   : > { %v791_v34 = vsel %vm394_vm5, %v789_v31, 0.0 }
 0x108   : > { %v782_v35 = vrot.slane %v781_v32, 4  ;;  %v792_v36 = vadd.f32 %v791_v34, %v790_v33  ;;  %v1215_v33 = vld [vmem:[%s1713_s3] ss:$0 sm:$0xff] }
 0x10a   : > { %v783_v37 = vadd.f32 %v782_v35, %v781_v32  ;;  %v793_v38 = vrot.slane %v792_v36, 4 }
 0x10c   : > { %v784_v39 = vrot.slane %v783_v37, 2  ;;  %v794_v40 = vadd.f32 %v793_v38, %v792_v36 }
 0x10e   : > { %v785_v41 = vadd.f32 %v784_v39, %v783_v37  ;;  %v795_v42 = vrot.slane %v794_v40, 2 }
 0x110   : > { %v786_v43 = vrot.slane %v785_v41, 1  ;;  %v796_v44 = vadd.f32 %v795_v42, %v794_v40 }
 0x112   : > { %v787_v45 = vadd.f32 %v786_v43, %v785_v41  ;;  %v797_v46 = vrot.slane %v796_v44, 1 }
 0x114   : > { %1350 = vmatmul.mubr.msk.f32.vlgmr.msra.gmra.mxu1 %vm394_vm5, %v787_v45  ;;  %v798_v47 = vadd.f32 %v797_v46, %v796_v44 }
 0x115   : > { %1379 = vmatprep.mubr.msk.bf16.mxu1 %vm1436_vm0, %v1435_v2  ;;  %1372 = vmatpush3.bf16.msra.mxu1 %v1413_v48 }
 0x116   : > { %1369 = vmatmul.mubr.msk.f32.vlgmr.msra.gmra.mxu0 %vm394_vm5, %v798_v47  ;;  %1373 = vmatprep.subr.bf16.mxu1 %v1435_v2 }
 0x119   : > { %1374 = vmatpush3.bf16.msra.mxu1 %v1414_v49 }
 0x11a   : > { %1375 = vmatprep.subr.bf16.mxu1 %v1435_v2 }
 0x11d   : > { %1376 = vmatpush3.bf16.msra.mxu1 %v1415_v50 }
 0x11e   : > { %1377 = vmatprep.subr.bf16.mxu1 %v1435_v2  ;;  %v1211_v2 = vld [vmem:[%s1715_s5] ss:$0 sm:$0xff] }
 0x121   : > { %1378 = vmatpush3.bf16.msra.mxu1 %v1416_v51 }
 0x1d4   : > { %v868_v52 = vpop.f32.mrf.mxu1 }
 0x1d5   : > { %v872_v53 = vmul.f32 0.0078125, %v868_v52 }
 0x1d6   : > { %v1351_v54 = vpop.f32.mrf.mxu1  ;;  %v942_v55 = vpop.f32.mrf.mxu0 }
 0x1d7   : > { %v947_v56 = vmul.f32 %v872_v53, %v872_v53  ;;  %v946_v57 = vmul.f32 0.0078125, %v942_v55  ;;  %v955_v63 = vrot.slane %v872_v53, %v954_v62 }
 0x1d8   : > { %v1370_v58 = vpop.f32.mrf.mxu0 }
 0x1d9   : > { %v948_v59 = vsub.f32 %v946_v57, %v947_v56  ;;  %v956_v1 = vsub.f32 %v775_v23, %v955_v63  ;;  %v957_v3 = vsub.f32 %v776_v28, %v955_v63 }
 0x1db   : > { %v949_v60 = vmax.f32 %v948_v59, 0.0 }
 0x1dd   : > { %v950_v61 = vadd.f32 1e-05, %v949_v60 }
 0x1df   : > { %1417 = vrsqrt.f32 %v950_v61 }
 0x1ec   : > { %v1418_v0 = vpop.eup %1417 }
 0x1ed   : > { %v961_v4 = vrot.slane %v1418_v0, %v954_v62 }
 0x1ef   : > { %v962_v5 = vmul.f32 %v961_v4, %v956_v1  ;;  %v963_v7 = vmul.f32 %v961_v4, %v957_v3 }
 0x1f1   : > { %v970_v9 = vmul.f32 %v1211_v2, %v962_v5  ;;  %v971_v10 = vmul.f32 %v1211_v2, %v963_v7 }
 0x1f3   : > { %v978_v11 = vadd.f32 %v1212_v8, %v970_v9  ;;  %v979_v12 = vadd.f32 %v1212_v8, %v971_v10 }
 0x1f5   : > { %v980_v6 = vmin.f32 %v978_v11, 20.0  ;;  %v981_v13 = vmin.f32 %v979_v12, 20.0 }
 0x1f7   : > { %v982_v14 = vmul.f32 1.442695, %v980_v6  ;;  %v984_v15 = vmul.f32 1.442695, %v981_v13 }
 0x1f9   : > { %1419 = vpow2.f32 %v982_v14 }
 0x1fa   : > { %1421 = vpow2.f32 %v984_v15 }
 0x206   : > { %v1420_v16 = vpop.eup %1419 }
 0x207   : > { %v1422_v17 = vpop.eup %1421  ;;  %v986_v18 = vadd.f32 1.0, %v1420_v16 }
 0x208   : > { %v987_v19 = vadd.f32 1.0, %v1422_v17 }
 0x209   : > { %v988_v20 = vmul.f32 %v986_v18, %v986_v18 }
 0x20a   : > { %v989_v21 = vmul.f32 %v987_v19, %v987_v19 }
 0x20b   : > { %v994_v22 = vadd.f32 1.0, %v988_v20  ;;  %v1213_v24 = vadd.f32 -1.0, %v988_v20 }
 0x20c   : > { %v995_v23 = vadd.f32 1.0, %v989_v21  ;;  %v1214_v25 = vadd.f32 -1.0, %v989_v21 }
 0x20d   : > { %1423 = vrcp.f32 %v994_v22  ;;  %v992_v26 = vmul.f32 %v1213_v24, %v978_v11 }
 0x20e   : > { %1425 = vrcp.f32 %v995_v23  ;;  %v993_v28 = vmul.f32 %v1214_v25, %v979_v12 }
 0x21a   : > { %v1424_v27 = vpop.eup %1423 }
 0x21b   : > { %v1426_v29 = vpop.eup %1425  ;;  %v998_v30 = vmul.f32 %v1424_v27, %v992_v26 }
 0x21c   : > { %v999_v31 = vmul.f32 %v1426_v29, %v993_v28 }
 0x21e   : > { %v1000_v32 = vpack.c.bf16 %v999_v31, %v998_v30 }
 0x220   : > { %1380 = vmatmul.mubr.msk.bf16.vlgmr.msra.gmra.mxu1 %vm394_vm5, %v1000_v32 }
 0x2e0   : > { %v1077_v34 = vpop.f32.mrf.mxu1 }
 0x2e1   : > { %v1078_v35 = vadd.f32 %v1215_v33, %v1077_v34 }
 0x2e2   : > { %v1381_v36 = vpop.f32.mrf.mxu1 }
 0x2e3   : > { %1085 = vst.msk [vmem:[%s305_s30] sm:$0xff] %vm1084_vm10, %v1078_v35 }
 0x2e4   : > { %v1080_v37 = vpop.f32.mrf.mxu1 }
 0x2e5   : > { %v1081_v38 = vadd.f32 %v1215_v33, %v1080_v37 }
 0x2e6   : > { %v1382_v39 = vpop.f32.mrf.mxu1 }
 0x2e7   : > { %1086 = vst.msk [vmem:[%s305_s30 + $0x8] sm:$0xff] %vm1084_vm10, %v1081_v38 }
 0x2e8 PF: > { %s18_s27 = sadd.s32 1, %s1433_s27  }
 0x2e9   : > { %p15_p4 = scmp.ge.s32.totalorder %s18_s27, 4  }
 0x2eb   :  { %17 = sbr.rel (!%p15_p4) target bundleno = 1 (0x1), region = 86 }

// kernel: temporal_control_unet_forward.10
= control target key start
LH: loop header
LB: loop body
LE: loop exit
PB: predicated region body
PF: predicated region fallthrough
CT: control target
= control target key end

     0   :  { %s5402_s6 = smov 1   ;;  %s5403_s10 = smov 2   ;;  %s6314_s0 = inlined_call_operand.smem [shape: u32[32], index: -1, kind: input, shape index: {}] }
   0x1   :  { %s5451_s5 = sld [smem:[%s6314_s0]]   ;;  %s5404_s14 = smov 3  }
   0x2   :  { %s5456_s9 = sld [smem:[%s6314_s0 + %s5402_s6]]   ;;  %s5405_s18 = smov 4  }
   0x3   :  { %s5461_s13 = sld [smem:[%s6314_s0 + %s5403_s10]]   ;;  %s5406_s22 = smov 5  }
   0x4   :  { %s5466_s17 = sld [smem:[%s6314_s0 + %s5404_s14]]   ;;  %s5407_s26 = smov 6  }
   0x5   :  { %s5471_s21 = sld [smem:[%s6314_s0 + %s5405_s18]]   ;;  %s5408_s30 = smov 7  }
   0x6   :  { %s5476_s25 = sld [smem:[%s6314_s0 + %s5406_s22]]   ;;  %s5409_s4 = smov 8  }
   0x7   :  { %6333 = sst [smem:[#allocation19_spill]] %s5451_s5  ;;  %s5410_s10 = smov 9  }
   0x8   :  { %6334 = sst [smem:[#allocation20_spill]] %s5456_s9  ;;  %s5411_s15 = smov 10  }
   0x9   :  { %s5481_s29 = sld [smem:[%s6314_s0 + %s5407_s26]]   ;;  %s5412_s20 = smov 11  }
   0xa   :  { %s5486_s3 = sld [smem:[%s6314_s0 + %s5408_s30]]   ;;  %s5413_s26 = smov 12  }
   0xb   :  { %s5491_s8 = sld [smem:[%s6314_s0 + %s5409_s4]]   ;;  %s5414_s1 = smov 13  }
   0xc   :  { %6335 = sst [smem:[#allocation21_spill]] %s5476_s25  ;;  %s5415_s7 = smov 14  }
   0xd   :  { %s5496_s14 = sld [smem:[%s6314_s0 + %s5410_s10]]   ;;  %s5417_s22 = smov 16  }
   0xe   :  { %s5501_s19 = sld [smem:[%s6314_s0 + %s5411_s15]]   ;;  %s5416_s15 = smov 15  }
   0xf   :  { %6336 = sst [smem:[#allocation22_spill]] %s5481_s29  ;;  %s5418_s28 = smov 17  }
  0x10   :  { %6337 = sst [smem:[#allocation23_spill]] %s5486_s3 }
  0x11   :  { %6338 = sst [smem:[#allocation24_spill]] %s5491_s8 }
  0x12   :  { %s5506_s24 = sld [smem:[%s6314_s0 + %s5412_s20]]  }
  0x13   :  { %6339 = sst [smem:[#allocation25_spill]] %s5496_s14 }
  0x14   :  { %6340 = sst [smem:[#allocation26_spill]] %s5501_s19 }
  0x15   :  { %s5511_s30 = sld [smem:[%s6314_s0 + %s5413_s26]]  }
  0x16   :  { %s5516_s6 = sld [smem:[%s6314_s0 + %s5414_s1]]  }
  0x17   :  { %s5521_s12 = sld [smem:[%s6314_s0 + %s5415_s7]]   ;;  %s5419_s7 = smov 18  }
  0x18   :  { %6341 = sst [smem:[#allocation27_spill]] %s5506_s24 }
  0x19   :  { %s5526_s20 = sld [smem:[%s6314_s0 + %s5416_s15]]   ;;  %s5420_s15 = smov 19  }
  0x1a   :  { %s5531_s27 = sld [smem:[%s6314_s0 + %s5417_s22]]   ;;  %s5421_s22 = smov 20  }
  0x1b   :  { %s5536_s4 = sld [smem:[%s6314_s0 + %s5418_s28]]   ;;  %s5422_s28 = smov 21  }
  0x1c   :  { %6342 = sst [smem:[#allocation28_spill]] %s5516_s6 }
  0x1d   :  { %s5541_s19 = sld [smem:[%s6314_s0 + %s5419_s7]]   ;;  %s5423_s7 = smov 22  }
  0x1e   :  { %s5546_s3 = sld [smem:[%s6314_s0 + %s5420_s15]]   ;;  %s5424_s15 = smov 23  }
  0x1f   :  { %s5551_s14 = sld [smem:[%s6314_s0 + %s5421_s22]]   ;;  %s5425_s22 = smov 24  }
  0x20   :  { %s5556_s24 = sld [smem:[%s6314_s0 + %s5422_s28]]   ;;  %s5426_s28 = smov 25  }
  0x21   :  { %6343 = sst [smem:[#allocation29_spill]] %s5536_s4 }
  0x23   :  { %6344 = sst [smem:[#allocation30_spill]] %s5541_s19 }
  0x24   :  { %6345 = sst [smem:[#allocation31_spill]] %s5546_s3 }
  0x25   :  { %6346 = sst [smem:[#allocation32_spill]] %s5551_s14 }
  0x26   :  { %6347 = sst [smem:[#allocation33_spill]] %s5556_s24 }
  0x27   :  { %s5561_s19 = sld [smem:[%s6314_s0 + %s5423_s7]]   ;;  %s5427_s7 = smov 26  }
  0x28   :  { %s5566_s3 = sld [smem:[%s6314_s0 + %s5424_s15]]   ;;  %s5428_s15 = smov 27  }
  0x29   :  { %s5571_s14 = sld [smem:[%s6314_s0 + %s5425_s22]]   ;;  %s5429_s22 = smov 28  }
  0x2a   :  { %s5576_s24 = sld [smem:[%s6314_s0 + %s5426_s28]]   ;;  %s5430_s28 = smov 29  }
  0x2b   :  { %s5581_s25 = sld [smem:[%s6314_s0 + %s5427_s7]]   ;;  %s5431_s7 = smov 30  }
  0x2c   :  { %s5601_s29 = sld [smem:[%s6314_s0 + %s5431_s7]]  }
  0x2d   :  { %6348 = sst [smem:[#allocation34_spill]] %s5561_s19 }
  0x2e   :  { %6349 = sst [smem:[#allocation35_spill]] %s5566_s3 }
  0x2f   :  { %6350 = sst [smem:[#allocation36_spill]] %s5571_s14 }
  0x30   :  { %6351 = sst [smem:[#allocation37_spill]] %s5576_s24 }
  0x31   :  { %s5586_s3 = sld [smem:[%s6314_s0 + %s5428_s15]]   ;;  %s5432_s15 = smov 31  }
  0x32   :  { %s5591_s14 = sld [smem:[%s6314_s0 + %s5429_s22]]  }
  0x33   :  { %s5596_s24 = sld [smem:[%s6314_s0 + %s5430_s28]]  }
  0x37   :  { %6352 = sst [smem:[#allocation38_spill]] %s5586_s3 }
  0x38   :  { %s5606_s3 = sld [smem:[%s6314_s0 + %s5432_s15]]  }
  0x39   :  { %69 = vsyncpa [#allocation3], 0 }
  0x3a   :  { %70 = vsyncpa [#allocation6], 0 }
  0x3b   :  { %71 = vsyncpa [#allocation9], 0 }
  0x3c   :  { %72 = vsyncpa [#allocation4], 0 }
  0x3d   :  { %74 = vsyncpa [#allocation4 + $0x1], 0 }
  0x3e   :  { %75 = vsyncpa [#allocation13], 0 }
  0x3f   :  { %77 = vsyncpa [#allocation13 + $0x1], 0  ;;  %s5608_s22 = smov 0   ;;  %s5610_s23 = smov 0  }
  0x40   :  { %s5612_s26 = smov 0   ;;  %s5614_s28 = smov 0  }
  0x41 LB: > { %s6353_s6 = sld [smem:[#allocation28_spill]]  ;;  %s5629_s0 = sadd.s32 4294967295, %s5400_s28   ;;  %s5388_s22 = sphi %s5608_s22, %s6399_s22   ;;  %s5400_s28 = sphi %s5614_s28, %s6396_s28   ;;  %s5396_s26 = sphi %s5612_s26, %s6398_s26   ;;  %s5392_s23 = sphi %s5610_s23, %s6400_s23  }
  0x42   : > { %6354 = sst [smem:[#allocation39_spill]] %s5388_s22  ;;  %s4044_s1 = sadd.s32 4294967294, %s5400_s28  }
  0x43   : > { %6355 = sst [smem:[#allocation40_spill]] %s5396_s26  ;;  %s5633_s2 = sadd.s32 1, %s5400_s28  }
  0x44   : > { %6356 = sst [smem:[#allocation41_spill]] %s5400_s28  ;;  %s693_s7 = sadd.s32 1, %s5396_s26 }
  0x45   : > { %6357 = sst [smem:[#allocation42_spill]] %s5633_s2  ;;  %s690_s10 = ssub.s32 %s5400_s28, %s5633_s2 }
  0x46   : > { %p703_p0 = scmp.ne.s32.totalorder %s5396_s26, %s5392_s23  ;;  %p691_p1 = scmp.eq.s32.totalorder %s690_s10, 0 }
  0x47   : > { %p704_p2 = scmp.eq.s32.totalorder %s5629_s0, 1  ;;  %p709_p3 = scmp.ne.s32.totalorder %s5392_s23, %s5388_s22 }
  0x48   : > { %p710_p4 = scmp.eq.s32.totalorder %s4044_s1, 1  ;;  %p4045_p7 = scmp.ge.s32.totalorder %s5400_s28, 1 }
  0x49   : > { %s5644_s11 = scalar_select %p691_p1, %s5396_s26, %s693_s7  }
  0x4a   : > { %p5646_p5 = por %p704_p2, %p703_p0  ;;  %p5650_p6 = por %p710_p4, %p709_p3 }
  0x4b   : > { %6358 = sst [smem:[#allocation43_spill]] %s5644_s11  ;;  %p795_p8 = scmp.lt.s32.totalorder %s5400_s28, 3 }
  0x4c   : > { %s6359_s15 = scalar_select %p5646_p5, 1, 0 }
  0x4d   : > { %s6360_s16 = scalar_select %p5650_p6, 1, 0 }
  0x4e   : > { %p6325_p9 = scmp.eq.s32.totalorder %s5629_s0, 0  ;;  %p5657_p10 = pnand %p4045_p7, %p795_p8 }
  0x4f   : > { %6361 = sst [smem:[#allocation44_spill]] %s6360_s16  ;;  %s5433_s10 = smov [#allocation5]  }
  0x50   : > { %s6362_s18 = scalar_select %p5657_p10, 1, 0 }
  0x51   : > { %s855_s1 = sshll.u32 %s5433_s10, 4  ;;  %p4939_p11 = pneg %p5657_p10  ;;  %s856_s1 = int_to_ptr.vmem [resolvable:$true] %s855_s1 }
  0x52   : > { %s5434_s7 = smov [#allocation8]   ;;  %s5435_s2 = smov [#allocation2]  }
  0x53   : > { %s889_s11 = sshll.u32 %s5434_s7, 4  ;;  %p5665_p12 = pnand %p6325_p9, %p4939_p11  ;;  %s890_s11 = int_to_ptr.vmem [resolvable:$true] %s889_s11 }
  0x54   : > { %s835_s16 = sshll.u32 %s5435_s2, 4  ;;  %s5179_s10 = scalar_lea.vmem %s856_s1, 16  ;;  %s5669_s16 = int_to_ptr.vmem [resolvable:$true] %s835_s16 }
  0x55   : > { %p5673_p13 = pneg %p5665_p12  ;;  %p5180_p0 = scmp.ne.s32.totalorder %s856_s1, %s5179_s10 }
  0x56   : > { %s5186_s7 = scalar_lea.vmem %s856_s1, 32  ;;  %p5187_p3 = scmp.lt.s32.totalorder %s856_s1, %s856_s1 }
  0x57   : > { %p5182_p1 = pnand %p5180_p0, %p5673_p13  ;;  %p5188_p4 = scmp.lt.s32.totalorder %s5186_s7, %s5179_s10 }
  0x59   : > { %p5183_p2 = pneg %p5182_p1  ;;  %p5189_p7 = por %p5188_p4, %p5187_p3 }
  0x5b   : > { %p5190_p8 = pnand %p5189_p7, %p5183_p2 }
  0x5d   : > { %5193 = shalt.err (!%p5190_p8)
}
  0x5e   : > { %4945 = dma.hbm_to_vmem [thread:$0]  (!%p5665_p12), %s5531_s27, 16, %s856_s1, [#allocation6]  }
  0x5f   : > { %s5205_s2 = scalar_lea.vmem %s890_s11, 16  ;;  %s5212_s28 = scalar_lea.vmem %s890_s11, 32 }
  0x60   : > { %p5206_p11 = scmp.ne.s32.totalorder %s890_s11, %s5205_s2  ;;  %p5213_p5 = scmp.lt.s32.totalorder %s890_s11, %s890_s11 }
  0x61   : > { %p5214_p0 = scmp.lt.s32.totalorder %s5212_s28, %s5205_s2 }
  0x62   : > { %p5208_p9 = pnand %p5206_p11, %p5673_p13 }
  0x63   : > { %p5215_p1 = por %p5214_p0, %p5213_p5 }
  0x64   : > { %p5209_p6 = pneg %p5208_p9 }
  0x66   : > { %p5216_p10 = pnand %p5215_p1, %p5209_p6 }
  0x68   : > { %5219 = shalt.err (!%p5216_p10)
}
  0x69   : > { %s6365_s19 = sld [smem:[#allocation34_spill]]  ;;  %s5231_s1 = scalar_lea.vmem %s5669_s16, 16 }
  0x6a   : > { %p5232_p2 = scmp.ne.s32.totalorder %s5669_s16, %s5231_s1  ;;  %s5238_s10 = scalar_lea.vmem %s5669_s16, 32 }
  0x6b   : > { %p5239_p4 = scmp.lt.s32.totalorder %s5669_s16, %s5669_s16  ;;  %p5240_p5 = scmp.lt.s32.totalorder %s5238_s10, %s5231_s1 }
  0x6c   : > { %p5234_p3 = pnand %p5232_p2, %p5673_p13 }
  0x6d   : > { %p5241_p6 = por %p5240_p5, %p5239_p4 }
  0x6e   : > { %p5235_p9 = pneg %p5234_p3 }
  0x6f   : > { %4951 = dma.hbm_to_vmem [thread:$0]  (!%p5665_p12), %s6365_s19, 16, %s890_s11, [#allocation9]  }
  0x70   : > { %p5242_p10 = pnand %p5241_p6, %p5235_p9 }
  0x72   : > { %5245 = shalt.err (!%p5242_p10)
}
  0x73   : > { %4942 = dma.hbm_to_vmem [thread:$0]  (!%p5665_p12), %s5511_s30, 16, %s5669_s16, [#allocation3]  }
  0x74   : > { %s5436_s28 = smov [#allocation7]   ;;  %s5437_s7 = smov [#allocation10]  }
  0x75   : > { %s866_s11 = sshll.u32 %s5436_s28, 4  ;;  %s909_s2 = sshll.u32 %s5437_s7, 4  ;;  %s867_s11 = int_to_ptr.vmem [resolvable:$true] %s866_s11  ;;  %s910_s2 = int_to_ptr.vmem [resolvable:$true] %s909_s2 }
  0x76   : > { %s5257_s19 = scalar_lea.vmem %s867_s11, 16  ;;  %s5264_s1 = scalar_lea.vmem %s867_s11, 32 }
  0x77   : > { %p5258_p7 = scmp.ne.s32.totalorder %s867_s11, %s5257_s19  ;;  %p5265_p0 = scmp.lt.s32.totalorder %s867_s11, %s867_s11 }
  0x78   : > { %p5266_p1 = scmp.lt.s32.totalorder %s5264_s1, %s5257_s19 }
  0x79   : > { %p5260_p8 = pnand %p5258_p7, %p5673_p13 }
  0x7a   : > { %p5267_p2 = por %p5266_p1, %p5265_p0 }
  0x7b   : > { %p5261_p11 = pneg %p5260_p8 }
  0x7d   : > { %p5268_p3 = pnand %p5267_p2, %p5261_p11 }
  0x7f   : > { %5271 = shalt.err (!%p5268_p3)
}
  0x80   : > { %s6366_s4 = sld [smem:[#allocation29_spill]]  ;;  %s5283_s16 = scalar_lea.vmem %s910_s2, 16 }
  0x81   : > { %p5284_p9 = scmp.ne.s32.totalorder %s910_s2, %s5283_s16  ;;  %s5290_s10 = scalar_lea.vmem %s910_s2, 32 }
  0x82   : > { %p5291_p6 = scmp.lt.s32.totalorder %s910_s2, %s910_s2  ;;  %p5292_p10 = scmp.lt.s32.totalorder %s5290_s10, %s5283_s16 }
  0x83   : > { %p5286_p4 = pnand %p5284_p9, %p5673_p13 }
  0x84   : > { %p5293_p7 = por %p5292_p10, %p5291_p6 }
  0x85   : > { %p5287_p5 = pneg %p5286_p4 }
  0x86   : > { %4948 = dma.hbm_to_vmem [thread:$0]  (!%p5665_p12), %s6366_s4, 16, %s867_s11, [#allocation6]  }
  0x87   : > { %p5294_p8 = pnand %p5293_p7, %p5287_p5 }
  0x89   : > { %5297 = shalt.err (!%p5294_p8)
}
  0x8a   : > { %4954 = dma.hbm_to_vmem [thread:$0]  (!%p5665_p12), %s5581_s25, 16, %s910_s2, [#allocation9]  }
  0x8b   : > { %p6367_p11 = scmp.ne.s32.totalorder %s6362_s18, 0 }
  0x8c   : > { %p6368_p0 = scmp.eq.s32.totalorder (!%p6367_p11), %s5629_s0, 0 }
  0x8d   : > { %945 = sbr.rel (%p6367_p11) target bundleno = 2435 (0x983), region = 132 }
  0x92   : > { %5367 = dma.done.wait (%p6368_p0), [#allocation3], 16   ;;  %p6369_p1 = pmov %p6368_p0 }
  0x93   : > { %p6370_p13 = pmov %p6368_p0 }
  0x94   : > { %5369 = vsyncadd (%p6369_p1), [#allocation3], 4294967280 }
  0x95   : > { %5371 = dma.done.wait (%p6370_p13), [#allocation6], 32   ;;  %p6371_p2 = pmov %p6368_p0 }
  0x96   : > { %p6372_p3 = pmov %p6368_p0 }
  0x97   : > { %5373 = vsyncadd (%p6371_p2), [#allocation6], 4294967264 }
  0x98   : > { %5375 = dma.done.wait (%p6372_p3), [#allocation9], 32   ;;  %p6373_p12 = pmov %p6368_p0 }
  0x99   : > { %v5438_v0 = vmov 0.0   ;;  %vm5439_vm0 = vmmov 0   ;;  %s6374_s9 = sld [smem:[#allocation20_spill]]  ;;  %p1060_p9 = scmp.lt.s32.totalorder %s5629_s0, 1  ;;  %v1088_v1 = vlaneseq  ;;  %v5044_v2 = vld [vmem:[%s5521_s12 + $0x38] sm:$0xff]   ;;  %v5045_v3 = vld [vmem:[%s5521_s12 + $0x30] sm:$0xff]  }
  0x9a   : > { %5377 = vsyncadd (%p6373_p12), [#allocation9], 4294967264  ;;  %4503 = vmatprep.subr.bf16.mxu1 %v5438_v0  ;;  %4495 = vmatprep.subr.bf16.mxu0 %v5438_v0  ;;  %v5046_v4 = vld [vmem:[%s6353_s6 + $0x8] sm:$0xff]   ;;  %v5048_v6 = vld [vmem:[%s6353_s6] sm:$0xff]   ;;  %s6375_s5 = sld [smem:[#allocation19_spill]]  ;;  %vm1216_vm2 = vcmask 523264  }
  0x9b   : > { %4499 = vmatprep.mubr.msk.bf16.mxu0 %vm5439_vm0, %v5438_v0  ;;  %4511 = vmatprep.mubr.msk.bf16.mxu1 %vm5439_vm0, %v5438_v0  ;;  %s1061_s19 = scalar_select %p1060_p9, %s5629_s0, 1  ;;  %v5737_v5 = vshrl.u32 %v1088_v1, 7  ;;  %v5047_v7 = vld [vmem:[%s5521_s12 + $0x28] sm:$0xff]   ;;  %v5049_v13 = vld [vmem:[%s5521_s12 + $0x20] sm:$0xff]   ;;  %v5051_v16 = vld [vmem:[%s5521_s12 + $0x58] sm:$0xff]   ;;  %vm1123_vm4 = vcmask 261120  }
  0x9c   : > { %4504 = vmatpush3.bf16.msra.mxu1 %v5044_v2  ;;  %4496 = vmatpush3.bf16.msra.mxu0 %v5046_v4  ;;  %v5053_v17 = vld [vmem:[%s5521_s12 + $0x50] sm:$0xff]   ;;  %v5055_v19 = vld [vmem:[%s5521_s12 + $0x48] sm:$0xff]   ;;  %v5057_v24 = vld [vmem:[%s5521_s12 + $0x40] sm:$0xff]   ;;  %s5440_s11 = smov 64   ;;  %s6376_s8 = sld [smem:[#allocation24_spill]] }
  0x9d   : > { %s5732_s22 = sshll.u32 %s1061_s19, 3  ;;  %4505 = vmatprep.subr.bf16.mxu1 %v5438_v0  ;;  %s1070_s26 = scalar_lea.vmem %s5461_s13, %s1061_s19  ;;  %4497 = vmatprep.subr.bf16.mxu0 %v5438_v0  ;;  %vm1090_vm1 = vcmp.ge.s32.totalorder %v5737_v5, 1  ;;  %vm1091_vm3 = vcmp.lt.s32.totalorder %v5737_v5, 7  ;;  %v5059_v28 = vld [vmem:[%s5521_s12 + $0x98] sm:$0xff]   ;;  %v5061_v32 = vld [vmem:[%s5521_s12 + $0x90] sm:$0xff]   ;;  %v5063_v33 = vld [vmem:[%s5521_s12 + $0x88] sm:$0xff]  }
  0x9e   : > { %v1094_v8 = vld [vmem:[%s1070_s26] sm:$0x1]  ;;  %v5050_v37 = vld [vmem:[%s5521_s12 + $0x18] sm:$0xff]   ;;  %v5052_v41 = vld [vmem:[%s5521_s12 + $0x10] sm:$0xff]   ;;  %s6377_s7 = sld [smem:[#allocation22_spill]]  ;;  %p6391_p5 = scmp.ne.s32.totalorder %s6359_s15, 0 }
  0x9f   : > { %s1067_s18 = scalar_lea.vmem %s6374_s9, %s5732_s22  ;;  %v1095_v9 = vmin.f32 %v1094_v8, 20.0  ;;  %v5065_v34 = vld [vmem:[%s5521_s12 + $0x80] sm:$0xff]   ;;  %v5054_v42 = vld [vmem:[%s5521_s12 + $0x8] sm:$0xff]   ;;  %v5058_v44 = vld [vmem:[%s5521_s12 + $0x78] sm:$0xff]   ;;  %s6378_s2 = sld [smem:[#allocation21_spill]] }
  0xa0   : > { %4506 = vmatpush3.bf16.msra.mxu1 %v5045_v3  ;;  %v5746_v10 = vld [vmem:[%s1067_s18] sm:$0xff]  ;;  %4498 = vmatpush3.bf16.msra.mxu0 %v5048_v6  ;;  %s1063_s28 = scalar_lea.vmem %s6375_s5, %s5732_s22  ;;  %v5060_v46 = vld [vmem:[%s5521_s12 + $0x70] sm:$0xff]   ;;  %v5062_v47 = vld [vmem:[%s5521_s12 + $0x68] sm:$0xff]   ;;  %s6379_s1 = sld [smem:[#allocation27_spill]] }
  0xa1   : > { %4507 = vmatprep.subr.bf16.mxu1 %v5438_v0  ;;  %v1189_v11 = vrot.slane %v5746_v10, 7  ;;  %4515 = vmatprep.subr.bf16.mxu0 %v5438_v0  ;;  %v1096_v12 = vmul.f32 1.442695, %v1095_v9  ;;  %v1092_v18 = vld [vmem:[%s1063_s28] sm:$0xff]  ;;  %v5816_v49 = vpack.c.bf16 %v5746_v10, %v5746_v10  ;;  %v5066_v50 = vld [vmem:[%s5521_s12 + $0xb8] sm:$0xff]   ;;  %v5067_v51 = vld [vmem:[%s5521_s12 + $0xb0] sm:$0xff]  }
  0xa2   : > { %v1184_v20 = vrot.slane %v1092_v18, 7  ;;  %v1499_v21 = vrot.slane %v1092_v18, 1  ;;  %v5773_v31 = vpack.c.bf16 %v1092_v18, %v1092_v18  ;;  %v5056_v43 = vld [vmem:[%s5521_s12] sm:$0xff]   ;;  %v5068_v52 = vld [vmem:[%s5521_s12 + $0xa8] sm:$0xff]   ;;  %v1572_v53 = vrot.slane %v5746_v10, 1  ;;  %v5838_v57 = vld [vmem:[%s5466_s17 + $0x38] sm:$0xff] }
  0xa3   : > { %v1190_v14 = vsel %vm1090_vm1, %v1189_v11, 0.0  ;;  %5132 = vpow2.f32 %v1096_v12  ;;  %v5064_v48 = vld [vmem:[%s5521_s12 + $0x60] sm:$0xff]   ;;  %v5844_v58 = vld [vmem:[%s5466_s17 + $0x30] sm:$0xff]  ;;  %v5851_v59 = vld [vmem:[%s5466_s17 + $0x28] sm:$0xff]  ;;  %v5894_v12 = vsub.s32 0, %v5737_v5  ;;  %s6380_s16 = sld [smem:[#allocation35_spill]] }
  0xa4   : > { %4508 = vmatpush3.bf16.msra.mxu1 %v5047_v7  ;;  %v1191_v15 = vpack.c.bf16 %v1190_v14, %v1190_v14  ;;  %v1187_v26 = vsel %vm1090_vm1, %v1184_v20, 0.0  ;;  %v1502_v27 = vsel %vm1091_vm3, %v1499_v21, 0.0  ;;  %v5069_v54 = vld [vmem:[%s5521_s12 + $0xa0] sm:$0xff]   ;;  %v1573_v55 = vsel %vm1091_vm3, %v1572_v53, 0.0  ;;  %v5865_v61 = vld [vmem:[%s5466_s17 + $0x18] sm:$0xff]  ;;  %v5872_v62 = vld [vmem:[%s5466_s17 + $0x10] sm:$0xff] }
  0xa5   : > { %4509 = vmatprep.subr.bf16.mxu1 %v5438_v0  ;;  %v1503_v39 = vpack.c.bf16 %v1502_v27, %v1502_v27  ;;  %v1188_v45 = vpack.c.bf16 %v1187_v26, %v1187_v26  ;;  %v1574_v56 = vpack.c.bf16 %v1573_v55, %v1573_v55  ;;  %v5858_v60 = vld [vmem:[%s5466_s17 + $0x20] sm:$0xff]  ;;  %v5879_v63 = vld [vmem:[%s5466_s17 + $0x8] sm:$0xff]  ;;  %s6381_s10 = sld [smem:[#allocation36_spill]]  ;;  %s6054_s28 = sand.u32 1, %s5392_s23  }
  0xa6   : > { %v5883_v1 = vld [vmem:[%s5466_s17] sm:$0xff]  ;;  %s6382_s19 = sld [smem:[#allocation25_spill]]  ;;  %s3758_s4 = scalar_lea.sflag [#allocation4], %s6054_s28 }
  0xa7   : > { %v1110_v11 = vld [vmem:[#allocation2] sm:$0x1]  ;;  %s6383_s26 = sld [smem:[#allocation23_spill]]  ;;  %s5441_s6 = smov [#allocation11]  }
  0xa8   : > { %4510 = vmatpush3.bf16.msra.mxu1 %v5049_v13  ;;  %s6384_s18 = sld [smem:[#allocation26_spill]] }
  0xa9   : > { %4527 = vmatprep.subr.bf16.mxu1 %v5438_v0 }
  0xab   : > { %4512 = vmatmul.mubr.msk.bf16.vlgmr.msra.gmra.mxu1 %vm1216_vm2, %v1191_v15 }
  0xac   : > { %4528 = vmatpush3.bf16.msra.mxu1 %v5051_v16  ;;  %4535 = vmatprep.mubr.msk.bf16.mxu1 %vm5439_vm0, %v5438_v0 }
  0xad   : > { %4529 = vmatprep.subr.bf16.mxu1 %v5438_v0 }
  0xb0   : > { %4530 = vmatpush3.bf16.msra.mxu1 %v5053_v17  ;;  %v5133_v22 = vpop.eup %5132 }
  0xb1   : > { %4531 = vmatprep.subr.bf16.mxu1 %v5438_v0  ;;  %v1098_v23 = vadd.f32 1.0, %v5133_v22 }
  0xb3   : > { %v1099_v25 = vmul.f32 %v1098_v23, %v1098_v23 }
  0xb4   : > { %4532 = vmatpush3.bf16.msra.mxu1 %v5055_v19 }
  0xb5   : > { %4533 = vmatprep.subr.bf16.mxu1 %v5438_v0  ;;  %v4064_v29 = vadd.f32 -1.0, %v1099_v25  ;;  %v1102_v30 = vadd.f32 1.0, %v1099_v25 }
  0xb7   : > { %5134 = vrcp.f32 %v1102_v30  ;;  %v1101_v35 = vmul.f32 %v4064_v29, %v1094_v8 }
  0xb8   : > { %4534 = vmatpush3.bf16.msra.mxu1 %v5057_v24 }
  0xb9   : > { %4551 = vmatprep.subr.bf16.mxu1 %v5438_v0 }
  0xbb   : > { %4536 = vmatmul.mubr.msk.bf16.vlgmr.msra.gmra.mxu1 %vm1216_vm2, %v5773_v31 }
  0xbc   : > { %4552 = vmatpush3.bf16.msra.mxu1 %v5059_v28  ;;  %4559 = vmatprep.mubr.msk.bf16.mxu1 %vm5439_vm0, %v5438_v0 }
  0xbd   : > { %4553 = vmatprep.subr.bf16.mxu1 %v5438_v0 }
  0xc0   : > { %4554 = vmatpush3.bf16.msra.mxu1 %v5061_v32 }
  0xc1   : > { %4555 = vmatprep.subr.bf16.mxu1 %v5438_v0 }
  0xc4   : > { %4556 = vmatpush3.bf16.msra.mxu1 %v5063_v33  ;;  %v5135_v36 = vpop.eup %5134 }
  0xc5   : > { %4557 = vmatprep.subr.bf16.mxu1 %v5438_v0  ;;  %v1104_v38 = vmul.f32 %v5135_v36, %v1101_v35  ;;  %v4130_v36 = vld [vmem:[%s5471_s21] ss:$0 sm:$0xff] }
  0xc7   : > { %v5787_v40 = vpack.c.bf16 %v1104_v38, %v1104_v38 }
  0xc8   : > { %4558 = vmatpush3.bf16.msra.mxu1 %v5065_v34 }
  0xc9   : > { %4575 = vmatprep.subr.mxu1 %v5438_v0  ;;  %4500 = vmatmul.mubr.msk.bf16.vlgmr.msra.gmra.mxu0 %vm1123_vm4, %v5787_v40 }
  0xca   : > { %4516 = vmatpush3.bf16.msra.mxu0 %v5050_v37  ;;  %4523 = vmatprep.mubr.msk.bf16.mxu0 %vm5439_vm0, %v5438_v0 }
  0xcb   : > { %4560 = vmatmul.mubr.msk.bf16.vlgmr.msra.gmra.mxu1 %vm1216_vm2, %v1503_v39  ;;  %4517 = vmatprep.subr.bf16.mxu0 %v5438_v0 }
  0xcc   : > { %4591 = vmatprep.mubr.msk.f32.mxu1 %vm5439_vm0, %v5438_v0  ;;  %4576 = vmatpush3.msra.mxu1 %v5838_v57 }
  0xcd   : > { %4577 = vmatprep.subr.mxu1 %v5438_v0 }
  0xce   : > { %4518 = vmatpush3.bf16.msra.mxu0 %v5052_v41  ;;  %4578 = vmatpush3.msra.mxu1 %v5844_v58 }
  0xcf   : > { %4519 = vmatprep.subr.bf16.mxu0 %v5438_v0  ;;  %4579 = vmatprep.subr.mxu1 %v5438_v0 }
  0xd0   : > { %4580 = vmatpush3.msra.mxu1 %v5851_v59 }
  0xd1   : > { %4581 = vmatprep.subr.mxu1 %v5438_v0 }
  0xd2   : > { %4520 = vmatpush3.bf16.msra.mxu0 %v5054_v42  ;;  %4582 = vmatpush3.msra.mxu1 %v5858_v60 }
  0xd3   : > { %4521 = vmatprep.subr.bf16.mxu0 %v5438_v0  ;;  %4583 = vmatprep.subr.mxu1 %v5438_v0 }
  0xd4   : > { %4584 = vmatpush3.msra.mxu1 %v5865_v61 }
  0xd5   : > { %4585 = vmatprep.subr.mxu1 %v5438_v0 }
  0xd6   : > { %4522 = vmatpush3.bf16.msra.mxu0 %v5056_v43  ;;  %4586 = vmatpush3.msra.mxu1 %v5872_v62 }
  0xd7   : > { %4539 = vmatprep.subr.bf16.mxu0 %v5438_v0  ;;  %4587 = vmatprep.subr.mxu1 %v5438_v0 }
  0xd8   : > { %4588 = vmatpush3.msra.mxu1 %v5879_v63 }
  0xd9   : > { %4524 = vmatmul.mubr.msk.bf16.vlgmr.msra.gmra.mxu0 %vm1216_vm2, %v1188_v45  ;;  %4589 = vmatprep.subr.mxu1 %v5438_v0 }
  0xda   : > { %4540 = vmatpush3.bf16.msra.mxu0 %v5058_v44  ;;  %4547 = vmatprep.mubr.msk.bf16.mxu0 %vm5439_vm0, %v5438_v0 }
  0xdb   : > { %4541 = vmatprep.subr.bf16.mxu0 %v5438_v0  ;;  %4590 = vmatpush3.msra.mxu1 %v5883_v1 }
  0xdc   : > { %4613 = vmatprep.subr.bf16.mxu1 %v5438_v0 }
  0xde   : > { %4542 = vmatpush3.bf16.msra.mxu0 %v5060_v46 }
  0xdf   : > { %4543 = vmatprep.subr.bf16.mxu0 %v5438_v0 }
  0xe2   : > { %4544 = vmatpush3.bf16.msra.mxu0 %v5062_v47 }
  0xe3   : > { %4545 = vmatprep.subr.bf16.mxu0 %v5438_v0 }
  0xe6   : > { %4546 = vmatpush3.bf16.msra.mxu0 %v5064_v48 }
  0xe7   : > { %4563 = vmatprep.subr.bf16.mxu0 %v5438_v0 }
  0xe9   : > { %4548 = vmatmul.mubr.msk.bf16.vlgmr.msra.gmra.mxu0 %vm1216_vm2, %v5816_v49 }
  0xea   : > { %4564 = vmatpush3.bf16.msra.mxu0 %v5066_v50  ;;  %4571 = vmatprep.mubr.msk.bf16.mxu0 %vm5439_vm0, %v5438_v0 }
  0xeb   : > { %4565 = vmatprep.subr.bf16.mxu0 %v5438_v0 }
  0xee   : > { %4566 = vmatpush3.bf16.msra.mxu0 %v5067_v51 }
  0xef   : > { %4567 = vmatprep.subr.bf16.mxu0 %v5438_v0 }
  0xf2   : > { %4568 = vmatpush3.bf16.msra.mxu0 %v5068_v52 }
  0xf3   : > { %4569 = vmatprep.subr.bf16.mxu0 %v5438_v0 }
  0xf6   : > { %4570 = vmatpush3.bf16.msra.mxu0 %v5069_v54 }
  0xf7   : > { %4594 = vmatprep.subr.mxu0 %v5438_v0 }
  0xf9   : > { %4572 = vmatmul.mubr.msk.bf16.vlgmr.msra.gmra.mxu0 %vm1216_vm2, %v1574_v56 }
  0xfa   : > { %4610 = vmatprep.mubr.msk.f32.mxu0 %vm5439_vm0, %v5438_v0  ;;  %4595 = vmatpush3.msra.mxu0 %v5838_v57 }
  0xfb   : > { %4596 = vmatprep.subr.mxu0 %v5438_v0 }
  0xfc   : > { %4597 = vmatpush3.msra.mxu0 %v5844_v58 }
  0xfd   : > { %4598 = vmatprep.subr.mxu0 %v5438_v0 }
  0xfe   : > { %4599 = vmatpush3.msra.mxu0 %v5851_v59 }
  0xff   : > { %4600 = vmatprep.subr.mxu0 %v5438_v0 }
 0x100   : > { %4601 = vmatpush3.msra.mxu0 %v5858_v60 }
 0x101   : > { %4602 = vmatprep.subr.mxu0 %v5438_v0 }
 0x102   : > { %4603 = vmatpush3.msra.mxu0 %v5865_v61 }
 0x103   : > { %4604 = vmatprep.subr.mxu0 %v5438_v0 }
 0x104   : > { %4605 = vmatpush3.msra.mxu0 %v5872_v62 }
 0x105   : > { %4606 = vmatprep.subr.mxu0 %v5438_v0 }
 0x106   : > { %4607 = vmatpush3.msra.mxu0 %v5879_v63 }
 0x107   : > { %4608 = vmatprep.subr.mxu0 %v5438_v0 }
 0x108   : > { %4609 = vmatpush3.msra.mxu0 %v5883_v1 }
 0x109   : > { %4625 = vmatprep.subr.bf16.mxu0 %v5438_v0 }
 0x16b   : > { %v1254_v2 = vpop.f32.mrf.mxu1 }
 0x16d   : > { %v4513_v3 = vpop.f32.mrf.mxu1 }
 0x16f   : > { %v1257_v4 = vpop.f32.mrf.mxu1 }
 0x171   : > { %v4514_v6 = vpop.f32.mrf.mxu1 }
 0x172   : > { %v5070_v6 = vld [vmem:[%s5526_s20 + $0x38] sm:$0xff]  }
 0x17b   : > { %v1406_v7 = vpop.f32.mrf.mxu1 }
 0x17d   : > { %v4537_v8 = vpop.f32.mrf.mxu1 }
 0x17e   : > { %v5071_v8 = vld [vmem:[%s5526_s20 + $0x30] sm:$0xff]  }
 0x17f   : > { %v1409_v9 = vpop.f32.mrf.mxu1 }
 0x180   : > { %v5074_v9 = vld [vmem:[%s5526_s20 + $0x10] sm:$0xff]  }
 0x181   : > { %v4538_v10 = vpop.f32.mrf.mxu1 }
 0x182   : > { %v5073_v10 = vld [vmem:[%s5526_s20 + $0x28] sm:$0xff]  }
 0x189   : > { %v1161_v13 = vpop.f32.mrf.mxu0 }
 0x18a   : > { %v5896_v15 = vadd.f32 %v1161_v13, %v1110_v11  ;;  %v5076_v11 = vld [vmem:[%s5526_s20 + $0x8] sm:$0xff]   ;;  %v5075_v13 = vld [vmem:[%s5526_s20 + $0x20] sm:$0xff]  }
 0x18b   : > { %v1565_v14 = vpop.f32.mrf.mxu1  ;;  %v4501_v16 = vpop.f32.mrf.mxu0 }
 0x18c   : > { %v1853_v18 = vrot.slane %v5896_v15, %v5894_v12 }
 0x18d   : > { %v4561_v17 = vpop.f32.mrf.mxu1  ;;  %v1164_v19 = vpop.f32.mrf.mxu0 }
 0x18e   : > { %1855 = vrot.lane.b32.xlu0 %v1853_v18, %s5440_s11 }
 0x18f   : > { %v1568_v20 = vpop.f32.mrf.mxu1  ;;  %v4502_v21 = vpop.f32.mrf.mxu0 }
 0x191   : > { %v4562_v22 = vpop.f32.mrf.mxu1 }
 0x199   : > { %v1321_v23 = vpop.f32.mrf.mxu0 }
 0x19a   : > { %v1322_v30 = vadd.f32 %v1321_v23, %v1254_v2 }
 0x19b   : > { %v4525_v24 = vpop.f32.mrf.mxu0 }
 0x19c   : > { %v1412_v33 = vadd.f32 %v1406_v7, %v1322_v30  ;;  %v5072_v7 = vld [vmem:[%s5526_s20 + $0x18] sm:$0xff]   ;;  %v4133_v30 = vld [vmem:[%s6376_s8] ss:$0 sm:$0xff]  ;;  %s5302_s8 = sshll.u32 %s5441_s6, 4  ;;  %s5303_s8 = int_to_ptr.vmem [resolvable:$false] %s5302_s8 }
 0x19d   : > { %v1324_v25 = vpop.f32.mrf.mxu0  ;;  %s5304_s9 = scalar_lea.vmem %s5303_s8, 256 }
 0x19f   : > { %v4526_v26 = vpop.f32.mrf.mxu0 }
 0x1a9   : > { %v1475_v27 = vpop.f32.mrf.mxu0 }
 0x1aa   : > { %v1481_v34 = vadd.f32 %v1475_v27, %v1412_v33 }
 0x1ab   : > { %v4549_v28 = vpop.f32.mrf.mxu0 }
 0x1ac   : > { %v1571_v35 = vadd.f32 %v1565_v14, %v1481_v34  ;;  %v5077_v14 = vld [vmem:[%s5526_s20] sm:$0xff]  }
 0x1ad   : > { %v1478_v29 = vpop.f32.mrf.mxu0  ;;  %v4134_v34 = vld [vmem:[%s6377_s7] ss:$0 sm:$0xff]  ;;  %s4058_s7 = sshll.u32 %s6054_s28, 3 }
 0x1af   : > { %v4550_v32 = vpop.f32.mrf.mxu0 }
 0x1b0   : > { %v1844_v32 = vadd.f32 1.0, %v5896_v15 }
 0x1b9   : > { %v1636_v37 = vpop.f32.mrf.mxu0 }
 0x1ba   : > { %v1642_v38 = vadd.f32 %v1636_v37, %v1571_v35 }
 0x1bb   : > { %v4573_v39 = vpop.f32.mrf.mxu0 }
 0x1bc   : > { %v1649_v41 = vadd.f32 %v4130_v36, %v1642_v38  ;;  %v1848_v36 = vrot.slane %v1844_v32, %v5894_v12 }
 0x1bd   : > { %v1639_v42 = vpop.f32.mrf.mxu0 }
 0x1be   : > { %v1652_v43 = vsel %vm1216_vm2, %v1649_v41, 0.0  ;;  %v1659_v44 = vmul.f32 %v1649_v41, %v1649_v41 }
 0x1bf   : > { %v1653_v45 = vrot.slane %v1652_v43, 4  ;;  %v4574_v46 = vpop.f32.mrf.mxu0 }
 0x1c0   : > { %v1660_v47 = vsel %vm1216_vm2, %v1659_v44, 0.0 }
 0x1c1   : > { %v1654_v48 = vadd.f32 %v1653_v45, %v1652_v43  ;;  %v1661_v50 = vrot.slane %v1660_v47, 4 }
 0x1c3   : > { %v1655_v51 = vrot.slane %v1654_v48, 2  ;;  %v1662_v52 = vadd.f32 %v1661_v50, %v1660_v47 }
 0x1c5   : > { %v1656_v53 = vadd.f32 %v1655_v51, %v1654_v48  ;;  %v1663_v54 = vrot.slane %v1662_v52, 2 }
 0x1c7   : > { %v1657_v55 = vrot.slane %v1656_v53, 1  ;;  %v1664_v56 = vadd.f32 %v1663_v54, %v1662_v52  ;;  %v5078_v52 = vld [vmem:[%s5526_s20 + $0x58] sm:$0xff]  }
 0x1c9   : > { %v1658_v2 = vadd.f32 %v1657_v55, %v1656_v53  ;;  %v1665_v3 = vrot.slane %v1664_v56, 1 }
 0x1cb   : > { %4592 = vmatmul.mubr.msk.f32.vlgmr.msra.gmra.mxu1 %vm1216_vm2, %v1658_v2  ;;  %v1666_v4 = vadd.f32 %v1665_v3, %v1664_v56  ;;  %v5079_v2 = vld [vmem:[%s5526_s20 + $0x50] sm:$0xff]   ;;  %v5080_v3 = vld [vmem:[%s5526_s20 + $0x48] sm:$0xff]  }
 0x1cc   : > { %4621 = vmatprep.mubr.msk.bf16.mxu1 %vm5439_vm0, %v5438_v0  ;;  %4614 = vmatpush3.bf16.msra.mxu1 %v5070_v6  ;;  %v5081_v6 = vld [vmem:[%s5526_s20 + $0x40] sm:$0xff]  }
 0x1cd   : > { %4611 = vmatmul.mubr.msk.f32.vlgmr.msra.gmra.mxu0 %vm1216_vm2, %v1666_v4  ;;  %4615 = vmatprep.subr.bf16.mxu1 %v5438_v0 }
 0x1ce   : > { %4633 = vmatprep.mubr.msk.bf16.mxu0 %vm5439_vm0, %v5438_v0  ;;  %4626 = vmatpush3.bf16.msra.mxu0 %v5072_v7 }
 0x1cf   : > { %4627 = vmatprep.subr.bf16.mxu0 %v5438_v0 }
 0x1d0   : > { %4616 = vmatpush3.bf16.msra.mxu1 %v5071_v8 }
 0x1d1   : > { %4617 = vmatprep.subr.bf16.mxu1 %v5438_v0 }
 0x1d2   : > { %4628 = vmatpush3.bf16.msra.mxu0 %v5074_v9 }
 0x1d3   : > { %4629 = vmatprep.subr.bf16.mxu0 %v5438_v0 }
 0x1d4   : > { %4618 = vmatpush3.bf16.msra.mxu1 %v5073_v10 }
 0x1d5   : > { %4619 = vmatprep.subr.bf16.mxu1 %v5438_v0 }
 0x1d6   : > { %4630 = vmatpush3.bf16.msra.mxu0 %v5076_v11 }
 0x1d7   : > { %4631 = vmatprep.subr.bf16.mxu0 %v5438_v0 }
 0x1d8   : > { %4620 = vmatpush3.bf16.msra.mxu1 %v5075_v13 }
 0x1d9   : > { %4637 = vmatprep.subr.bf16.mxu1 %v5438_v0 }
 0x1da   : > { %4632 = vmatpush3.bf16.msra.mxu0 %v5077_v14 }
 0x1db   : > { %4649 = vmatprep.subr.mxu0 %v5438_v0 }
 0x200   : > { %v1856_v39 = vpop.permute.xlu0 %1855 }
 0x28b   : > { %v1736_v16 = vpop.f32.mrf.mxu1 }
 0x28c   : > { %v1740_v17 = vmul.f32 0.015625, %v1736_v16 }
 0x28d   : > { %v4593_v18 = vpop.f32.mrf.mxu1  ;;  %v1810_v19 = vpop.f32.mrf.mxu0 }
 0x28e   : > { %v1815_v20 = vmul.f32 %v1740_v17, %v1740_v17  ;;  %v1814_v21 = vmul.f32 0.015625, %v1810_v19  ;;  %v1823_v26 = vrot.slane %v1740_v17, %v5894_v12 }
 0x28f   : > { %v4612_v22 = vpop.f32.mrf.mxu0 }
 0x290   : > { %v1816_v23 = vsub.f32 %v1814_v21, %v1815_v20  ;;  %v1824_v28 = vsub.f32 %v1649_v41, %v1823_v26  ;;  %v4167_v20 = vld [vmem:[%s6378_s2] ss:$0 sm:$0xff]  ;;  %s6065_s2 = scalar_lea.vmem [#allocation11], %s4058_s7 }
 0x292   : > { %v1817_v24 = vmax.f32 %v1816_v23, 0.0 }
 0x294   : > { %v1818_v25 = vadd.f32 1e-05, %v1817_v24 }
 0x296   : > { %5136 = vrsqrt.f32 %v1818_v25 }
 0x2a3   : > { %v5137_v27 = vpop.eup %5136 }
 0x2a4   : > { %v1828_v29 = vrot.slane %v5137_v27, %v5894_v12 }
 0x2a6   : > { %v1829_v33 = vmul.f32 %v1828_v29, %v1824_v28 }
 0x2a8   : > { %v1836_v35 = vmul.f32 %v4133_v30, %v1829_v33 }
 0x2aa   : > { %v1843_v37 = vadd.f32 %v4134_v34, %v1836_v35 }
 0x2ac   : > { %v1849_v38 = vmul.f32 %v1848_v36, %v1843_v37 }
 0x2ae   : > { %v1858_v42 = vadd.f32 %v1856_v39, %v1849_v38 }
 0x2b0   : > { %v1859_v43 = vmin.f32 %v1858_v42, 20.0 }
 0x2b2   : > { %v1860_v44 = vmul.f32 1.442695, %v1859_v43 }
 0x2b4   : > { %5138 = vpow2.f32 %v1860_v44 }
 0x2c1   : > { %v5139_v45 = vpop.eup %5138 }
 0x2c2   : > { %v1862_v41 = vadd.f32 1.0, %v5139_v45  ;;  %v5083_v45 = vld [vmem:[%s6379_s1 + $0x38] sm:$0xff]  }
 0x2c4   : > { %v1863_v46 = vmul.f32 %v1862_v41, %v1862_v41 }
 0x2c6   : > { %v1866_v47 = vadd.f32 1.0, %v1863_v46  ;;  %v4135_v15 = vadd.f32 -1.0, %v1863_v46  ;;  %v5084_v46 = vld [vmem:[%s6379_s1 + $0x10] sm:$0xff]  }
 0x2c8   : > { %5140 = vrcp.f32 %v1866_v47  ;;  %v1865_v48 = vmul.f32 %v4135_v15, %v1858_v42  ;;  %v5082_v42 = vld [vmem:[%s6379_s1 + $0x18] sm:$0xff]   ;;  %v5085_v47 = vld [vmem:[%s6379_s1 + $0x30] sm:$0xff]   ;;  %v5086_v15 = vld [vmem:[%s6379_s1 + $0x8] sm:$0xff]  }
 0x2d5   : > { %v5141_v50 = vpop.eup %5140 }
 0x2d6   : > { %v1868_v51 = vmul.f32 %v5141_v50, %v1865_v48  ;;  %v5087_v48 = vld [vmem:[%s6379_s1 + $0x28] sm:$0xff]   ;;  %v5088_v50 = vld [vmem:[%s6379_s1] sm:$0xff]  }
 0x2d8   : > { %v1890_v53 = vpack.c.bf16 %v1868_v51, %v1868_v51  ;;  %v1878_v54 = vrot.slane %v1868_v51, 7  ;;  %v2034_v4 = vrot.slane %v1868_v51, 1  ;;  %v5089_v51 = vld [vmem:[%s6379_s1 + $0x20] sm:$0xff]  }
 0x2da   : > { %4622 = vmatmul.mubr.msk.bf16.vlgmr.msra.gmra.mxu1 %vm1216_vm2, %v1890_v53  ;;  %v1879_v55 = vsel %vm1090_vm1, %v1878_v54, 0.0  ;;  %v2035_v7 = vsel %vm1091_vm3, %v2034_v4, 0.0  ;;  %v5091_v53 = vld [vmem:[%s6380_s16] sm:$0xff]   ;;  %v5094_v54 = vld [vmem:[%s6381_s10 + $0x18] sm:$0xff]  }
 0x2db   : > { %4638 = vmatpush3.bf16.msra.mxu1 %v5078_v52  ;;  %v1880_v56 = vpack.c.bf16 %v1879_v55, %v1879_v55  ;;  %4645 = vmatprep.mubr.msk.bf16.mxu1 %vm5439_vm0, %v5438_v0  ;;  %v2036_v8 = vpack.c.bf16 %v2035_v7, %v2035_v7  ;;  %v5090_v52 = vld [vmem:[%s6380_s16 + $0x8] sm:$0xff]  }
 0x2dc   : > { %4639 = vmatprep.subr.bf16.mxu1 %v5438_v0  ;;  %v5095_v55 = vld [vmem:[%s6381_s10 + $0x28] sm:$0xff]  }
 0x2dd   : > { %4634 = vmatmul.mubr.msk.bf16.vlgmr.msra.gmra.mxu0 %vm1216_vm2, %v1880_v56  ;;  %v5096_v56 = vld [vmem:[%s6381_s10 + $0x10] sm:$0xff]  }
 0x2de   : > { %4650 = vmatpush3.msra.mxu0 %v5838_v57  ;;  %4665 = vmatprep.mubr.msk.f32.mxu0 %vm5439_vm0, %v5438_v0 }
 0x2df   : > { %4640 = vmatpush3.bf16.msra.mxu1 %v5079_v2  ;;  %4651 = vmatprep.subr.mxu0 %v5438_v0  ;;  %v5098_v2 = vld [vmem:[%s6381_s10 + $0x8] sm:$0xff]  }
 0x2e0   : > { %4641 = vmatprep.subr.bf16.mxu1 %v5438_v0  ;;  %4652 = vmatpush3.msra.mxu0 %v5844_v58 }
 0x2e1   : > { %4653 = vmatprep.subr.mxu0 %v5438_v0 }
 0x2e2   : > { %4654 = vmatpush3.msra.mxu0 %v5851_v59 }
 0x2e3   : > { %4642 = vmatpush3.bf16.msra.mxu1 %v5080_v3  ;;  %4655 = vmatprep.subr.mxu0 %v5438_v0  ;;  %v5099_v3 = vld [vmem:[%s6381_s10] sm:$0xff]  }
 0x2e4   : > { %4643 = vmatprep.subr.bf16.mxu1 %v5438_v0  ;;  %4656 = vmatpush3.msra.mxu0 %v5858_v60 }
 0x2e5   : > { %4657 = vmatprep.subr.mxu0 %v5438_v0 }
 0x2e6   : > { %4658 = vmatpush3.msra.mxu0 %v5865_v61 }
 0x2e7   : > { %4644 = vmatpush3.bf16.msra.mxu1 %v5081_v6  ;;  %4659 = vmatprep.subr.mxu0 %v5438_v0 }
 0x2e8   : > { %4668 = vmatprep.subr.mxu1 %v5438_v0  ;;  %4660 = vmatpush3.msra.mxu0 %v5872_v62 }
 0x2e9   : > { %4661 = vmatprep.subr.mxu0 %v5438_v0 }
 0x2ea   : > { %4646 = vmatmul.mubr.msk.bf16.vlgmr.msra.gmra.mxu1 %vm1216_vm2, %v2036_v8  ;;  %4662 = vmatpush3.msra.mxu0 %v5879_v63 }
 0x2eb   : > { %4669 = vmatpush3.msra.mxu1 %v5838_v57  ;;  %4663 = vmatprep.subr.mxu0 %v5438_v0 }
 0x2ec   : > { %4670 = vmatprep.subr.mxu1 %v5438_v0  ;;  %4664 = vmatpush3.msra.mxu0 %v5883_v1 }
 0x2ed   : > { %4671 = vmatpush3.msra.mxu1 %v5844_v58  ;;  %4684 = vmatprep.mubr.msk.f32.mxu1 %vm5439_vm0, %v5438_v0 }
 0x2ee   : > { %4672 = vmatprep.subr.mxu1 %v5438_v0  ;;  %4687 = vmatprep.subr.bf16.mxu0 %v5438_v0 }
 0x2ef   : > { %4673 = vmatpush3.msra.mxu1 %v5851_v59 }
 0x2f0   : > { %4674 = vmatprep.subr.mxu1 %v5438_v0 }
 0x2f1   : > { %4675 = vmatpush3.msra.mxu1 %v5858_v60 }
 0x2f2   : > { %4676 = vmatprep.subr.mxu1 %v5438_v0 }
 0x2f3   : > { %4677 = vmatpush3.msra.mxu1 %v5865_v61 }
 0x2f4   : > { %4678 = vmatprep.subr.mxu1 %v5438_v0 }
 0x2f5   : > { %4679 = vmatpush3.msra.mxu1 %v5872_v62 }
 0x2f6   : > { %4680 = vmatprep.subr.mxu1 %v5438_v0 }
 0x2f7   : > { %4681 = vmatpush3.msra.mxu1 %v5879_v63 }
 0x2f8   : > { %4682 = vmatprep.subr.mxu1 %v5438_v0 }
 0x2f9   : > { %4683 = vmatpush3.msra.mxu1 %v5883_v1 }
 0x2fa   : > { %4699 = vmatprep.subr.bf16.mxu1 %v5438_v0 }
 0x39a   : > { %v1952_v9 = vpop.f32.mrf.mxu1 }
 0x39c   : > { %v4623_v10 = vpop.f32.mrf.mxu1 }
 0x39d   : > { %v2019_v11 = vpop.f32.mrf.mxu0 }
 0x39e   : > { %v1955_v13 = vpop.f32.mrf.mxu1  ;;  %v2020_v19 = vadd.f32 %v2019_v11, %v1952_v9 }
 0x39f   : > { %v4635_v14 = vpop.f32.mrf.mxu0 }
 0x3a0   : > { %v4624_v16 = vpop.f32.mrf.mxu1 }
 0x3a1   : > { %v2022_v17 = vpop.f32.mrf.mxu0 }
 0x3a3   : > { %v4636_v18 = vpop.f32.mrf.mxu0 }
 0x3aa   : > { %v2098_v21 = vpop.f32.mrf.mxu1 }
 0x3ab   : > { %v2104_v22 = vadd.f32 %v2098_v21, %v2020_v19 }
 0x3ac   : > { %v4647_v23 = vpop.f32.mrf.mxu1 }
 0x3ad   : > { %v5986_v24 = vadd.f32 %v4167_v20, %v2104_v22 }
 0x3ae   : > { %v2101_v25 = vpop.f32.mrf.mxu1 }
 0x3af   : > { %v2114_v26 = vsel %vm1216_vm2, %v5986_v24, 0.0  ;;  %v2121_v27 = vmul.f32 %v5986_v24, %v5986_v24 }
 0x3b0   : > { %v2115_v28 = vrot.slane %v2114_v26, 4  ;;  %v4648_v29 = vpop.f32.mrf.mxu1 }
 0x3b1   : > { %v2122_v30 = vsel %vm1216_vm2, %v2121_v27, 0.0 }
 0x3b2   : > { %v2116_v32 = vadd.f32 %v2115_v28, %v2114_v26  ;;  %v2123_v33 = vrot.slane %v2122_v30, 4 }
 0x3b4   : > { %v2117_v34 = vrot.slane %v2116_v32, 2  ;;  %v2124_v35 = vadd.f32 %v2123_v33, %v2122_v30  ;;  %v4170_v30 = vld [vmem:[%s6382_s19] ss:$0 sm:$0xff]  ;;  %s6386_s19 = sld [smem:[#allocation32_spill]] }
 0x3b5   : > { %v4171_v33 = vld [vmem:[%s6383_s26] ss:$0 sm:$0xff]  ;;  %s6387_s26 = sld [smem:[#allocation30_spill]] }
 0x3b6   : > { %v2118_v36 = vadd.f32 %v2117_v34, %v2116_v32  ;;  %v2125_v37 = vrot.slane %v2124_v35, 2 }
 0x3b8   : > { %v2119_v38 = vrot.slane %v2118_v36, 1  ;;  %v2126_v39 = vadd.f32 %v2125_v37, %v2124_v35 }
 0x3ba   : > { %v2120_v43 = vadd.f32 %v2119_v38, %v2118_v36  ;;  %v2127_v44 = vrot.slane %v2126_v39, 1 }
 0x3bc   : > { %4666 = vmatmul.mubr.msk.f32.vlgmr.msra.gmra.mxu0 %vm1216_vm2, %v2120_v43  ;;  %v2128_v41 = vadd.f32 %v2127_v44, %v2126_v39  ;;  %v4178_v44 = vld [vmem:[%s6384_s18] ss:$0 sm:$0xff]  ;;  %s6388_s18 = sld [smem:[#allocation38_spill]] }
 0x3bd   : > { %4688 = vmatpush3.bf16.msra.mxu0 %v5082_v42  ;;  %4695 = vmatprep.mubr.msk.bf16.mxu0 %vm5439_vm0, %v5438_v0 }
 0x3be   : > { %4685 = vmatmul.mubr.msk.f32.vlgmr.msra.gmra.mxu1 %vm1216_vm2, %v2128_v41  ;;  %4689 = vmatprep.subr.bf16.mxu0 %v5438_v0 }
 0x3bf   : > { %4700 = vmatpush3.bf16.msra.mxu1 %v5083_v45  ;;  %4707 = vmatprep.mubr.msk.bf16.mxu1 %vm5439_vm0, %v5438_v0 }
 0x3c0   : > { %4701 = vmatprep.subr.bf16.mxu1 %v5438_v0 }
 0x3c1   : > { %4690 = vmatpush3.bf16.msra.mxu0 %v5084_v46 }
 0x3c2   : > { %4691 = vmatprep.subr.bf16.mxu0 %v5438_v0 }
 0x3c3   : > { %4702 = vmatpush3.bf16.msra.mxu1 %v5085_v47 }
 0x3c4   : > { %4703 = vmatprep.subr.bf16.mxu1 %v5438_v0 }
 0x3c5   : > { %4692 = vmatpush3.bf16.msra.mxu0 %v5086_v15 }
 0x3c6   : > { %4693 = vmatprep.subr.bf16.mxu0 %v5438_v0 }
 0x3c7   : > { %4704 = vmatpush3.bf16.msra.mxu1 %v5087_v48 }
 0x3c8   : > { %4705 = vmatprep.subr.bf16.mxu1 %v5438_v0 }
 0x3c9   : > { %4694 = vmatpush3.bf16.msra.mxu0 %v5088_v50  ;;  %v5100_v50 = vld [vmem:[%s6381_s10 + $0x58] sm:$0xff]  }
 0x3ca   : > { %4711 = vmatprep.subr.bf16.mxu0 %v5438_v0 }
 0x3cb   : > { %4706 = vmatpush3.bf16.msra.mxu1 %v5089_v51 }
 0x3cc   : > { %4696 = vmatmul.mubr.msk.bf16.vlgmr.msra.gmra.mxu0 %vm1216_vm2, %v5773_v31  ;;  %4731 = vmatprep.subr.bf16.mxu1 %v5438_v0  ;;  %v5092_v31 = vld [vmem:[%s6381_s10 + $0x38] sm:$0xff]  }
 0x3cd   : > { %4715 = vmatprep.mubr.msk.bf16.mxu0 %vm5439_vm0, %v5438_v0  ;;  %4712 = vmatpush3.bf16.msra.mxu0 %v5090_v52 }
 0x3ce   : > { %4708 = vmatmul.mubr.msk.bf16.vlgmr.msra.gmra.mxu1 %vm1216_vm2, %v5816_v49  ;;  %4713 = vmatprep.subr.bf16.mxu0 %v5438_v0  ;;  %v5093_v49 = vld [vmem:[%s6381_s10 + $0x30] sm:$0xff]  }
 0x3cf   : > { %4739 = vmatprep.mubr.msk.bf16.mxu1 %vm5439_vm0, %v5438_v0  ;;  %4732 = vmatpush3.bf16.msra.mxu1 %v5094_v54  ;;  %v5102_v54 = vld [vmem:[%s6381_s10 + $0x48] sm:$0xff]  }
 0x3d0   : > { %4733 = vmatprep.subr.bf16.mxu1 %v5438_v0 }
 0x3d1   : > { %4714 = vmatpush3.bf16.msra.mxu0 %v5091_v53 }
 0x3d2   : > { %4719 = vmatprep.subr.bf16.mxu0 %v5438_v0 }
 0x3d3   : > { %4734 = vmatpush3.bf16.msra.mxu1 %v5096_v56 }
 0x3d4   : > { %4716 = vmatmul.mubr.msk.bf16.vlgmr.msra.gmra.mxu0 %vm1123_vm4, %v5787_v40  ;;  %4735 = vmatprep.subr.bf16.mxu1 %v5438_v0  ;;  %v5097_v40 = vld [vmem:[%s6381_s10 + $0x20] sm:$0xff]  }
 0x3d5   : > { %4720 = vmatpush3.bf16.msra.mxu0 %v5092_v31  ;;  %4727 = vmatprep.mubr.msk.bf16.mxu0 %vm5439_vm0, %v5438_v0 }
 0x3d6   : > { %4721 = vmatprep.subr.bf16.mxu0 %v5438_v0 }
 0x3d7   : > { %4736 = vmatpush3.bf16.msra.mxu1 %v5098_v2 }
 0x3d8   : > { %4737 = vmatprep.subr.bf16.mxu1 %v5438_v0 }
 0x3d9   : > { %4722 = vmatpush3.bf16.msra.mxu0 %v5093_v49  ;;  %v5101_v49 = vld [vmem:[%s6381_s10 + $0x50] sm:$0xff]  }
 0x3da   : > { %4723 = vmatprep.subr.bf16.mxu0 %v5438_v0 }
 0x3db   : > { %4738 = vmatpush3.bf16.msra.mxu1 %v5099_v3  ;;  %v5103_v3 = vld [vmem:[%s6381_s10 + $0x40] sm:$0xff]  }
 0x3dc   : > { %4755 = vmatprep.subr.mxu1 %v5438_v0 }
 0x3dd   : > { %4724 = vmatpush3.bf16.msra.mxu0 %v5095_v55  ;;  %v2474_v55 = vld [vmem:[#allocation8] sm:$0x1] }
 0x3de   : > { %4725 = vmatprep.subr.bf16.mxu0 %v5438_v0 }
 0x3e1   : > { %4726 = vmatpush3.bf16.msra.mxu0 %v5097_v40 }
 0x3e2   : > { %4743 = vmatprep.subr.bf16.mxu0 %v5438_v0 }
 0x47c   : > { %v2198_v4 = vpop.f32.mrf.mxu0 }
 0x47d   : > { %v2202_v6 = vmul.f32 0.015625, %v2198_v4 }
 0x47e   : > { %v4667_v7 = vpop.f32.mrf.mxu0  ;;  %v2272_v8 = vpop.f32.mrf.mxu1 }
 0x47f   : > { %v2277_v9 = vmul.f32 %v2202_v6, %v2202_v6  ;;  %v2276_v10 = vmul.f32 0.015625, %v2272_v8  ;;  %v2285_v22 = vrot.slane %v2202_v6, %v5894_v12 }
 0x480   : > { %v4686_v11 = vpop.f32.mrf.mxu1 }
 0x481   : > { %v2278_v13 = vsub.f32 %v2276_v10, %v2277_v9  ;;  %v2286_v28 = vsub.f32 %v5986_v24, %v2285_v22 }
 0x483   : > { %v2279_v14 = vmax.f32 %v2278_v13, 0.0 }
 0x485   : > { %v2280_v16 = vadd.f32 1e-05, %v2279_v14 }
 0x487   : > { %5142 = vrsqrt.f32 %v2280_v16 }
 0x48c   : > { %v2391_v17 = vpop.f32.mrf.mxu0 }
 0x48d   : > { %v2403_v45 = vadd.f32 %v4178_v44, %v2391_v17 }
 0x48e   : > { %v4697_v18 = vpop.f32.mrf.mxu0  ;;  %v2462_v19 = vpop.f32.mrf.mxu1 }
 0x48f   : > { %v2468_v46 = vadd.f32 %v2462_v19, %v2403_v45 }
 0x490   : > { %v2394_v20 = vpop.f32.mrf.mxu0  ;;  %v4709_v21 = vpop.f32.mrf.mxu1 }
 0x492   : > { %v4698_v23 = vpop.f32.mrf.mxu0  ;;  %v2465_v25 = vpop.f32.mrf.mxu1 }
 0x494   : > { %v5143_v26 = vpop.eup %5142  ;;  %v4710_v27 = vpop.f32.mrf.mxu1 }
 0x495   : > { %v2290_v29 = vrot.slane %v5143_v26, %v5894_v12  ;;  %v2521_v40 = vpop.f32.mrf.mxu0 }
 0x496   : > { %v6087_v2 = vadd.f32 %v2521_v40, %v2474_v55 }
 0x497   : > { %v2291_v32 = vmul.f32 %v2290_v29, %v2286_v28  ;;  %v4717_v4 = vpop.f32.mrf.mxu0 }
 0x498   : > { %v2973_v6 = vrot.slane %v6087_v2, %v5894_v12  ;;  %v4221_v4 = vld [vmem:[%s6386_s19] ss:$0 sm:$0xff]  ;;  %s6389_s19 = sld [smem:[#allocation33_spill]] }
 0x499   : > { %v2298_v34 = vmul.f32 %v4170_v30, %v2291_v32  ;;  %v2524_v8 = vpop.f32.mrf.mxu0 }
 0x49a   : > { %2975 = vrot.lane.b32.xlu0 %v2973_v6, %s5440_s11  ;;  %s6385_s11 = sld [smem:[#allocation37_spill]]  ;;  %v2964_v6 = vadd.f32 1.0, %v6087_v2  ;;  %v4222_v8 = vld [vmem:[%s6387_s26] ss:$0 sm:$0xff] }
 0x49b   : > { %v2305_v35 = vadd.f32 %v4171_v33, %v2298_v34  ;;  %v4718_v9 = vpop.f32.mrf.mxu0  ;;  %s6390_s26 = sld [smem:[#allocation31_spill]] }
 0x49d   : > { %v2306_v36 = vmin.f32 %v2305_v35, 20.0 }
 0x49f   : > { %v2307_v37 = vmul.f32 1.442695, %v2306_v36 }
 0x4a0   : > { %v5107_v44 = vld [vmem:[%s6385_s11 + $0x28] sm:$0xff]  }
 0x4a1   : > { %5144 = vpow2.f32 %v2307_v37  ;;  %v5110_v45 = vld [vmem:[%s6385_s11 + $0x8] sm:$0xff]  }
 0x4ae   : > { %v5145_v38 = vpop.eup %5144 }
 0x4af   : > { %v2309_v39 = vadd.f32 1.0, %v5145_v38  ;;  %v5104_v38 = vld [vmem:[%s6385_s11 + $0x38] sm:$0xff]  }
 0x4b1   : > { %v2310_v42 = vmul.f32 %v2309_v39, %v2309_v39  ;;  %v5106_v39 = vld [vmem:[%s6385_s11 + $0x18] sm:$0xff]  }
 0x4b3   : > { %v2313_v43 = vadd.f32 1.0, %v2310_v42  ;;  %v4172_v24 = vadd.f32 -1.0, %v2310_v42  ;;  %v5105_v42 = vld [vmem:[%s6385_s11 + $0x30] sm:$0xff]  }
 0x4b5   : > { %5146 = vrcp.f32 %v2313_v43  ;;  %v2312_v41 = vmul.f32 %v4172_v24, %v2305_v35  ;;  %v5108_v43 = vld [vmem:[%s6385_s11 + $0x10] sm:$0xff]   ;;  %v5109_v24 = vld [vmem:[%s6385_s11 + $0x20] sm:$0xff]  }
 0x4c2   : > { %v5147_v47 = vpop.eup %5146 }
 0x4c3   : > { %v2315_v15 = vmul.f32 %v5147_v47, %v2312_v41  ;;  %v5111_v41 = vld [vmem:[%s6385_s11] sm:$0xff]  }
 0x4c5   : > { %v6057_v48 = vadd.f32 %v2468_v46, %v2315_v15 }
 0x4c7   : > { %v2548_v51 = vpack.c.bf16 %v6057_v48, %v6057_v48  ;;  %v2536_v52 = vrot.slane %v6057_v48, 7  ;;  %3437 = vst.msk [vmem:[%s6065_s2] sm:$0xff] %vm1216_vm2, %v6057_v48  ;;  %v2692_v56 = vrot.slane %v6057_v48, 1 }
 0x4c9   : > { %4728 = vmatmul.mubr.msk.bf16.vlgmr.msra.gmra.mxu0 %vm1216_vm2, %v2548_v51  ;;  %v2537_v53 = vsel %vm1090_vm1, %v2536_v52, 0.0  ;;  %v2693_v7 = vsel %vm1091_vm3, %v2692_v56, 0.0 }
 0x4ca   : > { %4744 = vmatpush3.bf16.msra.mxu0 %v5100_v50  ;;  %v2538_v31 = vpack.c.bf16 %v2537_v53, %v2537_v53  ;;  %4751 = vmatprep.mubr.msk.bf16.mxu0 %vm5439_vm0, %v5438_v0  ;;  %v2694_v10 = vpack.c.bf16 %v2693_v7, %v2693_v7 }
 0x4cb   : > { %4745 = vmatprep.subr.bf16.mxu0 %v5438_v0 }
 0x4cc   : > { %4740 = vmatmul.mubr.msk.bf16.vlgmr.msra.gmra.mxu1 %vm1216_vm2, %v2538_v31 }
 0x4cd   : > { %4756 = vmatpush3.msra.mxu1 %v5838_v57  ;;  %4771 = vmatprep.mubr.msk.f32.mxu1 %vm5439_vm0, %v5438_v0 }
 0x4ce   : > { %4746 = vmatpush3.bf16.msra.mxu0 %v5101_v49  ;;  %4757 = vmatprep.subr.mxu1 %v5438_v0 }
 0x4cf   : > { %4747 = vmatprep.subr.bf16.mxu0 %v5438_v0  ;;  %4758 = vmatpush3.msra.mxu1 %v5844_v58 }
 0x4d0   : > { %4759 = vmatprep.subr.mxu1 %v5438_v0 }
 0x4d1   : > { %4760 = vmatpush3.msra.mxu1 %v5851_v59 }
 0x4d2   : > { %4748 = vmatpush3.bf16.msra.mxu0 %v5102_v54  ;;  %4761 = vmatprep.subr.mxu1 %v5438_v0 }
 0x4d3   : > { %4749 = vmatprep.subr.bf16.mxu0 %v5438_v0  ;;  %4762 = vmatpush3.msra.mxu1 %v5858_v60 }
 0x4d4   : > { %4763 = vmatprep.subr.mxu1 %v5438_v0 }
 0x4d5   : > { %4764 = vmatpush3.msra.mxu1 %v5865_v61 }
 0x4d6   : > { %4750 = vmatpush3.bf16.msra.mxu0 %v5103_v3  ;;  %4765 = vmatprep.subr.mxu1 %v5438_v0 }
 0x4d7   : > { %4774 = vmatprep.subr.mxu0 %v5438_v0  ;;  %4766 = vmatpush3.msra.mxu1 %v5872_v62 }
 0x4d8   : > { %4767 = vmatprep.subr.mxu1 %v5438_v0 }
 0x4d9   : > { %4752 = vmatmul.mubr.msk.bf16.vlgmr.msra.gmra.mxu0 %vm1216_vm2, %v2694_v10  ;;  %4768 = vmatpush3.msra.mxu1 %v5879_v63  ;;  %v2968_v10 = vrot.slane %v2964_v6, %v5894_v12 }
 0x4da   : > { %4775 = vmatpush3.msra.mxu0 %v5838_v57  ;;  %4769 = vmatprep.subr.mxu1 %v5438_v0 }
 0x4db   : > { %4776 = vmatprep.subr.mxu0 %v5438_v0  ;;  %4770 = vmatpush3.msra.mxu1 %v5883_v1 }
 0x4dc   : > { %4777 = vmatpush3.msra.mxu0 %v5844_v58  ;;  %4790 = vmatprep.mubr.msk.f32.mxu0 %vm5439_vm0, %v5438_v0 }
 0x4dd   : > { %4778 = vmatprep.subr.mxu0 %v5438_v0  ;;  %4793 = vmatprep.subr.bf16.mxu1 %v5438_v0 }
 0x4de   : > { %4779 = vmatpush3.msra.mxu0 %v5851_v59 }
 0x4df   : > { %4780 = vmatprep.subr.mxu0 %v5438_v0 }
 0x4e0   : > { %4781 = vmatpush3.msra.mxu0 %v5858_v60 }
 0x4e1   : > { %4782 = vmatprep.subr.mxu0 %v5438_v0 }
 0x4e2   : > { %4783 = vmatpush3.msra.mxu0 %v5865_v61 }
 0x4e3   : > { %4784 = vmatprep.subr.mxu0 %v5438_v0 }
 0x4e4   : > { %4785 = vmatpush3.msra.mxu0 %v5872_v62  ;;  %v4218_v62 = vld [vmem:[#allocation5] ss:$0 sm:$0xff] }
 0x4e5   : > { %4786 = vmatprep.subr.mxu0 %v5438_v0 }
 0x4e6   : > { %4787 = vmatpush3.msra.mxu0 %v5879_v63 }
 0x4e7   : > { %4788 = vmatprep.subr.mxu0 %v5438_v0 }
 0x4e8   : > { %4789 = vmatpush3.msra.mxu0 %v5883_v1 }
 0x4e9   : > { %4805 = vmatprep.subr.bf16.mxu0 %v5438_v0 }
 0x589   : > { %v2610_v57 = vpop.f32.mrf.mxu0 }
 0x58b   : > { %v4729_v58 = vpop.f32.mrf.mxu0 }
 0x58c   : > { %v2677_v59 = vpop.f32.mrf.mxu1 }
 0x58d   : > { %v2613_v60 = vpop.f32.mrf.mxu0  ;;  %v2678_v16 = vadd.f32 %v2677_v59, %v2610_v57  ;;  %v2976_v59 = vpop.permute.xlu0 %2975 }
 0x58e   : > { %v4741_v11 = vpop.f32.mrf.mxu1 }
 0x58f   : > { %v4730_v61 = vpop.f32.mrf.mxu0 }
 0x590   : > { %v2680_v13 = vpop.f32.mrf.mxu1 }
 0x592   : > { %v4742_v14 = vpop.f32.mrf.mxu1 }
 0x599   : > { %v2756_v17 = vpop.f32.mrf.mxu0 }
 0x59a   : > { %v2762_v18 = vadd.f32 %v2756_v17, %v2678_v16 }
 0x59b   : > { %v4753_v19 = vpop.f32.mrf.mxu0 }
 0x59c   : > { %v2769_v63 = vadd.f32 %v4218_v62, %v2762_v18 }
 0x59d   : > { %v2759_v20 = vpop.f32.mrf.mxu0 }
 0x59e   : > { %v2772_v21 = vsel %vm1216_vm2, %v2769_v63, 0.0  ;;  %v2779_v1 = vmul.f32 %v2769_v63, %v2769_v63 }
 0x59f   : > { %v2773_v22 = vrot.slane %v2772_v21, 4  ;;  %v4754_v23 = vpop.f32.mrf.mxu0 }
 0x5a0   : > { %v2780_v25 = vsel %vm1216_vm2, %v2779_v1, 0.0  ;;  %v5113_v23 = vld [vmem:[%s6385_s11 + $0x50] sm:$0xff]  }
 0x5a1   : > { %v2774_v26 = vadd.f32 %v2773_v22, %v2772_v21  ;;  %v2781_v27 = vrot.slane %v2780_v25, 4 }
 0x5a3   : > { %v2775_v28 = vrot.slane %v2774_v26, 2  ;;  %v2782_v29 = vadd.f32 %v2781_v27, %v2780_v25  ;;  %v5160_v25 = vld [vmem:[%s5466_s17 + $0x38] sm:$0xff]  ;;  %v5161_v27 = vld [vmem:[%s5466_s17 + $0x30] sm:$0xff] }
 0x5a5   : > { %v2776_v30 = vadd.f32 %v2775_v28, %v2774_v26  ;;  %v2783_v32 = vrot.slane %v2782_v29, 2  ;;  %v5114_v26 = vld [vmem:[%s6385_s11 + $0x48] sm:$0xff]  }
 0x5a7   : > { %v2777_v33 = vrot.slane %v2776_v30, 1  ;;  %v2784_v34 = vadd.f32 %v2783_v32, %v2782_v29  ;;  %v5162_v29 = vld [vmem:[%s5466_s17 + $0x28] sm:$0xff]  ;;  %v5163_v32 = vld [vmem:[%s5466_s17 + $0x20] sm:$0xff] }
 0x5a9   : > { %v2778_v35 = vadd.f32 %v2777_v33, %v2776_v30  ;;  %v2785_v36 = vrot.slane %v2784_v34, 1  ;;  %v5115_v30 = vld [vmem:[%s6385_s11 + $0x40] sm:$0xff]  }
 0x5ab   : > { %4772 = vmatmul.mubr.msk.f32.vlgmr.msra.gmra.mxu1 %vm1216_vm2, %v2778_v35  ;;  %v2786_v37 = vadd.f32 %v2785_v36, %v2784_v34  ;;  %v5164_v34 = vld [vmem:[%s5466_s17 + $0x18] sm:$0xff]  ;;  %v5165_v36 = vld [vmem:[%s5466_s17 + $0x10] sm:$0xff] }
 0x5ac   : > { %4801 = vmatprep.mubr.msk.bf16.mxu1 %vm5439_vm0, %v5438_v0  ;;  %4794 = vmatpush3.bf16.msra.mxu1 %v5104_v38  ;;  %v5167_v38 = vld [vmem:[%s5466_s17] sm:$0xff] }
 0x5ad   : > { %4791 = vmatmul.mubr.msk.f32.vlgmr.msra.gmra.mxu0 %vm1216_vm2, %v2786_v37  ;;  %4795 = vmatprep.subr.bf16.mxu1 %v5438_v0  ;;  %v5166_v37 = vld [vmem:[%s5466_s17 + $0x8] sm:$0xff] }
 0x5ae   : > { %4813 = vmatprep.mubr.msk.bf16.mxu0 %vm5439_vm0, %v5438_v0  ;;  %4806 = vmatpush3.bf16.msra.mxu0 %v5106_v39 }
 0x5af   : > { %4807 = vmatprep.subr.bf16.mxu0 %v5438_v0 }
 0x5b0   : > { %4796 = vmatpush3.bf16.msra.mxu1 %v5105_v42 }
 0x5b1   : > { %4797 = vmatprep.subr.bf16.mxu1 %v5438_v0 }
 0x5b2   : > { %4808 = vmatpush3.bf16.msra.mxu0 %v5108_v43 }
 0x5b3   : > { %4809 = vmatprep.subr.bf16.mxu0 %v5438_v0 }
 0x5b4   : > { %4798 = vmatpush3.bf16.msra.mxu1 %v5107_v44 }
 0x5b5   : > { %4799 = vmatprep.subr.bf16.mxu1 %v5438_v0 }
 0x5b6   : > { %4810 = vmatpush3.bf16.msra.mxu0 %v5110_v45 }
 0x5b7   : > { %4811 = vmatprep.subr.bf16.mxu0 %v5438_v0 }
 0x5b8   : > { %4800 = vmatpush3.bf16.msra.mxu1 %v5109_v24 }
 0x5b9   : > { %4817 = vmatprep.subr.bf16.mxu1 %v5438_v0 }
 0x5ba   : > { %4812 = vmatpush3.bf16.msra.mxu0 %v5111_v41 }
 0x5bb   : > { %4829 = vmatprep.subr.mxu0 %v5438_v0 }
 0x66b   : > { %v2856_v46 = vpop.f32.mrf.mxu1 }
 0x66c   : > { %v2860_v47 = vmul.f32 0.015625, %v2856_v46 }
 0x66d   : > { %v4773_v15 = vpop.f32.mrf.mxu1  ;;  %v2930_v50 = vpop.f32.mrf.mxu0 }
 0x66e   : > { %v2935_v51 = vmul.f32 %v2860_v47, %v2860_v47  ;;  %v2934_v52 = vmul.f32 0.015625, %v2930_v50  ;;  %v2943_v55 = vrot.slane %v2860_v47, %v5894_v12  ;;  %v4255_v15 = vld [vmem:[#allocation7] ss:$0 sm:$0xff] }
 0x66f   : > { %v4792_v53 = vpop.f32.mrf.mxu0 }
 0x670   : > { %v2936_v31 = vsub.f32 %v2934_v52, %v2935_v51  ;;  %v2944_v40 = vsub.f32 %v2769_v63, %v2943_v55  ;;  %v5112_v63 = vld [vmem:[%s6385_s11 + $0x58] sm:$0xff]  }
 0x672   : > { %v2937_v49 = vmax.f32 %v2936_v31, 0.0 }
 0x674   : > { %v2938_v54 = vadd.f32 1e-05, %v2937_v49 }
 0x676   : > { %5148 = vrsqrt.f32 %v2938_v54 }
 0x683   : > { %v5149_v56 = vpop.eup %5148 }
 0x684   : > { %v2948_v3 = vrot.slane %v5149_v56, %v5894_v12 }
 0x686   : > { %v2949_v7 = vmul.f32 %v2948_v3, %v2944_v40 }
 0x688   : > { %v2956_v9 = vmul.f32 %v4221_v4, %v2949_v7 }
 0x68a   : > { %v2963_v57 = vadd.f32 %v4222_v8, %v2956_v9 }
 0x68c   : > { %v2969_v58 = vmul.f32 %v2968_v10, %v2963_v57 }
 0x68e   : > { %v2978_v60 = vadd.f32 %v2976_v59, %v2969_v58 }
 0x690   : > { %v2979_v11 = vmin.f32 %v2978_v60, 20.0 }
 0x692   : > { %v2980_v61 = vmul.f32 1.442695, %v2979_v11  ;;  %v5116_v11 = vld [vmem:[%s6388_s18 + $0x38] sm:$0xff]  }
 0x694   : > { %5150 = vpow2.f32 %v2980_v61  ;;  %v5117_v61 = vld [vmem:[%s6388_s18 + $0x78] sm:$0xff]  }
 0x6a1   : > { %v5151_v13 = vpop.eup %5150 }
 0x6a2   : > { %v2982_v14 = vadd.f32 1.0, %v5151_v13  ;;  %v5118_v13 = vld [vmem:[%s6388_s18 + $0x30] sm:$0xff]  }
 0x6a4   : > { %v2983_v16 = vmul.f32 %v2982_v14, %v2982_v14  ;;  %v5119_v14 = vld [vmem:[%s6388_s18 + $0x70] sm:$0xff]  }
 0x6a6   : > { %v2986_v62 = vadd.f32 1.0, %v2983_v16  ;;  %v4223_v2 = vadd.f32 -1.0, %v2983_v16  ;;  %v5120_v16 = vld [vmem:[%s6388_s18 + $0x28] sm:$0xff]  }
 0x6a8   : > { %5152 = vrcp.f32 %v2986_v62  ;;  %v2985_v17 = vmul.f32 %v4223_v2, %v2978_v60  ;;  %v5121_v62 = vld [vmem:[%s6388_s18 + $0x68] sm:$0xff]   ;;  %v5122_v2 = vld [vmem:[%s6388_s18 + $0x20] sm:$0xff]  }
 0x6b5   : > { %v5153_v18 = vpop.eup %5152 }
 0x6b6   : > { %v2988_v19 = vmul.f32 %v5153_v18, %v2985_v17  ;;  %v5123_v17 = vld [vmem:[%s6388_s18 + $0x60] sm:$0xff]  }
 0x6b8   : > { %v3010_v20 = vpack.c.bf16 %v2988_v19, %v2988_v19  ;;  %v2998_v21 = vrot.slane %v2988_v19, 7  ;;  %v3154_v28 = vrot.slane %v2988_v19, 1 }
 0x6ba   : > { %4802 = vmatmul.mubr.msk.bf16.vlgmr.msra.gmra.mxu1 %vm1216_vm2, %v3010_v20  ;;  %v2999_v1 = vsel %vm1090_vm1, %v2998_v21, 0.0  ;;  %v3155_v33 = vsel %vm1091_vm3, %v3154_v28, 0.0 }
 0x6bb   : > { %4818 = vmatpush3.bf16.msra.mxu1 %v5112_v63  ;;  %v3000_v22 = vpack.c.bf16 %v2999_v1, %v2999_v1  ;;  %4825 = vmatprep.mubr.msk.bf16.mxu1 %vm5439_vm0, %v5438_v0  ;;  %v3156_v35 = vpack.c.bf16 %v3155_v33, %v3155_v33 }
 0x6bc   : > { %4819 = vmatprep.subr.bf16.mxu1 %v5438_v0 }
 0x6bd   : > { %4814 = vmatmul.mubr.msk.bf16.vlgmr.msra.gmra.mxu0 %vm1216_vm2, %v3000_v22 }
 0x6be   : > { %4830 = vmatpush3.msra.mxu0 %v5160_v25  ;;  %4845 = vmatprep.mubr.msk.f32.mxu0 %vm5439_vm0, %v5438_v0 }
 0x6bf   : > { %4820 = vmatpush3.bf16.msra.mxu1 %v5113_v23  ;;  %4831 = vmatprep.subr.mxu0 %v5438_v0 }
 0x6c0   : > { %4821 = vmatprep.subr.bf16.mxu1 %v5438_v0  ;;  %4832 = vmatpush3.msra.mxu0 %v5161_v27 }
 0x6c1   : > { %4833 = vmatprep.subr.mxu0 %v5438_v0 }
 0x6c2   : > { %4834 = vmatpush3.msra.mxu0 %v5162_v29 }
 0x6c3   : > { %4822 = vmatpush3.bf16.msra.mxu1 %v5114_v26  ;;  %4835 = vmatprep.subr.mxu0 %v5438_v0 }
 0x6c4   : > { %4823 = vmatprep.subr.bf16.mxu1 %v5438_v0  ;;  %4836 = vmatpush3.msra.mxu0 %v5163_v32 }
 0x6c5   : > { %4837 = vmatprep.subr.mxu0 %v5438_v0 }
 0x6c6   : > { %4838 = vmatpush3.msra.mxu0 %v5164_v34 }
 0x6c7   : > { %4824 = vmatpush3.bf16.msra.mxu1 %v5115_v30  ;;  %4839 = vmatprep.subr.mxu0 %v5438_v0 }
 0x6c8   : > { %4848 = vmatprep.subr.mxu1 %v5438_v0  ;;  %4840 = vmatpush3.msra.mxu0 %v5165_v36 }
 0x6c9   : > { %4841 = vmatprep.subr.mxu0 %v5438_v0 }
 0x6ca   : > { %4826 = vmatmul.mubr.msk.bf16.vlgmr.msra.gmra.mxu1 %vm1216_vm2, %v3156_v35  ;;  %4842 = vmatpush3.msra.mxu0 %v5166_v37 }
 0x6cb   : > { %4849 = vmatpush3.msra.mxu1 %v5160_v25  ;;  %4843 = vmatprep.subr.mxu0 %v5438_v0 }
 0x6cc   : > { %4850 = vmatprep.subr.mxu1 %v5438_v0  ;;  %4844 = vmatpush3.msra.mxu0 %v5167_v38 }
 0x6cd   : > { %4851 = vmatpush3.msra.mxu1 %v5161_v27  ;;  %4864 = vmatprep.mubr.msk.f32.mxu1 %vm5439_vm0, %v5438_v0 }
 0x6ce   : > { %4852 = vmatprep.subr.mxu1 %v5438_v0  ;;  %4867 = vmatprep.subr.bf16.mxu0 %v5438_v0 }
 0x6cf   : > { %4853 = vmatpush3.msra.mxu1 %v5162_v29 }
 0x6d0   : > { %4854 = vmatprep.subr.mxu1 %v5438_v0 }
 0x6d1   : > { %4855 = vmatpush3.msra.mxu1 %v5163_v32  ;;  %v4258_v32 = vld [vmem:[%s6389_s19] ss:$0 sm:$0xff]  ;;  %s6235_s19 = scalar_lea.vmem [#allocation12], %s4058_s7  ;;  %s4308_s7 = sshll.u32 %s5629_s0, 7 }
 0x6d2   : > { %4856 = vmatprep.subr.mxu1 %v5438_v0  ;;  %s3782_s1 = scalar_lea.hbm %s5591_s14, %s4308_s7 }
 0x6d3   : > { %4857 = vmatpush3.msra.mxu1 %v5164_v34  ;;  %v4259_v34 = vld [vmem:[%s6390_s26] ss:$0 sm:$0xff]  ;;  %s3784_s26 = sshll.u32 %s6065_s2, 4  ;;  %s3785_s26 = int_to_ptr.vmem [resolvable:$true] %s3784_s26 }
 0x6d4   : > { %4858 = vmatprep.subr.mxu1 %v5438_v0  ;;  %s5298_s5 = scalar_lea.vmem %s3785_s26, 128  ;;  %p5305_p7 = scmp.lt.s32.totalorder %s3785_s26, %s5303_s8 }
 0x6d5   : > { %4859 = vmatpush3.msra.mxu1 %v5165_v36  ;;  %p5299_p4 = scmp.ne.s32.totalorder %s3785_s26, %s5298_s5  ;;  %p5306_p8 = scmp.lt.s32.totalorder %s5304_s9, %s5298_s5 }
 0x6d6   : > { %4860 = vmatprep.subr.mxu1 %v5438_v0 }
 0x6d7   : > { %4861 = vmatpush3.msra.mxu1 %v5166_v37  ;;  %p5300_p6 = pnand %p5299_p4, %p6391_p5  ;;  %p5307_p11 = por %p5306_p8, %p5305_p7 }
 0x6d8   : > { %4862 = vmatprep.subr.mxu1 %v5438_v0 }
 0x6d9   : > { %4863 = vmatpush3.msra.mxu1 %v5167_v38  ;;  %p5301_p10 = pneg %p5300_p6 }
 0x6da   : > { %4879 = vmatprep.subr.bf16.mxu1 %v5438_v0 }
 0x6db   : > { %p5308_p0 = pnand %p5307_p11, %p5301_p10 }
 0x77a   : > { %v3072_v39 = vpop.f32.mrf.mxu1 }
 0x77c   : > { %v4803_v42 = vpop.f32.mrf.mxu1 }
 0x77d   : > { %v3139_v43 = vpop.f32.mrf.mxu0 }
 0x77e   : > { %v3075_v44 = vpop.f32.mrf.mxu1  ;;  %v3140_v47 = vadd.f32 %v3139_v43, %v3072_v39 }
 0x77f   : > { %v4815_v45 = vpop.f32.mrf.mxu0 }
 0x780   : > { %v4804_v24 = vpop.f32.mrf.mxu1 }
 0x781   : > { %v3142_v41 = vpop.f32.mrf.mxu0 }
 0x783   : > { %v4816_v46 = vpop.f32.mrf.mxu0 }
 0x78a   : > { %v3218_v50 = vpop.f32.mrf.mxu1 }
 0x78b   : > { %v3224_v51 = vadd.f32 %v3218_v50, %v3140_v47  ;;  %v5124_v47 = vld [vmem:[%s6388_s18 + $0x18] sm:$0xff]  }
 0x78c   : > { %v4827_v52 = vpop.f32.mrf.mxu1 }
 0x78d   : > { %v3231_v53 = vadd.f32 %v4255_v15, %v3224_v51  ;;  %v5125_v52 = vld [vmem:[%s6388_s18 + $0x58] sm:$0xff]  }
 0x78e   : > { %v3221_v31 = vpop.f32.mrf.mxu1 }
 0x78f   : > { %v3234_v49 = vsel %vm1216_vm2, %v3231_v53, 0.0  ;;  %v3241_v54 = vmul.f32 %v3231_v53, %v3231_v53  ;;  %v5127_v31 = vld [vmem:[%s6388_s18 + $0x50] sm:$0xff]  }
 0x790   : > { %v3235_v55 = vrot.slane %v3234_v49, 4  ;;  %v4828_v56 = vpop.f32.mrf.mxu1 }
 0x791   : > { %v3242_v40 = vsel %vm1216_vm2, %v3241_v54, 0.0  ;;  %v5130_v56 = vld [vmem:[%s6388_s18] sm:$0xff]  }
 0x792   : > { %v3236_v3 = vadd.f32 %v3235_v55, %v3234_v49  ;;  %v3243_v4 = vrot.slane %v3242_v40, 4  ;;  %v5128_v49 = vld [vmem:[%s6388_s18 + $0x8] sm:$0xff]  }
 0x793   : > { %v5129_v55 = vld [vmem:[%s6388_s18 + $0x48] sm:$0xff]  }
 0x794   : > { %v3237_v6 = vrot.slane %v3236_v3, 2  ;;  %v3244_v7 = vadd.f32 %v3243_v4, %v3242_v40 }
 0x796   : > { %v3238_v8 = vadd.f32 %v3237_v6, %v3236_v3  ;;  %v3245_v9 = vrot.slane %v3244_v7, 2  ;;  %v5131_v3 = vld [vmem:[%s6388_s18 + $0x40] sm:$0xff]  }
 0x798   : > { %v3239_v10 = vrot.slane %v3238_v8, 1  ;;  %v3246_v57 = vadd.f32 %v3245_v9, %v3244_v7 }
 0x79a   : > { %v3240_v58 = vadd.f32 %v3239_v10, %v3238_v8  ;;  %v3247_v59 = vrot.slane %v3246_v57, 1 }
 0x79c   : > { %4846 = vmatmul.mubr.msk.f32.vlgmr.msra.gmra.mxu0 %vm1216_vm2, %v3240_v58  ;;  %v3248_v60 = vadd.f32 %v3247_v59, %v3246_v57 }
 0x79d   : > { %4875 = vmatprep.mubr.msk.bf16.mxu0 %vm5439_vm0, %v5438_v0  ;;  %4868 = vmatpush3.bf16.msra.mxu0 %v5117_v61 }
 0x79e   : > { %4865 = vmatmul.mubr.msk.f32.vlgmr.msra.gmra.mxu1 %vm1216_vm2, %v3248_v60  ;;  %4869 = vmatprep.subr.bf16.mxu0 %v5438_v0 }
 0x79f   : > { %4887 = vmatprep.mubr.msk.bf16.mxu1 %vm5439_vm0, %v5438_v0  ;;  %4880 = vmatpush3.bf16.msra.mxu1 %v5116_v11 }
 0x7a0   : > { %4881 = vmatprep.subr.bf16.mxu1 %v5438_v0 }
 0x7a1   : > { %4870 = vmatpush3.bf16.msra.mxu0 %v5119_v14 }
 0x7a2   : > { %4871 = vmatprep.subr.bf16.mxu0 %v5438_v0 }
 0x7a3   : > { %4882 = vmatpush3.bf16.msra.mxu1 %v5118_v13 }
 0x7a4   : > { %4883 = vmatprep.subr.bf16.mxu1 %v5438_v0 }
 0x7a5   : > { %4872 = vmatpush3.bf16.msra.mxu0 %v5121_v62 }
 0x7a6   : > { %4873 = vmatprep.subr.bf16.mxu0 %v5438_v0 }
 0x7a7   : > { %4884 = vmatpush3.bf16.msra.mxu1 %v5120_v16 }
 0x7a8   : > { %4885 = vmatprep.subr.bf16.mxu1 %v5438_v0 }
 0x7a9   : > { %4874 = vmatpush3.bf16.msra.mxu0 %v5123_v17 }
 0x7aa   : > { %4891 = vmatprep.subr.bf16.mxu0 %v5438_v0 }
 0x7ab   : > { %4886 = vmatpush3.bf16.msra.mxu1 %v5122_v2 }
 0x7ac   : > { %4903 = vmatprep.subr.bf16.mxu1 %v5438_v0 }
 0x85c   : > { %v3318_v18 = vpop.f32.mrf.mxu0 }
 0x85d   : > { %v3322_v19 = vmul.f32 0.015625, %v3318_v18 }
 0x85e   : > { %v4847_v63 = vpop.f32.mrf.mxu0  ;;  %v3392_v20 = vpop.f32.mrf.mxu1 }
 0x85f   : > { %v3397_v21 = vmul.f32 %v3322_v19, %v3322_v19  ;;  %v3396_v1 = vmul.f32 0.015625, %v3392_v20  ;;  %v3405_v27 = vrot.slane %v3322_v19, %v5894_v12 }
 0x860   : > { %v4866_v22 = vpop.f32.mrf.mxu1 }
 0x861   : > { %v3398_v23 = vsub.f32 %v3396_v1, %v3397_v21  ;;  %v3406_v29 = vsub.f32 %v3231_v53, %v3405_v27  ;;  %v5126_v53 = vld [vmem:[%s6388_s18 + $0x10] sm:$0xff]  }
 0x863   : > { %v3399_v25 = vmax.f32 %v3398_v23, 0.0 }
 0x865   : > { %v3400_v26 = vadd.f32 1e-05, %v3399_v25 }
 0x867   : > { %5154 = vrsqrt.f32 %v3400_v26 }
 0x874   : > { %v5155_v28 = vpop.eup %5154 }
 0x875   : > { %v3410_v30 = vrot.slane %v5155_v28, %v5894_v12 }
 0x877   : > { %v3411_v33 = vmul.f32 %v3410_v30, %v3406_v29 }
 0x879   : > { %v3418_v35 = vmul.f32 %v4258_v32, %v3411_v33 }
 0x87b   : > { %v3425_v36 = vadd.f32 %v4259_v34, %v3418_v35 }
 0x87d   : > { %v3426_v37 = vmin.f32 %v3425_v36, 20.0 }
 0x87f   : > { %v3427_v38 = vmul.f32 1.442695, %v3426_v37 }
 0x881   : > { %5156 = vpow2.f32 %v3427_v38 }
 0x88e   : > { %v5157_v39 = vpop.eup %5156 }
 0x88f   : > { %v3429_v42 = vadd.f32 1.0, %v5157_v39 }
 0x891   : > { %v3430_v43 = vmul.f32 %v3429_v42, %v3429_v42 }
 0x893   : > { %v3433_v44 = vadd.f32 1.0, %v3430_v43  ;;  %v4260_v45 = vadd.f32 -1.0, %v3430_v43 }
 0x895   : > { %5158 = vrcp.f32 %v3433_v44  ;;  %v3432_v24 = vmul.f32 %v4260_v45, %v3425_v36 }
 0x8a2   : > { %v5159_v12 = vpop.eup %5158 }
 0x8a3   : > { %v3435_v41 = vmul.f32 %v5159_v12, %v3432_v24 }
 0x8a5   : > { %v3436_v46 = vadd.f32 %v3435_v41, %v6057_v48 }
 0x8a7   : > { %v3440_v15 = vpack.c.bf16 %v3436_v46, %v3436_v46  ;;  %v3441_v50 = vrot.slane %v3436_v46, 7  ;;  %3438 = vst.msk [vmem:[%s6235_s19] sm:$0xff] %vm1216_vm2, %v3436_v46  ;;  %v3444_v54 = vrot.slane %v3436_v46, 1 }
 0x8a9   : > { %4888 = vmatmul.mubr.msk.bf16.vlgmr.msra.gmra.mxu1 %vm1216_vm2, %v3440_v15  ;;  %v3442_v51 = vsel %vm1090_vm1, %v3441_v50, 0.0  ;;  %v3445_v40 = vsel %vm1091_vm3, %v3444_v54, 0.0 }
 0x8aa   : > { %4904 = vmatpush3.bf16.msra.mxu1 %v5124_v47  ;;  %v3443_v48 = vpack.c.bf16 %v3442_v51, %v3442_v51  ;;  %4911 = vmatprep.mubr.msk.bf16.mxu1 %vm5439_vm0, %v5438_v0  ;;  %v3446_v4 = vpack.c.bf16 %v3445_v40, %v3445_v40 }
 0x8ab   : > { %4905 = vmatprep.subr.bf16.mxu1 %v5438_v0 }
 0x8ac   : > { %4876 = vmatmul.mubr.msk.bf16.vlgmr.msra.gmra.mxu0 %vm1216_vm2, %v3443_v48 }
 0x8ad   : > { %4892 = vmatpush3.bf16.msra.mxu0 %v5125_v52  ;;  %4899 = vmatprep.mubr.msk.bf16.mxu0 %vm5439_vm0, %v5438_v0 }
 0x8ae   : > { %4906 = vmatpush3.bf16.msra.mxu1 %v5126_v53  ;;  %4893 = vmatprep.subr.bf16.mxu0 %v5438_v0 }
 0x8af   : > { %4907 = vmatprep.subr.bf16.mxu1 %v5438_v0 }
 0x8b1   : > { %4894 = vmatpush3.bf16.msra.mxu0 %v5127_v31 }
 0x8b2   : > { %4908 = vmatpush3.bf16.msra.mxu1 %v5128_v49  ;;  %4895 = vmatprep.subr.bf16.mxu0 %v5438_v0 }
 0x8b3   : > { %4909 = vmatprep.subr.bf16.mxu1 %v5438_v0 }
 0x8b5   : > { %4896 = vmatpush3.bf16.msra.mxu0 %v5129_v55 }
 0x8b6   : > { %4910 = vmatpush3.bf16.msra.mxu1 %v5130_v56  ;;  %4897 = vmatprep.subr.bf16.mxu0 %v5438_v0 }
 0x8b9   : > { %4898 = vmatpush3.bf16.msra.mxu0 %v5131_v3  ;;  %4912 = vmatmul.mubr.msk.bf16.vlgmr.msra.gmra.mxu1 %vm1216_vm2, %v3446_v4 }
 0x8bc   : > { %4900 = vmatmul.mubr.msk.bf16.vlgmr.msra.gmra.mxu0 %vm1216_vm2, %v3440_v15 }
 0x8bd   : > { %5311 = shalt.err (!%p5308_p0)
}
 0x8be   : > { %s5312_s10 = scalar_lea.hbm %s3782_s1, 128  ;;  %s5316_s2 = scalar_lea.hbm %s5591_s14, 256 }
 0x8bf   : > { %p5313_p1 = scmp.ne.s32.totalorder %s3782_s1, %s5312_s10  ;;  %p5317_p3 = scmp.lt.s32.totalorder %s3782_s1, %s5591_s14 }
 0x8c0   : > { %p5318_p12 = scmp.lt.s32.totalorder %s5316_s2, %s5312_s10 }
 0x8c1   : > { %p5314_p13 = pnand %p5313_p1, %p6391_p5 }
 0x8c2   : > { %p5319_p9 = por %p5318_p12, %p5317_p3 }
 0x8c3   : > { %p5315_p2 = pneg %p5314_p13 }
 0x8c5   : > { %p5320_p4 = pnand %p5319_p9, %p5315_p2 }
 0x8c7   : > { %5323 = shalt.err (!%p5320_p4)
}
 0x8c8   : > { %4935 = dma.vmem_to_hbm [thread:$0]  (%p6391_p5), %s3785_s26, 128, %s3782_s1, %s3758_s4  }
 0x8c9   : > { %s3795_s5 = scalar_lea.hbm %s5596_s24, %s4308_s7  ;;  %s3797_s9 = sshll.u32 %s6235_s19, 4  ;;  %s3798_s9 = int_to_ptr.vmem [resolvable:$true] %s3797_s9 }
 0x8ca   : > { %s3763_s8 = scalar_lea.sflag [#allocation13], %s6054_s28  ;;  %s5324_s6 = scalar_lea.vmem %s3798_s9, 128 }
 0x8cb   : > { %p5325_p6 = scmp.ne.s32.totalorder %s3798_s9, %s5324_s6  ;;  %s5442_s10 = smov [#allocation12]  }
 0x8cc   : > { %s5328_s2 = sshll.u32 %s5442_s10, 4  ;;  %s5329_s2 = int_to_ptr.vmem [resolvable:$false] %s5328_s2 }
 0x8cd   : > { %p5326_p10 = pnand %p5325_p6, %p6391_p5  ;;  %s5330_s11 = scalar_lea.vmem %s5329_s2, 256 }
 0x8ce   : > { %p5331_p8 = scmp.lt.s32.totalorder %s3798_s9, %s5329_s2  ;;  %p5332_p11 = scmp.lt.s32.totalorder %s5330_s11, %s5324_s6 }
 0x8cf   : > { %p5327_p7 = pneg %p5326_p10 }
 0x8d0   : > { %p5333_p0 = por %p5332_p11, %p5331_p8 }
 0x8d2   : > { %p5334_p1 = pnand %p5333_p0, %p5327_p7 }
 0x8d4   : > { %5337 = shalt.err (!%p5334_p1)
}
 0x8d5   : > { %s5338_s4 = scalar_lea.hbm %s3795_s5, 128  ;;  %s5342_s0 = scalar_lea.hbm %s5596_s24, 256 }
 0x8d6   : > { %p5339_p13 = scmp.ne.s32.totalorder %s3795_s5, %s5338_s4  ;;  %p5343_p12 = scmp.lt.s32.totalorder %s3795_s5, %s5596_s24 }
 0x8d7   : > { %p5344_p9 = scmp.lt.s32.totalorder %s5342_s0, %s5338_s4 }
 0x8d8   : > { %p5340_p2 = pnand %p5339_p13, %p6391_p5 }
 0x8d9   : > { %p5345_p4 = por %p5344_p9, %p5343_p12 }
 0x8da   : > { %p5341_p3 = pneg %p5340_p2 }
 0x8dc   : > { %p5346_p6 = pnand %p5345_p4, %p5341_p3 }
 0x8de   : > { %5349 = shalt.err (!%p5346_p6)
}
 0x8df   : > { %4936 = dma.vmem_to_hbm [thread:$0]  (%p6391_p5), %s3798_s9, 128, %s3795_s5, %s3763_s8   ;;  %v4287_v6 = vld [vmem:[#allocation10] ss:$0 sm:$0xff] }
 0x8e0   : > { %s1074_s1 = scalar_lea.vmem %s5601_s29, %s5732_s22  ;;  %s1078_s15 = scalar_lea.vmem %s5606_s3, %s5732_s22 }
 0x969   : > { %v3593_v0 = vpop.f32.mrf.mxu1 }
 0x96b   : > { %v4889_v5 = vpop.f32.mrf.mxu1 }
 0x96c   : > { %v3526_v7 = vpop.f32.mrf.mxu0 }
 0x96d   : > { %v3594_v8 = vadd.f32 %v3593_v0, %v3526_v7  ;;  %v3596_v9 = vpop.f32.mrf.mxu1 }
 0x96e   : > { %v4877_v10 = vpop.f32.mrf.mxu0 }
 0x96f   : > { %v3605_v57 = vadd.f32 %v4287_v6, %v3594_v8  ;;  %v4890_v58 = vpop.f32.mrf.mxu1 }
 0x970   : > { %v3529_v59 = vpop.f32.mrf.mxu0 }
 0x971   : > { %3755 = vst.msk [vmem:[%s1074_s1] sm:$0xff] %vm1216_vm2, %v3605_v57 }
 0x972   : > { %v4878_v60 = vpop.f32.mrf.mxu0 }
 0x979   : > { %v3748_v11 = vpop.f32.mrf.mxu1 }
 0x97b   : > { %v4913_v61 = vpop.f32.mrf.mxu1 }
 0x97c   : > { %v3681_v13 = vpop.f32.mrf.mxu0 }
 0x97d   : > { %v3749_v14 = vadd.f32 %v3748_v11, %v3681_v13  ;;  %v3751_v16 = vpop.f32.mrf.mxu1 }
 0x97e   : > { %v4901_v62 = vpop.f32.mrf.mxu0 }
 0x97f   : > { %v3754_v2 = vadd.f32 %v4287_v6, %v3749_v14  ;;  %v4914_v17 = vpop.f32.mrf.mxu1 }
 0x980   : > { %v3684_v18 = vpop.f32.mrf.mxu0 }
 0x981   : > { %3756 = vst.msk [vmem:[%s1078_s15] sm:$0xff] %vm1216_vm2, %v3754_v2 }
 0x982   : > { %v4902_v19 = vpop.f32.mrf.mxu0 }
 0x983 PF: > { %s6392_s28 = sld [smem:[#allocation41_spill]] }
 0x984   : > { %s6393_s11 = sld [smem:[#allocation39_spill]] }
 0x985   : > { %s6394_s19 = sld [smem:[#allocation44_spill]] }
 0x989   : > { %p4972_p5 = scmp.ge.s32.totalorder %s6392_s28, 2 }
 0x98a   : > { %s3815_s7 = sand.u32 1, %s6393_s11  }
 0x98b   : > { %p6395_p10 = scmp.ne.s32.totalorder %s6394_s19, 0  ;;  %s3816_s26 = scalar_lea.sflag [#allocation4], %s3815_s7 }
 0x98d   : > { %p4956_p7 = pnand %p4972_p5, %p6395_p10 }
 0x98f   : > { %p4957_p8 = pneg %p4956_p7 }
 0x991   : > { %5379 = dma.done.wait (%p4957_p8), %s3816_s26, 128  }
 0x992   : > { %5381 = vsyncadd (%p4957_p8), %s3816_s26, 4294967168  ;;  %s3825_s22 = scalar_lea.sflag [#allocation13], %s3815_s7 }
 0x993   : > { %5383 = dma.done.wait (%p4957_p8), %s3825_s22, 128  }
 0x994   : > { %5385 = vsyncadd (%p4957_p8), %s3825_s22, 4294967168  ;;  %s6396_s28 = sld [smem:[#allocation42_spill]]  ;;  %s6399_s22 = smov %s5392_s23 }
 0x995   : > { %s6397_s5 = sld [smem:[#allocation40_spill]] }
 0x996   : > { %s6398_s26 = sld [smem:[#allocation43_spill]] }
 0x99a   : > { %p80_p11 = scmp.ge.s32.totalorder %s6396_s28, 4  }
 0x99b   : > { %s6400_s23 = smov %s6397_s5 }
 0x99c   :  { %82 = sbr.rel (!%p80_p11) target bundleno = 65 (0x41), region = 277 }
 0x9a1   :  { %3844 = vsyncpa [#allocation3], 1 }
 0x9a2   :  { %3846 = vsyncpa [#allocation3 + $0x1], 1 }
 0x9a3   :  { %3847 = vsyncpa [#allocation6], 1 }
 0x9a4   :  { %3848 = vsyncpa [#allocation9], 1 }
 0x9a5   :  { %3849 = vsyncpa [#allocation4], 1 }
 0x9a6   :  { %3851 = vsyncpa [#allocation4 + $0x1], 1 }
 0x9a7   :  { %3852 = vsyncpa [#allocation13], 1 }
 0x9a8   :  { %3854 = vsyncpa [#allocation13 + $0x1], 1 }

</bundles_post_ra>
